<compile_context>
chip_gen: v7x
topology: tpu7x:2x2x1
jax: 0.10.0
libtpu: 0.0.40
codegen_flags: <defaults>
</compile_context>

<pallas_src>
import functools
import math

import jax
import jax.numpy as jnp
from jax.experimental import pallas as pl
from jax.experimental.pallas import tpu as pltpu


# ----------------------------- small helpers --------------------------------

def _round_up(x, m):
    return (x + m - 1) // m * m


def _row_tile(m, max_tile=256):
    """Tile size / padded extent for the row (sublane) dimension."""
    if m >= max_tile:
        return max_tile, _round_up(m, max_tile)
    mp = _round_up(m, 8)
    return mp, mp


def _k_tile(k):
    """Pad K to a multiple of 128 and pick the largest dividing tile <= 512."""
    kp = _round_up(max(k, 128), 128)
    for c in (512, 256, 128):
        if kp % c == 0:
            return c, kp
    return 128, kp  # unreachable


def _n_tile(n):
    if n % 256 == 0:
        return 256
    if n % 128 == 0:
        return 128
    return n  # e.g. 64 output channels -> full-dim block (allowed)


# ----------------------------- Pallas kernels ------------------------------

def _fused_matmul_kernel(do_relu, has_res, *refs):
    """Tiled matmul with BN scale/shift (+ReLU, +residual) fused in the epilogue.

    refs = (a, b, scale, shift[, res], out, acc_scratch)
    grid = (M//tm, N//tn, K//tk); K is the innermost reduction axis.
    """
    if has_res:
        a_ref, b_ref, scale_ref, shift_ref, res_ref, o_ref, acc_ref = refs
    else:
        a_ref, b_ref, scale_ref, shift_ref, o_ref, acc_ref = refs
        res_ref = None

    @pl.when(pl.program_id(2) == 0)
    def _init():
        acc_ref[...] = jnp.zeros_like(acc_ref)

    acc_ref[...] += jnp.dot(a_ref[...], b_ref[...],
                            preferred_element_type=jnp.float32)

    @pl.when(pl.program_id(2) == pl.num_programs(2) - 1)
    def _finalize():
        y = acc_ref[...] * scale_ref[...] + shift_ref[...]
        if has_res:
            y = y + res_ref[...]
        if do_relu:
            y = jnp.maximum(y, 0.0)
        o_ref[...] = y.astype(o_ref.dtype)


def _norm_kernel(x_ref, mean_ref, inv_ref, o_ref):
    # (x - mean) * (1/std): multiply by precomputed reciprocal, no division.
    o_ref[...] = (x_ref[...] - mean_ref[...]) * inv_ref[...]


def _maxpool_kernel(p_ref, o_ref):
    # p_ref: (9, tm, C) window taps ; reduce over the 9 taps.
    o_ref[...] = jnp.max(p_ref[...], axis=0)


# --------------------------- pallas_call wrappers ---------------------------

def fused_matmul_bn(a, b, scale, shift, *, relu, residual=None):
    """act((A @ B) * scale + shift [+ residual]) with bf16 MXU, f32 accumulation.

    a: (M, K)  b: (K, N)  scale/shift: (1, N) f32  residual: (M, N) f32 or None.
    Returns (M, N) f32.
    """
    M, K = a.shape
    K2, N = b.shape
    assert K == K2

    tm, Mp = _row_tile(M)
    tk, Kp = _k_tile(K)
    tn = _n_tile(N)

    a_p = jnp.pad(a.astype(jnp.bfloat16), ((0, Mp - M), (0, Kp - K)))
    b_p = jnp.pad(b.astype(jnp.bfloat16), ((0, Kp - K), (0, 0)))

    args = [a_p, b_p, scale, shift]
    in_specs = [
        pl.BlockSpec((tm, tk), lambda i, j, k: (i, k)),
        pl.BlockSpec((tk, tn), lambda i, j, k: (k, j)),
        pl.BlockSpec((1, tn), lambda i, j, k: (0, j)),
        pl.BlockSpec((1, tn), lambda i, j, k: (0, j)),
    ]
    io_aliases = {}
    has_res = residual is not None
    if has_res:
        res_p = jnp.pad(residual.astype(jnp.float32), ((0, Mp - M), (0, 0)))
        args.append(res_p)
        in_specs.append(pl.BlockSpec((tm, tn), lambda i, j, k: (i, j)))
        io_aliases = {4: 0}  # shortcut buffer updated in place

    out = pl.pallas_call(
        functools.partial(_fused_matmul_kernel, relu, has_res),
        out_shape=jax.ShapeDtypeStruct((Mp, N), jnp.float32),
        grid=(Mp // tm, N // tn, Kp // tk),
        in_specs=in_specs,
        out_specs=pl.BlockSpec((tm, tn), lambda i, j, k: (i, j)),
        scratch_shapes=[pltpu.VMEM((tm, tn), jnp.float32)],
        input_output_aliases=io_aliases,
        compiler_params=pltpu.CompilerParams(
            dimension_semantics=("parallel", "parallel", "arbitrary")),
    )(*args)
    return out[:M] if Mp != M else out


def pallas_normalize(x, mean, inv_std):
    """(x - mean) * inv_std on channels-last rows. x: (M, C), mean/inv_std: (1, C)."""
    M, C = x.shape
    tm, Mp = _row_tile(M)
    xp = jnp.pad(x, ((0, Mp - M), (0, 0))) if Mp != M else x
    out = pl.pallas_call(
        _norm_kernel,
        out_shape=jax.ShapeDtypeStruct((Mp, C), jnp.float32),
        grid=(Mp // tm,),
        in_specs=[pl.BlockSpec((tm, C), lambda i: (i, 0)),
                  pl.BlockSpec((1, C), lambda i: (0, 0)),
                  pl.BlockSpec((1, C), lambda i: (0, 0))],
        out_specs=pl.BlockSpec((tm, C), lambda i: (i, 0)),
        compiler_params=pltpu.CompilerParams(dimension_semantics=("parallel",)),
    )(xp, mean, inv_std)
    return out[:M] if Mp != M else out


def pallas_maxpool_reduce(patches):
    """patches: (9, M, C) -> row-tiled max over the 9 taps -> (M, C)."""
    KK, M, C = patches.shape
    tm, Mp = _row_tile(M)
    if Mp != M:
        patches = jnp.pad(patches, ((0, 0), (0, Mp - M), (0, 0)),
                          constant_values=-jnp.inf)
    out = pl.pallas_call(
        _maxpool_kernel,
        out_shape=jax.ShapeDtypeStruct((Mp, C), jnp.float32),
        grid=(Mp // tm,),
        in_specs=[pl.BlockSpec((KK, tm, C), lambda i: (0, i, 0))],
        out_specs=pl.BlockSpec((tm, C), lambda i: (i, 0)),
        compiler_params=pltpu.CompilerParams(dimension_semantics=("parallel",)),
    )(patches)
    return out[:M] if Mp != M else out


# ------------------------------ conv / pool glue -----------------------------

def _im2col(x_nhwc, kh, kw, stride, pad):
    N, H, W, C = x_nhwc.shape
    OH = (H + 2 * pad - kh) // stride + 1
    OW = (W + 2 * pad - kw) // stride + 1
    xp = jnp.pad(x_nhwc, ((0, 0), (pad, pad), (pad, pad), (0, 0)))
    cols = []
    for i in range(kh):
        for j in range(kw):
            cols.append(xp[:, i:i + stride * OH:stride,
                           j:j + stride * OW:stride, :])
    patches = jnp.concatenate(cols, axis=-1)        # (N, OH, OW, kh*kw*C)
    return patches.reshape(N * OH * OW, kh * kw * C), OH, OW


def conv2d_bn(x_nhwc, w_oihw, scale, shift, *, stride, pad, relu, residual=None):
    """Conv2d (bias=False) + folded-BN (+ReLU, +residual) via one fused Pallas call.

    Returns ((N*OH*OW, Cout) f32, OH, OW).
    """
    Cout, Cin, kh, kw = w_oihw.shape
    cols, OH, OW = _im2col(x_nhwc, kh, kw, stride, pad)
    # reorder weight to match (i, j, c) patch ordering -> (kh*kw*Cin, Cout)
    wm = jnp.transpose(w_oihw, (2, 3, 1, 0)).reshape(kh * kw * Cin, Cout)
    y = fused_matmul_bn(cols, wm, scale, shift, relu=relu, residual=residual)
    return y, OH, OW


def maxpool_3x3_s2_p1(x_nhwc):
    N, H, W, C = x_nhwc.shape
    k, s, pad = 3, 2, 1
    OH = (H + 2 * pad - k) // s + 1
    OW = (W + 2 * pad - k) // s + 1
    xp = jnp.pad(x_nhwc, ((0, 0), (pad, pad), (pad, pad), (0, 0)),
                 constant_values=-jnp.inf)
    taps = []
    for i in range(k):
        for j in range(k):
            taps.append(xp[:, i:i + s * OH:s, j:j + s * OW:s, :]
                        .reshape(N * OH * OW, C))
    patches = jnp.stack(taps, axis=0)               # (9, M, C)
    return pallas_maxpool_reduce(patches), OH, OW


# ------------------------------- parameters ---------------------------------

class ParamGen:
    def __init__(self, seed=42):
        self.key = jax.random.PRNGKey(seed)
        self.i = 0

    def next(self):
        self.i += 1
        return jax.random.fold_in(self.key, self.i)


def conv_w(pg, cout, cin, kh, kw):
    std = 1.0 / math.sqrt(cin * kh * kw)
    return std * jax.random.normal(pg.next(), (cout, cin, kh, kw), jnp.float32)


def bn_params(pg, c, eps=1e-5):
    gamma = jax.random.uniform(pg.next(), (c,), jnp.float32, 0.8, 1.2)
    beta = 0.05 * jax.random.normal(pg.next(), (c,), jnp.float32)
    running_mean = 0.05 * jax.random.normal(pg.next(), (c,), jnp.float32)
    running_var = jax.random.uniform(pg.next(), (c,), jnp.float32, 0.8, 1.2)
    scale = gamma / jnp.sqrt(running_var + eps)
    shift = beta - running_mean * scale
    return scale.reshape(1, c), shift.reshape(1, c)


def bottleneck_params(pg, inplanes, planes, downsample):
    p = {
        "conv1_w": conv_w(pg, planes, inplanes, 1, 1),
        "bn1": bn_params(pg, planes),
        "conv2_w": conv_w(pg, planes, planes, 3, 3),
        "bn2": bn_params(pg, planes),
        "conv3_w": conv_w(pg, planes * 4, planes, 1, 1),
        "bn3": bn_params(pg, planes * 4),
    }
    if downsample:
        p["down_w"] = conv_w(pg, planes * 4, inplanes, 1, 1)
        p["down_bn"] = bn_params(pg, planes * 4)
    return p


def layer_params(pg, inplanes, planes, blocks):
    ps = [bottleneck_params(pg, inplanes, planes, downsample=True)]
    for _ in range(blocks - 1):
        ps.append(bottleneck_params(pg, planes * 4, planes, downsample=False))
    return ps


def make_params():
    pg = ParamGen(42)
    std = jnp.array([0.229, 0.224, 0.225], jnp.float32)
    params = {
        "conv1_w": conv_w(pg, 64, 3, 7, 7),     # resnet.conv1
        "conv1m_w": conv_w(pg, 64, 1, 7, 7),    # conv1_m
        "conv1o_w": conv_w(pg, 64, 1, 7, 7),    # conv1_o
        "bn1": bn_params(pg, 64),
        "layer1": layer_params(pg, 64, 64, 3),      # res2
        "layer2": layer_params(pg, 256, 128, 4),    # res3
        "layer3": layer_params(pg, 512, 256, 6),    # res4
        "mean": jnp.array([0.485, 0.456, 0.406], jnp.float32).reshape(1, 3),
        "inv_std": (1.0 / std).reshape(1, 3),
    }
    return params


# -------------------------------- forward -----------------------------------

def bottleneck(x_flat, N, H, W, p, stride):
    """torchvision Bottleneck (stride on the 3x3 conv, ResNet V1.5)."""
    Cin = x_flat.shape[-1]
    x_nhwc = x_flat.reshape(N, H, W, Cin)
    width = p["conv1_w"].shape[0]

    out, _, _ = conv2d_bn(x_nhwc, p["conv1_w"], *p["bn1"],
                          stride=1, pad=0, relu=True)
    out, OH, OW = conv2d_bn(out.reshape(N, H, W, width), p["conv2_w"], *p["bn2"],
                            stride=stride, pad=1, relu=True)

    if "down_w" in p:
        idn, _, _ = conv2d_bn(x_nhwc, p["down_w"], *p["down_bn"],
                              stride=stride, pad=0, relu=False)
    else:
        idn = x_flat

    # conv3 + bn3 + residual add + ReLU fused into one kernel epilogue.
    out, _, _ = conv2d_bn(out.reshape(N, OH, OW, width), p["conv3_w"], *p["bn3"],
                          stride=1, pad=0, relu=True, residual=idn)
    return out, OH, OW


def run_layer(x_flat, N, H, W, blocks, stride):
    for i, blk in enumerate(blocks):
        x_flat, H, W = bottleneck(x_flat, N, H, W, blk, stride if i == 0 else 1)
    return x_flat, H, W


def encoder_m_forward(params, in_f, in_m, in_o):
    N, _, H, W = in_f.shape

    # f = (in_f - mean) / std   (channels-last rows, multiply by 1/std in kernel)
    f_rows = jnp.transpose(in_f.astype(jnp.float32), (0, 2, 3, 1)).reshape(N * H * W, 3)
    f_rows = pallas_normalize(f_rows, params["mean"], params["inv_std"])
    f_nhwc = f_rows.reshape(N, H, W, 3)
    f = jnp.transpose(f_nhwc, (0, 3, 1, 2))                     # NCHW output

    # x = conv1(f) + conv1_m(m) + conv1_o(o)  == one conv on concatenated channels
    m = in_m.astype(jnp.float32)[..., None]                     # (N,H,W,1)
    o = in_o.astype(jnp.float32)[..., None]
    x_nhwc = jnp.concatenate([f_nhwc, m, o], axis=-1)           # (N,H,W,5)
    w_cat = jnp.concatenate(
        [params["conv1_w"], params["conv1m_w"], params["conv1o_w"]], axis=1)

    # stem conv + bn1 + relu fused (K = 7*7*5 = 245 -> zero-padded to 256)
    c1_flat, OH, OW = conv2d_bn(x_nhwc, w_cat, *params["bn1"],
                                stride=2, pad=3, relu=True)
    c1_nhwc = c1_flat.reshape(N, OH, OW, 64)

    x, H2, W2 = maxpool_3x3_s2_p1(c1_nhwc)                      # (N*H2*W2, 64)

    r2, r2H, r2W = run_layer(x, N, H2, W2, params["layer1"], stride=1)
    r3, r3H, r3W = run_layer(r2, N, r2H, r2W, params["layer2"], stride=2)
    r4, r4H, r4W = run_layer(r3, N, r3H, r3W, params["layer3"], stride=2)

    def to_nchw(t, h, w):
        c = t.shape[-1]
        return jnp.transpose(t.reshape(N, h, w, c), (0, 3, 1, 2))

    return (to_nchw(r4, r4H, r4W),
            to_nchw(r3, r3H, r3W),
            to_nchw(r2, r2H, r2W),
            jnp.transpose(c1_nhwc, (0, 3, 1, 2)),
            f)


# ---------------------------------- main -------------------------------------

if __name__ == "__main__":
    N, H, W = 2, 16, 16
    key = jax.random.PRNGKey(0)
    kf, km, ko = jax.random.split(key, 3)
    in_f = jax.random.uniform(kf, (N, 3, H, W), jnp.float32)
    in_m = (jax.random.uniform(km, (N, H, W)) > 0.5).astype(jnp.float32)
    in_o = (jax.random.uniform(ko, (N, H, W)) > 0.5).astype(jnp.float32)

    params = make_params()

    fwd = jax.jit(encoder_m_forward)
    r4, r3, r2, c1, f = fwd(params, in_f, in_m, in_o)
    jax.block_until_ready((r4, r3, r2, c1, f))

    assert r4.shape == (N, 1024, 1, 1), r4.shape
    assert r3.shape == (N, 512, 2, 2), r3.shape
    assert r2.shape == (N, 256, 4, 4), r2.shape
    assert c1.shape == (N, 64, 8, 8), c1.shape
    assert f.shape == (N, 3, 16, 16), f.shape
    for t in (r4, r3, r2, c1, f):
        assert bool(jnp.all(jnp.isfinite(t)))

    print("KERNEL_OK")
</pallas_src>

<mosaic_0001>
module attributes {stable_mosaic.version = 11 : i64} {
  func.func @_norm_kernel(%arg0: i32, %arg1: memref<256x3xf32, #tpu.memory_space<vmem>>, %arg2: memref<1x3xf32, #tpu.memory_space<vmem>>, %arg3: memref<1x3xf32, #tpu.memory_space<vmem>>, %arg4: memref<256x3xf32, #tpu.memory_space<vmem>>) attributes {dimension_semantics = [#tpu.dimension_semantics<parallel>], iteration_bounds = array<i64: 2>, scalar_prefetch = 0 : i64, scratch_operands = 0 : i64, tpu.core_type = #tpu.core_type<tc>, window_params = [{transform_indices = @transform_0, window_bounds = array<i64: 256, 3>}, {pipeline_mode = #tpu.pipeline_mode<synchronous>, transform_indices = @transform_1, window_bounds = array<i64: 1, 3>}, {pipeline_mode = #tpu.pipeline_mode<synchronous>, transform_indices = @transform_2, window_bounds = array<i64: 1, 3>}, {transform_indices = @transform_3, window_bounds = array<i64: 256, 3>}]} {
    %c0 = arith.constant 0 : index
    %c0_0 = arith.constant 0 : index
    %0 = vector.load %arg1[%c0, %c0_0] : memref<256x3xf32, #tpu.memory_space<vmem>>, vector<256x3xf32>
    %c0_1 = arith.constant 0 : index
    %c0_2 = arith.constant 0 : index
    %1 = vector.load %arg2[%c0_1, %c0_2] : memref<1x3xf32, #tpu.memory_space<vmem>>, vector<1x3xf32>
    %2 = vector.broadcast %1 : vector<1x3xf32> to vector<256x3xf32>
    %3 = arith.subf %0, %2 : vector<256x3xf32>
    %c0_3 = arith.constant 0 : index
    %c0_4 = arith.constant 0 : index
    %4 = vector.load %arg3[%c0_3, %c0_4] : memref<1x3xf32, #tpu.memory_space<vmem>>, vector<1x3xf32>
    %5 = vector.broadcast %4 : vector<1x3xf32> to vector<256x3xf32>
    %6 = arith.mulf %3, %5 : vector<256x3xf32>
    %c0_5 = arith.constant 0 : index
    %c0_6 = arith.constant 0 : index
    %7 = vector.load %arg4[%c0_5, %c0_6] : memref<256x3xf32, #tpu.memory_space<vmem>>, vector<256x3xf32>
    tpu.vector_store %arg4[%c0_5, %c0_6], %6 {strides = array<i32>} : memref<256x3xf32, #tpu.memory_space<vmem>>, vector<256x3xf32>,
    return
  }
  func.func @transform_0(%arg0: i32) -> (i32, i32) {
    %c0_i32 = arith.constant 0 : i32
    %c0_i32_0 = arith.constant 0 : i32
    return %arg0, %c0_i32 : i32, i32
  }
  func.func @transform_1(%arg0: i32) -> (i32, i32) {
    %c0_i32 = arith.constant 0 : i32
    %c0_i32_0 = arith.constant 0 : i32
    %c0_i32_1 = arith.constant 0 : i32
    return %c0_i32, %c0_i32_0 : i32, i32
  }
  func.func @transform_2(%arg0: i32) -> (i32, i32) {
    %c0_i32 = arith.constant 0 : i32
    %c0_i32_0 = arith.constant 0 : i32
    %c0_i32_1 = arith.constant 0 : i32
    return %c0_i32, %c0_i32_0 : i32, i32
  }
  func.func @transform_3(%arg0: i32) -> (i32, i32) {
    %c0_i32 = arith.constant 0 : i32
    %c0_i32_0 = arith.constant 0 : i32
    return %arg0, %c0_i32 : i32, i32
  }
}

module attributes {stable_mosaic.version = 11 : i64} {
  func.func @_fused_matmul_kernel(%arg0: i32, %arg1: i32, %arg2: i32, %arg3: memref<128x256xbf16, #tpu.memory_space<vmem>>, %arg4: memref<256x64xbf16, #tpu.memory_space<vmem>>, %arg5: memref<1x64xf32, #tpu.memory_space<vmem>>, %arg6: memref<1x64xf32, #tpu.memory_space<vmem>>, %arg7: memref<128x64xf32, #tpu.memory_space<vmem>>, %arg8: memref<128x64xf32, #tpu.memory_space<vmem>>) attributes {dimension_semantics = [#tpu.dimension_semantics<parallel>, #tpu.dimension_semantics<parallel>, #tpu.dimension_semantics<arbitrary>], iteration_bounds = array<i64: 1, 1, 1>, scalar_prefetch = 0 : i64, scratch_operands = 1 : i64, tpu.core_type = #tpu.core_type<tc>, window_params = [{transform_indices = @transform_0, window_bounds = array<i64: 128, 256>}, {transform_indices = @transform_1, window_bounds = array<i64: 256, 64>}, {transform_indices = @transform_2, window_bounds = array<i64: 1, 64>}, {transform_indices = @transform_3, window_bounds = array<i64: 1, 64>}, {transform_indices = @transform_4, window_bounds = array<i64: 128, 64>}]} {
    %c0_i32 = arith.constant 0 : i32
    %0 = arith.cmpi eq, %arg2, %c0_i32 : i32
    %1 = arith.extui %0 : i1 to i32
    %c0_i32_0 = arith.constant 0 : i32
    %2 = arith.cmpi ne, %1, %c0_i32_0 : i32
    scf.if %2 {
      %cst_10 = arith.constant 0.000000e+00 : f32
      %12 = vector.broadcast %cst_10 : f32 to vector<128x64xf32>
      %c0_11 = arith.constant 0 : index
      %c0_12 = arith.constant 0 : index
      %13 = vector.load %arg8[%c0_11, %c0_12] : memref<128x64xf32, #tpu.memory_space<vmem>>, vector<128x64xf32>
      tpu.vector_store %arg8[%c0_11, %c0_12], %12 {strides = array<i32>} : memref<128x64xf32, #tpu.memory_space<vmem>>, vector<128x64xf32>,
    } else {
    }
    %c0 = arith.constant 0 : index
    %c0_1 = arith.constant 0 : index
    %3 = vector.load %arg8[%c0, %c0_1] : memref<128x64xf32, #tpu.memory_space<vmem>>, vector<128x64xf32>
    %c0_2 = arith.constant 0 : index
    %c0_3 = arith.constant 0 : index
    %4 = vector.load %arg3[%c0_2, %c0_3] : memref<128x256xbf16, #tpu.memory_space<vmem>>, vector<128x256xbf16>
    %c0_4 = arith.constant 0 : index
    %c0_5 = arith.constant 0 : index
    %5 = vector.load %arg4[%c0_4, %c0_5] : memref<256x64xbf16, #tpu.memory_space<vmem>>, vector<256x64xbf16>
    %cst = arith.constant dense<0.000000e+00> : vector<128x64xf32>
    %6 = tpu.matmul %4, %5, %cst {dimension_numbers = #tpu.dot_dimension_numbers<[1], [0], [0], [1], [0, 0, 1, 1], [], []>} : vector<128x256xbf16>, vector<256x64xbf16>, vector<128x64xf32> -> vector<128x64xf32>
    %7 = arith.addf %3, %6 : vector<128x64xf32>
    %c0_6 = arith.constant 0 : index
    %c0_7 = arith.constant 0 : index
    %8 = vector.load %arg8[%c0_6, %c0_7] : memref<128x64xf32, #tpu.memory_space<vmem>>, vector<128x64xf32>
    tpu.vector_store %arg8[%c0_6, %c0_7], %7 {strides = array<i32>} : memref<128x64xf32, #tpu.memory_space<vmem>>, vector<128x64xf32>,
    %c0_i32_8 = arith.constant 0 : i32
    %9 = arith.cmpi eq, %arg2, %c0_i32_8 : i32
    %10 = arith.extui %9 : i1 to i32
    %c0_i32_9 = arith.constant 0 : i32
    %11 = arith.cmpi ne, %10, %c0_i32_9 : i32
    scf.if %11 {
      %c0_10 = arith.constant 0 : index
      %c0_11 = arith.constant 0 : index
      %12 = vector.load %arg8[%c0_10, %c0_11] : memref<128x64xf32, #tpu.memory_space<vmem>>, vector<128x64xf32>
      %c0_12 = arith.constant 0 : index
      %c0_13 = arith.constant 0 : index
      %13 = vector.load %arg5[%c0_12, %c0_13] : memref<1x64xf32, #tpu.memory_space<vmem>>, vector<1x64xf32>
      %14 = vector.broadcast %13 : vector<1x64xf32> to vector<128x64xf32>
      %15 = arith.mulf %12, %14 : vector<128x64xf32>
      %c0_14 = arith.constant 0 : index
      %c0_15 = arith.constant 0 : index
      %16 = vector.load %arg6[%c0_14, %c0_15] : memref<1x64xf32, #tpu.memory_space<vmem>>, vector<1x64xf32>
      %17 = vector.broadcast %16 : vector<1x64xf32> to vector<128x64xf32>
      %18 = arith.addf %15, %17 : vector<128x64xf32>
      %cst_16 = arith.constant 0.000000e+00 : f32
      %19 = vector.broadcast %cst_16 : f32 to vector<128x64xf32>
      %20 = arith.maximumf %18, %19 : vector<128x64xf32>
      %c0_17 = arith.constant 0 : index
      %c0_18 = arith.constant 0 : index
      %21 = vector.load %arg7[%c0_17, %c0_18] : memref<128x64xf32, #tpu.memory_space<vmem>>, vector<128x64xf32>
      tpu.vector_store %arg7[%c0_17, %c0_18], %20 {strides = array<i32>} : memref<128x64xf32, #tpu.memory_space<vmem>>, vector<128x64xf32>,
    } else {
    }
    return
  }
  func.func @transform_0(%arg0: i32, %arg1: i32, %arg2: i32) -> (i32, i32) {
    %c0_i32 = arith.constant 0 : i32
    return %arg0, %arg2 : i32, i32
  }
  func.func @transform_1(%arg0: i32, %arg1: i32, %arg2: i32) -> (i32, i32) {
    %c0_i32 = arith.constant 0 : i32
    return %arg2, %arg1 : i32, i32
  }
  func.func @transform_2(%arg0: i32, %arg1: i32, %arg2: i32) -> (i32, i32) {
    %c0_i32 = arith.constant 0 : i32
    %c0_i32_0 = arith.constant 0 : i32
    return %c0_i32, %arg1 : i32, i32
  }
  func.func @transform_3(%arg0: i32, %arg1: i32, %arg2: i32) -> (i32, i32) {
    %c0_i32 = arith.constant 0 : i32
    %c0_i32_0 = arith.constant 0 : i32
    return %c0_i32, %arg1 : i32, i32
  }
  func.func @transform_4(%arg0: i32, %arg1: i32, %arg2: i32) -> (i32, i32) {
    %c0_i32 = arith.constant 0 : i32
    return %arg0, %arg1 : i32, i32
  }
}

module attributes {stable_mosaic.version = 11 : i64} {
  func.func @_maxpool_kernel(%arg0: i32, %arg1: memref<9x32x64xf32, #tpu.memory_space<vmem>>, %arg2: memref<32x64xf32, #tpu.memory_space<vmem>>) attributes {dimension_semantics = [#tpu.dimension_semantics<parallel>], iteration_bounds = array<i64: 1>, scalar_prefetch = 0 : i64, scratch_operands = 0 : i64, tpu.core_type = #tpu.core_type<tc>, window_params = [{transform_indices = @transform_0, window_bounds = array<i64: 9, 32, 64>}, {transform_indices = @transform_1, window_bounds = array<i64: 32, 64>}]} {
    %c0 = arith.constant 0 : index
    %c0_0 = arith.constant 0 : index
    %c0_1 = arith.constant 0 : index
    %0 = vector.load %arg1[%c0, %c0_0, %c0_1] : memref<9x32x64xf32, #tpu.memory_space<vmem>>, vector<9x32x64xf32>
    %cst = arith.constant dense<0xFF800000> : vector<32x64xf32>
    %1 = vector.multi_reduction <maximumf>, %0, %cst [0] : vector<9x32x64xf32> to vector<32x64xf32>
    %c0_2 = arith.constant 0 : index
    %c0_3 = arith.constant 0 : index
    %2 = vector.load %arg2[%c0_2, %c0_3] : memref<32x64xf32, #tpu.memory_space<vmem>>, vector<32x64xf32>
    tpu.vector_store %arg2[%c0_2, %c0_3], %1 {strides = array<i32>} : memref<32x64xf32, #tpu.memory_space<vmem>>, vector<32x64xf32>,
    return
  }
  func.func @transform_0(%arg0: i32) -> (i32, i32, i32) {
    %c0_i32 = arith.constant 0 : i32
    %c0_i32_0 = arith.constant 0 : i32
    %c0_i32_1 = arith.constant 0 : i32
    return %c0_i32, %arg0, %c0_i32_0 : i32, i32, i32
  }
  func.func @transform_1(%arg0: i32) -> (i32, i32) {
    %c0_i32 = arith.constant 0 : i32
    %c0_i32_0 = arith.constant 0 : i32
    return %arg0, %c0_i32 : i32, i32
  }
}

module attributes {stable_mosaic.version = 11 : i64} {
  func.func @_fused_matmul_kernel(%arg0: i32, %arg1: i32, %arg2: i32, %arg3: memref<32x128xbf16, #tpu.memory_space<vmem>>, %arg4: memref<128x64xbf16, #tpu.memory_space<vmem>>, %arg5: memref<1x64xf32, #tpu.memory_space<vmem>>, %arg6: memref<1x64xf32, #tpu.memory_space<vmem>>, %arg7: memref<32x64xf32, #tpu.memory_space<vmem>>, %arg8: memref<32x64xf32, #tpu.memory_space<vmem>>) attributes {dimension_semantics = [#tpu.dimension_semantics<parallel>, #tpu.dimension_semantics<parallel>, #tpu.dimension_semantics<arbitrary>], iteration_bounds = array<i64: 1, 1, 1>, scalar_prefetch = 0 : i64, scratch_operands = 1 : i64, tpu.core_type = #tpu.core_type<tc>, window_params = [{transform_indices = @transform_0, window_bounds = array<i64: 32, 128>}, {transform_indices = @transform_1, window_bounds = array<i64: 128, 64>}, {transform_indices = @transform_2, window_bounds = array<i64: 1, 64>}, {transform_indices = @transform_3, window_bounds = array<i64: 1, 64>}, {transform_indices = @transform_4, window_bounds = array<i64: 32, 64>}]} {
    %c0_i32 = arith.constant 0 : i32
    %0 = arith.cmpi eq, %arg2, %c0_i32 : i32
    %1 = arith.extui %0 : i1 to i32
    %c0_i32_0 = arith.constant 0 : i32
    %2 = arith.cmpi ne, %1, %c0_i32_0 : i32
    scf.if %2 {
      %cst_10 = arith.constant 0.000000e+00 : f32
      %12 = vector.broadcast %cst_10 : f32 to vector<32x64xf32>
      %c0_11 = arith.constant 0 : index
      %c0_12 = arith.constant 0 : index
      %13 = vector.load %arg8[%c0_11, %c0_12] : memref<32x64xf32, #tpu.memory_space<vmem>>, vector<32x64xf32>
      tpu.vector_store %arg8[%c0_11, %c0_12], %12 {strides = array<i32>} : memref<32x64xf32, #tpu.memory_space<vmem>>, vector<32x64xf32>,
    } else {
    }
    %c0 = arith.constant 0 : index
    %c0_1 = arith.constant 0 : index
    %3 = vector.load %arg8[%c0, %c0_1] : memref<32x64xf32, #tpu.memory_space<vmem>>, vector<32x64xf32>
    %c0_2 = arith.constant 0 : index
    %c0_3 = arith.constant 0 : index
    %4 = vector.load %arg3[%c0_2, %c0_3] : memref<32x128xbf16, #tpu.memory_space<vmem>>, vector<32x128xbf16>
    %c0_4 = arith.constant 0 : index
    %c0_5 = arith.constant 0 : index
    %5 = vector.load %arg4[%c0_4, %c0_5] : memref<128x64xbf16, #tpu.memory_space<vmem>>, vector<128x64xbf16>
    %cst = arith.constant dense<0.000000e+00> : vector<32x64xf32>
    %6 = tpu.matmul %4, %5, %cst {dimension_numbers = #tpu.dot_dimension_numbers<[1], [0], [0], [1], [0, 0, 1, 1], [], []>} : vector<32x128xbf16>, vector<128x64xbf16>, vector<32x64xf32> -> vector<32x64xf32>
    %7 = arith.addf %3, %6 : vector<32x64xf32>
    %c0_6 = arith.constant 0 : index
    %c0_7 = arith.constant 0 : index
    %8 = vector.load %arg8[%c0_6, %c0_7] : memref<32x64xf32, #tpu.memory_space<vmem>>, vector<32x64xf32>
    tpu.vector_store %arg8[%c0_6, %c0_7], %7 {strides = array<i32>} : memref<32x64xf32, #tpu.memory_space<vmem>>, vector<32x64xf32>,
    %c0_i32_8 = arith.constant 0 : i32
    %9 = arith.cmpi eq, %arg2, %c0_i32_8 : i32
    %10 = arith.extui %9 : i1 to i32
    %c0_i32_9 = arith.constant 0 : i32
    %11 = arith.cmpi ne, %10, %c0_i32_9 : i32
    scf.if %11 {
      %c0_10 = arith.constant 0 : index
      %c0_11 = arith.constant 0 : index
      %12 = vector.load %arg8[%c0_10, %c0_11] : memref<32x64xf32, #tpu.memory_space<vmem>>, vector<32x64xf32>
      %c0_12 = arith.constant 0 : index
      %c0_13 = arith.constant 0 : index
      %13 = vector.load %arg5[%c0_12, %c0_13] : memref<1x64xf32, #tpu.memory_space<vmem>>, vector<1x64xf32>
      %14 = vector.broadcast %13 : vector<1x64xf32> to vector<32x64xf32>
      %15 = arith.mulf %12, %14 : vector<32x64xf32>
      %c0_14 = arith.constant 0 : index
      %c0_15 = arith.constant 0 : index
      %16 = vector.load %arg6[%c0_14, %c0_15] : memref<1x64xf32, #tpu.memory_space<vmem>>, vector<1x64xf32>
      %17 = vector.broadcast %16 : vector<1x64xf32> to vector<32x64xf32>
      %18 = arith.addf %15, %17 : vector<32x64xf32>
      %cst_16 = arith.constant 0.000000e+00 : f32
      %19 = vector.broadcast %cst_16 : f32 to vector<32x64xf32>
      %20 = arith.maximumf %18, %19 : vector<32x64xf32>
      %c0_17 = arith.constant 0 : index
      %c0_18 = arith.constant 0 : index
      %21 = vector.load %arg7[%c0_17, %c0_18] : memref<32x64xf32, #tpu.memory_space<vmem>>, vector<32x64xf32>
      tpu.vector_store %arg7[%c0_17, %c0_18], %20 {strides = array<i32>} : memref<32x64xf32, #tpu.memory_space<vmem>>, vector<32x64xf32>,
    } else {
    }
    return
  }
  func.func @transform_0(%arg0: i32, %arg1: i32, %arg2: i32) -> (i32, i32) {
    %c0_i32 = arith.constant 0 : i32
    return %arg0, %arg2 : i32, i32
  }
  func.func @transform_1(%arg0: i32, %arg1: i32, %arg2: i32) -> (i32, i32) {
    %c0_i32 = arith.constant 0 : i32
    return %arg2, %arg1 : i32, i32
  }
  func.func @transform_2(%arg0: i32, %arg1: i32, %arg2: i32) -> (i32, i32) {
    %c0_i32 = arith.constant 0 : i32
    %c0_i32_0 = arith.constant 0 : i32
    return %c0_i32, %arg1 : i32, i32
  }
  func.func @transform_3(%arg0: i32, %arg1: i32, %arg2: i32) -> (i32, i32) {
    %c0_i32 = arith.constant 0 : i32
    %c0_i32_0 = arith.constant 0 : i32
    return %c0_i32, %arg1 : i32, i32
  }
  func.func @transform_4(%arg0: i32, %arg1: i32, %arg2: i32) -> (i32, i32) {
    %c0_i32 = arith.constant 0 : i32
    return %arg0, %arg1 : i32, i32
  }
}

module attributes {stable_mosaic.version = 11 : i64} {
  func.func @_fused_matmul_kernel(%arg0: i32, %arg1: i32, %arg2: i32, %arg3: memref<32x128xbf16, #tpu.memory_space<vmem>>, %arg4: memref<128x64xbf16, #tpu.memory_space<vmem>>, %arg5: memref<1x64xf32, #tpu.memory_space<vmem>>, %arg6: memref<1x64xf32, #tpu.memory_space<vmem>>, %arg7: memref<32x64xf32, #tpu.memory_space<vmem>>, %arg8: memref<32x64xf32, #tpu.memory_space<vmem>>) attributes {dimension_semantics = [#tpu.dimension_semantics<parallel>, #tpu.dimension_semantics<parallel>, #tpu.dimension_semantics<arbitrary>], iteration_bounds = array<i64: 1, 1, 5>, scalar_prefetch = 0 : i64, scratch_operands = 1 : i64, tpu.core_type = #tpu.core_type<tc>, window_params = [{transform_indices = @transform_0, window_bounds = array<i64: 32, 128>}, {transform_indices = @transform_1, window_bounds = array<i64: 128, 64>}, {transform_indices = @transform_2, window_bounds = array<i64: 1, 64>}, {transform_indices = @transform_3, window_bounds = array<i64: 1, 64>}, {transform_indices = @transform_4, window_bounds = array<i64: 32, 64>}]} {
    %c0_i32 = arith.constant 0 : i32
    %0 = arith.cmpi eq, %arg2, %c0_i32 : i32
    %1 = arith.extui %0 : i1 to i32
    %c0_i32_0 = arith.constant 0 : i32
    %2 = arith.cmpi ne, %1, %c0_i32_0 : i32
    scf.if %2 {
      %cst_9 = arith.constant 0.000000e+00 : f32
      %12 = vector.broadcast %cst_9 : f32 to vector<32x64xf32>
      %c0_10 = arith.constant 0 : index
      %c0_11 = arith.constant 0 : index
      %13 = vector.load %arg8[%c0_10, %c0_11] : memref<32x64xf32, #tpu.memory_space<vmem>>, vector<32x64xf32>
      tpu.vector_store %arg8[%c0_10, %c0_11], %12 {strides = array<i32>} : memref<32x64xf32, #tpu.memory_space<vmem>>, vector<32x64xf32>,
    } else {
    }
    %c0 = arith.constant 0 : index
    %c0_1 = arith.constant 0 : index
    %3 = vector.load %arg8[%c0, %c0_1] : memref<32x64xf32, #tpu.memory_space<vmem>>, vector<32x64xf32>
    %c0_2 = arith.constant 0 : index
    %c0_3 = arith.constant 0 : index
    %4 = vector.load %arg3[%c0_2, %c0_3] : memref<32x128xbf16, #tpu.memory_space<vmem>>, vector<32x128xbf16>
    %c0_4 = arith.constant 0 : index
    %c0_5 = arith.constant 0 : index
    %5 = vector.load %arg4[%c0_4, %c0_5] : memref<128x64xbf16, #tpu.memory_space<vmem>>, vector<128x64xbf16>
    %cst = arith.constant dense<0.000000e+00> : vector<32x64xf32>
    %6 = tpu.matmul %4, %5, %cst {dimension_numbers = #tpu.dot_dimension_numbers<[1], [0], [0], [1], [0, 0, 1, 1], [], []>} : vector<32x128xbf16>, vector<128x64xbf16>, vector<32x64xf32> -> vector<32x64xf32>
    %7 = arith.addf %3, %6 : vector<32x64xf32>
    %c0_6 = arith.constant 0 : index
    %c0_7 = arith.constant 0 : index
    %8 = vector.load %arg8[%c0_6, %c0_7] : memref<32x64xf32, #tpu.memory_space<vmem>>, vector<32x64xf32>
    tpu.vector_store %arg8[%c0_6, %c0_7], %7 {strides = array<i32>} : memref<32x64xf32, #tpu.memory_space<vmem>>, vector<32x64xf32>,
    %c4_i32 = arith.constant 4 : i32
    %9 = arith.cmpi eq, %arg2, %c4_i32 : i32
    %10 = arith.extui %9 : i1 to i32
    %c0_i32_8 = arith.constant 0 : i32
    %11 = arith.cmpi ne, %10, %c0_i32_8 : i32
    scf.if %11 {
      %c0_9 = arith.constant 0 : index
      %c0_10 = arith.constant 0 : index
      %12 = vector.load %arg8[%c0_9, %c0_10] : memref<32x64xf32, #tpu.memory_space<vmem>>, vector<32x64xf32>
      %c0_11 = arith.constant 0 : index
      %c0_12 = arith.constant 0 : index
      %13 = vector.load %arg5[%c0_11, %c0_12] : memref<1x64xf32, #tpu.memory_space<vmem>>, vector<1x64xf32>
      %14 = vector.broadcast %13 : vector<1x64xf32> to vector<32x64xf32>
      %15 = arith.mulf %12, %14 : vector<32x64xf32>
      %c0_13 = arith.constant 0 : index
      %c0_14 = arith.constant 0 : index
      %16 = vector.load %arg6[%c0_13, %c0_14] : memref<1x64xf32, #tpu.memory_space<vmem>>, vector<1x64xf32>
      %17 = vector.broadcast %16 : vector<1x64xf32> to vector<32x64xf32>
      %18 = arith.addf %15, %17 : vector<32x64xf32>
      %cst_15 = arith.constant 0.000000e+00 : f32
      %19 = vector.broadcast %cst_15 : f32 to vector<32x64xf32>
      %20 = arith.maximumf %18, %19 : vector<32x64xf32>
      %c0_16 = arith.constant 0 : index
      %c0_17 = arith.constant 0 : index
      %21 = vector.load %arg7[%c0_16, %c0_17] : memref<32x64xf32, #tpu.memory_space<vmem>>, vector<32x64xf32>
      tpu.vector_store %arg7[%c0_16, %c0_17], %20 {strides = array<i32>} : memref<32x64xf32, #tpu.memory_space<vmem>>, vector<32x64xf32>,
    } else {
    }
    return
  }
  func.func @transform_0(%arg0: i32, %arg1: i32, %arg2: i32) -> (i32, i32) {
    %c0_i32 = arith.constant 0 : i32
    return %arg0, %arg2 : i32, i32
  }
  func.func @transform_1(%arg0: i32, %arg1: i32, %arg2: i32) -> (i32, i32) {
    %c0_i32 = arith.constant 0 : i32
    return %arg2, %arg1 : i32, i32
  }
  func.func @transform_2(%arg0: i32, %arg1: i32, %arg2: i32) -> (i32, i32) {
    %c0_i32 = arith.constant 0 : i32
    %c0_i32_0 = arith.constant 0 : i32
    return %c0_i32, %arg1 : i32, i32
  }
  func.func @transform_3(%arg0: i32, %arg1: i32, %arg2: i32) -> (i32, i32) {
    %c0_i32 = arith.constant 0 : i32
    %c0_i32_0 = arith.constant 0 : i32
    return %c0_i32, %arg1 : i32, i32
  }
  func.func @transform_4(%arg0: i32, %arg1: i32, %arg2: i32) -> (i32, i32) {
    %c0_i32 = arith.constant 0 : i32
    return %arg0, %arg1 : i32, i32
  }
}

module attributes {stable_mosaic.version = 11 : i64} {
  func.func @_fused_matmul_kernel(%arg0: i32, %arg1: i32, %arg2: i32, %arg3: memref<32x128xbf16, #tpu.memory_space<vmem>>, %arg4: memref<128x256xbf16, #tpu.memory_space<vmem>>, %arg5: memref<1x256xf32, #tpu.memory_space<vmem>>, %arg6: memref<1x256xf32, #tpu.memory_space<vmem>>, %arg7: memref<32x256xf32, #tpu.memory_space<vmem>>, %arg8: memref<32x256xf32, #tpu.memory_space<vmem>>) attributes {dimension_semantics = [#tpu.dimension_semantics<parallel>, #tpu.dimension_semantics<parallel>, #tpu.dimension_semantics<arbitrary>], iteration_bounds = array<i64: 1, 1, 1>, scalar_prefetch = 0 : i64, scratch_operands = 1 : i64, tpu.core_type = #tpu.core_type<tc>, window_params = [{transform_indices = @transform_0, window_bounds = array<i64: 32, 128>}, {transform_indices = @transform_1, window_bounds = array<i64: 128, 256>}, {transform_indices = @transform_2, window_bounds = array<i64: 1, 256>}, {transform_indices = @transform_3, window_bounds = array<i64: 1, 256>}, {transform_indices = @transform_4, window_bounds = array<i64: 32, 256>}]} {
    %c0_i32 = arith.constant 0 : i32
    %0 = arith.cmpi eq, %arg2, %c0_i32 : i32
    %1 = arith.extui %0 : i1 to i32
    %c0_i32_0 = arith.constant 0 : i32
    %2 = arith.cmpi ne, %1, %c0_i32_0 : i32
    scf.if %2 {
      %cst_10 = arith.constant 0.000000e+00 : f32
      %12 = vector.broadcast %cst_10 : f32 to vector<32x256xf32>
      %c0_11 = arith.constant 0 : index
      %c0_12 = arith.constant 0 : index
      %13 = vector.load %arg8[%c0_11, %c0_12] : memref<32x256xf32, #tpu.memory_space<vmem>>, vector<32x256xf32>
      tpu.vector_store %arg8[%c0_11, %c0_12], %12 {strides = array<i32>} : memref<32x256xf32, #tpu.memory_space<vmem>>, vector<32x256xf32>,
    } else {
    }
    %c0 = arith.constant 0 : index
    %c0_1 = arith.constant 0 : index
    %3 = vector.load %arg8[%c0, %c0_1] : memref<32x256xf32, #tpu.memory_space<vmem>>, vector<32x256xf32>
    %c0_2 = arith.constant 0 : index
    %c0_3 = arith.constant 0 : index
    %4 = vector.load %arg3[%c0_2, %c0_3] : memref<32x128xbf16, #tpu.memory_space<vmem>>, vector<32x128xbf16>
    %c0_4 = arith.constant 0 : index
    %c0_5 = arith.constant 0 : index
    %5 = vector.load %arg4[%c0_4, %c0_5] : memref<128x256xbf16, #tpu.memory_space<vmem>>, vector<128x256xbf16>
    %cst = arith.constant dense<0.000000e+00> : vector<32x256xf32>
    %6 = tpu.matmul %4, %5, %cst {dimension_numbers = #tpu.dot_dimension_numbers<[1], [0], [0], [1], [0, 0, 1, 1], [], []>} : vector<32x128xbf16>, vector<128x256xbf16>, vector<32x256xf32> -> vector<32x256xf32>
    %7 = arith.addf %3, %6 : vector<32x256xf32>
    %c0_6 = arith.constant 0 : index
    %c0_7 = arith.constant 0 : index
    %8 = vector.load %arg8[%c0_6, %c0_7] : memref<32x256xf32, #tpu.memory_space<vmem>>, vector<32x256xf32>
    tpu.vector_store %arg8[%c0_6, %c0_7], %7 {strides = array<i32>} : memref<32x256xf32, #tpu.memory_space<vmem>>, vector<32x256xf32>,
    %c0_i32_8 = arith.constant 0 : i32
    %9 = arith.cmpi eq, %arg2, %c0_i32_8 : i32
    %10 = arith.extui %9 : i1 to i32
    %c0_i32_9 = arith.constant 0 : i32
    %11 = arith.cmpi ne, %10, %c0_i32_9 : i32
    scf.if %11 {
      %c0_10 = arith.constant 0 : index
      %c0_11 = arith.constant 0 : index
      %12 = vector.load %arg8[%c0_10, %c0_11] : memref<32x256xf32, #tpu.memory_space<vmem>>, vector<32x256xf32>
      %c0_12 = arith.constant 0 : index
      %c0_13 = arith.constant 0 : index
      %13 = vector.load %arg5[%c0_12, %c0_13] : memref<1x256xf32, #tpu.memory_space<vmem>>, vector<1x256xf32>
      %14 = vector.broadcast %13 : vector<1x256xf32> to vector<32x256xf32>
      %15 = arith.mulf %12, %14 : vector<32x256xf32>
      %c0_14 = arith.constant 0 : index
      %c0_15 = arith.constant 0 : index
      %16 = vector.load %arg6[%c0_14, %c0_15] : memref<1x256xf32, #tpu.memory_space<vmem>>, vector<1x256xf32>
      %17 = vector.broadcast %16 : vector<1x256xf32> to vector<32x256xf32>
      %18 = arith.addf %15, %17 : vector<32x256xf32>
      %c0_16 = arith.constant 0 : index
      %c0_17 = arith.constant 0 : index
      %19 = vector.load %arg7[%c0_16, %c0_17] : memref<32x256xf32, #tpu.memory_space<vmem>>, vector<32x256xf32>
      tpu.vector_store %arg7[%c0_16, %c0_17], %18 {strides = array<i32>} : memref<32x256xf32, #tpu.memory_space<vmem>>, vector<32x256xf32>,
    } else {
    }
    return
  }
  func.func @transform_0(%arg0: i32, %arg1: i32, %arg2: i32) -> (i32, i32) {
    %c0_i32 = arith.constant 0 : i32
    return %arg0, %arg2 : i32, i32
  }
  func.func @transform_1(%arg0: i32, %arg1: i32, %arg2: i32) -> (i32, i32) {
    %c0_i32 = arith.constant 0 : i32
    return %arg2, %arg1 : i32, i32
  }
  func.func @transform_2(%arg0: i32, %arg1: i32, %arg2: i32) -> (i32, i32) {
    %c0_i32 = arith.constant 0 : i32
    %c0_i32_0 = arith.constant 0 : i32
    return %c0_i32, %arg1 : i32, i32
  }
  func.func @transform_3(%arg0: i32, %arg1: i32, %arg2: i32) -> (i32, i32) {
    %c0_i32 = arith.constant 0 : i32
    %c0_i32_0 = arith.constant 0 : i32
    return %c0_i32, %arg1 : i32, i32
  }
  func.func @transform_4(%arg0: i32, %arg1: i32, %arg2: i32) -> (i32, i32) {
    %c0_i32 = arith.constant 0 : i32
    return %arg0, %arg1 : i32, i32
  }
}

module attributes {stable_mosaic.version = 11 : i64} {
  func.func @_fused_matmul_kernel(%arg0: i32, %arg1: i32, %arg2: i32, %arg3: memref<32x128xbf16, #tpu.memory_space<vmem>>, %arg4: memref<128x256xbf16, #tpu.memory_space<vmem>>, %arg5: memref<1x256xf32, #tpu.memory_space<vmem>>, %arg6: memref<1x256xf32, #tpu.memory_space<vmem>>, %arg7: memref<32x256xf32, #tpu.memory_space<vmem>>, %arg8: memref<32x256xf32, #tpu.memory_space<vmem>>, %arg9: memref<32x256xf32, #tpu.memory_space<vmem>>) attributes {dimension_semantics = [#tpu.dimension_semantics<parallel>, #tpu.dimension_semantics<parallel>, #tpu.dimension_semantics<arbitrary>], iteration_bounds = array<i64: 1, 1, 1>, scalar_prefetch = 0 : i64, scratch_operands = 1 : i64, tpu.core_type = #tpu.core_type<tc>, window_params = [{transform_indices = @transform_0, window_bounds = array<i64: 32, 128>}, {transform_indices = @transform_1, window_bounds = array<i64: 128, 256>}, {transform_indices = @transform_2, window_bounds = array<i64: 1, 256>}, {transform_indices = @transform_3, window_bounds = array<i64: 1, 256>}, {transform_indices = @transform_4, window_bounds = array<i64: 32, 256>}, {transform_indices = @transform_5, window_bounds = array<i64: 32, 256>}]} {
    %c0_i32 = arith.constant 0 : i32
    %0 = arith.cmpi eq, %arg2, %c0_i32 : i32
    %1 = arith.extui %0 : i1 to i32
    %c0_i32_0 = arith.constant 0 : i32
    %2 = arith.cmpi ne, %1, %c0_i32_0 : i32
    scf.if %2 {
      %cst_10 = arith.constant 0.000000e+00 : f32
      %12 = vector.broadcast %cst_10 : f32 to vector<32x256xf32>
      %c0_11 = arith.constant 0 : index
      %c0_12 = arith.constant 0 : index
      %13 = vector.load %arg9[%c0_11, %c0_12] : memref<32x256xf32, #tpu.memory_space<vmem>>, vector<32x256xf32>
      tpu.vector_store %arg9[%c0_11, %c0_12], %12 {strides = array<i32>} : memref<32x256xf32, #tpu.memory_space<vmem>>, vector<32x256xf32>,
    } else {
    }
    %c0 = arith.constant 0 : index
    %c0_1 = arith.constant 0 : index
    %3 = vector.load %arg9[%c0, %c0_1] : memref<32x256xf32, #tpu.memory_space<vmem>>, vector<32x256xf32>
    %c0_2 = arith.constant 0 : index
    %c0_3 = arith.constant 0 : index
    %4 = vector.load %arg3[%c0_2, %c0_3] : memref<32x128xbf16, #tpu.memory_space<vmem>>, vector<32x128xbf16>
    %c0_4 = arith.constant 0 : index
    %c0_5 = arith.constant 0 : index
    %5 = vector.load %arg4[%c0_4, %c0_5] : memref<128x256xbf16, #tpu.memory_space<vmem>>, vector<128x256xbf16>
    %cst = arith.constant dense<0.000000e+00> : vector<32x256xf32>
    %6 = tpu.matmul %4, %5, %cst {dimension_numbers = #tpu.dot_dimension_numbers<[1], [0], [0], [1], [0, 0, 1, 1], [], []>} : vector<32x128xbf16>, vector<128x256xbf16>, vector<32x256xf32> -> vector<32x256xf32>
    %7 = arith.addf %3, %6 : vector<32x256xf32>
    %c0_6 = arith.constant 0 : index
    %c0_7 = arith.constant 0 : index
    %8 = vector.load %arg9[%c0_6, %c0_7] : memref<32x256xf32, #tpu.memory_space<vmem>>, vector<32x256xf32>
    tpu.vector_store %arg9[%c0_6, %c0_7], %7 {strides = array<i32>} : memref<32x256xf32, #tpu.memory_space<vmem>>, vector<32x256xf32>,
    %c0_i32_8 = arith.constant 0 : i32
    %9 = arith.cmpi eq, %arg2, %c0_i32_8 : i32
    %10 = arith.extui %9 : i1 to i32
    %c0_i32_9 = arith.constant 0 : i32
    %11 = arith.cmpi ne, %10, %c0_i32_9 : i32
    scf.if %11 {
      %c0_10 = arith.constant 0 : index
      %c0_11 = arith.constant 0 : index
      %12 = vector.load %arg9[%c0_10, %c0_11] : memref<32x256xf32, #tpu.memory_space<vmem>>, vector<32x256xf32>
      %c0_12 = arith.constant 0 : index
      %c0_13 = arith.constant 0 : index
      %13 = vector.load %arg5[%c0_12, %c0_13] : memref<1x256xf32, #tpu.memory_space<vmem>>, vector<1x256xf32>
      %14 = vector.broadcast %13 : vector<1x256xf32> to vector<32x256xf32>
      %15 = arith.mulf %12, %14 : vector<32x256xf32>
      %c0_14 = arith.constant 0 : index
      %c0_15 = arith.constant 0 : index
      %16 = vector.load %arg6[%c0_14, %c0_15] : memref<1x256xf32, #tpu.memory_space<vmem>>, vector<1x256xf32>
      %17 = vector.broadcast %16 : vector<1x256xf32> to vector<32x256xf32>
      %18 = arith.addf %15, %17 : vector<32x256xf32>
      %c0_16 = arith.constant 0 : index
      %c0_17 = arith.constant 0 : index
      %19 = vector.load %arg7[%c0_16, %c0_17] : memref<32x256xf32, #tpu.memory_space<vmem>>, vector<32x256xf32>
      %20 = arith.addf %18, %19 : vector<32x256xf32>
      %cst_18 = arith.constant 0.000000e+00 : f32
      %21 = vector.broadcast %cst_18 : f32 to vector<32x256xf32>
      %22 = arith.maximumf %20, %21 : vector<32x256xf32>
      %c0_19 = arith.constant 0 : index
      %c0_20 = arith.constant 0 : index
      %23 = vector.load %arg8[%c0_19, %c0_20] : memref<32x256xf32, #tpu.memory_space<vmem>>, vector<32x256xf32>
      tpu.vector_store %arg8[%c0_19, %c0_20], %22 {strides = array<i32>} : memref<32x256xf32, #tpu.memory_space<vmem>>, vector<32x256xf32>,
    } else {
    }
    return
  }
  func.func @transform_0(%arg0: i32, %arg1: i32, %arg2: i32) -> (i32, i32) {
    %c0_i32 = arith.constant 0 : i32
    return %arg0, %arg2 : i32, i32
  }
  func.func @transform_1(%arg0: i32, %arg1: i32, %arg2: i32) -> (i32, i32) {
    %c0_i32 = arith.constant 0 : i32
    return %arg2, %arg1 : i32, i32
  }
  func.func @transform_2(%arg0: i32, %arg1: i32, %arg2: i32) -> (i32, i32) {
    %c0_i32 = arith.constant 0 : i32
    %c0_i32_0 = arith.constant 0 : i32
    return %c0_i32, %arg1 : i32, i32
  }
  func.func @transform_3(%arg0: i32, %arg1: i32, %arg2: i32) -> (i32, i32) {
    %c0_i32 = arith.constant 0 : i32
    %c0_i32_0 = arith.constant 0 : i32
    return %c0_i32, %arg1 : i32, i32
  }
  func.func @transform_4(%arg0: i32, %arg1: i32, %arg2: i32) -> (i32, i32) {
    %c0_i32 = arith.constant 0 : i32
    return %arg0, %arg1 : i32, i32
  }
  func.func @transform_5(%arg0: i32, %arg1: i32, %arg2: i32) -> (i32, i32) {
    %c0_i32 = arith.constant 0 : i32
    return %arg0, %arg1 : i32, i32
  }
}

module attributes {stable_mosaic.version = 11 : i64} {
  func.func @_fused_matmul_kernel(%arg0: i32, %arg1: i32, %arg2: i32, %arg3: memref<32x256xbf16, #tpu.memory_space<vmem>>, %arg4: memref<256x64xbf16, #tpu.memory_space<vmem>>, %arg5: memref<1x64xf32, #tpu.memory_space<vmem>>, %arg6: memref<1x64xf32, #tpu.memory_space<vmem>>, %arg7: memref<32x64xf32, #tpu.memory_space<vmem>>, %arg8: memref<32x64xf32, #tpu.memory_space<vmem>>) attributes {dimension_semantics = [#tpu.dimension_semantics<parallel>, #tpu.dimension_semantics<parallel>, #tpu.dimension_semantics<arbitrary>], iteration_bounds = array<i64: 1, 1, 1>, scalar_prefetch = 0 : i64, scratch_operands = 1 : i64, tpu.core_type = #tpu.core_type<tc>, window_params = [{transform_indices = @transform_0, window_bounds = array<i64: 32, 256>}, {transform_indices = @transform_1, window_bounds = array<i64: 256, 64>}, {transform_indices = @transform_2, window_bounds = array<i64: 1, 64>}, {transform_indices = @transform_3, window_bounds = array<i64: 1, 64>}, {transform_indices = @transform_4, window_bounds = array<i64: 32, 64>}]} {
    %c0_i32 = arith.constant 0 : i32
    %0 = arith.cmpi eq, %arg2, %c0_i32 : i32
    %1 = arith.extui %0 : i1 to i32
    %c0_i32_0 = arith.constant 0 : i32
    %2 = arith.cmpi ne, %1, %c0_i32_0 : i32
    scf.if %2 {
      %cst_10 = arith.constant 0.000000e+00 : f32
      %12 = vector.broadcast %cst_10 : f32 to vector<32x64xf32>
      %c0_11 = arith.constant 0 : index
      %c0_12 = arith.constant 0 : index
      %13 = vector.load %arg8[%c0_11, %c0_12] : memref<32x64xf32, #tpu.memory_space<vmem>>, vector<32x64xf32>
      tpu.vector_store %arg8[%c0_11, %c0_12], %12 {strides = array<i32>} : memref<32x64xf32, #tpu.memory_space<vmem>>, vector<32x64xf32>,
    } else {
    }
    %c0 = arith.constant 0 : index
    %c0_1 = arith.constant 0 : index
    %3 = vector.load %arg8[%c0, %c0_1] : memref<32x64xf32, #tpu.memory_space<vmem>>, vector<32x64xf32>
    %c0_2 = arith.constant 0 : index
    %c0_3 = arith.constant 0 : index
    %4 = vector.load %arg3[%c0_2, %c0_3] : memref<32x256xbf16, #tpu.memory_space<vmem>>, vector<32x256xbf16>
    %c0_4 = arith.constant 0 : index
    %c0_5 = arith.constant 0 : index
    %5 = vector.load %arg4[%c0_4, %c0_5] : memref<256x64xbf16, #tpu.memory_space<vmem>>, vector<256x64xbf16>
    %cst = arith.constant dense<0.000000e+00> : vector<32x64xf32>
    %6 = tpu.matmul %4, %5, %cst {dimension_numbers = #tpu.dot_dimension_numbers<[1], [0], [0], [1], [0, 0, 1, 1], [], []>} : vector<32x256xbf16>, vector<256x64xbf16>, vector<32x64xf32> -> vector<32x64xf32>
    %7 = arith.addf %3, %6 : vector<32x64xf32>
    %c0_6 = arith.constant 0 : index
    %c0_7 = arith.constant 0 : index
    %8 = vector.load %arg8[%c0_6, %c0_7] : memref<32x64xf32, #tpu.memory_space<vmem>>, vector<32x64xf32>
    tpu.vector_store %arg8[%c0_6, %c0_7], %7 {strides = array<i32>} : memref<32x64xf32, #tpu.memory_space<vmem>>, vector<32x64xf32>,
    %c0_i32_8 = arith.constant 0 : i32
    %9 = arith.cmpi eq, %arg2, %c0_i32_8 : i32
    %10 = arith.extui %9 : i1 to i32
    %c0_i32_9 = arith.constant 0 : i32
    %11 = arith.cmpi ne, %10, %c0_i32_9 : i32
    scf.if %11 {
      %c0_10 = arith.constant 0 : index
      %c0_11 = arith.constant 0 : index
      %12 = vector.load %arg8[%c0_10, %c0_11] : memref<32x64xf32, #tpu.memory_space<vmem>>, vector<32x64xf32>
      %c0_12 = arith.constant 0 : index
      %c0_13 = arith.constant 0 : index
      %13 = vector.load %arg5[%c0_12, %c0_13] : memref<1x64xf32, #tpu.memory_space<vmem>>, vector<1x64xf32>
      %14 = vector.broadcast %13 : vector<1x64xf32> to vector<32x64xf32>
      %15 = arith.mulf %12, %14 : vector<32x64xf32>
      %c0_14 = arith.constant 0 : index
      %c0_15 = arith.constant 0 : index
      %16 = vector.load %arg6[%c0_14, %c0_15] : memref<1x64xf32, #tpu.memory_space<vmem>>, vector<1x64xf32>
      %17 = vector.broadcast %16 : vector<1x64xf32> to vector<32x64xf32>
      %18 = arith.addf %15, %17 : vector<32x64xf32>
      %cst_16 = arith.constant 0.000000e+00 : f32
      %19 = vector.broadcast %cst_16 : f32 to vector<32x64xf32>
      %20 = arith.maximumf %18, %19 : vector<32x64xf32>
      %c0_17 = arith.constant 0 : index
      %c0_18 = arith.constant 0 : index
      %21 = vector.load %arg7[%c0_17, %c0_18] : memref<32x64xf32, #tpu.memory_space<vmem>>, vector<32x64xf32>
      tpu.vector_store %arg7[%c0_17, %c0_18], %20 {strides = array<i32>} : memref<32x64xf32, #tpu.memory_space<vmem>>, vector<32x64xf32>,
    } else {
    }
    return
  }
  func.func @transform_0(%arg0: i32, %arg1: i32, %arg2: i32) -> (i32, i32) {
    %c0_i32 = arith.constant 0 : i32
    return %arg0, %arg2 : i32, i32
  }
  func.func @transform_1(%arg0: i32, %arg1: i32, %arg2: i32) -> (i32, i32) {
    %c0_i32 = arith.constant 0 : i32
    return %arg2, %arg1 : i32, i32
  }
  func.func @transform_2(%arg0: i32, %arg1: i32, %arg2: i32) -> (i32, i32) {
    %c0_i32 = arith.constant 0 : i32
    %c0_i32_0 = arith.constant 0 : i32
    return %c0_i32, %arg1 : i32, i32
  }
  func.func @transform_3(%arg0: i32, %arg1: i32, %arg2: i32) -> (i32, i32) {
    %c0_i32 = arith.constant 0 : i32
    %c0_i32_0 = arith.constant 0 : i32
    return %c0_i32, %arg1 : i32, i32
  }
  func.func @transform_4(%arg0: i32, %arg1: i32, %arg2: i32) -> (i32, i32) {
    %c0_i32 = arith.constant 0 : i32
    return %arg0, %arg1 : i32, i32
  }
}

module attributes {stable_mosaic.version = 11 : i64} {
  func.func @_fused_matmul_kernel(%arg0: i32, %arg1: i32, %arg2: i32, %arg3: memref<32x256xbf16, #tpu.memory_space<vmem>>, %arg4: memref<256x128xbf16, #tpu.memory_space<vmem>>, %arg5: memref<1x128xf32, #tpu.memory_space<vmem>>, %arg6: memref<1x128xf32, #tpu.memory_space<vmem>>, %arg7: memref<32x128xf32, #tpu.memory_space<vmem>>, %arg8: memref<32x128xf32, #tpu.memory_space<vmem>>) attributes {dimension_semantics = [#tpu.dimension_semantics<parallel>, #tpu.dimension_semantics<parallel>, #tpu.dimension_semantics<arbitrary>], iteration_bounds = array<i64: 1, 1, 1>, scalar_prefetch = 0 : i64, scratch_operands = 1 : i64, tpu.core_type = #tpu.core_type<tc>, window_params = [{transform_indices = @transform_0, window_bounds = array<i64: 32, 256>}, {transform_indices = @transform_1, window_bounds = array<i64: 256, 128>}, {transform_indices = @transform_2, window_bounds = array<i64: 1, 128>}, {transform_indices = @transform_3, window_bounds = array<i64: 1, 128>}, {transform_indices = @transform_4, window_bounds = array<i64: 32, 128>}]} {
    %c0_i32 = arith.constant 0 : i32
    %0 = arith.cmpi eq, %arg2, %c0_i32 : i32
    %1 = arith.extui %0 : i1 to i32
    %c0_i32_0 = arith.constant 0 : i32
    %2 = arith.cmpi ne, %1, %c0_i32_0 : i32
    scf.if %2 {
      %cst_10 = arith.constant 0.000000e+00 : f32
      %12 = vector.broadcast %cst_10 : f32 to vector<32x128xf32>
      %c0_11 = arith.constant 0 : index
      %c0_12 = arith.constant 0 : index
      %13 = vector.load %arg8[%c0_11, %c0_12] : memref<32x128xf32, #tpu.memory_space<vmem>>, vector<32x128xf32>
      tpu.vector_store %arg8[%c0_11, %c0_12], %12 {strides = array<i32>} : memref<32x128xf32, #tpu.memory_space<vmem>>, vector<32x128xf32>,
    } else {
    }
    %c0 = arith.constant 0 : index
    %c0_1 = arith.constant 0 : index
    %3 = vector.load %arg8[%c0, %c0_1] : memref<32x128xf32, #tpu.memory_space<vmem>>, vector<32x128xf32>
    %c0_2 = arith.constant 0 : index
    %c0_3 = arith.constant 0 : index
    %4 = vector.load %arg3[%c0_2, %c0_3] : memref<32x256xbf16, #tpu.memory_space<vmem>>, vector<32x256xbf16>
    %c0_4 = arith.constant 0 : index
    %c0_5 = arith.constant 0 : index
    %5 = vector.load %arg4[%c0_4, %c0_5] : memref<256x128xbf16, #tpu.memory_space<vmem>>, vector<256x128xbf16>
    %cst = arith.constant dense<0.000000e+00> : vector<32x128xf32>
    %6 = tpu.matmul %4, %5, %cst {dimension_numbers = #tpu.dot_dimension_numbers<[1], [0], [0], [1], [0, 0, 1, 1], [], []>} : vector<32x256xbf16>, vector<256x128xbf16>, vector<32x128xf32> -> vector<32x128xf32>
    %7 = arith.addf %3, %6 : vector<32x128xf32>
    %c0_6 = arith.constant 0 : index
    %c0_7 = arith.constant 0 : index
    %8 = vector.load %arg8[%c0_6, %c0_7] : memref<32x128xf32, #tpu.memory_space<vmem>>, vector<32x128xf32>
    tpu.vector_store %arg8[%c0_6, %c0_7], %7 {strides = array<i32>} : memref<32x128xf32, #tpu.memory_space<vmem>>, vector<32x128xf32>,
    %c0_i32_8 = arith.constant 0 : i32
    %9 = arith.cmpi eq, %arg2, %c0_i32_8 : i32
    %10 = arith.extui %9 : i1 to i32
    %c0_i32_9 = arith.constant 0 : i32
    %11 = arith.cmpi ne, %10, %c0_i32_9 : i32
    scf.if %11 {
      %c0_10 = arith.constant 0 : index
      %c0_11 = arith.constant 0 : index
      %12 = vector.load %arg8[%c0_10, %c0_11] : memref<32x128xf32, #tpu.memory_space<vmem>>, vector<32x128xf32>
      %c0_12 = arith.constant 0 : index
      %c0_13 = arith.constant 0 : index
      %13 = vector.load %arg5[%c0_12, %c0_13] : memref<1x128xf32, #tpu.memory_space<vmem>>, vector<1x128xf32>
      %14 = vector.broadcast %13 : vector<1x128xf32> to vector<32x128xf32>
      %15 = arith.mulf %12, %14 : vector<32x128xf32>
      %c0_14 = arith.constant 0 : index
      %c0_15 = arith.constant 0 : index
      %16 = vector.load %arg6[%c0_14, %c0_15] : memref<1x128xf32, #tpu.memory_space<vmem>>, vector<1x128xf32>
      %17 = vector.broadcast %16 : vector<1x128xf32> to vector<32x128xf32>
      %18 = arith.addf %15, %17 : vector<32x128xf32>
      %cst_16 = arith.constant 0.000000e+00 : f32
      %19 = vector.broadcast %cst_16 : f32 to vector<32x128xf32>
      %20 = arith.maximumf %18, %19 : vector<32x128xf32>
      %c0_17 = arith.constant 0 : index
      %c0_18 = arith.constant 0 : index
      %21 = vector.load %arg7[%c0_17, %c0_18] : memref<32x128xf32, #tpu.memory_space<vmem>>, vector<32x128xf32>
      tpu.vector_store %arg7[%c0_17, %c0_18], %20 {strides = array<i32>} : memref<32x128xf32, #tpu.memory_space<vmem>>, vector<32x128xf32>,
    } else {
    }
    return
  }
  func.func @transform_0(%arg0: i32, %arg1: i32, %arg2: i32) -> (i32, i32) {
    %c0_i32 = arith.constant 0 : i32
    return %arg0, %arg2 : i32, i32
  }
  func.func @transform_1(%arg0: i32, %arg1: i32, %arg2: i32) -> (i32, i32) {
    %c0_i32 = arith.constant 0 : i32
    return %arg2, %arg1 : i32, i32
  }
  func.func @transform_2(%arg0: i32, %arg1: i32, %arg2: i32) -> (i32, i32) {
    %c0_i32 = arith.constant 0 : i32
    %c0_i32_0 = arith.constant 0 : i32
    return %c0_i32, %arg1 : i32, i32
  }
  func.func @transform_3(%arg0: i32, %arg1: i32, %arg2: i32) -> (i32, i32) {
    %c0_i32 = arith.constant 0 : i32
    %c0_i32_0 = arith.constant 0 : i32
    return %c0_i32, %arg1 : i32, i32
  }
  func.func @transform_4(%arg0: i32, %arg1: i32, %arg2: i32) -> (i32, i32) {
    %c0_i32 = arith.constant 0 : i32
    return %arg0, %arg1 : i32, i32
  }
}

module attributes {stable_mosaic.version = 11 : i64} {
  func.func @_fused_matmul_kernel(%arg0: i32, %arg1: i32, %arg2: i32, %arg3: memref<8x128xbf16, #tpu.memory_space<vmem>>, %arg4: memref<128x128xbf16, #tpu.memory_space<vmem>>, %arg5: memref<1x128xf32, #tpu.memory_space<vmem>>, %arg6: memref<1x128xf32, #tpu.memory_space<vmem>>, %arg7: memref<8x128xf32, #tpu.memory_space<vmem>>, %arg8: memref<8x128xf32, #tpu.memory_space<vmem>>) attributes {dimension_semantics = [#tpu.dimension_semantics<parallel>, #tpu.dimension_semantics<parallel>, #tpu.dimension_semantics<arbitrary>], iteration_bounds = array<i64: 1, 1, 9>, scalar_prefetch = 0 : i64, scratch_operands = 1 : i64, tpu.core_type = #tpu.core_type<tc>, window_params = [{transform_indices = @transform_0, window_bounds = array<i64: 8, 128>}, {transform_indices = @transform_1, window_bounds = array<i64: 128, 128>}, {transform_indices = @transform_2, window_bounds = array<i64: 1, 128>}, {transform_indices = @transform_3, window_bounds = array<i64: 1, 128>}, {transform_indices = @transform_4, window_bounds = array<i64: 8, 128>}]} {
    %c0_i32 = arith.constant 0 : i32
    %0 = arith.cmpi eq, %arg2, %c0_i32 : i32
    %1 = arith.extui %0 : i1 to i32
    %c0_i32_0 = arith.constant 0 : i32
    %2 = arith.cmpi ne, %1, %c0_i32_0 : i32
    scf.if %2 {
      %cst_9 = arith.constant 0.000000e+00 : f32
      %12 = vector.broadcast %cst_9 : f32 to vector<8x128xf32>
      %c0_10 = arith.constant 0 : index
      %c0_11 = arith.constant 0 : index
      %13 = vector.load %arg8[%c0_10, %c0_11] : memref<8x128xf32, #tpu.memory_space<vmem>>, vector<8x128xf32>
      tpu.vector_store %arg8[%c0_10, %c0_11], %12 {strides = array<i32>} : memref<8x128xf32, #tpu.memory_space<vmem>>, vector<8x128xf32>,
    } else {
    }
    %c0 = arith.constant 0 : index
    %c0_1 = arith.constant 0 : index
    %3 = vector.load %arg8[%c0, %c0_1] : memref<8x128xf32, #tpu.memory_space<vmem>>, vector<8x128xf32>
    %c0_2 = arith.constant 0 : index
    %c0_3 = arith.constant 0 : index
    %4 = vector.load %arg3[%c0_2, %c0_3] : memref<8x128xbf16, #tpu.memory_space<vmem>>, vector<8x128xbf16>
    %c0_4 = arith.constant 0 : index
    %c0_5 = arith.constant 0 : index
    %5 = vector.load %arg4[%c0_4, %c0_5] : memref<128x128xbf16, #tpu.memory_space<vmem>>, vector<128x128xbf16>
    %cst = arith.constant dense<0.000000e+00> : vector<8x128xf32>
    %6 = tpu.matmul %4, %5, %cst {dimension_numbers = #tpu.dot_dimension_numbers<[1], [0], [0], [1], [0, 0, 1, 1], [], []>} : vector<8x128xbf16>, vector<128x128xbf16>, vector<8x128xf32> -> vector<8x128xf32>
    %7 = arith.addf %3, %6 : vector<8x128xf32>
    %c0_6 = arith.constant 0 : index
    %c0_7 = arith.constant 0 : index
    %8 = vector.load %arg8[%c0_6, %c0_7] : memref<8x128xf32, #tpu.memory_space<vmem>>, vector<8x128xf32>
    tpu.vector_store %arg8[%c0_6, %c0_7], %7 {strides = array<i32>} : memref<8x128xf32, #tpu.memory_space<vmem>>, vector<8x128xf32>,
    %c8_i32 = arith.constant 8 : i32
    %9 = arith.cmpi eq, %arg2, %c8_i32 : i32
    %10 = arith.extui %9 : i1 to i32
    %c0_i32_8 = arith.constant 0 : i32
    %11 = arith.cmpi ne, %10, %c0_i32_8 : i32
    scf.if %11 {
      %c0_9 = arith.constant 0 : index
      %c0_10 = arith.constant 0 : index
      %12 = vector.load %arg8[%c0_9, %c0_10] : memref<8x128xf32, #tpu.memory_space<vmem>>, vector<8x128xf32>
      %c0_11 = arith.constant 0 : index
      %c0_12 = arith.constant 0 : index
      %13 = vector.load %arg5[%c0_11, %c0_12] : memref<1x128xf32, #tpu.memory_space<vmem>>, vector<1x128xf32>
      %14 = vector.broadcast %13 : vector<1x128xf32> to vector<8x128xf32>
      %15 = arith.mulf %12, %14 : vector<8x128xf32>
      %c0_13 = arith.constant 0 : index
      %c0_14 = arith.constant 0 : index
      %16 = vector.load %arg6[%c0_13, %c0_14] : memref<1x128xf32, #tpu.memory_space<vmem>>, vector<1x128xf32>
      %17 = vector.broadcast %16 : vector<1x128xf32> to vector<8x128xf32>
      %18 = arith.addf %15, %17 : vector<8x128xf32>
      %cst_15 = arith.constant 0.000000e+00 : f32
      %19 = vector.broadcast %cst_15 : f32 to vector<8x128xf32>
      %20 = arith.maximumf %18, %19 : vector<8x128xf32>
      %c0_16 = arith.constant 0 : index
      %c0_17 = arith.constant 0 : index
      %21 = vector.load %arg7[%c0_16, %c0_17] : memref<8x128xf32, #tpu.memory_space<vmem>>, vector<8x128xf32>
      tpu.vector_store %arg7[%c0_16, %c0_17], %20 {strides = array<i32>} : memref<8x128xf32, #tpu.memory_space<vmem>>, vector<8x128xf32>,
    } else {
    }
    return
  }
  func.func @transform_0(%arg0: i32, %arg1: i32, %arg2: i32) -> (i32, i32) {
    %c0_i32 = arith.constant 0 : i32
    return %arg0, %arg2 : i32, i32
  }
  func.func @transform_1(%arg0: i32, %arg1: i32, %arg2: i32) -> (i32, i32) {
    %c0_i32 = arith.constant 0 : i32
    return %arg2, %arg1 : i32, i32
  }
  func.func @transform_2(%arg0: i32, %arg1: i32, %arg2: i32) -> (i32, i32) {
    %c0_i32 = arith.constant 0 : i32
    %c0_i32_0 = arith.constant 0 : i32
    return %c0_i32, %arg1 : i32, i32
  }
  func.func @transform_3(%arg0: i32, %arg1: i32, %arg2: i32) -> (i32, i32) {
    %c0_i32 = arith.constant 0 : i32
    %c0_i32_0 = arith.constant 0 : i32
    return %c0_i32, %arg1 : i32, i32
  }
  func.func @transform_4(%arg0: i32, %arg1: i32, %arg2: i32) -> (i32, i32) {
    %c0_i32 = arith.constant 0 : i32
    return %arg0, %arg1 : i32, i32
  }
}

module attributes {stable_mosaic.version = 11 : i64} {
  func.func @_fused_matmul_kernel(%arg0: i32, %arg1: i32, %arg2: i32, %arg3: memref<8x256xbf16, #tpu.memory_space<vmem>>, %arg4: memref<256x256xbf16, #tpu.memory_space<vmem>>, %arg5: memref<1x256xf32, #tpu.memory_space<vmem>>, %arg6: memref<1x256xf32, #tpu.memory_space<vmem>>, %arg7: memref<8x256xf32, #tpu.memory_space<vmem>>, %arg8: memref<8x256xf32, #tpu.memory_space<vmem>>) attributes {dimension_semantics = [#tpu.dimension_semantics<parallel>, #tpu.dimension_semantics<parallel>, #tpu.dimension_semantics<arbitrary>], iteration_bounds = array<i64: 1, 2, 1>, scalar_prefetch = 0 : i64, scratch_operands = 1 : i64, tpu.core_type = #tpu.core_type<tc>, window_params = [{transform_indices = @transform_0, window_bounds = array<i64: 8, 256>}, {transform_indices = @transform_1, window_bounds = array<i64: 256, 256>}, {transform_indices = @transform_2, window_bounds = array<i64: 1, 256>}, {transform_indices = @transform_3, window_bounds = array<i64: 1, 256>}, {transform_indices = @transform_4, window_bounds = array<i64: 8, 256>}]} {
    %c0_i32 = arith.constant 0 : i32
    %0 = arith.cmpi eq, %arg2, %c0_i32 : i32
    %1 = arith.extui %0 : i1 to i32
    %c0_i32_0 = arith.constant 0 : i32
    %2 = arith.cmpi ne, %1, %c0_i32_0 : i32
    scf.if %2 {
      %cst_10 = arith.constant 0.000000e+00 : f32
      %12 = vector.broadcast %cst_10 : f32 to vector<8x256xf32>
      %c0_11 = arith.constant 0 : index
      %c0_12 = arith.constant 0 : index
      %13 = vector.load %arg8[%c0_11, %c0_12] : memref<8x256xf32, #tpu.memory_space<vmem>>, vector<8x256xf32>
      tpu.vector_store %arg8[%c0_11, %c0_12], %12 {strides = array<i32>} : memref<8x256xf32, #tpu.memory_space<vmem>>, vector<8x256xf32>,
    } else {
    }
    %c0 = arith.constant 0 : index
    %c0_1 = arith.constant 0 : index
    %3 = vector.load %arg8[%c0, %c0_1] : memref<8x256xf32, #tpu.memory_space<vmem>>, vector<8x256xf32>
    %c0_2 = arith.constant 0 : index
    %c0_3 = arith.constant 0 : index
    %4 = vector.load %arg3[%c0_2, %c0_3] : memref<8x256xbf16, #tpu.memory_space<vmem>>, vector<8x256xbf16>
    %c0_4 = arith.constant 0 : index
    %c0_5 = arith.constant 0 : index
    %5 = vector.load %arg4[%c0_4, %c0_5] : memref<256x256xbf16, #tpu.memory_space<vmem>>, vector<256x256xbf16>
    %cst = arith.constant dense<0.000000e+00> : vector<8x256xf32>
    %6 = tpu.matmul %4, %5, %cst {dimension_numbers = #tpu.dot_dimension_numbers<[1], [0], [0], [1], [0, 0, 1, 1], [], []>} : vector<8x256xbf16>, vector<256x256xbf16>, vector<8x256xf32> -> vector<8x256xf32>
    %7 = arith.addf %3, %6 : vector<8x256xf32>
    %c0_6 = arith.constant 0 : index
    %c0_7 = arith.constant 0 : index
    %8 = vector.load %arg8[%c0_6, %c0_7] : memref<8x256xf32, #tpu.memory_space<vmem>>, vector<8x256xf32>
    tpu.vector_store %arg8[%c0_6, %c0_7], %7 {strides = array<i32>} : memref<8x256xf32, #tpu.memory_space<vmem>>, vector<8x256xf32>,
    %c0_i32_8 = arith.constant 0 : i32
    %9 = arith.cmpi eq, %arg2, %c0_i32_8 : i32
    %10 = arith.extui %9 : i1 to i32
    %c0_i32_9 = arith.constant 0 : i32
    %11 = arith.cmpi ne, %10, %c0_i32_9 : i32
    scf.if %11 {
      %c0_10 = arith.constant 0 : index
      %c0_11 = arith.constant 0 : index
      %12 = vector.load %arg8[%c0_10, %c0_11] : memref<8x256xf32, #tpu.memory_space<vmem>>, vector<8x256xf32>
      %c0_12 = arith.constant 0 : index
      %c0_13 = arith.constant 0 : index
      %13 = vector.load %arg5[%c0_12, %c0_13] : memref<1x256xf32, #tpu.memory_space<vmem>>, vector<1x256xf32>
      %14 = vector.broadcast %13 : vector<1x256xf32> to vector<8x256xf32>
      %15 = arith.mulf %12, %14 : vector<8x256xf32>
      %c0_14 = arith.constant 0 : index
      %c0_15 = arith.constant 0 : index
      %16 = vector.load %arg6[%c0_14, %c0_15] : memref<1x256xf32, #tpu.memory_space<vmem>>, vector<1x256xf32>
      %17 = vector.broadcast %16 : vector<1x256xf32> to vector<8x256xf32>
      %18 = arith.addf %15, %17 : vector<8x256xf32>
      %c0_16 = arith.constant 0 : index
      %c0_17 = arith.constant 0 : index
      %19 = vector.load %arg7[%c0_16, %c0_17] : memref<8x256xf32, #tpu.memory_space<vmem>>, vector<8x256xf32>
      tpu.vector_store %arg7[%c0_16, %c0_17], %18 {strides = array<i32>} : memref<8x256xf32, #tpu.memory_space<vmem>>, vector<8x256xf32>,
    } else {
    }
    return
  }
  func.func @transform_0(%arg0: i32, %arg1: i32, %arg2: i32) -> (i32, i32) {
    %c0_i32 = arith.constant 0 : i32
    return %arg0, %arg2 : i32, i32
  }
  func.func @transform_1(%arg0: i32, %arg1: i32, %arg2: i32) -> (i32, i32) {
    %c0_i32 = arith.constant 0 : i32
    return %arg2, %arg1 : i32, i32
  }
  func.func @transform_2(%arg0: i32, %arg1: i32, %arg2: i32) -> (i32, i32) {
    %c0_i32 = arith.constant 0 : i32
    %c0_i32_0 = arith.constant 0 : i32
    return %c0_i32, %arg1 : i32, i32
  }
  func.func @transform_3(%arg0: i32, %arg1: i32, %arg2: i32) -> (i32, i32) {
    %c0_i32 = arith.constant 0 : i32
    %c0_i32_0 = arith.constant 0 : i32
    return %c0_i32, %arg1 : i32, i32
  }
  func.func @transform_4(%arg0: i32, %arg1: i32, %arg2: i32) -> (i32, i32) {
    %c0_i32 = arith.constant 0 : i32
    return %arg0, %arg1 : i32, i32
  }
}

module attributes {stable_mosaic.version = 11 : i64} {
  func.func @_fused_matmul_kernel(%arg0: i32, %arg1: i32, %arg2: i32, %arg3: memref<8x128xbf16, #tpu.memory_space<vmem>>, %arg4: memref<128x256xbf16, #tpu.memory_space<vmem>>, %arg5: memref<1x256xf32, #tpu.memory_space<vmem>>, %arg6: memref<1x256xf32, #tpu.memory_space<vmem>>, %arg7: memref<8x256xf32, #tpu.memory_space<vmem>>, %arg8: memref<8x256xf32, #tpu.memory_space<vmem>>, %arg9: memref<8x256xf32, #tpu.memory_space<vmem>>) attributes {dimension_semantics = [#tpu.dimension_semantics<parallel>, #tpu.dimension_semantics<parallel>, #tpu.dimension_semantics<arbitrary>], iteration_bounds = array<i64: 1, 2, 1>, scalar_prefetch = 0 : i64, scratch_operands = 1 : i64, tpu.core_type = #tpu.core_type<tc>, window_params = [{transform_indices = @transform_0, window_bounds = array<i64: 8, 128>}, {transform_indices = @transform_1, window_bounds = array<i64: 128, 256>}, {transform_indices = @transform_2, window_bounds = array<i64: 1, 256>}, {transform_indices = @transform_3, window_bounds = array<i64: 1, 256>}, {transform_indices = @transform_4, window_bounds = array<i64: 8, 256>}, {transform_indices = @transform_5, window_bounds = array<i64: 8, 256>}]} {
    %c0_i32 = arith.constant 0 : i32
    %0 = arith.cmpi eq, %arg2, %c0_i32 : i32
    %1 = arith.extui %0 : i1 to i32
    %c0_i32_0 = arith.constant 0 : i32
    %2 = arith.cmpi ne, %1, %c0_i32_0 : i32
    scf.if %2 {
      %cst_10 = arith.constant 0.000000e+00 : f32
      %12 = vector.broadcast %cst_10 : f32 to vector<8x256xf32>
      %c0_11 = arith.constant 0 : index
      %c0_12 = arith.constant 0 : index
      %13 = vector.load %arg9[%c0_11, %c0_12] : memref<8x256xf32, #tpu.memory_space<vmem>>, vector<8x256xf32>
      tpu.vector_store %arg9[%c0_11, %c0_12], %12 {strides = array<i32>} : memref<8x256xf32, #tpu.memory_space<vmem>>, vector<8x256xf32>,
    } else {
    }
    %c0 = arith.constant 0 : index
    %c0_1 = arith.constant 0 : index
    %3 = vector.load %arg9[%c0, %c0_1] : memref<8x256xf32, #tpu.memory_space<vmem>>, vector<8x256xf32>
    %c0_2 = arith.constant 0 : index
    %c0_3 = arith.constant 0 : index
    %4 = vector.load %arg3[%c0_2, %c0_3] : memref<8x128xbf16, #tpu.memory_space<vmem>>, vector<8x128xbf16>
    %c0_4 = arith.constant 0 : index
    %c0_5 = arith.constant 0 : index
    %5 = vector.load %arg4[%c0_4, %c0_5] : memref<128x256xbf16, #tpu.memory_space<vmem>>, vector<128x256xbf16>
    %cst = arith.constant dense<0.000000e+00> : vector<8x256xf32>
    %6 = tpu.matmul %4, %5, %cst {dimension_numbers = #tpu.dot_dimension_numbers<[1], [0], [0], [1], [0, 0, 1, 1], [], []>} : vector<8x128xbf16>, vector<128x256xbf16>, vector<8x256xf32> -> vector<8x256xf32>
    %7 = arith.addf %3, %6 : vector<8x256xf32>
    %c0_6 = arith.constant 0 : index
    %c0_7 = arith.constant 0 : index
    %8 = vector.load %arg9[%c0_6, %c0_7] : memref<8x256xf32, #tpu.memory_space<vmem>>, vector<8x256xf32>
    tpu.vector_store %arg9[%c0_6, %c0_7], %7 {strides = array<i32>} : memref<8x256xf32, #tpu.memory_space<vmem>>, vector<8x256xf32>,
    %c0_i32_8 = arith.constant 0 : i32
    %9 = arith.cmpi eq, %arg2, %c0_i32_8 : i32
    %10 = arith.extui %9 : i1 to i32
    %c0_i32_9 = arith.constant 0 : i32
    %11 = arith.cmpi ne, %10, %c0_i32_9 : i32
    scf.if %11 {
      %c0_10 = arith.constant 0 : index
      %c0_11 = arith.constant 0 : index
      %12 = vector.load %arg9[%c0_10, %c0_11] : memref<8x256xf32, #tpu.memory_space<vmem>>, vector<8x256xf32>
      %c0_12 = arith.constant 0 : index
      %c0_13 = arith.constant 0 : index
      %13 = vector.load %arg5[%c0_12, %c0_13] : memref<1x256xf32, #tpu.memory_space<vmem>>, vector<1x256xf32>
      %14 = vector.broadcast %13 : vector<1x256xf32> to vector<8x256xf32>
      %15 = arith.mulf %12, %14 : vector<8x256xf32>
      %c0_14 = arith.constant 0 : index
      %c0_15 = arith.constant 0 : index
      %16 = vector.load %arg6[%c0_14, %c0_15] : memref<1x256xf32, #tpu.memory_space<vmem>>, vector<1x256xf32>
      %17 = vector.broadcast %16 : vector<1x256xf32> to vector<8x256xf32>
      %18 = arith.addf %15, %17 : vector<8x256xf32>
      %c0_16 = arith.constant 0 : index
      %c0_17 = arith.constant 0 : index
      %19 = vector.load %arg7[%c0_16, %c0_17] : memref<8x256xf32, #tpu.memory_space<vmem>>, vector<8x256xf32>
      %20 = arith.addf %18, %19 : vector<8x256xf32>
      %cst_18 = arith.constant 0.000000e+00 : f32
      %21 = vector.broadcast %cst_18 : f32 to vector<8x256xf32>
      %22 = arith.maximumf %20, %21 : vector<8x256xf32>
      %c0_19 = arith.constant 0 : index
      %c0_20 = arith.constant 0 : index
      %23 = vector.load %arg8[%c0_19, %c0_20] : memref<8x256xf32, #tpu.memory_space<vmem>>, vector<8x256xf32>
      tpu.vector_store %arg8[%c0_19, %c0_20], %22 {strides = array<i32>} : memref<8x256xf32, #tpu.memory_space<vmem>>, vector<8x256xf32>,
    } else {
    }
    return
  }
  func.func @transform_0(%arg0: i32, %arg1: i32, %arg2: i32) -> (i32, i32) {
    %c0_i32 = arith.constant 0 : i32
    return %arg0, %arg2 : i32, i32
  }
  func.func @transform_1(%arg0: i32, %arg1: i32, %arg2: i32) -> (i32, i32) {
    %c0_i32 = arith.constant 0 : i32
    return %arg2, %arg1 : i32, i32
  }
  func.func @transform_2(%arg0: i32, %arg1: i32, %arg2: i32) -> (i32, i32) {
    %c0_i32 = arith.constant 0 : i32
    %c0_i32_0 = arith.constant 0 : i32
    return %c0_i32, %arg1 : i32, i32
  }
  func.func @transform_3(%arg0: i32, %arg1: i32, %arg2: i32) -> (i32, i32) {
    %c0_i32 = arith.constant 0 : i32
    %c0_i32_0 = arith.constant 0 : i32
    return %c0_i32, %arg1 : i32, i32
  }
  func.func @transform_4(%arg0: i32, %arg1: i32, %arg2: i32) -> (i32, i32) {
    %c0_i32 = arith.constant 0 : i32
    return %arg0, %arg1 : i32, i32
  }
  func.func @transform_5(%arg0: i32, %arg1: i32, %arg2: i32) -> (i32, i32) {
    %c0_i32 = arith.constant 0 : i32
    return %arg0, %arg1 : i32, i32
  }
}

module attributes {stable_mosaic.version = 11 : i64} {
  func.func @_fused_matmul_kernel(%arg0: i32, %arg1: i32, %arg2: i32, %arg3: memref<8x512xbf16, #tpu.memory_space<vmem>>, %arg4: memref<512x128xbf16, #tpu.memory_space<vmem>>, %arg5: memref<1x128xf32, #tpu.memory_space<vmem>>, %arg6: memref<1x128xf32, #tpu.memory_space<vmem>>, %arg7: memref<8x128xf32, #tpu.memory_space<vmem>>, %arg8: memref<8x128xf32, #tpu.memory_space<vmem>>) attributes {dimension_semantics = [#tpu.dimension_semantics<parallel>, #tpu.dimension_semantics<parallel>, #tpu.dimension_semantics<arbitrary>], iteration_bounds = array<i64: 1, 1, 1>, scalar_prefetch = 0 : i64, scratch_operands = 1 : i64, tpu.core_type = #tpu.core_type<tc>, window_params = [{transform_indices = @transform_0, window_bounds = array<i64: 8, 512>}, {transform_indices = @transform_1, window_bounds = array<i64: 512, 128>}, {transform_indices = @transform_2, window_bounds = array<i64: 1, 128>}, {transform_indices = @transform_3, window_bounds = array<i64: 1, 128>}, {transform_indices = @transform_4, window_bounds = array<i64: 8, 128>}]} {
    %c0_i32 = arith.constant 0 : i32
    %0 = arith.cmpi eq, %arg2, %c0_i32 : i32
    %1 = arith.extui %0 : i1 to i32
    %c0_i32_0 = arith.constant 0 : i32
    %2 = arith.cmpi ne, %1, %c0_i32_0 : i32
    scf.if %2 {
      %cst_10 = arith.constant 0.000000e+00 : f32
      %12 = vector.broadcast %cst_10 : f32 to vector<8x128xf32>
      %c0_11 = arith.constant 0 : index
      %c0_12 = arith.constant 0 : index
      %13 = vector.load %arg8[%c0_11, %c0_12] : memref<8x128xf32, #tpu.memory_space<vmem>>, vector<8x128xf32>
      tpu.vector_store %arg8[%c0_11, %c0_12], %12 {strides = array<i32>} : memref<8x128xf32, #tpu.memory_space<vmem>>, vector<8x128xf32>,
    } else {
    }
    %c0 = arith.constant 0 : index
    %c0_1 = arith.constant 0 : index
    %3 = vector.load %arg8[%c0, %c0_1] : memref<8x128xf32, #tpu.memory_space<vmem>>, vector<8x128xf32>
    %c0_2 = arith.constant 0 : index
    %c0_3 = arith.constant 0 : index
    %4 = vector.load %arg3[%c0_2, %c0_3] : memref<8x512xbf16, #tpu.memory_space<vmem>>, vector<8x512xbf16>
    %c0_4 = arith.constant 0 : index
    %c0_5 = arith.constant 0 : index
    %5 = vector.load %arg4[%c0_4, %c0_5] : memref<512x128xbf16, #tpu.memory_space<vmem>>, vector<512x128xbf16>
    %cst = arith.constant dense<0.000000e+00> : vector<8x128xf32>
    %6 = tpu.matmul %4, %5, %cst {dimension_numbers = #tpu.dot_dimension_numbers<[1], [0], [0], [1], [0, 0, 1, 1], [], []>} : vector<8x512xbf16>, vector<512x128xbf16>, vector<8x128xf32> -> vector<8x128xf32>
    %7 = arith.addf %3, %6 : vector<8x128xf32>
    %c0_6 = arith.constant 0 : index
    %c0_7 = arith.constant 0 : index
    %8 = vector.load %arg8[%c0_6, %c0_7] : memref<8x128xf32, #tpu.memory_space<vmem>>, vector<8x128xf32>
    tpu.vector_store %arg8[%c0_6, %c0_7], %7 {strides = array<i32>} : memref<8x128xf32, #tpu.memory_space<vmem>>, vector<8x128xf32>,
    %c0_i32_8 = arith.constant 0 : i32
    %9 = arith.cmpi eq, %arg2, %c0_i32_8 : i32
    %10 = arith.extui %9 : i1 to i32
    %c0_i32_9 = arith.constant 0 : i32
    %11 = arith.cmpi ne, %10, %c0_i32_9 : i32
    scf.if %11 {
      %c0_10 = arith.constant 0 : index
      %c0_11 = arith.constant 0 : index
      %12 = vector.load %arg8[%c0_10, %c0_11] : memref<8x128xf32, #tpu.memory_space<vmem>>, vector<8x128xf32>
      %c0_12 = arith.constant 0 : index
      %c0_13 = arith.constant 0 : index
      %13 = vector.load %arg5[%c0_12, %c0_13] : memref<1x128xf32, #tpu.memory_space<vmem>>, vector<1x128xf32>
      %14 = vector.broadcast %13 : vector<1x128xf32> to vector<8x128xf32>
      %15 = arith.mulf %12, %14 : vector<8x128xf32>
      %c0_14 = arith.constant 0 : index
      %c0_15 = arith.constant 0 : index
      %16 = vector.load %arg6[%c0_14, %c0_15] : memref<1x128xf32, #tpu.memory_space<vmem>>, vector<1x128xf32>
      %17 = vector.broadcast %16 : vector<1x128xf32> to vector<8x128xf32>
      %18 = arith.addf %15, %17 : vector<8x128xf32>
      %cst_16 = arith.constant 0.000000e+00 : f32
      %19 = vector.broadcast %cst_16 : f32 to vector<8x128xf32>
      %20 = arith.maximumf %18, %19 : vector<8x128xf32>
      %c0_17 = arith.constant 0 : index
      %c0_18 = arith.constant 0 : index
      %21 = vector.load %arg7[%c0_17, %c0_18] : memref<8x128xf32, #tpu.memory_space<vmem>>, vector<8x128xf32>
      tpu.vector_store %arg7[%c0_17, %c0_18], %20 {strides = array<i32>} : memref<8x128xf32, #tpu.memory_space<vmem>>, vector<8x128xf32>,
    } else {
    }
    return
  }
  func.func @transform_0(%arg0: i32, %arg1: i32, %arg2: i32) -> (i32, i32) {
    %c0_i32 = arith.constant 0 : i32
    return %arg0, %arg2 : i32, i32
  }
  func.func @transform_1(%arg0: i32, %arg1: i32, %arg2: i32) -> (i32, i32) {
    %c0_i32 = arith.constant 0 : i32
    return %arg2, %arg1 : i32, i32
  }
  func.func @transform_2(%arg0: i32, %arg1: i32, %arg2: i32) -> (i32, i32) {
    %c0_i32 = arith.constant 0 : i32
    %c0_i32_0 = arith.constant 0 : i32
    return %c0_i32, %arg1 : i32, i32
  }
  func.func @transform_3(%arg0: i32, %arg1: i32, %arg2: i32) -> (i32, i32) {
    %c0_i32 = arith.constant 0 : i32
    %c0_i32_0 = arith.constant 0 : i32
    return %c0_i32, %arg1 : i32, i32
  }
  func.func @transform_4(%arg0: i32, %arg1: i32, %arg2: i32) -> (i32, i32) {
    %c0_i32 = arith.constant 0 : i32
    return %arg0, %arg1 : i32, i32
  }
}

module attributes {stable_mosaic.version = 11 : i64} {
  func.func @_fused_matmul_kernel(%arg0: i32, %arg1: i32, %arg2: i32, %arg3: memref<8x512xbf16, #tpu.memory_space<vmem>>, %arg4: memref<512x256xbf16, #tpu.memory_space<vmem>>, %arg5: memref<1x256xf32, #tpu.memory_space<vmem>>, %arg6: memref<1x256xf32, #tpu.memory_space<vmem>>, %arg7: memref<8x256xf32, #tpu.memory_space<vmem>>, %arg8: memref<8x256xf32, #tpu.memory_space<vmem>>) attributes {dimension_semantics = [#tpu.dimension_semantics<parallel>, #tpu.dimension_semantics<parallel>, #tpu.dimension_semantics<arbitrary>], iteration_bounds = array<i64: 1, 1, 1>, scalar_prefetch = 0 : i64, scratch_operands = 1 : i64, tpu.core_type = #tpu.core_type<tc>, window_params = [{transform_indices = @transform_0, window_bounds = array<i64: 8, 512>}, {transform_indices = @transform_1, window_bounds = array<i64: 512, 256>}, {transform_indices = @transform_2, window_bounds = array<i64: 1, 256>}, {transform_indices = @transform_3, window_bounds = array<i64: 1, 256>}, {transform_indices = @transform_4, window_bounds = array<i64: 8, 256>}]} {
    %c0_i32 = arith.constant 0 : i32
    %0 = arith.cmpi eq, %arg2, %c0_i32 : i32
    %1 = arith.extui %0 : i1 to i32
    %c0_i32_0 = arith.constant 0 : i32
    %2 = arith.cmpi ne, %1, %c0_i32_0 : i32
    scf.if %2 {
      %cst_10 = arith.constant 0.000000e+00 : f32
      %12 = vector.broadcast %cst_10 : f32 to vector<8x256xf32>
      %c0_11 = arith.constant 0 : index
      %c0_12 = arith.constant 0 : index
      %13 = vector.load %arg8[%c0_11, %c0_12] : memref<8x256xf32, #tpu.memory_space<vmem>>, vector<8x256xf32>
      tpu.vector_store %arg8[%c0_11, %c0_12], %12 {strides = array<i32>} : memref<8x256xf32, #tpu.memory_space<vmem>>, vector<8x256xf32>,
    } else {
    }
    %c0 = arith.constant 0 : index
    %c0_1 = arith.constant 0 : index
    %3 = vector.load %arg8[%c0, %c0_1] : memref<8x256xf32, #tpu.memory_space<vmem>>, vector<8x256xf32>
    %c0_2 = arith.constant 0 : index
    %c0_3 = arith.constant 0 : index
    %4 = vector.load %arg3[%c0_2, %c0_3] : memref<8x512xbf16, #tpu.memory_space<vmem>>, vector<8x512xbf16>
    %c0_4 = arith.constant 0 : index
    %c0_5 = arith.constant 0 : index
    %5 = vector.load %arg4[%c0_4, %c0_5] : memref<512x256xbf16, #tpu.memory_space<vmem>>, vector<512x256xbf16>
    %cst = arith.constant dense<0.000000e+00> : vector<8x256xf32>
    %6 = tpu.matmul %4, %5, %cst {dimension_numbers = #tpu.dot_dimension_numbers<[1], [0], [0], [1], [0, 0, 1, 1], [], []>} : vector<8x512xbf16>, vector<512x256xbf16>, vector<8x256xf32> -> vector<8x256xf32>
    %7 = arith.addf %3, %6 : vector<8x256xf32>
    %c0_6 = arith.constant 0 : index
    %c0_7 = arith.constant 0 : index
    %8 = vector.load %arg8[%c0_6, %c0_7] : memref<8x256xf32, #tpu.memory_space<vmem>>, vector<8x256xf32>
    tpu.vector_store %arg8[%c0_6, %c0_7], %7 {strides = array<i32>} : memref<8x256xf32, #tpu.memory_space<vmem>>, vector<8x256xf32>,
    %c0_i32_8 = arith.constant 0 : i32
    %9 = arith.cmpi eq, %arg2, %c0_i32_8 : i32
    %10 = arith.extui %9 : i1 to i32
    %c0_i32_9 = arith.constant 0 : i32
    %11 = arith.cmpi ne, %10, %c0_i32_9 : i32
    scf.if %11 {
      %c0_10 = arith.constant 0 : index
      %c0_11 = arith.constant 0 : index
      %12 = vector.load %arg8[%c0_10, %c0_11] : memref<8x256xf32, #tpu.memory_space<vmem>>, vector<8x256xf32>
      %c0_12 = arith.constant 0 : index
      %c0_13 = arith.constant 0 : index
      %13 = vector.load %arg5[%c0_12, %c0_13] : memref<1x256xf32, #tpu.memory_space<vmem>>, vector<1x256xf32>
      %14 = vector.broadcast %13 : vector<1x256xf32> to vector<8x256xf32>
      %15 = arith.mulf %12, %14 : vector<8x256xf32>
      %c0_14 = arith.constant 0 : index
      %c0_15 = arith.constant 0 : index
      %16 = vector.load %arg6[%c0_14, %c0_15] : memref<1x256xf32, #tpu.memory_space<vmem>>, vector<1x256xf32>
      %17 = vector.broadcast %16 : vector<1x256xf32> to vector<8x256xf32>
      %18 = arith.addf %15, %17 : vector<8x256xf32>
      %cst_16 = arith.constant 0.000000e+00 : f32
      %19 = vector.broadcast %cst_16 : f32 to vector<8x256xf32>
      %20 = arith.maximumf %18, %19 : vector<8x256xf32>
      %c0_17 = arith.constant 0 : index
      %c0_18 = arith.constant 0 : index
      %21 = vector.load %arg7[%c0_17, %c0_18] : memref<8x256xf32, #tpu.memory_space<vmem>>, vector<8x256xf32>
      tpu.vector_store %arg7[%c0_17, %c0_18], %20 {strides = array<i32>} : memref<8x256xf32, #tpu.memory_space<vmem>>, vector<8x256xf32>,
    } else {
    }
    return
  }
  func.func @transform_0(%arg0: i32, %arg1: i32, %arg2: i32) -> (i32, i32) {
    %c0_i32 = arith.constant 0 : i32
    return %arg0, %arg2 : i32, i32
  }
  func.func @transform_1(%arg0: i32, %arg1: i32, %arg2: i32) -> (i32, i32) {
    %c0_i32 = arith.constant 0 : i32
    return %arg2, %arg1 : i32, i32
  }
  func.func @transform_2(%arg0: i32, %arg1: i32, %arg2: i32) -> (i32, i32) {
    %c0_i32 = arith.constant 0 : i32
    %c0_i32_0 = arith.constant 0 : i32
    return %c0_i32, %arg1 : i32, i32
  }
  func.func @transform_3(%arg0: i32, %arg1: i32, %arg2: i32) -> (i32, i32) {
    %c0_i32 = arith.constant 0 : i32
    %c0_i32_0 = arith.constant 0 : i32
    return %c0_i32, %arg1 : i32, i32
  }
  func.func @transform_4(%arg0: i32, %arg1: i32, %arg2: i32) -> (i32, i32) {
    %c0_i32 = arith.constant 0 : i32
    return %arg0, %arg1 : i32, i32
  }
}

module attributes {stable_mosaic.version = 11 : i64} {
  func.func @_fused_matmul_kernel(%arg0: i32, %arg1: i32, %arg2: i32, %arg3: memref<8x256xbf16, #tpu.memory_space<vmem>>, %arg4: memref<256x256xbf16, #tpu.memory_space<vmem>>, %arg5: memref<1x256xf32, #tpu.memory_space<vmem>>, %arg6: memref<1x256xf32, #tpu.memory_space<vmem>>, %arg7: memref<8x256xf32, #tpu.memory_space<vmem>>, %arg8: memref<8x256xf32, #tpu.memory_space<vmem>>) attributes {dimension_semantics = [#tpu.dimension_semantics<parallel>, #tpu.dimension_semantics<parallel>, #tpu.dimension_semantics<arbitrary>], iteration_bounds = array<i64: 1, 1, 9>, scalar_prefetch = 0 : i64, scratch_operands = 1 : i64, tpu.core_type = #tpu.core_type<tc>, window_params = [{transform_indices = @transform_0, window_bounds = array<i64: 8, 256>}, {transform_indices = @transform_1, window_bounds = array<i64: 256, 256>}, {transform_indices = @transform_2, window_bounds = array<i64: 1, 256>}, {transform_indices = @transform_3, window_bounds = array<i64: 1, 256>}, {transform_indices = @transform_4, window_bounds = array<i64: 8, 256>}]} {
    %c0_i32 = arith.constant 0 : i32
    %0 = arith.cmpi eq, %arg2, %c0_i32 : i32
    %1 = arith.extui %0 : i1 to i32
    %c0_i32_0 = arith.constant 0 : i32
    %2 = arith.cmpi ne, %1, %c0_i32_0 : i32
    scf.if %2 {
      %cst_9 = arith.constant 0.000000e+00 : f32
      %12 = vector.broadcast %cst_9 : f32 to vector<8x256xf32>
      %c0_10 = arith.constant 0 : index
      %c0_11 = arith.constant 0 : index
      %13 = vector.load %arg8[%c0_10, %c0_11] : memref<8x256xf32, #tpu.memory_space<vmem>>, vector<8x256xf32>
      tpu.vector_store %arg8[%c0_10, %c0_11], %12 {strides = array<i32>} : memref<8x256xf32, #tpu.memory_space<vmem>>, vector<8x256xf32>,
    } else {
    }
    %c0 = arith.constant 0 : index
    %c0_1 = arith.constant 0 : index
    %3 = vector.load %arg8[%c0, %c0_1] : memref<8x256xf32, #tpu.memory_space<vmem>>, vector<8x256xf32>
    %c0_2 = arith.constant 0 : index
    %c0_3 = arith.constant 0 : index
    %4 = vector.load %arg3[%c0_2, %c0_3] : memref<8x256xbf16, #tpu.memory_space<vmem>>, vector<8x256xbf16>
    %c0_4 = arith.constant 0 : index
    %c0_5 = arith.constant 0 : index
    %5 = vector.load %arg4[%c0_4, %c0_5] : memref<256x256xbf16, #tpu.memory_space<vmem>>, vector<256x256xbf16>
    %cst = arith.constant dense<0.000000e+00> : vector<8x256xf32>
    %6 = tpu.matmul %4, %5, %cst {dimension_numbers = #tpu.dot_dimension_numbers<[1], [0], [0], [1], [0, 0, 1, 1], [], []>} : vector<8x256xbf16>, vector<256x256xbf16>, vector<8x256xf32> -> vector<8x256xf32>
    %7 = arith.addf %3, %6 : vector<8x256xf32>
    %c0_6 = arith.constant 0 : index
    %c0_7 = arith.constant 0 : index
    %8 = vector.load %arg8[%c0_6, %c0_7] : memref<8x256xf32, #tpu.memory_space<vmem>>, vector<8x256xf32>
    tpu.vector_store %arg8[%c0_6, %c0_7], %7 {strides = array<i32>} : memref<8x256xf32, #tpu.memory_space<vmem>>, vector<8x256xf32>,
    %c8_i32 = arith.constant 8 : i32
    %9 = arith.cmpi eq, %arg2, %c8_i32 : i32
    %10 = arith.extui %9 : i1 to i32
    %c0_i32_8 = arith.constant 0 : i32
    %11 = arith.cmpi ne, %10, %c0_i32_8 : i32
    scf.if %11 {
      %c0_9 = arith.constant 0 : index
      %c0_10 = arith.constant 0 : index
      %12 = vector.load %arg8[%c0_9, %c0_10] : memref<8x256xf32, #tpu.memory_space<vmem>>, vector<8x256xf32>
      %c0_11 = arith.constant 0 : index
      %c0_12 = arith.constant 0 : index
      %13 = vector.load %arg5[%c0_11, %c0_12] : memref<1x256xf32, #tpu.memory_space<vmem>>, vector<1x256xf32>
      %14 = vector.broadcast %13 : vector<1x256xf32> to vector<8x256xf32>
      %15 = arith.mulf %12, %14 : vector<8x256xf32>
      %c0_13 = arith.constant 0 : index
      %c0_14 = arith.constant 0 : index
      %16 = vector.load %arg6[%c0_13, %c0_14] : memref<1x256xf32, #tpu.memory_space<vmem>>, vector<1x256xf32>
      %17 = vector.broadcast %16 : vector<1x256xf32> to vector<8x256xf32>
      %18 = arith.addf %15, %17 : vector<8x256xf32>
      %cst_15 = arith.constant 0.000000e+00 : f32
      %19 = vector.broadcast %cst_15 : f32 to vector<8x256xf32>
      %20 = arith.maximumf %18, %19 : vector<8x256xf32>
      %c0_16 = arith.constant 0 : index
      %c0_17 = arith.constant 0 : index
      %21 = vector.load %arg7[%c0_16, %c0_17] : memref<8x256xf32, #tpu.memory_space<vmem>>, vector<8x256xf32>
      tpu.vector_store %arg7[%c0_16, %c0_17], %20 {strides = array<i32>} : memref<8x256xf32, #tpu.memory_space<vmem>>, vector<8x256xf32>,
    } else {
    }
    return
  }
  func.func @transform_0(%arg0: i32, %arg1: i32, %arg2: i32) -> (i32, i32) {
    %c0_i32 = arith.constant 0 : i32
    return %arg0, %arg2 : i32, i32
  }
  func.func @transform_1(%arg0: i32, %arg1: i32, %arg2: i32) -> (i32, i32) {
    %c0_i32 = arith.constant 0 : i32
    return %arg2, %arg1 : i32, i32
  }
  func.func @transform_2(%arg0: i32, %arg1: i32, %arg2: i32) -> (i32, i32) {
    %c0_i32 = arith.constant 0 : i32
    %c0_i32_0 = arith.constant 0 : i32
    return %c0_i32, %arg1 : i32, i32
  }
  func.func @transform_3(%arg0: i32, %arg1: i32, %arg2: i32) -> (i32, i32) {
    %c0_i32 = arith.constant 0 : i32
    %c0_i32_0 = arith.constant 0 : i32
    return %c0_i32, %arg1 : i32, i32
  }
  func.func @transform_4(%arg0: i32, %arg1: i32, %arg2: i32) -> (i32, i32) {
    %c0_i32 = arith.constant 0 : i32
    return %arg0, %arg1 : i32, i32
  }
}

module attributes {stable_mosaic.version = 11 : i64} {
  func.func @_fused_matmul_kernel(%arg0: i32, %arg1: i32, %arg2: i32, %arg3: memref<8x512xbf16, #tpu.memory_space<vmem>>, %arg4: memref<512x256xbf16, #tpu.memory_space<vmem>>, %arg5: memref<1x256xf32, #tpu.memory_space<vmem>>, %arg6: memref<1x256xf32, #tpu.memory_space<vmem>>, %arg7: memref<8x256xf32, #tpu.memory_space<vmem>>, %arg8: memref<8x256xf32, #tpu.memory_space<vmem>>) attributes {dimension_semantics = [#tpu.dimension_semantics<parallel>, #tpu.dimension_semantics<parallel>, #tpu.dimension_semantics<arbitrary>], iteration_bounds = array<i64: 1, 4, 1>, scalar_prefetch = 0 : i64, scratch_operands = 1 : i64, tpu.core_type = #tpu.core_type<tc>, window_params = [{transform_indices = @transform_0, window_bounds = array<i64: 8, 512>}, {transform_indices = @transform_1, window_bounds = array<i64: 512, 256>}, {transform_indices = @transform_2, window_bounds = array<i64: 1, 256>}, {transform_indices = @transform_3, window_bounds = array<i64: 1, 256>}, {transform_indices = @transform_4, window_bounds = array<i64: 8, 256>}]} {
    %c0_i32 = arith.constant 0 : i32
    %0 = arith.cmpi eq, %arg2, %c0_i32 : i32
    %1 = arith.extui %0 : i1 to i32
    %c0_i32_0 = arith.constant 0 : i32
    %2 = arith.cmpi ne, %1, %c0_i32_0 : i32
    scf.if %2 {
      %cst_10 = arith.constant 0.000000e+00 : f32
      %12 = vector.broadcast %cst_10 : f32 to vector<8x256xf32>
      %c0_11 = arith.constant 0 : index
      %c0_12 = arith.constant 0 : index
      %13 = vector.load %arg8[%c0_11, %c0_12] : memref<8x256xf32, #tpu.memory_space<vmem>>, vector<8x256xf32>
      tpu.vector_store %arg8[%c0_11, %c0_12], %12 {strides = array<i32>} : memref<8x256xf32, #tpu.memory_space<vmem>>, vector<8x256xf32>,
    } else {
    }
    %c0 = arith.constant 0 : index
    %c0_1 = arith.constant 0 : index
    %3 = vector.load %arg8[%c0, %c0_1] : memref<8x256xf32, #tpu.memory_space<vmem>>, vector<8x256xf32>
    %c0_2 = arith.constant 0 : index
    %c0_3 = arith.constant 0 : index
    %4 = vector.load %arg3[%c0_2, %c0_3] : memref<8x512xbf16, #tpu.memory_space<vmem>>, vector<8x512xbf16>
    %c0_4 = arith.constant 0 : index
    %c0_5 = arith.constant 0 : index
    %5 = vector.load %arg4[%c0_4, %c0_5] : memref<512x256xbf16, #tpu.memory_space<vmem>>, vector<512x256xbf16>
    %cst = arith.constant dense<0.000000e+00> : vector<8x256xf32>
    %6 = tpu.matmul %4, %5, %cst {dimension_numbers = #tpu.dot_dimension_numbers<[1], [0], [0], [1], [0, 0, 1, 1], [], []>} : vector<8x512xbf16>, vector<512x256xbf16>, vector<8x256xf32> -> vector<8x256xf32>
    %7 = arith.addf %3, %6 : vector<8x256xf32>
    %c0_6 = arith.constant 0 : index
    %c0_7 = arith.constant 0 : index
    %8 = vector.load %arg8[%c0_6, %c0_7] : memref<8x256xf32, #tpu.memory_space<vmem>>, vector<8x256xf32>
    tpu.vector_store %arg8[%c0_6, %c0_7], %7 {strides = array<i32>} : memref<8x256xf32, #tpu.memory_space<vmem>>, vector<8x256xf32>,
    %c0_i32_8 = arith.constant 0 : i32
    %9 = arith.cmpi eq, %arg2, %c0_i32_8 : i32
    %10 = arith.extui %9 : i1 to i32
    %c0_i32_9 = arith.constant 0 : i32
    %11 = arith.cmpi ne, %10, %c0_i32_9 : i32
    scf.if %11 {
      %c0_10 = arith.constant 0 : index
      %c0_11 = arith.constant 0 : index
      %12 = vector.load %arg8[%c0_10, %c0_11] : memref<8x256xf32, #tpu.memory_space<vmem>>, vector<8x256xf32>
      %c0_12 = arith.constant 0 : index
      %c0_13 = arith.constant 0 : index
      %13 = vector.load %arg5[%c0_12, %c0_13] : memref<1x256xf32, #tpu.memory_space<vmem>>, vector<1x256xf32>
      %14 = vector.broadcast %13 : vector<1x256xf32> to vector<8x256xf32>
      %15 = arith.mulf %12, %14 : vector<8x256xf32>
      %c0_14 = arith.constant 0 : index
      %c0_15 = arith.constant 0 : index
      %16 = vector.load %arg6[%c0_14, %c0_15] : memref<1x256xf32, #tpu.memory_space<vmem>>, vector<1x256xf32>
      %17 = vector.broadcast %16 : vector<1x256xf32> to vector<8x256xf32>
      %18 = arith.addf %15, %17 : vector<8x256xf32>
      %c0_16 = arith.constant 0 : index
      %c0_17 = arith.constant 0 : index
      %19 = vector.load %arg7[%c0_16, %c0_17] : memref<8x256xf32, #tpu.memory_space<vmem>>, vector<8x256xf32>
      tpu.vector_store %arg7[%c0_16, %c0_17], %18 {strides = array<i32>} : memref<8x256xf32, #tpu.memory_space<vmem>>, vector<8x256xf32>,
    } else {
    }
    return
  }
  func.func @transform_0(%arg0: i32, %arg1: i32, %arg2: i32) -> (i32, i32) {
    %c0_i32 = arith.constant 0 : i32
    return %arg0, %arg2 : i32, i32
  }
  func.func @transform_1(%arg0: i32, %arg1: i32, %arg2: i32) -> (i32, i32) {
    %c0_i32 = arith.constant 0 : i32
    return %arg2, %arg1 : i32, i32
  }
  func.func @transform_2(%arg0: i32, %arg1: i32, %arg2: i32) -> (i32, i32) {
    %c0_i32 = arith.constant 0 : i32
    %c0_i32_0 = arith.constant 0 : i32
    return %c0_i32, %arg1 : i32, i32
  }
  func.func @transform_3(%arg0: i32, %arg1: i32, %arg2: i32) -> (i32, i32) {
    %c0_i32 = arith.constant 0 : i32
    %c0_i32_0 = arith.constant 0 : i32
    return %c0_i32, %arg1 : i32, i32
  }
  func.func @transform_4(%arg0: i32, %arg1: i32, %arg2: i32) -> (i32, i32) {
    %c0_i32 = arith.constant 0 : i32
    return %arg0, %arg1 : i32, i32
  }
}

module attributes {stable_mosaic.version = 11 : i64} {
  func.func @_fused_matmul_kernel(%arg0: i32, %arg1: i32, %arg2: i32, %arg3: memref<8x256xbf16, #tpu.memory_space<vmem>>, %arg4: memref<256x256xbf16, #tpu.memory_space<vmem>>, %arg5: memref<1x256xf32, #tpu.memory_space<vmem>>, %arg6: memref<1x256xf32, #tpu.memory_space<vmem>>, %arg7: memref<8x256xf32, #tpu.memory_space<vmem>>, %arg8: memref<8x256xf32, #tpu.memory_space<vmem>>, %arg9: memref<8x256xf32, #tpu.memory_space<vmem>>) attributes {dimension_semantics = [#tpu.dimension_semantics<parallel>, #tpu.dimension_semantics<parallel>, #tpu.dimension_semantics<arbitrary>], iteration_bounds = array<i64: 1, 4, 1>, scalar_prefetch = 0 : i64, scratch_operands = 1 : i64, tpu.core_type = #tpu.core_type<tc>, window_params = [{transform_indices = @transform_0, window_bounds = array<i64: 8, 256>}, {transform_indices = @transform_1, window_bounds = array<i64: 256, 256>}, {transform_indices = @transform_2, window_bounds = array<i64: 1, 256>}, {transform_indices = @transform_3, window_bounds = array<i64: 1, 256>}, {transform_indices = @transform_4, window_bounds = array<i64: 8, 256>}, {transform_indices = @transform_5, window_bounds = array<i64: 8, 256>}]} {
    %c0_i32 = arith.constant 0 : i32
    %0 = arith.cmpi eq, %arg2, %c0_i32 : i32
    %1 = arith.extui %0 : i1 to i32
    %c0_i32_0 = arith.constant 0 : i32
    %2 = arith.cmpi ne, %1, %c0_i32_0 : i32
    scf.if %2 {
      %cst_10 = arith.constant 0.000000e+00 : f32
      %12 = vector.broadcast %cst_10 : f32 to vector<8x256xf32>
      %c0_11 = arith.constant 0 : index
      %c0_12 = arith.constant 0 : index
      %13 = vector.load %arg9[%c0_11, %c0_12] : memref<8x256xf32, #tpu.memory_space<vmem>>, vector<8x256xf32>
      tpu.vector_store %arg9[%c0_11, %c0_12], %12 {strides = array<i32>} : memref<8x256xf32, #tpu.memory_space<vmem>>, vector<8x256xf32>,
    } else {
    }
    %c0 = arith.constant 0 : index
    %c0_1 = arith.constant 0 : index
    %3 = vector.load %arg9[%c0, %c0_1] : memref<8x256xf32, #tpu.memory_space<vmem>>, vector<8x256xf32>
    %c0_2 = arith.constant 0 : index
    %c0_3 = arith.constant 0 : index
    %4 = vector.load %arg3[%c0_2, %c0_3] : memref<8x256xbf16, #tpu.memory_space<vmem>>, vector<8x256xbf16>
    %c0_4 = arith.constant 0 : index
    %c0_5 = arith.constant 0 : index
    %5 = vector.load %arg4[%c0_4, %c0_5] : memref<256x256xbf16, #tpu.memory_space<vmem>>, vector<256x256xbf16>
    %cst = arith.constant dense<0.000000e+00> : vector<8x256xf32>
    %6 = tpu.matmul %4, %5, %cst {dimension_numbers = #tpu.dot_dimension_numbers<[1], [0], [0], [1], [0, 0, 1, 1], [], []>} : vector<8x256xbf16>, vector<256x256xbf16>, vector<8x256xf32> -> vector<8x256xf32>
    %7 = arith.addf %3, %6 : vector<8x256xf32>
    %c0_6 = arith.constant 0 : index
    %c0_7 = arith.constant 0 : index
    %8 = vector.load %arg9[%c0_6, %c0_7] : memref<8x256xf32, #tpu.memory_space<vmem>>, vector<8x256xf32>
    tpu.vector_store %arg9[%c0_6, %c0_7], %7 {strides = array<i32>} : memref<8x256xf32, #tpu.memory_space<vmem>>, vector<8x256xf32>,
    %c0_i32_8 = arith.constant 0 : i32
    %9 = arith.cmpi eq, %arg2, %c0_i32_8 : i32
    %10 = arith.extui %9 : i1 to i32
    %c0_i32_9 = arith.constant 0 : i32
    %11 = arith.cmpi ne, %10, %c0_i32_9 : i32
    scf.if %11 {
      %c0_10 = arith.constant 0 : index
      %c0_11 = arith.constant 0 : index
      %12 = vector.load %arg9[%c0_10, %c0_11] : memref<8x256xf32, #tpu.memory_space<vmem>>, vector<8x256xf32>
      %c0_12 = arith.constant 0 : index
      %c0_13 = arith.constant 0 : index
      %13 = vector.load %arg5[%c0_12, %c0_13] : memref<1x256xf32, #tpu.memory_space<vmem>>, vector<1x256xf32>
      %14 = vector.broadcast %13 : vector<1x256xf32> to vector<8x256xf32>
      %15 = arith.mulf %12, %14 : vector<8x256xf32>
      %c0_14 = arith.constant 0 : index
      %c0_15 = arith.constant 0 : index
      %16 = vector.load %arg6[%c0_14, %c0_15] : memref<1x256xf32, #tpu.memory_space<vmem>>, vector<1x256xf32>
      %17 = vector.broadcast %16 : vector<1x256xf32> to vector<8x256xf32>
      %18 = arith.addf %15, %17 : vector<8x256xf32>
      %c0_16 = arith.constant 0 : index
      %c0_17 = arith.constant 0 : index
      %19 = vector.load %arg7[%c0_16, %c0_17] : memref<8x256xf32, #tpu.memory_space<vmem>>, vector<8x256xf32>
      %20 = arith.addf %18, %19 : vector<8x256xf32>
      %cst_18 = arith.constant 0.000000e+00 : f32
      %21 = vector.broadcast %cst_18 : f32 to vector<8x256xf32>
      %22 = arith.maximumf %20, %21 : vector<8x256xf32>
      %c0_19 = arith.constant 0 : index
      %c0_20 = arith.constant 0 : index
      %23 = vector.load %arg8[%c0_19, %c0_20] : memref<8x256xf32, #tpu.memory_space<vmem>>, vector<8x256xf32>
      tpu.vector_store %arg8[%c0_19, %c0_20], %22 {strides = array<i32>} : memref<8x256xf32, #tpu.memory_space<vmem>>, vector<8x256xf32>,
    } else {
    }
    return
  }
  func.func @transform_0(%arg0: i32, %arg1: i32, %arg2: i32) -> (i32, i32) {
    %c0_i32 = arith.constant 0 : i32
    return %arg0, %arg2 : i32, i32
  }
  func.func @transform_1(%arg0: i32, %arg1: i32, %arg2: i32) -> (i32, i32) {
    %c0_i32 = arith.constant 0 : i32
    return %arg2, %arg1 : i32, i32
  }
  func.func @transform_2(%arg0: i32, %arg1: i32, %arg2: i32) -> (i32, i32) {
    %c0_i32 = arith.constant 0 : i32
    %c0_i32_0 = arith.constant 0 : i32
    return %c0_i32, %arg1 : i32, i32
  }
  func.func @transform_3(%arg0: i32, %arg1: i32, %arg2: i32) -> (i32, i32) {
    %c0_i32 = arith.constant 0 : i32
    %c0_i32_0 = arith.constant 0 : i32
    return %c0_i32, %arg1 : i32, i32
  }
  func.func @transform_4(%arg0: i32, %arg1: i32, %arg2: i32) -> (i32, i32) {
    %c0_i32 = arith.constant 0 : i32
    return %arg0, %arg1 : i32, i32
  }
  func.func @transform_5(%arg0: i32, %arg1: i32, %arg2: i32) -> (i32, i32) {
    %c0_i32 = arith.constant 0 : i32
    return %arg0, %arg1 : i32, i32
  }
}

module attributes {stable_mosaic.version = 11 : i64} {
  func.func @_fused_matmul_kernel(%arg0: i32, %arg1: i32, %arg2: i32, %arg3: memref<8x512xbf16, #tpu.memory_space<vmem>>, %arg4: memref<512x256xbf16, #tpu.memory_space<vmem>>, %arg5: memref<1x256xf32, #tpu.memory_space<vmem>>, %arg6: memref<1x256xf32, #tpu.memory_space<vmem>>, %arg7: memref<8x256xf32, #tpu.memory_space<vmem>>, %arg8: memref<8x256xf32, #tpu.memory_space<vmem>>) attributes {dimension_semantics = [#tpu.dimension_semantics<parallel>, #tpu.dimension_semantics<parallel>, #tpu.dimension_semantics<arbitrary>], iteration_bounds = array<i64: 1, 1, 2>, scalar_prefetch = 0 : i64, scratch_operands = 1 : i64, tpu.core_type = #tpu.core_type<tc>, window_params = [{transform_indices = @transform_0, window_bounds = array<i64: 8, 512>}, {transform_indices = @transform_1, window_bounds = array<i64: 512, 256>}, {transform_indices = @transform_2, window_bounds = array<i64: 1, 256>}, {transform_indices = @transform_3, window_bounds = array<i64: 1, 256>}, {transform_indices = @transform_4, window_bounds = array<i64: 8, 256>}]} {
    %c0_i32 = arith.constant 0 : i32
    %0 = arith.cmpi eq, %arg2, %c0_i32 : i32
    %1 = arith.extui %0 : i1 to i32
    %c0_i32_0 = arith.constant 0 : i32
    %2 = arith.cmpi ne, %1, %c0_i32_0 : i32
    scf.if %2 {
      %cst_9 = arith.constant 0.000000e+00 : f32
      %12 = vector.broadcast %cst_9 : f32 to vector<8x256xf32>
      %c0_10 = arith.constant 0 : index
      %c0_11 = arith.constant 0 : index
      %13 = vector.load %arg8[%c0_10, %c0_11] : memref<8x256xf32, #tpu.memory_space<vmem>>, vector<8x256xf32>
      tpu.vector_store %arg8[%c0_10, %c0_11], %12 {strides = array<i32>} : memref<8x256xf32, #tpu.memory_space<vmem>>, vector<8x256xf32>,
    } else {
    }
    %c0 = arith.constant 0 : index
    %c0_1 = arith.constant 0 : index
    %3 = vector.load %arg8[%c0, %c0_1] : memref<8x256xf32, #tpu.memory_space<vmem>>, vector<8x256xf32>
    %c0_2 = arith.constant 0 : index
    %c0_3 = arith.constant 0 : index
    %4 = vector.load %arg3[%c0_2, %c0_3] : memref<8x512xbf16, #tpu.memory_space<vmem>>, vector<8x512xbf16>
    %c0_4 = arith.constant 0 : index
    %c0_5 = arith.constant 0 : index
    %5 = vector.load %arg4[%c0_4, %c0_5] : memref<512x256xbf16, #tpu.memory_space<vmem>>, vector<512x256xbf16>
    %cst = arith.constant dense<0.000000e+00> : vector<8x256xf32>
    %6 = tpu.matmul %4, %5, %cst {dimension_numbers = #tpu.dot_dimension_numbers<[1], [0], [0], [1], [0, 0, 1, 1], [], []>} : vector<8x512xbf16>, vector<512x256xbf16>, vector<8x256xf32> -> vector<8x256xf32>
    %7 = arith.addf %3, %6 : vector<8x256xf32>
    %c0_6 = arith.constant 0 : index
    %c0_7 = arith.constant 0 : index
    %8 = vector.load %arg8[%c0_6, %c0_7] : memref<8x256xf32, #tpu.memory_space<vmem>>, vector<8x256xf32>
    tpu.vector_store %arg8[%c0_6, %c0_7], %7 {strides = array<i32>} : memref<8x256xf32, #tpu.memory_space<vmem>>, vector<8x256xf32>,
    %c1_i32 = arith.constant 1 : i32
    %9 = arith.cmpi eq, %arg2, %c1_i32 : i32
    %10 = arith.extui %9 : i1 to i32
    %c0_i32_8 = arith.constant 0 : i32
    %11 = arith.cmpi ne, %10, %c0_i32_8 : i32
    scf.if %11 {
      %c0_9 = arith.constant 0 : index
      %c0_10 = arith.constant 0 : index
      %12 = vector.load %arg8[%c0_9, %c0_10] : memref<8x256xf32, #tpu.memory_space<vmem>>, vector<8x256xf32>
      %c0_11 = arith.constant 0 : index
      %c0_12 = arith.constant 0 : index
      %13 = vector.load %arg5[%c0_11, %c0_12] : memref<1x256xf32, #tpu.memory_space<vmem>>, vector<1x256xf32>
      %14 = vector.broadcast %13 : vector<1x256xf32> to vector<8x256xf32>
      %15 = arith.mulf %12, %14 : vector<8x256xf32>
      %c0_13 = arith.constant 0 : index
      %c0_14 = arith.constant 0 : index
      %16 = vector.load %arg6[%c0_13, %c0_14] : memref<1x256xf32, #tpu.memory_space<vmem>>, vector<1x256xf32>
      %17 = vector.broadcast %16 : vector<1x256xf32> to vector<8x256xf32>
      %18 = arith.addf %15, %17 : vector<8x256xf32>
      %cst_15 = arith.constant 0.000000e+00 : f32
      %19 = vector.broadcast %cst_15 : f32 to vector<8x256xf32>
      %20 = arith.maximumf %18, %19 : vector<8x256xf32>
      %c0_16 = arith.constant 0 : index
      %c0_17 = arith.constant 0 : index
      %21 = vector.load %arg7[%c0_16, %c0_17] : memref<8x256xf32, #tpu.memory_space<vmem>>, vector<8x256xf32>
      tpu.vector_store %arg7[%c0_16, %c0_17], %20 {strides = array<i32>} : memref<8x256xf32, #tpu.memory_space<vmem>>, vector<8x256xf32>,
    } else {
    }
    return
  }
  func.func @transform_0(%arg0: i32, %arg1: i32, %arg2: i32) -> (i32, i32) {
    %c0_i32 = arith.constant 0 : i32
    return %arg0, %arg2 : i32, i32
  }
  func.func @transform_1(%arg0: i32, %arg1: i32, %arg2: i32) -> (i32, i32) {
    %c0_i32 = arith.constant 0 : i32
    return %arg2, %arg1 : i32, i32
  }
  func.func @transform_2(%arg0: i32, %arg1: i32, %arg2: i32) -> (i32, i32) {
    %c0_i32 = arith.constant 0 : i32
    %c0_i32_0 = arith.constant 0 : i32
    return %c0_i32, %arg1 : i32, i32
  }
  func.func @transform_3(%arg0: i32, %arg1: i32, %arg2: i32) -> (i32, i32) {
    %c0_i32 = arith.constant 0 : i32
    %c0_i32_0 = arith.constant 0 : i32
    return %c0_i32, %arg1 : i32, i32
  }
  func.func @transform_4(%arg0: i32, %arg1: i32, %arg2: i32) -> (i32, i32) {
    %c0_i32 = arith.constant 0 : i32
    return %arg0, %arg1 : i32, i32
  }
}

</mosaic_0001>

<bundles_post_ra>
// kernel: encoder_m_forward.45
= control target key start
LH: loop header
LB: loop body
LE: loop exit
PB: predicated region body
PF: predicated region fallthrough
CT: control target
= control target key end

     0   :  { %8 = vsyncpa [#allocation3], 0  ;;  %s826_s0 = inlined_call_operand.vmem [shape: f32[512,3], index: 0, kind: input, shape index: {}]   ;;  %s827_s1 = inlined_call_operand.hbm [shape: f32[1,3], index: 1, kind: input, shape index: {}]   ;;  %s828_s2 = inlined_call_operand.hbm [shape: f32[1,3], index: 2, kind: input, shape index: {}]   ;;  %s829_s3 = inlined_call_operand.vmem [shape: f32[512,3], index: 3, kind: output, shape index: {}]  }
   0x1   :  { %9 = vsyncpa [#allocation5], 0  ;;  %s561_s12 = smov 0  }
   0x2 LB: > { %s421_s13 = sadd.s32 4294967295, %s537_s12   ;;  %p423_p0 = scmp.ge.s32.totalorder %s537_s12, 1  ;;  %s537_s12 = sphi %s561_s12, %s15_s12  }
   0x3   : > { %p114_p1 = scmp.lt.s32.totalorder %s537_s12, 3  ;;  %p571_p2 = scmp.eq.s32.totalorder %s421_s13, 0 }
   0x4   : > { %s539_s16 = smov [#allocation2]   ;;  %s540_s18 = smov [#allocation4]  }
   0x5   : > { %s833_s14 = scalar_select %p571_p2, 1, 0 }
   0x6   : > { %p575_p3 = pnand %p423_p0, %p114_p1  ;;  %s127_s17 = sshll.u32 %s539_s16, 4  ;;  %s128_s17 = int_to_ptr.vmem [resolvable:$true] %s127_s17 }
   0x7   : > { %s138_s19 = sshll.u32 %s540_s18, 4  ;;  %s467_s23 = scalar_lea.hbm %s827_s1, 16  ;;  %s587_s19 = int_to_ptr.vmem [resolvable:$true] %s138_s19 }
   0x8   : > { %s834_s15 = scalar_select %p575_p3, 1, 0 }
   0x9   : > { %p446_p4 = pneg %p575_p3  ;;  %p468_p6 = scmp.ne.s32.totalorder %s827_s1, %s467_s23 }
   0xa   : > { %p474_p10 = scmp.lt.u32.totalorder %s467_s23, %s827_s1 }
   0xb   : > { %p583_p5 = pnand %p571_p2, %p446_p4 }
   0xd   : > { %p469_p7 = pneg %p583_p5 }
   0xf   : > { %p470_p8 = pnand %p469_p7, %p468_p6 }
  0x11   : > { %p471_p9 = pneg %p470_p8 }
  0x13   : > { %p476_p11 = pnand %p474_p10, %p471_p9 }
  0x15   : > { %479 = shalt.err (!%p476_p11)
}
  0x16   : > { %s480_s28 = scalar_lea.vmem %s128_s17, 16  ;;  %s487_s29 = scalar_lea.vmem %s128_s17, 32 }
  0x17   : > { %p481_p12 = scmp.ne.s32.totalorder %s128_s17, %s480_s28  ;;  %p488_p1 = scmp.lt.s32.totalorder %s128_s17, %s128_s17 }
  0x18   : > { %p489_p4 = scmp.lt.s32.totalorder %s487_s29, %s480_s28 }
  0x19   : > { %p483_p13 = pnand %p481_p12, %p469_p7 }
  0x1a   : > { %p490_p2 = por %p489_p4, %p488_p1 }
  0x1b   : > { %p484_p0 = pneg %p483_p13 }
  0x1d   : > { %p491_p3 = pnand %p490_p2, %p484_p0 }
  0x1f   : > { %494 = shalt.err (!%p491_p3)
}
  0x20   : > { %449 = dma.hbm_to_vmem [thread:$0]  (!%p583_p5), %s827_s1, 16, %s128_s17, [#allocation3]  }
  0x21   : > { %s495_s7 = scalar_lea.hbm %s828_s2, 16 }
  0x22   : > { %p496_p6 = scmp.ne.s32.totalorder %s828_s2, %s495_s7  ;;  %p502_p3 = scmp.lt.u32.totalorder %s495_s7, %s828_s2 }
  0x24   : > { %p498_p8 = pnand %p496_p6, %p469_p7 }
  0x26   : > { %p499_p2 = pneg %p498_p8 }
  0x28   : > { %p504_p9 = pnand %p502_p3, %p499_p2 }
  0x2a   : > { %507 = shalt.err (!%p504_p9)
}
  0x2b   : > { %s508_s16 = scalar_lea.vmem %s587_s19, 16  ;;  %s515_s17 = scalar_lea.vmem %s587_s19, 32 }
  0x2c   : > { %p509_p10 = scmp.ne.s32.totalorder %s587_s19, %s508_s16  ;;  %p516_p13 = scmp.lt.s32.totalorder %s587_s19, %s587_s19 }
  0x2d   : > { %p517_p0 = scmp.lt.s32.totalorder %s515_s17, %s508_s16 }
  0x2e   : > { %p511_p11 = pnand %p509_p10, %p469_p7 }
  0x2f   : > { %p518_p1 = por %p517_p0, %p516_p13 }
  0x30   : > { %p512_p12 = pneg %p511_p11 }
  0x32   : > { %p519_p4 = pnand %p518_p1, %p512_p12 }
  0x34   : > { %522 = shalt.err (!%p519_p4)
}
  0x35   : > { %452 = dma.hbm_to_vmem [thread:$0]  (!%p583_p5), %s828_s2, 16, %s587_s19, [#allocation5]  }
  0x36   : > { %p836_p6 = scmp.ne.s32.totalorder %s834_s15, 0 }
  0x37   : > { %p837_p7 = scmp.ne.s32.totalorder (!%p836_p6), %s833_s14, 0 }
  0x38   : > { %160 = sbr.rel (%p836_p6) target bundleno = 96 (0x60), region = 32 }
  0x3f   : > { %528 = dma.done.wait (%p837_p7), [#allocation3], 16  }
  0x40   : > { %530 = vsyncadd (%p837_p7), [#allocation3], 4294967280 }
  0x41   : > { %532 = dma.done.wait (%p837_p7), [#allocation5], 16  }
  0x42   : > { %534 = vsyncadd (%p837_p7), [#allocation5], 4294967280  ;;  %s430_s20 = sshll.u32 %s421_s13, 5  ;;  %v655_v1 = vld [vmem:[#allocation2] ss:$0 sm:$0xff]  ;;  %vm310_vm0 = vcmask 23552  }
  0x43   : > { %p189_p8 = scmp.lt.s32.totalorder %s430_s20, 63  ;;  %v657_v2 = vld [vmem:[#allocation4] ss:$0 sm:$0xff] }
  0x45   : > { %s839_s20 = smov (!%p189_p8, %s430_s20), 63 }
  0x46   : > { %s431_s19 = sshll.u32 %s839_s20, 3 }
  0x47   : > { %s652_s23 = scalar_lea.vmem %s826_s0, %s431_s19  ;;  %s666_s24 = scalar_lea.vmem %s829_s3, %s431_s19 }
  0x48   : > { %v200_v0 = vld [vmem:[%s652_s23] sm:$0xff]  ;;  %v201_v4 = vld [vmem:[%s652_s23 + $0x8] sm:$0xff]  ;;  %v202_v5 = vld [vmem:[%s652_s23 + $0x10] sm:$0xff] }
  0x49   : > { %v239_v3 = vsub.f32 %v200_v0, %v655_v1  ;;  %v203_v6 = vld [vmem:[%s652_s23 + $0x18] sm:$0xff]  ;;  %v240_v7 = vsub.f32 %v201_v4, %v655_v1  ;;  %v241_v8 = vsub.f32 %v202_v5, %v655_v1  ;;  %v204_v10 = vld [vmem:[%s652_s23 + $0x20] sm:$0xff]  ;;  %v205_v11 = vld [vmem:[%s652_s23 + $0x28] sm:$0xff] }
  0x4a   : > { %v242_v9 = vsub.f32 %v203_v6, %v655_v1  ;;  %v206_v12 = vld [vmem:[%s652_s23 + $0x30] sm:$0xff]  ;;  %v243_v14 = vsub.f32 %v204_v10, %v655_v1  ;;  %v244_v15 = vsub.f32 %v205_v11, %v655_v1  ;;  %v207_v17 = vld [vmem:[%s652_s23 + $0x38] sm:$0xff]  ;;  %v208_v18 = vld [vmem:[%s652_s23 + $0x40] sm:$0xff] }
  0x4b   : > { %v278_v13 = vmul.f32 %v657_v2, %v239_v3  ;;  %v245_v16 = vsub.f32 %v206_v12, %v655_v1  ;;  %v209_v19 = vld [vmem:[%s652_s23 + $0x48] sm:$0xff]  ;;  %v279_v20 = vmul.f32 %v657_v2, %v240_v7  ;;  %v280_v21 = vmul.f32 %v657_v2, %v241_v8  ;;  %v210_v24 = vld [vmem:[%s652_s23 + $0x50] sm:$0xff]  ;;  %v211_v25 = vld [vmem:[%s652_s23 + $0x58] sm:$0xff] }
  0x4c   : > { %v281_v22 = vmul.f32 %v657_v2, %v242_v9  ;;  %v246_v23 = vsub.f32 %v207_v17, %v655_v1  ;;  %v212_v26 = vld [vmem:[%s652_s23 + $0x60] sm:$0xff]  ;;  %v282_v27 = vmul.f32 %v657_v2, %v243_v14  ;;  %v283_v28 = vmul.f32 %v657_v2, %v244_v15  ;;  %v213_v31 = vld [vmem:[%s652_s23 + $0x68] sm:$0xff]  ;;  %v214_v32 = vld [vmem:[%s652_s23 + $0x70] sm:$0xff] }
  0x4d   : > { %311 = vst.msk [vmem:[%s666_s24] sm:$0xff] %vm310_vm0, %v278_v13  ;;  %v284_v29 = vmul.f32 %v657_v2, %v245_v16  ;;  %v247_v30 = vsub.f32 %v208_v18, %v655_v1  ;;  %v215_v33 = vld [vmem:[%s652_s23 + $0x78] sm:$0xff]  ;;  %312 = vst.msk [vmem:[%s666_s24 + $0x8] sm:$0xff] %vm310_vm0, %v279_v20  ;;  %v248_v35 = vsub.f32 %v209_v19, %v655_v1  ;;  %v216_v38 = vld [vmem:[%s652_s23 + $0x80] sm:$0xff] }
  0x4e   : > { %313 = vst.msk [vmem:[%s666_s24 + $0x10] sm:$0xff] %vm310_vm0, %v280_v21  ;;  %314 = vst.msk [vmem:[%s666_s24 + $0x18] sm:$0xff] %vm310_vm0, %v281_v22  ;;  %v285_v34 = vmul.f32 %v657_v2, %v246_v23  ;;  %v249_v36 = vsub.f32 %v210_v24, %v655_v1  ;;  %v250_v37 = vsub.f32 %v211_v25, %v655_v1  ;;  %v217_v43 = vld [vmem:[%s652_s23 + $0x88] sm:$0xff]  ;;  %v218_v44 = vld [vmem:[%s652_s23 + $0x90] sm:$0xff] }
  0x4f   : > { %315 = vst.msk [vmem:[%s666_s24 + $0x20] sm:$0xff] %vm310_vm0, %v282_v27  ;;  %316 = vst.msk [vmem:[%s666_s24 + $0x28] sm:$0xff] %vm310_vm0, %v283_v28  ;;  %v286_v39 = vmul.f32 %v657_v2, %v247_v30  ;;  %v251_v40 = vsub.f32 %v212_v26, %v655_v1  ;;  %v252_v41 = vsub.f32 %v213_v31, %v655_v1  ;;  %v219_v45 = vld [vmem:[%s652_s23 + $0x98] sm:$0xff]  ;;  %v220_v50 = vld [vmem:[%s652_s23 + $0xa0] sm:$0xff] }
  0x50   : > { %317 = vst.msk [vmem:[%s666_s24 + $0x30] sm:$0xff] %vm310_vm0, %v284_v29  ;;  %v253_v42 = vsub.f32 %v214_v32, %v655_v1  ;;  %318 = vst.msk [vmem:[%s666_s24 + $0x38] sm:$0xff] %vm310_vm0, %v285_v34  ;;  %v287_v46 = vmul.f32 %v657_v2, %v248_v35  ;;  %v288_v47 = vmul.f32 %v657_v2, %v249_v36  ;;  %v221_v51 = vld [vmem:[%s652_s23 + $0xa8] sm:$0xff]  ;;  %v222_v52 = vld [vmem:[%s652_s23 + $0xb0] sm:$0xff] }
  0x51   : > { %v289_v48 = vmul.f32 %v657_v2, %v250_v37  ;;  %v254_v49 = vsub.f32 %v215_v33, %v655_v1  ;;  %319 = vst.msk [vmem:[%s666_s24 + $0x40] sm:$0xff] %vm310_vm0, %v286_v39  ;;  %v290_v53 = vmul.f32 %v657_v2, %v251_v40  ;;  %v291_v54 = vmul.f32 %v657_v2, %v252_v41  ;;  %v223_v57 = vld [vmem:[%s652_s23 + $0xb8] sm:$0xff]  ;;  %v224_v62 = vld [vmem:[%s652_s23 + $0xc0] sm:$0xff]  ;;  %v225_v5 = vld [vmem:[%s652_s23 + $0xc8] sm:$0xff] }
  0x52   : > { %v292_v55 = vmul.f32 %v657_v2, %v253_v42  ;;  %v255_v56 = vsub.f32 %v216_v38, %v655_v1  ;;  %320 = vst.msk [vmem:[%s666_s24 + $0x48] sm:$0xff] %vm310_vm0, %v287_v46  ;;  %321 = vst.msk [vmem:[%s666_s24 + $0x50] sm:$0xff] %vm310_vm0, %v288_v47  ;;  %v256_v59 = vsub.f32 %v217_v43, %v655_v1  ;;  %v226_v6 = vld [vmem:[%s652_s23 + $0xd0] sm:$0xff]  ;;  %v227_v7 = vld [vmem:[%s652_s23 + $0xd8] sm:$0xff] }
  0x53   : > { %322 = vst.msk [vmem:[%s666_s24 + $0x58] sm:$0xff] %vm310_vm0, %v289_v48  ;;  %v293_v58 = vmul.f32 %v657_v2, %v254_v49  ;;  %v257_v60 = vsub.f32 %v218_v44, %v655_v1  ;;  %v258_v61 = vsub.f32 %v219_v45, %v655_v1  ;;  %323 = vst.msk [vmem:[%s666_s24 + $0x60] sm:$0xff] %vm310_vm0, %v290_v53  ;;  %v228_v12 = vld [vmem:[%s652_s23 + $0xe0] sm:$0xff]  ;;  %v229_v13 = vld [vmem:[%s652_s23 + $0xe8] sm:$0xff] }
  0x54   : > { %324 = vst.msk [vmem:[%s666_s24 + $0x68] sm:$0xff] %vm310_vm0, %v291_v54  ;;  %325 = vst.msk [vmem:[%s666_s24 + $0x70] sm:$0xff] %vm310_vm0, %v292_v55  ;;  %v294_v63 = vmul.f32 %v657_v2, %v255_v56  ;;  %v259_v0 = vsub.f32 %v220_v50, %v655_v1  ;;  %v260_v3 = vsub.f32 %v221_v51, %v655_v1  ;;  %v230_v14 = vld [vmem:[%s652_s23 + $0xf0] sm:$0xff]  ;;  %v231_v19 = vld [vmem:[%s652_s23 + $0xf8] sm:$0xff] }
  0x55   : > { %v261_v4 = vsub.f32 %v222_v52, %v655_v1  ;;  %326 = vst.msk [vmem:[%s666_s24 + $0x78] sm:$0xff] %vm310_vm0, %v293_v58  ;;  %v295_v8 = vmul.f32 %v657_v2, %v256_v59  ;;  %v296_v9 = vmul.f32 %v657_v2, %v257_v60  ;;  %v297_v10 = vmul.f32 %v657_v2, %v258_v61 }
  0x56   : > { %v262_v11 = vsub.f32 %v223_v57, %v655_v1  ;;  %327 = vst.msk [vmem:[%s666_s24 + $0x80] sm:$0xff] %vm310_vm0, %v294_v63  ;;  %v298_v15 = vmul.f32 %v657_v2, %v259_v0  ;;  %v299_v16 = vmul.f32 %v657_v2, %v260_v3  ;;  %v263_v18 = vsub.f32 %v224_v62, %v655_v1 }
  0x57   : > { %v300_v17 = vmul.f32 %v657_v2, %v261_v4  ;;  %328 = vst.msk [vmem:[%s666_s24 + $0x88] sm:$0xff] %vm310_vm0, %v295_v8  ;;  %329 = vst.msk [vmem:[%s666_s24 + $0x90] sm:$0xff] %vm310_vm0, %v296_v9  ;;  %v264_v21 = vsub.f32 %v225_v5, %v655_v1  ;;  %v265_v22 = vsub.f32 %v226_v6, %v655_v1 }
  0x58   : > { %330 = vst.msk [vmem:[%s666_s24 + $0x98] sm:$0xff] %vm310_vm0, %v297_v10  ;;  %v301_v20 = vmul.f32 %v657_v2, %v262_v11  ;;  %v266_v23 = vsub.f32 %v227_v7, %v655_v1  ;;  %331 = vst.msk [vmem:[%s666_s24 + $0xa0] sm:$0xff] %vm310_vm0, %v298_v15  ;;  %v302_v24 = vmul.f32 %v657_v2, %v263_v18 }
  0x59   : > { %332 = vst.msk [vmem:[%s666_s24 + $0xa8] sm:$0xff] %vm310_vm0, %v299_v16  ;;  %333 = vst.msk [vmem:[%s666_s24 + $0xb0] sm:$0xff] %vm310_vm0, %v300_v17  ;;  %v267_v25 = vsub.f32 %v228_v12, %v655_v1  ;;  %v268_v26 = vsub.f32 %v229_v13, %v655_v1  ;;  %v269_v27 = vsub.f32 %v230_v14, %v655_v1 }
  0x5a   : > { %334 = vst.msk [vmem:[%s666_s24 + $0xb8] sm:$0xff] %vm310_vm0, %v301_v20  ;;  %v303_v28 = vmul.f32 %v657_v2, %v264_v21  ;;  %v304_v29 = vmul.f32 %v657_v2, %v265_v22  ;;  %v305_v30 = vmul.f32 %v657_v2, %v266_v23  ;;  %v270_v31 = vsub.f32 %v231_v19, %v655_v1 }
  0x5b   : > { %335 = vst.msk [vmem:[%s666_s24 + $0xc0] sm:$0xff] %vm310_vm0, %v302_v24  ;;  %v306_v32 = vmul.f32 %v657_v2, %v267_v25  ;;  %v307_v33 = vmul.f32 %v657_v2, %v268_v26  ;;  %v308_v34 = vmul.f32 %v657_v2, %v269_v27 }
  0x5c   : > { %336 = vst.msk [vmem:[%s666_s24 + $0xc8] sm:$0xff] %vm310_vm0, %v303_v28  ;;  %337 = vst.msk [vmem:[%s666_s24 + $0xd0] sm:$0xff] %vm310_vm0, %v304_v29  ;;  %v309_v35 = vmul.f32 %v657_v2, %v270_v31 }
  0x5d   : > { %338 = vst.msk [vmem:[%s666_s24 + $0xd8] sm:$0xff] %vm310_vm0, %v305_v30  ;;  %339 = vst.msk [vmem:[%s666_s24 + $0xe0] sm:$0xff] %vm310_vm0, %v306_v32 }
  0x5e   : > { %340 = vst.msk [vmem:[%s666_s24 + $0xe8] sm:$0xff] %vm310_vm0, %v307_v33  ;;  %341 = vst.msk [vmem:[%s666_s24 + $0xf0] sm:$0xff] %vm310_vm0, %v308_v34 }
  0x5f   : > { %342 = vst.msk [vmem:[%s666_s24 + $0xf8] sm:$0xff] %vm310_vm0, %v309_v35 }
  0x60 PF: > { %s15_s12 = sadd.s32 1, %s537_s12  }
  0x61   : > { %p12_p5 = scmp.ge.s32.totalorder %s15_s12, 4  }
  0x63   :  { %14 = sbr.rel (!%p12_p5) target bundleno = 2 (0x2), region = 71 }
  0x6a   :  { %365 = vsyncpa [#allocation3], 1 }
  0x6b   :  { %367 = vsyncpa [#allocation3 + $0x1], 1 }
  0x6c   :  { %368 = vsyncpa [#allocation5], 1 }

// kernel: encoder_m_forward.46
= control target key start
LH: loop header
LB: loop body
LE: loop exit
PB: predicated region body
PF: predicated region fallthrough
CT: control target
= control target key end

     0   :  { %vm22_vm0 = vcmask 523264   ;;  %v665_v32 = vmov 0.0   ;;  %s925_s1 = inlined_call_operand.vmem [shape: bf16[256,64], index: 1, kind: input, shape index: {}]   ;;  %s926_s0 = inlined_call_operand.vmem [shape: bf16[128,256], index: 0, kind: input, shape index: {}]   ;;  %s927_s2 = inlined_call_operand.vmem [shape: f32[1,64], index: 2, kind: input, shape index: {}]   ;;  %s928_s3 = inlined_call_operand.vmem [shape: f32[1,64], index: 3, kind: input, shape index: {}]   ;;  %s929_s4 = inlined_call_operand.vmem [shape: f32[128,64], index: 4, kind: output, shape index: {}]  }
   0x1   :  { %v625_v0 = vld [vmem:[%s925_s1 + $0x40] sm:$0xff]   ;;  %v627_v2 = vld [vmem:[%s925_s1 + $0x48] sm:$0xff]   ;;  %v629_v4 = vld [vmem:[%s925_s1 + $0x50] sm:$0xff]   ;;  %23 = vst.msk [vmem:[#allocation2] sm:$0xff] %vm22_vm0, %v665_v32 }
   0x2   :  { %v626_v1 = vld [vmem:[%s925_s1] sm:$0xff]   ;;  %544 = vmatprep.subr.bf16.mxu0 %v625_v0  ;;  %608 = vmatprep.subr.bf16.mxu1 %v625_v0  ;;  %v628_v3 = vld [vmem:[%s925_s1 + $0x8] sm:$0xff]   ;;  %v630_v5 = vld [vmem:[%s925_s1 + $0x10] sm:$0xff]   ;;  %24 = vst.msk [vmem:[#allocation2 + $0x8] sm:$0xff] %vm22_vm0, %v665_v32 }
   0x3   :  { %545 = vmatpush3.bf16.msra.mxu0 %v626_v1  ;;  %616 = vmatpush3.bf16.msra.mxu1 %v626_v1  ;;  %v631_v6 = vld [vmem:[%s925_s1 + $0x58] sm:$0xff]   ;;  %v633_v8 = vld [vmem:[%s925_s1 + $0x60] sm:$0xff]   ;;  %v635_v10 = vld [vmem:[%s925_s1 + $0x68] sm:$0xff]   ;;  %25 = vst.msk [vmem:[#allocation2 + $0x10] sm:$0xff] %vm22_vm0, %v665_v32 }
   0x4   :  { %546 = vmatprep.subr.bf16.mxu0 %v627_v2  ;;  %609 = vmatprep.subr.bf16.mxu1 %v627_v2  ;;  %v632_v7 = vld [vmem:[%s925_s1 + $0x18] sm:$0xff]   ;;  %v634_v9 = vld [vmem:[%s925_s1 + $0x20] sm:$0xff]   ;;  %v636_v13 = vld [vmem:[%s925_s1 + $0x28] sm:$0xff]   ;;  %26 = vst.msk [vmem:[#allocation2 + $0x18] sm:$0xff] %vm22_vm0, %v665_v32 }
   0x5   :  { %v643_v11 = vld [vmem:[%s926_s0 + $0x4] ss:$8 sps:$4 sm:$0xff]   ;;  %v637_v14 = vld [vmem:[%s925_s1 + $0x70] sm:$0xff]   ;;  %v639_v16 = vld [vmem:[%s925_s1 + $0x78] sm:$0xff]   ;;  %27 = vst.msk [vmem:[#allocation2 + $0x20] sm:$0xff] %vm22_vm0, %v665_v32 }
   0x6   :  { %v646_v12 = vld [vmem:[%s926_s0 + $0x44] ss:$8 sps:$4 sm:$0xff]   ;;  %311 = vmatprep.mubr.bf16.mxu0 %v643_v11  ;;  %v638_v15 = vld [vmem:[%s925_s1 + $0x30] sm:$0xff]   ;;  %v640_v17 = vld [vmem:[%s925_s1 + $0x38] sm:$0xff]   ;;  %28 = vst.msk [vmem:[#allocation2 + $0x28] sm:$0xff] %vm22_vm0, %v665_v32 }
   0x7   :  { %547 = vmatpush3.bf16.msra.mxu0 %v628_v3  ;;  %617 = vmatpush3.bf16.msra.mxu1 %v628_v3  ;;  %v641_v18 = vld [vmem:[%s926_s0] ss:$8 sps:$4 sm:$0xff]   ;;  %v647_v20 = vld [vmem:[%s926_s0 + $0x14] ss:$8 sps:$4 sm:$0xff]   ;;  %v651_v22 = vld [vmem:[%s926_s0 + $0x10] ss:$8 sps:$4 sm:$0xff]  }
   0x8   :  { %548 = vmatprep.subr.bf16.mxu0 %v629_v4  ;;  %610 = vmatprep.subr.bf16.mxu1 %v629_v4  ;;  %v644_v19 = vld [vmem:[%s926_s0 + $0x40] ss:$8 sps:$4 sm:$0xff]   ;;  %v649_v21 = vld [vmem:[%s926_s0 + $0x54] ss:$8 sps:$4 sm:$0xff]   ;;  %v652_v23 = vld [vmem:[%s926_s0 + $0x50] ss:$8 sps:$4 sm:$0xff]  }
   0x9   :  { %343 = vmatprep.mubr.bf16.mxu1 %v646_v12  ;;  %v653_v24 = vld [vmem:[%s926_s0 + $0x24] ss:$8 sps:$4 sm:$0xff]   ;;  %v657_v26 = vld [vmem:[%s926_s0 + $0x20] ss:$8 sps:$4 sm:$0xff]   ;;  %v659_v28 = vld [vmem:[%s926_s0 + $0x34] ss:$8 sps:$4 sm:$0xff]  }
   0xa   :  { %v655_v25 = vld [vmem:[%s926_s0 + $0x64] ss:$8 sps:$4 sm:$0xff]   ;;  %v658_v27 = vld [vmem:[%s926_s0 + $0x60] ss:$8 sps:$4 sm:$0xff]   ;;  %v661_v29 = vld [vmem:[%s926_s0 + $0x74] ss:$8 sps:$4 sm:$0xff]  }
   0xb   :  { %549 = vmatpush3.bf16.msra.mxu0 %v630_v5  ;;  %618 = vmatpush3.bf16.msra.mxu1 %v630_v5  ;;  %v663_v30 = vld [vmem:[%s926_s0 + $0x30] ss:$8 sps:$4 sm:$0xff]   ;;  %29 = vst.msk [vmem:[#allocation2 + $0x30] sm:$0xff] %vm22_vm0, %v665_v32  ;;  %30 = vst.msk [vmem:[#allocation2 + $0x38] sm:$0xff] %vm22_vm0, %v665_v32  ;;  %v39_v35 = vld [vmem:[#allocation2] sm:$0xff] }
   0xc   :  { %550 = vmatprep.subr.bf16.mxu0 %v631_v6  ;;  %611 = vmatprep.subr.bf16.mxu1 %v631_v6  ;;  %v664_v31 = vld [vmem:[%s926_s0 + $0x70] ss:$8 sps:$4 sm:$0xff]   ;;  %31 = vst.msk [vmem:[#allocation2 + $0x40] sm:$0xff] %vm22_vm0, %v665_v32  ;;  %32 = vst.msk [vmem:[#allocation2 + $0x48] sm:$0xff] %vm22_vm0, %v665_v32  ;;  %v40_v43 = vld [vmem:[#allocation2 + $0x8] sm:$0xff] }
   0xd   :  { %33 = vst.msk [vmem:[#allocation2 + $0x50] sm:$0xff] %vm22_vm0, %v665_v32  ;;  %34 = vst.msk [vmem:[#allocation2 + $0x58] sm:$0xff] %vm22_vm0, %v665_v32  ;;  %v41_v55 = vld [vmem:[#allocation2 + $0x10] sm:$0xff]  ;;  %v810_v63 = vld [vmem:[%s927_s2] ss:$0 sm:$0xff] }
   0xe   :  { %35 = vst.msk [vmem:[#allocation2 + $0x60] sm:$0xff] %vm22_vm0, %v665_v32  ;;  %36 = vst.msk [vmem:[#allocation2 + $0x68] sm:$0xff] %vm22_vm0, %v665_v32  ;;  %v42_v0 = vld [vmem:[#allocation2 + $0x18] sm:$0xff] }
   0xf   :  { %551 = vmatpush3.bf16.msra.mxu0 %v632_v7  ;;  %619 = vmatpush3.bf16.msra.mxu1 %v632_v7  ;;  %37 = vst.msk [vmem:[#allocation2 + $0x70] sm:$0xff] %vm22_vm0, %v665_v32  ;;  %38 = vst.msk [vmem:[#allocation2 + $0x78] sm:$0xff] %vm22_vm0, %v665_v32 }
  0x10   :  { %552 = vmatprep.subr.bf16.mxu0 %v633_v8  ;;  %612 = vmatprep.subr.bf16.mxu1 %v633_v8 }
  0x13   :  { %553 = vmatpush3.bf16.msra.mxu0 %v634_v9  ;;  %620 = vmatpush3.bf16.msra.mxu1 %v634_v9  ;;  %v47_v37 = vld [vmem:[#allocation2 + $0x40] sm:$0xff]  ;;  %v48_v45 = vld [vmem:[#allocation2 + $0x48] sm:$0xff] }
  0x14   :  { %554 = vmatprep.subr.bf16.mxu0 %v635_v10  ;;  %613 = vmatprep.subr.bf16.mxu1 %v635_v10  ;;  %v49_v57 = vld [vmem:[#allocation2 + $0x50] sm:$0xff]  ;;  %v50_v2 = vld [vmem:[#allocation2 + $0x58] sm:$0xff]  ;;  %v815_v9 = vld [vmem:[%s928_s3] ss:$0 sm:$0xff] }
  0x17   :  { %555 = vmatpush3.bf16.msra.mxu0 %v636_v13  ;;  %621 = vmatpush3.bf16.msra.mxu1 %v636_v13 }
  0x18   :  { %556 = vmatprep.subr.bf16.mxu0 %v637_v14  ;;  %614 = vmatprep.subr.bf16.mxu1 %v637_v14 }
  0x1b   :  { %557 = vmatpush3.bf16.msra.mxu0 %v638_v15  ;;  %622 = vmatpush3.bf16.msra.mxu1 %v638_v15 }
  0x1c   :  { %558 = vmatprep.subr.bf16.mxu0 %v639_v16  ;;  %615 = vmatprep.subr.bf16.mxu1 %v639_v16 }
  0x1f   :  { %559 = vmatpush3.bf16.msra.mxu0 %v640_v17  ;;  %623 = vmatpush3.bf16.msra.mxu1 %v640_v17 }
  0x22   :  { %312 = vmatmul.mubr.bf16.vlgmr.msra.gmra.mrb[0].mxu0 %v641_v18  ;;  %344 = vmatmul.mubr.bf16.vlgmr.msra.gmra.mrb[0].mxu1 %v644_v19 }
  0x23   :  { %319 = vmatprep.mubr.bf16.mxu0 %v647_v20  ;;  %351 = vmatprep.mubr.bf16.mxu1 %v649_v21 }
  0x2a   :  { %320 = vmatmul.mubr.bf16.gmra.mrb[4].mxu0 %v651_v22  ;;  %352 = vmatmul.mubr.bf16.gmra.mrb[4].mxu1 %v652_v23 }
  0x2b   :  { %327 = vmatprep.mubr.bf16.mxu0 %v653_v24  ;;  %359 = vmatprep.mubr.bf16.mxu1 %v655_v25 }
  0x32   :  { %328 = vmatmul.mubr.bf16.gmra.mrb[8].mxu0 %v657_v26  ;;  %360 = vmatmul.mubr.bf16.gmra.mrb[8].mxu1 %v658_v27 }
  0x33   :  { %335 = vmatprep.mubr.bf16.mxu0 %v659_v28  ;;  %367 = vmatprep.mubr.bf16.mxu1 %v661_v29  ;;  %v43_v29 = vld [vmem:[#allocation2 + $0x20] sm:$0xff] }
  0x3a   :  { %336 = vmatmul.mubr.bf16.gmra.mrb[12].mxu0 %v663_v30  ;;  %368 = vmatmul.mubr.bf16.gmra.mrb[12].mxu1 %v664_v31  ;;  %v51_v30 = vld [vmem:[#allocation2 + $0x60] sm:$0xff] }
  0xf5   :  { %v560_v33 = vpop.f32.mrb[0].mxu0  ;;  %v584_v34 = vpop.f32.mrb[0].mxu1 }
  0xf6   :  { %v561_v36 = vpop.f32.mrb[1].mxu0  ;;  %v585_v38 = vpop.f32.mrb[1].mxu1 }
  0xf7   :  { %v562_v39 = vadd.f32 %v561_v36, %v560_v33  ;;  %v586_v40 = vadd.f32 %v585_v38, %v584_v34  ;;  %v563_v41 = vpop.f32.mrb[2].mxu0  ;;  %v587_v42 = vpop.f32.mrb[2].mxu1 }
  0xf8   :  { %v564_v44 = vpop.f32.mrb[3].mxu0  ;;  %v588_v46 = vpop.f32.mrb[3].mxu1 }
  0xf9   :  { %v376_v47 = vadd.f32 %v562_v39, %v39_v35  ;;  %v384_v48 = vadd.f32 %v586_v40, %v47_v37  ;;  %v565_v49 = vadd.f32 %v564_v44, %v563_v41  ;;  %v589_v50 = vadd.f32 %v588_v46, %v587_v42  ;;  %v44_v35 = vld [vmem:[#allocation2 + $0x28] sm:$0xff] }
  0xfa   :  { %v52_v37 = vld [vmem:[#allocation2 + $0x68] sm:$0xff] }
  0xfb   :  { %393 = vst.msk [vmem:[#allocation2] sm:$0xff] %vm22_vm0, %v376_v47  ;;  %401 = vst.msk [vmem:[#allocation2 + $0x40] sm:$0xff] %vm22_vm0, %v384_v48  ;;  %v377_v51 = vadd.f32 %v565_v49, %v40_v43  ;;  %v385_v52 = vadd.f32 %v589_v50, %v48_v45 }
  0xfd   :  { %394 = vst.msk [vmem:[#allocation2 + $0x8] sm:$0xff] %vm22_vm0, %v377_v51  ;;  %402 = vst.msk [vmem:[#allocation2 + $0x48] sm:$0xff] %vm22_vm0, %v385_v52  ;;  %v566_v53 = vpop.f32.mrb[4].mxu0  ;;  %v590_v54 = vpop.f32.mrb[4].mxu1 }
  0xfe   :  { %v567_v56 = vpop.f32.mrb[5].mxu0  ;;  %v591_v58 = vpop.f32.mrb[5].mxu1 }
  0xff   :  { %v568_v59 = vadd.f32 %v567_v56, %v566_v53  ;;  %v592_v60 = vadd.f32 %v591_v58, %v590_v54  ;;  %v569_v61 = vpop.f32.mrb[6].mxu0  ;;  %v593_v62 = vpop.f32.mrb[6].mxu1 }
 0x100   :  { %v570_v1 = vpop.f32.mrb[7].mxu0  ;;  %v594_v3 = vpop.f32.mrb[7].mxu1 }
 0x101   :  { %v378_v4 = vadd.f32 %v568_v59, %v41_v55  ;;  %v386_v5 = vadd.f32 %v592_v60, %v49_v57  ;;  %v571_v6 = vadd.f32 %v570_v1, %v569_v61  ;;  %v595_v7 = vadd.f32 %v594_v3, %v593_v62  ;;  %v53_v3 = vld [vmem:[#allocation2 + $0x70] sm:$0xff] }
 0x102   :  { %v412_v8 = vld [vmem:[#allocation2] sm:$0xff] }
 0x103   :  { %v420_v10 = vld [vmem:[#allocation2 + $0x40] sm:$0xff]  ;;  %v435_v11 = vmul.f32 %v810_v63, %v412_v8  ;;  %395 = vst.msk [vmem:[#allocation2 + $0x10] sm:$0xff] %vm22_vm0, %v378_v4  ;;  %403 = vst.msk [vmem:[#allocation2 + $0x50] sm:$0xff] %vm22_vm0, %v386_v5  ;;  %v379_v13 = vadd.f32 %v571_v6, %v42_v0  ;;  %v387_v14 = vadd.f32 %v595_v7, %v50_v2  ;;  %v45_v2 = vld [vmem:[#allocation2 + $0x30] sm:$0xff] }
 0x104   :  { %v443_v12 = vmul.f32 %v810_v63, %v420_v10  ;;  %v413_v15 = vld [vmem:[#allocation2 + $0x8] sm:$0xff]  ;;  %v46_v8 = vld [vmem:[#allocation2 + $0x38] sm:$0xff] }
 0x105   :  { %v421_v16 = vld [vmem:[#allocation2 + $0x48] sm:$0xff]  ;;  %v458_v17 = vadd.f32 %v815_v9, %v435_v11  ;;  %v436_v19 = vmul.f32 %v810_v63, %v413_v15  ;;  %396 = vst.msk [vmem:[#allocation2 + $0x18] sm:$0xff] %vm22_vm0, %v379_v13  ;;  %404 = vst.msk [vmem:[#allocation2 + $0x58] sm:$0xff] %vm22_vm0, %v387_v14  ;;  %v572_v21 = vpop.f32.mrb[8].mxu0  ;;  %v596_v22 = vpop.f32.mrb[8].mxu1  ;;  %v54_v11 = vld [vmem:[#allocation2 + $0x78] sm:$0xff] }
 0x106   :  { %v466_v18 = vadd.f32 %v815_v9, %v443_v12  ;;  %v444_v20 = vmul.f32 %v810_v63, %v421_v16  ;;  %v573_v23 = vpop.f32.mrb[9].mxu0  ;;  %v597_v24 = vpop.f32.mrb[9].mxu1 }
 0x107   :  { %v474_v25 = vmax.f32 %v458_v17, 0.0  ;;  %v459_v27 = vadd.f32 %v815_v9, %v436_v19  ;;  %v575_v31 = vpop.f32.mrb[10].mxu0  ;;  %v599_v32 = vpop.f32.mrb[10].mxu1  ;;  %v574_v33 = vadd.f32 %v573_v23, %v572_v21  ;;  %v598_v34 = vadd.f32 %v597_v24, %v596_v22 }
 0x108   :  { %v482_v26 = vmax.f32 %v466_v18, 0.0  ;;  %v467_v28 = vadd.f32 %v815_v9, %v444_v20  ;;  %v576_v36 = vpop.f32.mrb[11].mxu0  ;;  %v600_v38 = vpop.f32.mrb[11].mxu1 }
 0x109   :  { %490 = vst.msk [vmem:[%s929_s4] sm:$0xff] %vm22_vm0, %v474_v25  ;;  %v475_v39 = vmax.f32 %v459_v27, 0.0  ;;  %v577_v41 = vadd.f32 %v576_v36, %v575_v31  ;;  %v601_v42 = vadd.f32 %v600_v38, %v599_v32  ;;  %v380_v45 = vadd.f32 %v574_v33, %v43_v29 }
 0x10a   :  { %498 = vst.msk [vmem:[%s929_s4 + $0x40] sm:$0xff] %vm22_vm0, %v482_v26  ;;  %v483_v40 = vmax.f32 %v467_v28, 0.0  ;;  %v414_v43 = vld [vmem:[#allocation2 + $0x10] sm:$0xff]  ;;  %v388_v46 = vadd.f32 %v598_v34, %v51_v30 }
 0x10b   :  { %v422_v44 = vld [vmem:[#allocation2 + $0x50] sm:$0xff]  ;;  %491 = vst.msk [vmem:[%s929_s4 + $0x8] sm:$0xff] %vm22_vm0, %v475_v39  ;;  %v437_v47 = vmul.f32 %v810_v63, %v414_v43  ;;  %v381_v49 = vadd.f32 %v577_v41, %v44_v35  ;;  %v389_v50 = vadd.f32 %v601_v42, %v52_v37  ;;  %397 = vst.msk [vmem:[#allocation2 + $0x20] sm:$0xff] %vm22_vm0, %v380_v45 }
 0x10c   :  { %499 = vst.msk [vmem:[%s929_s4 + $0x48] sm:$0xff] %vm22_vm0, %v483_v40  ;;  %v445_v48 = vmul.f32 %v810_v63, %v422_v44  ;;  %v415_v51 = vld [vmem:[#allocation2 + $0x18] sm:$0xff]  ;;  %405 = vst.msk [vmem:[#allocation2 + $0x60] sm:$0xff] %vm22_vm0, %v388_v46 }
 0x10d   :  { %v423_v52 = vld [vmem:[#allocation2 + $0x58] sm:$0xff]  ;;  %v460_v53 = vadd.f32 %v815_v9, %v437_v47  ;;  %v438_v55 = vmul.f32 %v810_v63, %v415_v51  ;;  %398 = vst.msk [vmem:[#allocation2 + $0x28] sm:$0xff] %vm22_vm0, %v381_v49  ;;  %406 = vst.msk [vmem:[#allocation2 + $0x68] sm:$0xff] %vm22_vm0, %v389_v50  ;;  %v578_v57 = vpop.f32.mrb[12].mxu0  ;;  %v602_v58 = vpop.f32.mrb[12].mxu1 }
 0x10e   :  { %v468_v54 = vadd.f32 %v815_v9, %v445_v48  ;;  %v446_v56 = vmul.f32 %v810_v63, %v423_v52  ;;  %v579_v59 = vpop.f32.mrb[13].mxu0  ;;  %v603_v60 = vpop.f32.mrb[13].mxu1 }
 0x10f   :  { %v476_v61 = vmax.f32 %v460_v53, 0.0  ;;  %v461_v0 = vadd.f32 %v815_v9, %v438_v55  ;;  %v581_v4 = vpop.f32.mrb[14].mxu0  ;;  %v605_v5 = vpop.f32.mrb[14].mxu1  ;;  %v580_v6 = vadd.f32 %v579_v59, %v578_v57  ;;  %v604_v7 = vadd.f32 %v603_v60, %v602_v58 }
 0x110   :  { %v484_v62 = vmax.f32 %v468_v54, 0.0  ;;  %v469_v1 = vadd.f32 %v815_v9, %v446_v56  ;;  %v582_v10 = vpop.f32.mrb[15].mxu0  ;;  %v606_v12 = vpop.f32.mrb[15].mxu1 }
 0x111   :  { %492 = vst.msk [vmem:[%s929_s4 + $0x10] sm:$0xff] %vm22_vm0, %v476_v61  ;;  %v477_v13 = vmax.f32 %v461_v0, 0.0  ;;  %v583_v15 = vadd.f32 %v582_v10, %v581_v4  ;;  %v607_v16 = vadd.f32 %v606_v12, %v605_v5  ;;  %v382_v17 = vadd.f32 %v580_v6, %v45_v2 }
 0x112   :  { %500 = vst.msk [vmem:[%s929_s4 + $0x50] sm:$0xff] %vm22_vm0, %v484_v62  ;;  %v485_v14 = vmax.f32 %v469_v1, 0.0  ;;  %v390_v18 = vadd.f32 %v604_v7, %v53_v3  ;;  %v416_v19 = vld [vmem:[#allocation2 + $0x20] sm:$0xff] }
 0x113   :  { %493 = vst.msk [vmem:[%s929_s4 + $0x18] sm:$0xff] %vm22_vm0, %v477_v13  ;;  %v424_v20 = vld [vmem:[#allocation2 + $0x60] sm:$0xff]  ;;  %v383_v21 = vadd.f32 %v583_v15, %v46_v8  ;;  %v391_v22 = vadd.f32 %v607_v16, %v54_v11  ;;  %v439_v23 = vmul.f32 %v810_v63, %v416_v19  ;;  %399 = vst.msk [vmem:[#allocation2 + $0x30] sm:$0xff] %vm22_vm0, %v382_v17 }
 0x114   :  { %501 = vst.msk [vmem:[%s929_s4 + $0x58] sm:$0xff] %vm22_vm0, %v485_v14  ;;  %v447_v24 = vmul.f32 %v810_v63, %v424_v20  ;;  %v417_v25 = vld [vmem:[#allocation2 + $0x28] sm:$0xff]  ;;  %407 = vst.msk [vmem:[#allocation2 + $0x70] sm:$0xff] %vm22_vm0, %v390_v18 }
 0x115   :  { %v425_v26 = vld [vmem:[#allocation2 + $0x68] sm:$0xff]  ;;  %v440_v27 = vmul.f32 %v810_v63, %v417_v25  ;;  %400 = vst.msk [vmem:[#allocation2 + $0x38] sm:$0xff] %vm22_vm0, %v383_v21  ;;  %408 = vst.msk [vmem:[#allocation2 + $0x78] sm:$0xff] %vm22_vm0, %v391_v22  ;;  %v462_v29 = vadd.f32 %v815_v9, %v439_v23 }
 0x116   :  { %v448_v28 = vmul.f32 %v810_v63, %v425_v26  ;;  %v470_v30 = vadd.f32 %v815_v9, %v447_v24 }
 0x117   :  { %v463_v31 = vadd.f32 %v815_v9, %v440_v27  ;;  %v478_v33 = vmax.f32 %v462_v29, 0.0 }
 0x118   :  { %v471_v32 = vadd.f32 %v815_v9, %v448_v28  ;;  %v486_v34 = vmax.f32 %v470_v30, 0.0 }
 0x119   :  { %v479_v35 = vmax.f32 %v463_v31, 0.0  ;;  %494 = vst.msk [vmem:[%s929_s4 + $0x20] sm:$0xff] %vm22_vm0, %v478_v33 }
 0x11a   :  { %v487_v36 = vmax.f32 %v471_v32, 0.0  ;;  %502 = vst.msk [vmem:[%s929_s4 + $0x60] sm:$0xff] %vm22_vm0, %v486_v34  ;;  %v418_v37 = vld [vmem:[#allocation2 + $0x30] sm:$0xff] }
 0x11b   :  { %495 = vst.msk [vmem:[%s929_s4 + $0x28] sm:$0xff] %vm22_vm0, %v479_v35  ;;  %v426_v38 = vld [vmem:[#allocation2 + $0x70] sm:$0xff]  ;;  %v441_v39 = vmul.f32 %v810_v63, %v418_v37 }
 0x11c   :  { %503 = vst.msk [vmem:[%s929_s4 + $0x68] sm:$0xff] %vm22_vm0, %v487_v36  ;;  %v449_v40 = vmul.f32 %v810_v63, %v426_v38  ;;  %v419_v41 = vld [vmem:[#allocation2 + $0x38] sm:$0xff] }
 0x11d   :  { %v427_v42 = vld [vmem:[#allocation2 + $0x78] sm:$0xff]  ;;  %v442_v43 = vmul.f32 %v810_v63, %v419_v41  ;;  %v464_v45 = vadd.f32 %v815_v9, %v441_v39 }
 0x11e   :  { %v450_v44 = vmul.f32 %v810_v63, %v427_v42  ;;  %v472_v46 = vadd.f32 %v815_v9, %v449_v40 }
 0x11f   :  { %v465_v47 = vadd.f32 %v815_v9, %v442_v43  ;;  %v480_v49 = vmax.f32 %v464_v45, 0.0 }
 0x120   :  { %v473_v48 = vadd.f32 %v815_v9, %v450_v44  ;;  %v488_v50 = vmax.f32 %v472_v46, 0.0 }
 0x121   :  { %v481_v51 = vmax.f32 %v465_v47, 0.0  ;;  %496 = vst.msk [vmem:[%s929_s4 + $0x30] sm:$0xff] %vm22_vm0, %v480_v49 }
 0x122   :  { %v489_v52 = vmax.f32 %v473_v48, 0.0  ;;  %504 = vst.msk [vmem:[%s929_s4 + $0x70] sm:$0xff] %vm22_vm0, %v488_v50 }
 0x123   :  { %497 = vst.msk [vmem:[%s929_s4 + $0x38] sm:$0xff] %vm22_vm0, %v481_v51 }
 0x124   :  { %505 = vst.msk [vmem:[%s929_s4 + $0x78] sm:$0xff] %vm22_vm0, %v489_v52 }

// kernel: encoder_m_forward.47
= control target key start
LH: loop header
LB: loop body
LE: loop exit
PB: predicated region body
PF: predicated region fallthrough
CT: control target
= control target key end

     0   :  { %vm44_vm0 = vcmask 523264   ;;  %s291_s0 = inlined_call_operand.vmem [shape: f32[9,32,64], index: 0, kind: input, shape index: {}]   ;;  %s292_s1 = inlined_call_operand.vmem [shape: f32[32,64], index: 1, kind: output, shape index: {}]  }
   0x1   :  { %v8_v0 = vld [vmem:[%s291_s0] sm:$0xff]  ;;  %v9_v11 = vld [vmem:[%s291_s0 + $0x8] sm:$0xff]  ;;  %v10_v27 = vld [vmem:[%s291_s0 + $0x10] sm:$0xff] }
   0x2   :  { %v12_v1 = vld [vmem:[%s291_s0 + $0x20] sm:$0xff]  ;;  %v45_v4 = vsel %vm44_vm0, %v8_v0, -inf  ;;  %v13_v12 = vld [vmem:[%s291_s0 + $0x28] sm:$0xff]  ;;  %v62_v16 = vsel %vm44_vm0, %v9_v11, -inf  ;;  %v14_v28 = vld [vmem:[%s291_s0 + $0x30] sm:$0xff]  ;;  %v79_v33 = vsel %vm44_vm0, %v10_v27, -inf }
   0x3   :  { %v16_v2 = vld [vmem:[%s291_s0 + $0x40] sm:$0xff]  ;;  %v46_v5 = vsel %vm44_vm0, %v12_v1, -inf  ;;  %v17_v13 = vld [vmem:[%s291_s0 + $0x48] sm:$0xff]  ;;  %v63_v17 = vsel %vm44_vm0, %v13_v12, -inf  ;;  %v18_v29 = vld [vmem:[%s291_s0 + $0x50] sm:$0xff]  ;;  %v80_v34 = vsel %vm44_vm0, %v14_v28, -inf }
   0x4   :  { %v20_v3 = vld [vmem:[%s291_s0 + $0x60] sm:$0xff]  ;;  %v48_v6 = vsel %vm44_vm0, %v16_v2, -inf  ;;  %v47_v9 = vmax.f32 %v45_v4, %v46_v5  ;;  %v21_v15 = vld [vmem:[%s291_s0 + $0x68] sm:$0xff]  ;;  %v65_v18 = vsel %vm44_vm0, %v17_v13, -inf  ;;  %v64_v23 = vmax.f32 %v62_v16, %v63_v17  ;;  %v22_v32 = vld [vmem:[%s291_s0 + $0x70] sm:$0xff] }
   0x5   :  { %v24_v7 = vld [vmem:[%s291_s0 + $0x80] sm:$0xff]  ;;  %v50_v10 = vsel %vm44_vm0, %v20_v3, -inf  ;;  %v25_v22 = vld [vmem:[%s291_s0 + $0x88] sm:$0xff]  ;;  %v67_v26 = vsel %vm44_vm0, %v21_v15, -inf  ;;  %v82_v35 = vsel %vm44_vm0, %v18_v29, -inf  ;;  %v26_v39 = vld [vmem:[%s291_s0 + $0x90] sm:$0xff]  ;;  %v81_v40 = vmax.f32 %v79_v33, %v80_v34 }
   0x6   :  { %v28_v8 = vld [vmem:[%s291_s0 + $0xa0] sm:$0xff]  ;;  %v49_v14 = vmax.f32 %v47_v9, %v48_v6  ;;  %v52_v21 = vsel %vm44_vm0, %v24_v7, -inf  ;;  %v29_v30 = vld [vmem:[%s291_s0 + $0xa8] sm:$0xff]  ;;  %v66_v31 = vmax.f32 %v64_v23, %v65_v18  ;;  %v69_v38 = vsel %vm44_vm0, %v25_v22, -inf  ;;  %v11_v45 = vld [vmem:[%s291_s0 + $0x18] sm:$0xff] }
   0x7   :  { %v32_v19 = vld [vmem:[%s291_s0 + $0xc0] sm:$0xff]  ;;  %v54_v25 = vsel %vm44_vm0, %v28_v8, -inf  ;;  %v33_v37 = vld [vmem:[%s291_s0 + $0xc8] sm:$0xff]  ;;  %v84_v44 = vsel %vm44_vm0, %v22_v32, -inf  ;;  %v15_v46 = vld [vmem:[%s291_s0 + $0x38] sm:$0xff]  ;;  %v71_v50 = vsel %vm44_vm0, %v29_v30, -inf  ;;  %v83_v52 = vmax.f32 %v81_v40, %v82_v35 }
   0x8   :  { %v36_v20 = vld [vmem:[%s291_s0 + $0xe0] sm:$0xff]  ;;  %v51_v24 = vmax.f32 %v49_v14, %v50_v10  ;;  %v56_v41 = vsel %vm44_vm0, %v32_v19, -inf  ;;  %v68_v43 = vmax.f32 %v66_v31, %v67_v26  ;;  %v19_v47 = vld [vmem:[%s291_s0 + $0x58] sm:$0xff]  ;;  %v30_v51 = vld [vmem:[%s291_s0 + $0xb0] sm:$0xff]  ;;  %v96_v54 = vsel %vm44_vm0, %v11_v45, -inf }
   0x9   :  { %v58_v42 = vsel %vm44_vm0, %v36_v20, -inf  ;;  %v40_v48 = vld [vmem:[%s291_s0 + $0x100] sm:$0xff]  ;;  %v23_v53 = vld [vmem:[%s291_s0 + $0x78] sm:$0xff]  ;;  %v37_v55 = vld [vmem:[%s291_s0 + $0xe8] sm:$0xff]  ;;  %v86_v57 = vsel %vm44_vm0, %v26_v39, -inf  ;;  %v97_v58 = vsel %vm44_vm0, %v15_v46, -inf  ;;  %v85_v63 = vmax.f32 %v83_v52, %v84_v44 }
   0xa   :  { %v53_v36 = vmax.f32 %v51_v24, %v52_v21  ;;  %v70_v56 = vmax.f32 %v68_v43, %v69_v38  ;;  %v99_v59 = vsel %vm44_vm0, %v19_v47, -inf  ;;  %v73_v61 = vsel %vm44_vm0, %v33_v37, -inf  ;;  %v34_v62 = vld [vmem:[%s291_s0 + $0xd0] sm:$0xff]  ;;  %v27_v0 = vld [vmem:[%s291_s0 + $0x98] sm:$0xff]  ;;  %v41_v3 = vld [vmem:[%s291_s0 + $0x108] sm:$0xff] }
   0xb   :  { %v98_v1 = vmax.f32 %v96_v54, %v97_v58  ;;  %v60_v2 = vsel %vm44_vm0, %v40_v48, -inf  ;;  %v88_v5 = vsel %vm44_vm0, %v30_v51, -inf  ;;  %v101_v6 = vsel %vm44_vm0, %v23_v53, -inf  ;;  %v38_v9 = vld [vmem:[%s291_s0 + $0xf0] sm:$0xff]  ;;  %v31_v11 = vld [vmem:[%s291_s0 + $0xb8] sm:$0xff] }
   0xc   :  { %v55_v49 = vmax.f32 %v53_v36, %v54_v25  ;;  %v72_v4 = vmax.f32 %v70_v56, %v71_v50  ;;  %v75_v8 = vsel %vm44_vm0, %v37_v55, -inf  ;;  %v87_v10 = vmax.f32 %v85_v63, %v86_v57  ;;  %v42_v18 = vld [vmem:[%s291_s0 + $0x110] sm:$0xff]  ;;  %v35_v20 = vld [vmem:[%s291_s0 + $0xd8] sm:$0xff] }
   0xd   :  { %v100_v12 = vmax.f32 %v98_v1, %v99_v59  ;;  %v90_v14 = vsel %vm44_vm0, %v34_v62, -inf  ;;  %v103_v15 = vsel %vm44_vm0, %v27_v0, -inf  ;;  %v77_v17 = vsel %vm44_vm0, %v41_v3, -inf  ;;  %v39_v26 = vld [vmem:[%s291_s0 + $0xf8] sm:$0xff] }
   0xe   :  { %v57_v60 = vmax.f32 %v55_v49, %v56_v41  ;;  %v74_v13 = vmax.f32 %v72_v4, %v73_v61  ;;  %v89_v19 = vmax.f32 %v87_v10, %v88_v5  ;;  %v92_v23 = vsel %vm44_vm0, %v38_v9, -inf  ;;  %v43_v32 = vld [vmem:[%s291_s0 + $0x118] sm:$0xff] }
   0xf   :  { %v102_v21 = vmax.f32 %v100_v12, %v101_v6  ;;  %v105_v24 = vsel %vm44_vm0, %v31_v11, -inf  ;;  %v94_v29 = vsel %vm44_vm0, %v42_v18, -inf  ;;  %v107_v30 = vsel %vm44_vm0, %v35_v20, -inf }
  0x10   :  { %v59_v7 = vmax.f32 %v57_v60, %v58_v42  ;;  %v76_v22 = vmax.f32 %v74_v13, %v75_v8  ;;  %v91_v25 = vmax.f32 %v89_v19, %v90_v14  ;;  %v109_v34 = vsel %vm44_vm0, %v39_v26, -inf }
  0x11   :  { %v104_v27 = vmax.f32 %v102_v21, %v103_v15  ;;  %v111_v37 = vsel %vm44_vm0, %v43_v32, -inf }
  0x12   :  { %v61_v16 = vmax.f32 %v59_v7, %v60_v2  ;;  %v78_v28 = vmax.f32 %v76_v22, %v77_v17  ;;  %v93_v31 = vmax.f32 %v91_v25, %v92_v23 }
  0x13   :  { %v106_v33 = vmax.f32 %v104_v27, %v105_v24 }
  0x14   :  { %113 = vst.msk [vmem:[%s292_s1] sm:$0xff] %vm44_vm0, %v61_v16  ;;  %114 = vst.msk [vmem:[%s292_s1 + $0x8] sm:$0xff] %vm44_vm0, %v78_v28  ;;  %v95_v35 = vmax.f32 %v93_v31, %v94_v29 }
  0x15   :  { %v108_v36 = vmax.f32 %v106_v33, %v107_v30 }
  0x16   :  { %115 = vst.msk [vmem:[%s292_s1 + $0x10] sm:$0xff] %vm44_vm0, %v95_v35 }
  0x17   :  { %v110_v38 = vmax.f32 %v108_v36, %v109_v34 }
  0x19   :  { %v112_v39 = vmax.f32 %v110_v38, %v111_v37 }
  0x1b   :  { %116 = vst.msk [vmem:[%s292_s1 + $0x18] sm:$0xff] %vm44_vm0, %v112_v39 }

// kernel: encoder_m_forward.48
= control target key start
LH: loop header
LB: loop body
LE: loop exit
PB: predicated region body
PF: predicated region fallthrough
CT: control target
= control target key end

     0   :  { %vm22_vm0 = vcmask 523264   ;;  %v263_v1 = vmov 0.0   ;;  %s349_s1 = inlined_call_operand.vmem [shape: bf16[128,64], index: 1, kind: input, shape index: {}]   ;;  %s350_s0 = inlined_call_operand.vmem [shape: bf16[32,128], index: 0, kind: input, shape index: {}]   ;;  %s351_s2 = inlined_call_operand.vmem [shape: f32[1,64], index: 2, kind: input, shape index: {}]   ;;  %s352_s3 = inlined_call_operand.vmem [shape: f32[1,64], index: 3, kind: input, shape index: {}]   ;;  %s353_s4 = inlined_call_operand.vmem [shape: f32[32,64], index: 4, kind: output, shape index: {}]  }
   0x1   :  { %v253_v0 = vld [vmem:[%s349_s1] sm:$0xff]   ;;  %25 = vst.msk [vmem:[#allocation2 + $0x10] sm:$0xff] %vm22_vm0, %v263_v1  ;;  %23 = vst.msk [vmem:[#allocation2] sm:$0xff] %vm22_vm0, %v263_v1  ;;  %v254_v2 = vld [vmem:[%s349_s1 + $0x8] sm:$0xff]  }
   0x2   :  { %24 = vst.msk [vmem:[#allocation2 + $0x8] sm:$0xff] %vm22_vm0, %v263_v1  ;;  %26 = vst.msk [vmem:[#allocation2 + $0x18] sm:$0xff] %vm22_vm0, %v263_v1  ;;  %232 = vmatprep.subr.bf16.mxu0 %v253_v0  ;;  %v255_v3 = vld [vmem:[%s349_s1 + $0x10] sm:$0xff]   ;;  %v256_v4 = vld [vmem:[%s349_s1 + $0x18] sm:$0xff]  }
   0x3   :  { %233 = vmatpush3.bf16.msra.mxu0 %v253_v0  ;;  %v261_v5 = vld [vmem:[%s350_s0] sm:$0xff]   ;;  %v258_v7 = vld [vmem:[%s349_s1 + $0x28] sm:$0xff]   ;;  %v259_v8 = vld [vmem:[%s349_s1 + $0x30] sm:$0xff]  }
   0x4   :  { %234 = vmatprep.subr.bf16.mxu0 %v254_v2  ;;  %248 = vmatprep.mubr.bf16.mxu0 %v261_v5  ;;  %v257_v6 = vld [vmem:[%s349_s1 + $0x20] sm:$0xff]   ;;  %v260_v9 = vld [vmem:[%s349_s1 + $0x38] sm:$0xff]   ;;  %v262_v10 = vld [vmem:[%s350_s0 + $0x8] sm:$0xff]  }
   0x5   :  { %v220_v23 = vld [vmem:[%s351_s2] ss:$0 sm:$0xff] }
   0x6   :  { %v221_v25 = vld [vmem:[%s352_s3] ss:$0 sm:$0xff] }
   0x7   :  { %235 = vmatpush3.bf16.msra.mxu0 %v254_v2 }
   0x8   :  { %236 = vmatprep.subr.bf16.mxu0 %v255_v3  ;;  %v29_v11 = vld [vmem:[#allocation2 + $0x10] sm:$0xff]  ;;  %v27_v12 = vld [vmem:[#allocation2] sm:$0xff] }
   0x9   :  { %v30_v14 = vld [vmem:[#allocation2 + $0x18] sm:$0xff]  ;;  %v28_v17 = vld [vmem:[#allocation2 + $0x8] sm:$0xff] }
   0xb   :  { %237 = vmatpush3.bf16.msra.mxu0 %v255_v3 }
   0xc   :  { %238 = vmatprep.subr.bf16.mxu0 %v256_v4 }
   0xf   :  { %239 = vmatpush3.bf16.msra.mxu0 %v256_v4 }
  0x10   :  { %240 = vmatprep.subr.bf16.mxu0 %v257_v6 }
  0x13   :  { %241 = vmatpush3.bf16.msra.mxu0 %v257_v6 }
  0x14   :  { %242 = vmatprep.subr.bf16.mxu0 %v258_v7 }
  0x17   :  { %243 = vmatpush3.bf16.msra.mxu0 %v258_v7 }
  0x18   :  { %244 = vmatprep.subr.bf16.mxu0 %v259_v8 }
  0x1b   :  { %245 = vmatpush3.bf16.msra.mxu0 %v259_v8 }
  0x1c   :  { %246 = vmatprep.subr.bf16.mxu0 %v260_v9 }
  0x1f   :  { %247 = vmatpush3.bf16.msra.mxu0 %v260_v9 }
  0x22   :  { %249 = vmatmul.mubr.bf16.vlgmr.msra.gmra.mrb[0].mxu0 %v262_v10 }
  0xf5   :  { %v250_v13 = vpop.f32.mrb[0].mxu0 }
  0xf6   :  { %v162_v15 = vadd.f32 %v250_v13, %v29_v11  ;;  %v145_v16 = vpop.f32.mrb[1].mxu0 }
  0xf7   :  { %v160_v18 = vadd.f32 %v145_v16, %v27_v12  ;;  %v251_v19 = vpop.f32.mrb[2].mxu0 }
  0xf8   :  { %167 = vst.msk [vmem:[#allocation2 + $0x10] sm:$0xff] %vm22_vm0, %v162_v15  ;;  %v163_v20 = vadd.f32 %v251_v19, %v30_v14  ;;  %v148_v21 = vpop.f32.mrb[3].mxu0 }
  0xf9   :  { %165 = vst.msk [vmem:[#allocation2] sm:$0xff] %vm22_vm0, %v160_v18  ;;  %v161_v22 = vadd.f32 %v148_v21, %v28_v17 }
  0xfa   :  { %168 = vst.msk [vmem:[#allocation2 + $0x18] sm:$0xff] %vm22_vm0, %v163_v20 }
  0xfb   :  { %166 = vst.msk [vmem:[#allocation2 + $0x8] sm:$0xff] %vm22_vm0, %v161_v22 }
  0xff   :  { %v174_v24 = vld [vmem:[#allocation2 + $0x10] sm:$0xff] }
 0x100   :  { %v185_v26 = vmul.f32 %v220_v23, %v174_v24  ;;  %v172_v27 = vld [vmem:[#allocation2] sm:$0xff] }
 0x101   :  { %v183_v28 = vmul.f32 %v220_v23, %v172_v27  ;;  %v175_v29 = vld [vmem:[#allocation2 + $0x18] sm:$0xff] }
 0x102   :  { %v196_v30 = vadd.f32 %v221_v25, %v185_v26  ;;  %v186_v31 = vmul.f32 %v220_v23, %v175_v29  ;;  %v173_v32 = vld [vmem:[#allocation2 + $0x8] sm:$0xff] }
 0x103   :  { %v194_v33 = vadd.f32 %v221_v25, %v183_v28  ;;  %v184_v34 = vmul.f32 %v220_v23, %v173_v32 }
 0x104   :  { %v200_v35 = vmax.f32 %v196_v30, 0.0  ;;  %v197_v36 = vadd.f32 %v221_v25, %v186_v31 }
 0x105   :  { %v198_v37 = vmax.f32 %v194_v33, 0.0  ;;  %v195_v38 = vadd.f32 %v221_v25, %v184_v34 }
 0x106   :  { %204 = vst.msk [vmem:[%s353_s4 + $0x10] sm:$0xff] %vm22_vm0, %v200_v35  ;;  %v201_v39 = vmax.f32 %v197_v36, 0.0 }
 0x107   :  { %202 = vst.msk [vmem:[%s353_s4] sm:$0xff] %vm22_vm0, %v198_v37  ;;  %v199_v40 = vmax.f32 %v195_v38, 0.0 }
 0x108   :  { %205 = vst.msk [vmem:[%s353_s4 + $0x18] sm:$0xff] %vm22_vm0, %v201_v39 }
 0x109   :  { %203 = vst.msk [vmem:[%s353_s4 + $0x8] sm:$0xff] %vm22_vm0, %v199_v40 }

// kernel: encoder_m_forward.50
= control target key start
LH: loop header
LB: loop body
LE: loop exit
PB: predicated region body
PF: predicated region fallthrough
CT: control target
= control target key end

     0   :  { %v343_v1 = vmov 0   ;;  %v232_v19 = vlaneseq  ;;  %s453_s1 = inlined_call_operand.vmem [shape: bf16[128,256], index: 1, kind: input, shape index: {}]   ;;  %s454_s0 = inlined_call_operand.vmem [shape: bf16[32,128], index: 0, kind: input, shape index: {}]   ;;  %s455_s2 = inlined_call_operand.vmem [shape: f32[1,256], index: 2, kind: input, shape index: {}]   ;;  %s456_s3 = inlined_call_operand.vmem [shape: f32[1,256], index: 3, kind: input, shape index: {}]   ;;  %s457_s4 = inlined_call_operand.vmem [shape: f32[32,256], index: 4, kind: output, shape index: {}]  }
   0x1   :  { %v317_v0 = vld [vmem:[%s453_s1 + $0x4] ss:$8 sps:$4 sm:$0xff]   ;;  %182 = vmatprep.mubr.bf16.mxu0 %v343_v1  ;;  %192 = vmatprep.mubr.bf16.mxu1 %v343_v1  ;;  %v319_v2 = vld [vmem:[%s453_s1] ss:$8 sps:$4 sm:$0xff]   ;;  %v320_v3 = vld [vmem:[%s453_s1 + $0x14] ss:$8 sps:$4 sm:$0xff]  }
   0x2   :  { %150 = vmatprep.subr.bf16.mxu0 %v317_v0  ;;  %300 = vmatprep.subr.bf16.mxu1 %v317_v0  ;;  %v322_v4 = vld [vmem:[%s453_s1 + $0x10] ss:$8 sps:$4 sm:$0xff]   ;;  %v323_v5 = vld [vmem:[%s453_s1 + $0x24] ss:$8 sps:$4 sm:$0xff]   ;;  %v325_v6 = vld [vmem:[%s453_s1 + $0x20] ss:$8 sps:$4 sm:$0xff]  }
   0x3   :  { %151 = vmatpush1.bf16.msra.mxu0 %v319_v2  ;;  %308 = vmatpush1.bf16.msra.mxu1 %v319_v2  ;;  %v326_v7 = vld [vmem:[%s453_s1 + $0x34] ss:$8 sps:$4 sm:$0xff]   ;;  %v328_v8 = vld [vmem:[%s453_s1 + $0x30] ss:$8 sps:$4 sm:$0xff]   ;;  %v329_v9 = vld [vmem:[%s453_s1 + $0x44] ss:$8 sps:$4 sm:$0xff]  }
   0x4   :  { %152 = vmatprep.subr.bf16.mxu0 %v320_v3  ;;  %301 = vmatprep.subr.bf16.mxu1 %v320_v3  ;;  %v331_v10 = vld [vmem:[%s453_s1 + $0x40] ss:$8 sps:$4 sm:$0xff]   ;;  %v332_v11 = vld [vmem:[%s453_s1 + $0x54] ss:$8 sps:$4 sm:$0xff]   ;;  %v334_v12 = vld [vmem:[%s453_s1 + $0x50] ss:$8 sps:$4 sm:$0xff]  }
   0x5   :  { %v335_v13 = vld [vmem:[%s453_s1 + $0x64] ss:$8 sps:$4 sm:$0xff]   ;;  %v337_v14 = vld [vmem:[%s453_s1 + $0x60] ss:$8 sps:$4 sm:$0xff]   ;;  %v338_v15 = vld [vmem:[%s453_s1 + $0x74] ss:$8 sps:$4 sm:$0xff]  }
   0x6   :  { %v340_v16 = vld [vmem:[%s453_s1 + $0x70] ss:$8 sps:$4 sm:$0xff]   ;;  %v341_v17 = vld [vmem:[%s454_s0] sm:$0xff]   ;;  %v342_v18 = vld [vmem:[%s454_s0 + $0x8] sm:$0xff]   ;;  %v233_v20 = vshrl.u32 %v232_v19, 7 }
   0x7   :  { %153 = vmatpush1.bf16.msra.mxu0 %v322_v4  ;;  %309 = vmatpush1.bf16.msra.mxu1 %v322_v4  ;;  %v230_v22 = vld [vmem:[%s455_s2] sm:$0x3] }
   0x8   :  { %154 = vmatprep.subr.bf16.mxu0 %v323_v5  ;;  %302 = vmatprep.subr.bf16.mxu1 %v323_v5  ;;  %v234_v21 = vsub.s32 0, %v233_v20  ;;  %v238_v23 = vsub.s32 1, %v233_v20  ;;  %v250_v24 = vld [vmem:[%s456_s3] sm:$0x3] }
   0xa   :  { %v235_v25 = vrot.slane %v230_v22, %v234_v21  ;;  %v239_v26 = vrot.slane %v230_v22, %v238_v23  ;;  %v255_v27 = vrot.slane %v250_v24, %v234_v21  ;;  %v259_v30 = vrot.slane %v250_v24, %v238_v23 }
   0xb   :  { %155 = vmatpush1.bf16.msra.mxu0 %v325_v6  ;;  %310 = vmatpush1.bf16.msra.mxu1 %v325_v6 }
   0xc   :  { %156 = vmatprep.subr.bf16.mxu0 %v326_v7  ;;  %303 = vmatprep.subr.bf16.mxu1 %v326_v7 }
   0xf   :  { %157 = vmatpush1.bf16.msra.mxu0 %v328_v8  ;;  %311 = vmatpush1.bf16.msra.mxu1 %v328_v8 }
  0x10   :  { %158 = vmatprep.subr.bf16.mxu0 %v329_v9  ;;  %304 = vmatprep.subr.bf16.mxu1 %v329_v9 }
  0x13   :  { %159 = vmatpush1.bf16.msra.mxu0 %v331_v10  ;;  %312 = vmatpush1.bf16.msra.mxu1 %v331_v10 }
  0x14   :  { %160 = vmatprep.subr.bf16.mxu0 %v332_v11  ;;  %305 = vmatprep.subr.bf16.mxu1 %v332_v11 }
  0x17   :  { %161 = vmatpush1.bf16.msra.mxu0 %v334_v12  ;;  %313 = vmatpush1.bf16.msra.mxu1 %v334_v12 }
  0x18   :  { %162 = vmatprep.subr.bf16.mxu0 %v335_v13  ;;  %306 = vmatprep.subr.bf16.mxu1 %v335_v13 }
  0x1b   :  { %163 = vmatpush1.bf16.msra.mxu0 %v337_v14  ;;  %314 = vmatpush1.bf16.msra.mxu1 %v337_v14 }
  0x1c   :  { %164 = vmatprep.subr.bf16.mxu0 %v338_v15  ;;  %307 = vmatprep.subr.bf16.mxu1 %v338_v15 }
  0x1f   :  { %165 = vmatpush1.bf16.msra.mxu0 %v340_v16  ;;  %315 = vmatpush1.bf16.msra.mxu1 %v340_v16 }
  0x22   :  { %183 = vmatmul.mubr.bf16.vlgmr.msra.gmra.mrb[0].mxu0 %v341_v17  ;;  %193 = vmatmul.mubr.bf16.vlgmr.msra.gmra.mrb[0].mxu1 %v342_v18 }
  0xf5   :  { %v184_v28 = vpop.f32.mrb[0].mxu0  ;;  %v194_v29 = vpop.f32.mrb[0].mxu1 }
  0xf6   :  { %v242_v31 = vmul.f32 %v235_v25, %v184_v28  ;;  %v246_v32 = vmul.f32 %v235_v25, %v194_v29  ;;  %v186_v33 = vpop.f32.mrb[1].mxu0  ;;  %v196_v34 = vpop.f32.mrb[1].mxu1 }
  0xf7   :  { %v243_v35 = vmul.f32 %v239_v26, %v186_v33  ;;  %v247_v36 = vmul.f32 %v239_v26, %v196_v34  ;;  %v188_v37 = vpop.f32.mrb[2].mxu0  ;;  %v198_v38 = vpop.f32.mrb[2].mxu1 }
  0xf8   :  { %v262_v39 = vadd.f32 %v255_v27, %v242_v31  ;;  %v266_v40 = vadd.f32 %v255_v27, %v246_v32  ;;  %v244_v41 = vmul.f32 %v235_v25, %v188_v37  ;;  %v248_v42 = vmul.f32 %v235_v25, %v198_v38  ;;  %v190_v43 = vpop.f32.mrb[3].mxu0  ;;  %v200_v44 = vpop.f32.mrb[3].mxu1 }
  0xf9   :  { %v263_v45 = vadd.f32 %v259_v30, %v243_v35  ;;  %v267_v46 = vadd.f32 %v259_v30, %v247_v36  ;;  %v245_v47 = vmul.f32 %v239_v26, %v190_v43  ;;  %v249_v48 = vmul.f32 %v239_v26, %v200_v44 }
  0xfa   :  { %270 = vst [vmem:[%s457_s4] sm:$0xff] %v262_v39  ;;  %274 = vst [vmem:[%s457_s4 + $0x20] sm:$0xff] %v266_v40  ;;  %v264_v49 = vadd.f32 %v255_v27, %v244_v41  ;;  %v268_v50 = vadd.f32 %v255_v27, %v248_v42 }
  0xfb   :  { %271 = vst [vmem:[%s457_s4 + $0x8] sm:$0xff] %v263_v45  ;;  %275 = vst [vmem:[%s457_s4 + $0x28] sm:$0xff] %v267_v46  ;;  %v265_v51 = vadd.f32 %v259_v30, %v245_v47  ;;  %v269_v52 = vadd.f32 %v259_v30, %v249_v48 }
  0xfc   :  { %272 = vst [vmem:[%s457_s4 + $0x10] sm:$0xff] %v264_v49  ;;  %276 = vst [vmem:[%s457_s4 + $0x30] sm:$0xff] %v268_v50 }
  0xfd   :  { %273 = vst [vmem:[%s457_s4 + $0x18] sm:$0xff] %v265_v51  ;;  %277 = vst [vmem:[%s457_s4 + $0x38] sm:$0xff] %v269_v52 }

// kernel: encoder_m_forward.49
= control target key start
LH: loop header
LB: loop body
LE: loop exit
PB: predicated region body
PF: predicated region fallthrough
CT: control target
= control target key end

     0   :  { %s834_s15 = smov 0   ;;  %s836_s16 = smov 0   ;;  %s944_s0 = inlined_call_operand.vmem [shape: bf16[32,640], index: 0, kind: input, shape index: {}]   ;;  %s945_s1 = inlined_call_operand.vmem [shape: bf16[640,64], index: 1, kind: input, shape index: {}]   ;;  %s946_s2 = inlined_call_operand.vmem [shape: f32[1,64], index: 2, kind: input, shape index: {}]   ;;  %s947_s3 = inlined_call_operand.vmem [shape: f32[1,64], index: 3, kind: input, shape index: {}]   ;;  %s948_s4 = inlined_call_operand.vmem [shape: f32[32,64], index: 4, kind: output, shape index: {}]  }
   0x1   :  { %s838_s17 = smov 0   ;;  %s840_s18 = smov 0  }
   0x2   :  { %s842_s19 = smov 0  }
   0x3 LB: > { %s26_s20 = sadd.s32 1, %s802_s18  ;;  %p49_p1 = scmp.ne.s32.totalorder %s794_s16, %s790_s15  ;;  %s806_s19 = sphi %s842_s19, %s14_s19   ;;  %s802_s18 = sphi %s840_s18, %s952_s18   ;;  %s798_s17 = sphi %s838_s17, %s951_s17   ;;  %s794_s16 = sphi %s836_s16, %s950_s16   ;;  %s790_s15 = sphi %s834_s15, %s949_s15  }
   0x4   : > { %p27_p0 = scmp.ge.s32.totalorder %s26_s20, 5  ;;  %p50_p2 = scmp.eq.s32.totalorder %s806_s19, 0 }
   0x5   : > { %s42_s22 = sadd.s32 1, %s794_s16  ;;  %p662_p5 = scmp.ge.s32.totalorder %s806_s19, 5 }
   0x6   : > { %s954_s20 = smov (%p27_p0, %s26_s20), 0  ;;  %p51_p3 = por %p50_p2, %p49_p1 }
   0x7   : > { %s38_s21 = ssub.s32 %s802_s18, %s954_s20  ;;  %195 = sbr.rel (%p662_p5) target bundleno = 21 (0x15), region = 24 }
   0x8   : > { %p40_p4 = scmp.eq.s32.totalorder %s38_s21, 0 }
   0xa   : > { %s869_s23 = scalar_select %p40_p4, %s794_s16, %s42_s22  }
   0xe   : > { %198 = sbr.rel (!%p51_p3) target bundleno = 21 (0x15), region = 28  ;;  %s200_s24 = sand.u32 (%p51_p3), 1, %s794_s16  }
   0xf   : > { %s664_s25 = sshll.u32 (%p51_p3), %s802_s18, 2  ;;  %s663_s26 = sshll.u32 (%p51_p3), %s200_s24, 4 }
  0x10   : > { %s207_s29 = scalar_lea.vmem (%p51_p3), %s944_s0, %s664_s25  ;;  %s202_s30 = scalar_lea.vmem (%p51_p3), [#allocation3], %s663_s26 }
  0x11   : > { %v223_v0 = vld [vmem:[%s207_s29] sm:$0xf] (%p51_p3)  ;;  %v225_v1 = vld [vmem:[%s207_s29 + $0x14] sm:$0xf] (%p51_p3)  ;;  %v227_v2 = vld [vmem:[%s207_s29 + $0x28] sm:$0xf] (%p51_p3) }
  0x12   : > { %224 = vst [vmem:[%s202_s30] sm:$0xf] (%p51_p3), %v223_v0  ;;  %226 = vst [vmem:[%s202_s30 + $0x4] sm:$0xf] (%p51_p3), %v225_v1  ;;  %v229_v3 = vld [vmem:[%s207_s29 + $0x3c] sm:$0xf] (%p51_p3) }
  0x13   : > { %228 = vst [vmem:[%s202_s30 + $0x8] sm:$0xf] (%p51_p3), %v227_v2  ;;  %230 = vst [vmem:[%s202_s30 + $0xc] sm:$0xf] (%p51_p3), %v229_v3 }
  0x15 PF: > { %p665_p6 = scmp.ge.s32.totalorder %s806_s19, 1  ;;  %p272_p7 = scmp.lt.s32.totalorder %s806_s19, 6 }
  0x17   : > { %p273_p8 = pnand %p665_p6, %p272_p7 }
  0x18   : > { %s279_s5 = sand.u32 (!%p273_p8), 1, %s790_s15   ;;  %s667_s6 = sshll.u32 (!%p273_p8), %s798_s17, 4 }
  0x19   : > { %276 = sbr.rel (%p273_p8) target bundleno = 304 (0x130), region = 73  ;;  %s881_s7 = sshll.u32 (!%p273_p8), %s279_s5, 4 }
  0x1a   : > { %p323_p9 = scmp.lt.s32.totalorder (!%p273_p8), %s667_s6, 79  ;;  %s281_s12 = scalar_lea.vmem (!%p273_p8), [#allocation3], %s881_s7 }
  0x1b   : > { %p669_p10 = scmp.ne.s32.totalorder (!%p273_p8), %s798_s17, 0 }
  0x20   : > { %s956_s6 = smov (!%p323_p9, %s667_s6), 79  ;;  %350 = sbr.rel (%p669_p10) target bundleno = 39 (0x27), region = 81 }
  0x21   : > { %s668_s8 = sshll.u32 %s956_s6, 2  ;;  %vm351_vm0 = vcmask (!%p669_p10), 523264   ;;  %v808_v4 = vmov (!%p669_p10), 0.0  }
  0x22   : > { %s886_s11 = scalar_lea.vmem %s945_s1, %s668_s8  ;;  %352 = vst.msk [vmem:[#allocation2] sm:$0xff] (!%p669_p10), %vm351_vm0, %v808_v4  ;;  %353 = vst.msk [vmem:[#allocation2 + $0x8] sm:$0xff] (!%p669_p10), %vm351_vm0, %v808_v4 }
  0x23   : > { %354 = vst.msk [vmem:[#allocation2 + $0x10] sm:$0xff] (!%p669_p10), %vm351_vm0, %v808_v4  ;;  %355 = vst.msk [vmem:[#allocation2 + $0x18] sm:$0xff] (!%p669_p10), %vm351_vm0, %v808_v4 }
  0x27 PF: > { %v758_v5 = vld [vmem:[%s886_s11] sm:$0xff]   ;;  %v759_v6 = vld [vmem:[%s886_s11 + $0x8] sm:$0xff]   ;;  %v760_v7 = vld [vmem:[%s886_s11 + $0x10] sm:$0xff]   ;;  %vm493_vm1 = vcmask 523264   ;;  %p680_p11 = scmp.ne.s32.totalorder %s798_s17, 4 }
  0x28   : > { %697 = vmatprep.subr.bf16.mxu0 %v758_v5  ;;  %v761_v8 = vld [vmem:[%s886_s11 + $0x18] sm:$0xff]   ;;  %v766_v9 = vld [vmem:[%s281_s12] sm:$0xff]   ;;  %v763_v11 = vld [vmem:[%s886_s11 + $0x28] sm:$0xff]  }
  0x29   : > { %698 = vmatpush3.bf16.msra.mxu0 %v758_v5  ;;  %713 = vmatprep.mubr.bf16.mxu0 %v766_v9  ;;  %v762_v10 = vld [vmem:[%s886_s11 + $0x20] sm:$0xff]   ;;  %v764_v12 = vld [vmem:[%s886_s11 + $0x30] sm:$0xff]   ;;  %v765_v13 = vld [vmem:[%s886_s11 + $0x38] sm:$0xff]  }
  0x2a   : > { %699 = vmatprep.subr.bf16.mxu0 %v759_v6  ;;  %v767_v14 = vld [vmem:[%s281_s12 + $0x8] sm:$0xff]   ;;  %v358_v15 = vld [vmem:[#allocation2 + $0x10] sm:$0xff]  ;;  %v356_v16 = vld [vmem:[#allocation2] sm:$0xff] }
  0x2b   : > { %v359_v18 = vld [vmem:[#allocation2 + $0x18] sm:$0xff]  ;;  %v357_v21 = vld [vmem:[#allocation2 + $0x8] sm:$0xff]  ;;  %v681_v28 = vld [vmem:[%s946_s2] ss:$0 sm:$0xff] (!%p680_p11) }
  0x2c   : > { %v682_v29 = vld [vmem:[%s947_s3] ss:$0 sm:$0xff] (!%p680_p11) }
  0x2d   : > { %700 = vmatpush3.bf16.msra.mxu0 %v759_v6 }
  0x2e   : > { %701 = vmatprep.subr.bf16.mxu0 %v760_v7 }
  0x31   : > { %702 = vmatpush3.bf16.msra.mxu0 %v760_v7 }
  0x32   : > { %703 = vmatprep.subr.bf16.mxu0 %v761_v8 }
  0x35   : > { %704 = vmatpush3.bf16.msra.mxu0 %v761_v8 }
  0x36   : > { %705 = vmatprep.subr.bf16.mxu0 %v762_v10 }
  0x39   : > { %706 = vmatpush3.bf16.msra.mxu0 %v762_v10 }
  0x3a   : > { %707 = vmatprep.subr.bf16.mxu0 %v763_v11 }
  0x3d   : > { %708 = vmatpush3.bf16.msra.mxu0 %v763_v11 }
  0x3e   : > { %709 = vmatprep.subr.bf16.mxu0 %v764_v12 }
  0x41   : > { %710 = vmatpush3.bf16.msra.mxu0 %v764_v12 }
  0x42   : > { %711 = vmatprep.subr.bf16.mxu0 %v765_v13 }
  0x45   : > { %712 = vmatpush3.bf16.msra.mxu0 %v765_v13 }
  0x48   : > { %714 = vmatmul.mubr.bf16.vlgmr.msra.gmra.mrb[0].mxu0 %v767_v14 }
 0x11b   : > { %v715_v17 = vpop.f32.mrb[0].mxu0  ;;  %501 = sbr.rel (%p680_p11) target bundleno = 304 (0x130), region = 85 }
 0x11c   : > { %v491_v19 = vadd.f32 %v715_v17, %v358_v15  ;;  %v474_v20 = vpop.f32.mrb[1].mxu0 }
 0x11d   : > { %v489_v22 = vadd.f32 %v474_v20, %v356_v16  ;;  %v716_v23 = vpop.f32.mrb[2].mxu0 }
 0x11e   : > { %496 = vst.msk [vmem:[#allocation2 + $0x10] sm:$0xff] %vm493_vm1, %v491_v19  ;;  %v492_v24 = vadd.f32 %v716_v23, %v359_v18  ;;  %v477_v25 = vpop.f32.mrb[3].mxu0 }
 0x11f   : > { %494 = vst.msk [vmem:[#allocation2] sm:$0xff] %vm493_vm1, %v489_v22  ;;  %v490_v26 = vadd.f32 %v477_v25, %v357_v21 }
 0x120   : > { %497 = vst.msk [vmem:[#allocation2 + $0x18] sm:$0xff] %vm493_vm1, %v492_v24 }
 0x121   : > { %495 = vst.msk [vmem:[#allocation2 + $0x8] sm:$0xff] %vm493_vm1, %v490_v26 }
 0x125   : > { %v504_v32 = vld [vmem:[#allocation2 + $0x10] sm:$0xff] }
 0x126   : > { %v502_v27 = vld [vmem:[#allocation2] sm:$0xff]  ;;  %v515_v35 = vmul.f32 %v681_v28, %v504_v32 }
 0x127   : > { %v513_v30 = vmul.f32 %v681_v28, %v502_v27  ;;  %v505_v33 = vld [vmem:[#allocation2 + $0x18] sm:$0xff] }
 0x128   : > { %v503_v31 = vld [vmem:[#allocation2 + $0x8] sm:$0xff]  ;;  %v516_v36 = vmul.f32 %v681_v28, %v505_v33  ;;  %v526_v39 = vadd.f32 %v682_v29, %v515_v35 }
 0x129   : > { %v514_v34 = vmul.f32 %v681_v28, %v503_v31  ;;  %v524_v37 = vadd.f32 %v682_v29, %v513_v30 }
 0x12a   : > { %v527_v40 = vadd.f32 %v682_v29, %v516_v36  ;;  %v530_v43 = vmax.f32 %v526_v39, 0.0 }
 0x12b   : > { %v525_v38 = vadd.f32 %v682_v29, %v514_v34  ;;  %v528_v41 = vmax.f32 %v524_v37, 0.0 }
 0x12c   : > { %v531_v44 = vmax.f32 %v527_v40, 0.0  ;;  %534 = vst.msk [vmem:[%s948_s4 + $0x10] sm:$0xff] %vm493_vm1, %v530_v43 }
 0x12d   : > { %v529_v42 = vmax.f32 %v525_v38, 0.0  ;;  %532 = vst.msk [vmem:[%s948_s4] sm:$0xff] %vm493_vm1, %v528_v41 }
 0x12e   : > { %535 = vst.msk [vmem:[%s948_s4 + $0x18] sm:$0xff] %vm493_vm1, %v531_v44 }
 0x12f   : > { %533 = vst.msk [vmem:[%s948_s4 + $0x8] sm:$0xff] %vm493_vm1, %v529_v42 }
 0x130 PF: > { %s14_s19 = sadd.s32 1, %s806_s19   ;;  %s949_s15 = smov %s794_s16 }
 0x131   : > { %p11_p12 = scmp.ge.s32.totalorder %s14_s19, 7   ;;  %s950_s16 = smov %s869_s23 }
 0x132   : > { %s951_s17 = smov %s802_s18  ;;  %s952_s18 = smov %s954_s20 }
 0x133   :  { %13 = sbr.rel (!%p11_p12) target bundleno = 3 (0x3), region = 129 }

// kernel: encoder_m_forward.51
= control target key start
LH: loop header
LB: loop body
LE: loop exit
PB: predicated region body
PF: predicated region fallthrough
CT: control target
= control target key end

     0   :  { %v370_v1 = vmov 0   ;;  %v235_v19 = vlaneseq  ;;  %s509_s1 = inlined_call_operand.vmem [shape: bf16[128,256], index: 1, kind: input, shape index: {}]   ;;  %s510_s0 = inlined_call_operand.vmem [shape: bf16[32,128], index: 0, kind: input, shape index: {}]   ;;  %s511_s2 = inlined_call_operand.vmem [shape: f32[1,256], index: 2, kind: input, shape index: {}]   ;;  %s512_s3 = inlined_call_operand.vmem [shape: f32[1,256], index: 3, kind: input, shape index: {}]   ;;  %s513_s4 = inlined_call_operand.vmem [shape: f32[32,256], index: 4, kind: input, shape index: {}, may-alias: {4,5}]   ;;  %s514_s5 = inlined_call_operand.vmem [shape: f32[32,256], index: 5, kind: output, shape index: {}, may-alias: {4,5}]  }
   0x1   :  { %v344_v0 = vld [vmem:[%s509_s1 + $0x4] ss:$8 sps:$4 sm:$0xff]   ;;  %185 = vmatprep.mubr.bf16.mxu0 %v370_v1  ;;  %195 = vmatprep.mubr.bf16.mxu1 %v370_v1  ;;  %v346_v2 = vld [vmem:[%s509_s1] ss:$8 sps:$4 sm:$0xff]   ;;  %v347_v3 = vld [vmem:[%s509_s1 + $0x14] ss:$8 sps:$4 sm:$0xff]  }
   0x2   :  { %153 = vmatprep.subr.bf16.mxu0 %v344_v0  ;;  %327 = vmatprep.subr.bf16.mxu1 %v344_v0  ;;  %v349_v4 = vld [vmem:[%s509_s1 + $0x10] ss:$8 sps:$4 sm:$0xff]   ;;  %v350_v5 = vld [vmem:[%s509_s1 + $0x24] ss:$8 sps:$4 sm:$0xff]   ;;  %v352_v6 = vld [vmem:[%s509_s1 + $0x20] ss:$8 sps:$4 sm:$0xff]  }
   0x3   :  { %154 = vmatpush1.bf16.msra.mxu0 %v346_v2  ;;  %335 = vmatpush1.bf16.msra.mxu1 %v346_v2  ;;  %v353_v7 = vld [vmem:[%s509_s1 + $0x34] ss:$8 sps:$4 sm:$0xff]   ;;  %v355_v8 = vld [vmem:[%s509_s1 + $0x30] ss:$8 sps:$4 sm:$0xff]   ;;  %v356_v9 = vld [vmem:[%s509_s1 + $0x44] ss:$8 sps:$4 sm:$0xff]  }
   0x4   :  { %155 = vmatprep.subr.bf16.mxu0 %v347_v3  ;;  %328 = vmatprep.subr.bf16.mxu1 %v347_v3  ;;  %v358_v10 = vld [vmem:[%s509_s1 + $0x40] ss:$8 sps:$4 sm:$0xff]   ;;  %v359_v11 = vld [vmem:[%s509_s1 + $0x54] ss:$8 sps:$4 sm:$0xff]   ;;  %v361_v12 = vld [vmem:[%s509_s1 + $0x50] ss:$8 sps:$4 sm:$0xff]  }
   0x5   :  { %v362_v13 = vld [vmem:[%s509_s1 + $0x64] ss:$8 sps:$4 sm:$0xff]   ;;  %v364_v14 = vld [vmem:[%s509_s1 + $0x60] ss:$8 sps:$4 sm:$0xff]   ;;  %v365_v15 = vld [vmem:[%s509_s1 + $0x74] ss:$8 sps:$4 sm:$0xff]  }
   0x6   :  { %v367_v16 = vld [vmem:[%s509_s1 + $0x70] ss:$8 sps:$4 sm:$0xff]   ;;  %v368_v17 = vld [vmem:[%s510_s0] sm:$0xff]   ;;  %v369_v18 = vld [vmem:[%s510_s0 + $0x8] sm:$0xff]   ;;  %v236_v20 = vshrl.u32 %v235_v19, 7 }
   0x7   :  { %156 = vmatpush1.bf16.msra.mxu0 %v349_v4  ;;  %336 = vmatpush1.bf16.msra.mxu1 %v349_v4  ;;  %v233_v22 = vld [vmem:[%s511_s2] sm:$0x3]  ;;  %v274_v43 = vld [vmem:[%s513_s4 + $0x8] sm:$0xff]  ;;  %v275_v51 = vld [vmem:[%s513_s4 + $0x10] sm:$0xff] }
   0x8   :  { %157 = vmatprep.subr.bf16.mxu0 %v350_v5  ;;  %329 = vmatprep.subr.bf16.mxu1 %v350_v5  ;;  %v237_v21 = vsub.s32 0, %v236_v20  ;;  %v241_v23 = vsub.s32 1, %v236_v20  ;;  %v253_v24 = vld [vmem:[%s512_s3] sm:$0x3]  ;;  %v278_v44 = vld [vmem:[%s513_s4 + $0x28] sm:$0xff]  ;;  %v279_v52 = vld [vmem:[%s513_s4 + $0x30] sm:$0xff] }
   0x9   :  { %v273_v35 = vld [vmem:[%s513_s4] sm:$0xff]  ;;  %v276_v59 = vld [vmem:[%s513_s4 + $0x18] sm:$0xff] }
   0xa   :  { %v238_v25 = vrot.slane %v233_v22, %v237_v21  ;;  %v242_v26 = vrot.slane %v233_v22, %v241_v23  ;;  %v258_v27 = vrot.slane %v253_v24, %v237_v21  ;;  %v262_v30 = vrot.slane %v253_v24, %v241_v23  ;;  %v277_v36 = vld [vmem:[%s513_s4 + $0x20] sm:$0xff]  ;;  %v280_v60 = vld [vmem:[%s513_s4 + $0x38] sm:$0xff] }
   0xb   :  { %158 = vmatpush1.bf16.msra.mxu0 %v352_v6  ;;  %337 = vmatpush1.bf16.msra.mxu1 %v352_v6 }
   0xc   :  { %159 = vmatprep.subr.bf16.mxu0 %v353_v7  ;;  %330 = vmatprep.subr.bf16.mxu1 %v353_v7 }
   0xf   :  { %160 = vmatpush1.bf16.msra.mxu0 %v355_v8  ;;  %338 = vmatpush1.bf16.msra.mxu1 %v355_v8 }
  0x10   :  { %161 = vmatprep.subr.bf16.mxu0 %v356_v9  ;;  %331 = vmatprep.subr.bf16.mxu1 %v356_v9 }
  0x13   :  { %162 = vmatpush1.bf16.msra.mxu0 %v358_v10  ;;  %339 = vmatpush1.bf16.msra.mxu1 %v358_v10 }
  0x14   :  { %163 = vmatprep.subr.bf16.mxu0 %v359_v11  ;;  %332 = vmatprep.subr.bf16.mxu1 %v359_v11 }
  0x17   :  { %164 = vmatpush1.bf16.msra.mxu0 %v361_v12  ;;  %340 = vmatpush1.bf16.msra.mxu1 %v361_v12 }
  0x18   :  { %165 = vmatprep.subr.bf16.mxu0 %v362_v13  ;;  %333 = vmatprep.subr.bf16.mxu1 %v362_v13 }
  0x1b   :  { %166 = vmatpush1.bf16.msra.mxu0 %v364_v14  ;;  %341 = vmatpush1.bf16.msra.mxu1 %v364_v14 }
  0x1c   :  { %167 = vmatprep.subr.bf16.mxu0 %v365_v15  ;;  %334 = vmatprep.subr.bf16.mxu1 %v365_v15 }
  0x1f   :  { %168 = vmatpush1.bf16.msra.mxu0 %v367_v16  ;;  %342 = vmatpush1.bf16.msra.mxu1 %v367_v16 }
  0x22   :  { %186 = vmatmul.mubr.bf16.vlgmr.msra.gmra.mrb[0].mxu0 %v368_v17  ;;  %196 = vmatmul.mubr.bf16.vlgmr.msra.gmra.mrb[0].mxu1 %v369_v18 }
  0xf5   :  { %v187_v28 = vpop.f32.mrb[0].mxu0  ;;  %v197_v29 = vpop.f32.mrb[0].mxu1 }
  0xf6   :  { %v245_v31 = vmul.f32 %v238_v25, %v187_v28  ;;  %v249_v32 = vmul.f32 %v238_v25, %v197_v29  ;;  %v189_v33 = vpop.f32.mrb[1].mxu0  ;;  %v199_v34 = vpop.f32.mrb[1].mxu1 }
  0xf7   :  { %v246_v37 = vmul.f32 %v242_v26, %v189_v33  ;;  %v250_v38 = vmul.f32 %v242_v26, %v199_v34  ;;  %v191_v39 = vpop.f32.mrb[2].mxu0  ;;  %v201_v40 = vpop.f32.mrb[2].mxu1 }
  0xf8   :  { %v265_v41 = vadd.f32 %v258_v27, %v245_v31  ;;  %v269_v42 = vadd.f32 %v258_v27, %v249_v32  ;;  %v247_v45 = vmul.f32 %v238_v25, %v191_v39  ;;  %v251_v46 = vmul.f32 %v238_v25, %v201_v40  ;;  %v193_v47 = vpop.f32.mrb[3].mxu0  ;;  %v203_v48 = vpop.f32.mrb[3].mxu1 }
  0xf9   :  { %v266_v49 = vadd.f32 %v262_v30, %v246_v37  ;;  %v270_v50 = vadd.f32 %v262_v30, %v250_v38  ;;  %v248_v53 = vmul.f32 %v242_v26, %v193_v47  ;;  %v252_v54 = vmul.f32 %v242_v26, %v203_v48 }
  0xfa   :  { %v281_v55 = vadd.f32 %v273_v35, %v265_v41  ;;  %v285_v56 = vadd.f32 %v277_v36, %v269_v42  ;;  %v267_v57 = vadd.f32 %v258_v27, %v247_v45  ;;  %v271_v58 = vadd.f32 %v258_v27, %v251_v46 }
  0xfb   :  { %v282_v61 = vadd.f32 %v274_v43, %v266_v49  ;;  %v286_v62 = vadd.f32 %v278_v44, %v270_v50  ;;  %v268_v63 = vadd.f32 %v262_v30, %v248_v53  ;;  %v272_v0 = vadd.f32 %v262_v30, %v252_v54 }
  0xfc   :  { %v289_v1 = vmax.f32 %v281_v55, 0.0  ;;  %v293_v2 = vmax.f32 %v285_v56, 0.0  ;;  %v283_v3 = vadd.f32 %v275_v51, %v267_v57  ;;  %v287_v4 = vadd.f32 %v279_v52, %v271_v58 }
  0xfd   :  { %v290_v5 = vmax.f32 %v282_v61, 0.0  ;;  %v294_v6 = vmax.f32 %v286_v62, 0.0  ;;  %v284_v7 = vadd.f32 %v276_v59, %v268_v63  ;;  %v288_v8 = vadd.f32 %v280_v60, %v272_v0 }
  0xfe   :  { %297 = vst [vmem:[%s514_s5] sm:$0xff] %v289_v1  ;;  %301 = vst [vmem:[%s514_s5 + $0x20] sm:$0xff] %v293_v2  ;;  %v291_v9 = vmax.f32 %v283_v3, 0.0  ;;  %v295_v10 = vmax.f32 %v287_v4, 0.0 }
  0xff   :  { %298 = vst [vmem:[%s514_s5 + $0x8] sm:$0xff] %v290_v5  ;;  %302 = vst [vmem:[%s514_s5 + $0x28] sm:$0xff] %v294_v6  ;;  %v292_v11 = vmax.f32 %v284_v7, 0.0  ;;  %v296_v12 = vmax.f32 %v288_v8, 0.0 }
 0x100   :  { %299 = vst [vmem:[%s514_s5 + $0x10] sm:$0xff] %v291_v9  ;;  %303 = vst [vmem:[%s514_s5 + $0x30] sm:$0xff] %v295_v10 }
 0x101   :  { %300 = vst [vmem:[%s514_s5 + $0x18] sm:$0xff] %v292_v11  ;;  %304 = vst [vmem:[%s514_s5 + $0x38] sm:$0xff] %v296_v12 }

// kernel: encoder_m_forward.52
= control target key start
LH: loop header
LB: loop body
LE: loop exit
PB: predicated region body
PF: predicated region fallthrough
CT: control target
= control target key end

     0   :  { %vm22_vm0 = vcmask 523264   ;;  %v371_v20 = vmov 0.0   ;;  %s487_s1 = inlined_call_operand.vmem [shape: bf16[256,64], index: 1, kind: input, shape index: {}]   ;;  %s488_s0 = inlined_call_operand.vmem [shape: bf16[32,256], index: 0, kind: input, shape index: {}]   ;;  %s489_s2 = inlined_call_operand.vmem [shape: f32[1,64], index: 2, kind: input, shape index: {}]   ;;  %s490_s3 = inlined_call_operand.vmem [shape: f32[1,64], index: 3, kind: input, shape index: {}]   ;;  %s491_s4 = inlined_call_operand.vmem [shape: f32[32,64], index: 4, kind: output, shape index: {}]  }
   0x1   :  { %v349_v0 = vld [vmem:[%s487_s1 + $0x40] sm:$0xff]   ;;  %v351_v2 = vld [vmem:[%s487_s1 + $0x48] sm:$0xff]   ;;  %v353_v4 = vld [vmem:[%s487_s1 + $0x50] sm:$0xff]   ;;  %23 = vst.msk [vmem:[#allocation2] sm:$0xff] %vm22_vm0, %v371_v20 }
   0x2   :  { %v350_v1 = vld [vmem:[%s487_s1] sm:$0xff]   ;;  %304 = vmatprep.subr.bf16.mxu0 %v349_v0  ;;  %332 = vmatprep.subr.bf16.mxu1 %v349_v0  ;;  %v352_v3 = vld [vmem:[%s487_s1 + $0x8] sm:$0xff]   ;;  %v354_v5 = vld [vmem:[%s487_s1 + $0x10] sm:$0xff]   ;;  %24 = vst.msk [vmem:[#allocation2 + $0x8] sm:$0xff] %vm22_vm0, %v371_v20 }
   0x3   :  { %305 = vmatpush3.bf16.msra.mxu0 %v350_v1  ;;  %340 = vmatpush3.bf16.msra.mxu1 %v350_v1  ;;  %v355_v6 = vld [vmem:[%s487_s1 + $0x58] sm:$0xff]   ;;  %v357_v8 = vld [vmem:[%s487_s1 + $0x60] sm:$0xff]   ;;  %v359_v10 = vld [vmem:[%s487_s1 + $0x68] sm:$0xff]   ;;  %25 = vst.msk [vmem:[#allocation2 + $0x10] sm:$0xff] %vm22_vm0, %v371_v20 }
   0x4   :  { %306 = vmatprep.subr.bf16.mxu0 %v351_v2  ;;  %333 = vmatprep.subr.bf16.mxu1 %v351_v2  ;;  %v356_v7 = vld [vmem:[%s487_s1 + $0x18] sm:$0xff]   ;;  %v358_v9 = vld [vmem:[%s487_s1 + $0x20] sm:$0xff]   ;;  %v360_v13 = vld [vmem:[%s487_s1 + $0x28] sm:$0xff]   ;;  %26 = vst.msk [vmem:[#allocation2 + $0x18] sm:$0xff] %vm22_vm0, %v371_v20 }
   0x5   :  { %v367_v11 = vld [vmem:[%s488_s0 + $0x4] ss:$8 sps:$4 sm:$0xff]   ;;  %v370_v12 = vld [vmem:[%s488_s0 + $0x14] ss:$8 sps:$4 sm:$0xff]   ;;  %v365_v18 = vld [vmem:[%s488_s0] ss:$8 sps:$4 sm:$0xff]  }
   0x6   :  { %v361_v14 = vld [vmem:[%s487_s1 + $0x70] sm:$0xff]   ;;  %215 = vmatprep.mubr.bf16.mxu0 %v367_v11  ;;  %223 = vmatprep.mubr.bf16.mxu1 %v370_v12  ;;  %v363_v16 = vld [vmem:[%s487_s1 + $0x78] sm:$0xff]   ;;  %v302_v41 = vld [vmem:[%s489_s2] ss:$0 sm:$0xff] }
   0x7   :  { %307 = vmatpush3.bf16.msra.mxu0 %v352_v3  ;;  %341 = vmatpush3.bf16.msra.mxu1 %v352_v3  ;;  %v362_v15 = vld [vmem:[%s487_s1 + $0x30] sm:$0xff]   ;;  %v364_v17 = vld [vmem:[%s487_s1 + $0x38] sm:$0xff]   ;;  %v303_v43 = vld [vmem:[%s490_s3] ss:$0 sm:$0xff] }
   0x8   :  { %308 = vmatprep.subr.bf16.mxu0 %v353_v4  ;;  %334 = vmatprep.subr.bf16.mxu1 %v353_v4  ;;  %v368_v19 = vld [vmem:[%s488_s0 + $0x10] ss:$8 sps:$4 sm:$0xff]   ;;  %v27_v23 = vld [vmem:[#allocation2] sm:$0xff] }
   0x9   :  { %v28_v31 = vld [vmem:[#allocation2 + $0x8] sm:$0xff] }
   0xa   :  { %v29_v25 = vld [vmem:[#allocation2 + $0x10] sm:$0xff] }
   0xb   :  { %309 = vmatpush3.bf16.msra.mxu0 %v354_v5  ;;  %342 = vmatpush3.bf16.msra.mxu1 %v354_v5  ;;  %v30_v33 = vld [vmem:[#allocation2 + $0x18] sm:$0xff] }
   0xc   :  { %310 = vmatprep.subr.bf16.mxu0 %v355_v6  ;;  %335 = vmatprep.subr.bf16.mxu1 %v355_v6 }
   0xf   :  { %311 = vmatpush3.bf16.msra.mxu0 %v356_v7  ;;  %343 = vmatpush3.bf16.msra.mxu1 %v356_v7 }
  0x10   :  { %312 = vmatprep.subr.bf16.mxu0 %v357_v8  ;;  %336 = vmatprep.subr.bf16.mxu1 %v357_v8 }
  0x13   :  { %313 = vmatpush3.bf16.msra.mxu0 %v358_v9  ;;  %344 = vmatpush3.bf16.msra.mxu1 %v358_v9 }
  0x14   :  { %314 = vmatprep.subr.bf16.mxu0 %v359_v10  ;;  %337 = vmatprep.subr.bf16.mxu1 %v359_v10 }
  0x17   :  { %315 = vmatpush3.bf16.msra.mxu0 %v360_v13  ;;  %345 = vmatpush3.bf16.msra.mxu1 %v360_v13 }
  0x18   :  { %316 = vmatprep.subr.bf16.mxu0 %v361_v14  ;;  %338 = vmatprep.subr.bf16.mxu1 %v361_v14 }
  0x1b   :  { %317 = vmatpush3.bf16.msra.mxu0 %v362_v15  ;;  %346 = vmatpush3.bf16.msra.mxu1 %v362_v15 }
  0x1c   :  { %318 = vmatprep.subr.bf16.mxu0 %v363_v16  ;;  %339 = vmatprep.subr.bf16.mxu1 %v363_v16 }
  0x1f   :  { %319 = vmatpush3.bf16.msra.mxu0 %v364_v17  ;;  %347 = vmatpush3.bf16.msra.mxu1 %v364_v17 }
  0x22   :  { %216 = vmatmul.mubr.bf16.vlgmr.msra.gmra.mrb[0].mxu0 %v365_v18  ;;  %224 = vmatmul.mubr.bf16.vlgmr.msra.gmra.mrb[0].mxu1 %v368_v19 }
  0xf5   :  { %v320_v21 = vpop.f32.mrb[0].mxu0  ;;  %v326_v22 = vpop.f32.mrb[0].mxu1 }
  0xf6   :  { %v321_v24 = vpop.f32.mrb[1].mxu0  ;;  %v327_v26 = vpop.f32.mrb[1].mxu1 }
  0xf7   :  { %v322_v27 = vadd.f32 %v321_v24, %v320_v21  ;;  %v328_v28 = vadd.f32 %v327_v26, %v326_v22  ;;  %v323_v29 = vpop.f32.mrb[2].mxu0  ;;  %v329_v30 = vpop.f32.mrb[2].mxu1 }
  0xf8   :  { %v324_v32 = vpop.f32.mrb[3].mxu0  ;;  %v330_v34 = vpop.f32.mrb[3].mxu1 }
  0xf9   :  { %v232_v35 = vadd.f32 %v322_v27, %v27_v23  ;;  %v234_v36 = vadd.f32 %v328_v28, %v29_v25  ;;  %v325_v37 = vadd.f32 %v324_v32, %v323_v29  ;;  %v331_v38 = vadd.f32 %v330_v34, %v329_v30 }
  0xfb   :  { %237 = vst.msk [vmem:[#allocation2] sm:$0xff] %vm22_vm0, %v232_v35  ;;  %239 = vst.msk [vmem:[#allocation2 + $0x10] sm:$0xff] %vm22_vm0, %v234_v36  ;;  %v233_v39 = vadd.f32 %v325_v37, %v28_v31  ;;  %v235_v40 = vadd.f32 %v331_v38, %v30_v33 }
  0xfd   :  { %238 = vst.msk [vmem:[#allocation2 + $0x8] sm:$0xff] %vm22_vm0, %v233_v39  ;;  %240 = vst.msk [vmem:[#allocation2 + $0x18] sm:$0xff] %vm22_vm0, %v235_v40 }
 0x102   :  { %v244_v42 = vld [vmem:[#allocation2] sm:$0xff]  ;;  %v246_v44 = vld [vmem:[#allocation2 + $0x10] sm:$0xff] }
 0x103   :  { %v255_v45 = vmul.f32 %v302_v41, %v244_v42  ;;  %v257_v46 = vmul.f32 %v302_v41, %v246_v44 }
 0x104   :  { %v245_v47 = vld [vmem:[#allocation2 + $0x8] sm:$0xff]  ;;  %v247_v48 = vld [vmem:[#allocation2 + $0x18] sm:$0xff] }
 0x105   :  { %v266_v49 = vadd.f32 %v303_v43, %v255_v45  ;;  %v268_v50 = vadd.f32 %v303_v43, %v257_v46  ;;  %v256_v51 = vmul.f32 %v302_v41, %v245_v47  ;;  %v258_v52 = vmul.f32 %v302_v41, %v247_v48 }
 0x107   :  { %v270_v53 = vmax.f32 %v266_v49, 0.0  ;;  %v272_v54 = vmax.f32 %v268_v50, 0.0  ;;  %v267_v55 = vadd.f32 %v303_v43, %v256_v51  ;;  %v269_v56 = vadd.f32 %v303_v43, %v258_v52 }
 0x109   :  { %274 = vst.msk [vmem:[%s491_s4] sm:$0xff] %vm22_vm0, %v270_v53  ;;  %276 = vst.msk [vmem:[%s491_s4 + $0x10] sm:$0xff] %vm22_vm0, %v272_v54  ;;  %v271_v57 = vmax.f32 %v267_v55, 0.0  ;;  %v273_v58 = vmax.f32 %v269_v56, 0.0 }
 0x10b   :  { %275 = vst.msk [vmem:[%s491_s4 + $0x8] sm:$0xff] %vm22_vm0, %v271_v57  ;;  %277 = vst.msk [vmem:[%s491_s4 + $0x18] sm:$0xff] %vm22_vm0, %v273_v58 }

// kernel: encoder_m_forward.58
= control target key start
LH: loop header
LB: loop body
LE: loop exit
PB: predicated region body
PF: predicated region fallthrough
CT: control target
= control target key end

     0   :  { %s471_s1 = inlined_call_operand.vmem [shape: bf16[256,128], index: 1, kind: input, shape index: {}]   ;;  %s472_s0 = inlined_call_operand.vmem [shape: bf16[32,256], index: 0, kind: input, shape index: {}]   ;;  %s473_s2 = inlined_call_operand.vmem [shape: f32[1,128], index: 2, kind: input, shape index: {}]   ;;  %s474_s3 = inlined_call_operand.vmem [shape: f32[1,128], index: 3, kind: input, shape index: {}]   ;;  %s475_s4 = inlined_call_operand.vmem [shape: f32[32,128], index: 4, kind: output, shape index: {}]  }
   0x1   :  { %v346_v0 = vld [vmem:[%s471_s1 + $0x40] sm:$0xff]   ;;  %v348_v2 = vld [vmem:[%s471_s1 + $0x48] sm:$0xff]   ;;  %v350_v4 = vld [vmem:[%s471_s1 + $0x50] sm:$0xff]  }
   0x2   :  { %v347_v1 = vld [vmem:[%s471_s1] sm:$0xff]   ;;  %302 = vmatprep.subr.bf16.mxu0 %v346_v0  ;;  %330 = vmatprep.subr.bf16.mxu1 %v346_v0  ;;  %v349_v3 = vld [vmem:[%s471_s1 + $0x8] sm:$0xff]   ;;  %v351_v5 = vld [vmem:[%s471_s1 + $0x10] sm:$0xff]  }
   0x3   :  { %303 = vmatpush3.bf16.msra.mxu0 %v347_v1  ;;  %338 = vmatpush3.bf16.msra.mxu1 %v347_v1  ;;  %v352_v6 = vld [vmem:[%s471_s1 + $0x58] sm:$0xff]   ;;  %v354_v8 = vld [vmem:[%s471_s1 + $0x60] sm:$0xff]   ;;  %v356_v10 = vld [vmem:[%s471_s1 + $0x68] sm:$0xff]  }
   0x4   :  { %304 = vmatprep.subr.bf16.mxu0 %v348_v2  ;;  %331 = vmatprep.subr.bf16.mxu1 %v348_v2  ;;  %v353_v7 = vld [vmem:[%s471_s1 + $0x18] sm:$0xff]   ;;  %v355_v9 = vld [vmem:[%s471_s1 + $0x20] sm:$0xff]   ;;  %v357_v13 = vld [vmem:[%s471_s1 + $0x28] sm:$0xff]  }
   0x5   :  { %v364_v11 = vld [vmem:[%s472_s0 + $0x4] ss:$8 sps:$4 sm:$0xff]   ;;  %v367_v12 = vld [vmem:[%s472_s0 + $0x14] ss:$8 sps:$4 sm:$0xff]   ;;  %v362_v18 = vld [vmem:[%s472_s0] ss:$8 sps:$4 sm:$0xff]  }
   0x6   :  { %v358_v14 = vld [vmem:[%s471_s1 + $0x70] sm:$0xff]   ;;  %214 = vmatprep.mubr.bf16.mxu0 %v364_v11  ;;  %222 = vmatprep.mubr.bf16.mxu1 %v367_v12  ;;  %v360_v16 = vld [vmem:[%s471_s1 + $0x78] sm:$0xff]   ;;  %v300_v23 = vld [vmem:[%s473_s2] ss:$0 sm:$0xff] }
   0x7   :  { %305 = vmatpush3.bf16.msra.mxu0 %v349_v3  ;;  %339 = vmatpush3.bf16.msra.mxu1 %v349_v3  ;;  %v359_v15 = vld [vmem:[%s471_s1 + $0x30] sm:$0xff]   ;;  %v361_v17 = vld [vmem:[%s471_s1 + $0x38] sm:$0xff]   ;;  %v301_v29 = vld [vmem:[%s474_s3] ss:$0 sm:$0xff] }
   0x8   :  { %306 = vmatprep.subr.bf16.mxu0 %v350_v4  ;;  %332 = vmatprep.subr.bf16.mxu1 %v350_v4  ;;  %v365_v19 = vld [vmem:[%s472_s0 + $0x10] ss:$8 sps:$4 sm:$0xff]  }
   0xb   :  { %307 = vmatpush3.bf16.msra.mxu0 %v351_v5  ;;  %340 = vmatpush3.bf16.msra.mxu1 %v351_v5 }
   0xc   :  { %308 = vmatprep.subr.bf16.mxu0 %v352_v6  ;;  %333 = vmatprep.subr.bf16.mxu1 %v352_v6 }
   0xf   :  { %309 = vmatpush3.bf16.msra.mxu0 %v353_v7  ;;  %341 = vmatpush3.bf16.msra.mxu1 %v353_v7 }
  0x10   :  { %310 = vmatprep.subr.bf16.mxu0 %v354_v8  ;;  %334 = vmatprep.subr.bf16.mxu1 %v354_v8 }
  0x13   :  { %311 = vmatpush3.bf16.msra.mxu0 %v355_v9  ;;  %342 = vmatpush3.bf16.msra.mxu1 %v355_v9 }
  0x14   :  { %312 = vmatprep.subr.bf16.mxu0 %v356_v10  ;;  %335 = vmatprep.subr.bf16.mxu1 %v356_v10 }
  0x17   :  { %313 = vmatpush3.bf16.msra.mxu0 %v357_v13  ;;  %343 = vmatpush3.bf16.msra.mxu1 %v357_v13 }
  0x18   :  { %314 = vmatprep.subr.bf16.mxu0 %v358_v14  ;;  %336 = vmatprep.subr.bf16.mxu1 %v358_v14 }
  0x1b   :  { %315 = vmatpush3.bf16.msra.mxu0 %v359_v15  ;;  %344 = vmatpush3.bf16.msra.mxu1 %v359_v15 }
  0x1c   :  { %316 = vmatprep.subr.bf16.mxu0 %v360_v16  ;;  %337 = vmatprep.subr.bf16.mxu1 %v360_v16 }
  0x1f   :  { %317 = vmatpush3.bf16.msra.mxu0 %v361_v17  ;;  %345 = vmatpush3.bf16.msra.mxu1 %v361_v17 }
  0x22   :  { %215 = vmatmul.mubr.bf16.vlgmr.msra.gmra.mrb[0].mxu0 %v362_v18  ;;  %223 = vmatmul.mubr.bf16.vlgmr.msra.gmra.mrb[0].mxu1 %v365_v19 }
  0xf5   :  { %v318_v20 = vpop.f32.mrb[0].mxu0  ;;  %v324_v21 = vpop.f32.mrb[0].mxu1 }
  0xf6   :  { %v319_v22 = vpop.f32.mrb[1].mxu0  ;;  %v325_v24 = vpop.f32.mrb[1].mxu1 }
  0xf7   :  { %v320_v25 = vadd.f32 %v319_v22, %v318_v20  ;;  %v326_v26 = vadd.f32 %v325_v24, %v324_v21  ;;  %v321_v27 = vpop.f32.mrb[2].mxu0  ;;  %v327_v28 = vpop.f32.mrb[2].mxu1 }
  0xf8   :  { %v322_v30 = vpop.f32.mrb[3].mxu0  ;;  %v328_v31 = vpop.f32.mrb[3].mxu1 }
  0xf9   :  { %v253_v32 = vmul.f32 %v320_v25, %v300_v23  ;;  %v255_v33 = vmul.f32 %v326_v26, %v300_v23  ;;  %v323_v34 = vadd.f32 %v322_v30, %v321_v27  ;;  %v329_v35 = vadd.f32 %v328_v31, %v327_v28 }
  0xfb   :  { %v264_v36 = vadd.f32 %v301_v29, %v253_v32  ;;  %v266_v37 = vadd.f32 %v301_v29, %v255_v33  ;;  %v254_v38 = vmul.f32 %v323_v34, %v300_v23  ;;  %v256_v39 = vmul.f32 %v329_v35, %v300_v23 }
  0xfd   :  { %v268_v40 = vmax.f32 %v264_v36, 0.0  ;;  %v270_v41 = vmax.f32 %v266_v37, 0.0  ;;  %v265_v42 = vadd.f32 %v301_v29, %v254_v38  ;;  %v267_v43 = vadd.f32 %v301_v29, %v256_v39 }
  0xff   :  { %272 = vst [vmem:[%s475_s4] sm:$0xff] %v268_v40  ;;  %274 = vst [vmem:[%s475_s4 + $0x10] sm:$0xff] %v270_v41  ;;  %v269_v44 = vmax.f32 %v265_v42, 0.0  ;;  %v271_v45 = vmax.f32 %v267_v43, 0.0 }
 0x101   :  { %273 = vst [vmem:[%s475_s4 + $0x8] sm:$0xff] %v269_v44  ;;  %275 = vst [vmem:[%s475_s4 + $0x18] sm:$0xff] %v271_v45 }

// kernel: encoder_m_forward.59
= control target key start
LH: loop header
LB: loop body
LE: loop exit
PB: predicated region body
PF: predicated region fallthrough
CT: control target
= control target key end

     0   :  { %s689_s15 = smov 0   ;;  %s691_s16 = smov 0   ;;  %s741_s0 = inlined_call_operand.vmem [shape: bf16[8,1152], index: 0, kind: input, shape index: {}]   ;;  %s742_s1 = inlined_call_operand.vmem [shape: bf16[1152,128], index: 1, kind: input, shape index: {}]   ;;  %s743_s2 = inlined_call_operand.vmem [shape: f32[1,128], index: 2, kind: input, shape index: {}]   ;;  %s744_s3 = inlined_call_operand.vmem [shape: f32[1,128], index: 3, kind: input, shape index: {}]   ;;  %s745_s4 = inlined_call_operand.vmem [shape: f32[8,128], index: 4, kind: output, shape index: {}]  }
   0x1   :  { %s693_s17 = smov 0  }
   0x2 LB: > { %s26_s18 = sadd.s32 1, %s655_s16  ;;  %p554_p0 = scmp.ge.s32.totalorder %s659_s17, 1  ;;  %s659_s17 = sphi %s693_s17, %s14_s17   ;;  %s655_s16 = sphi %s691_s16, %s747_s16   ;;  %s651_s15 = sphi %s689_s15, %s746_s15  }
   0x3   : > { %p27_p1 = scmp.ge.s32.totalorder %s26_s18, 9  ;;  %p220_p2 = scmp.lt.s32.totalorder %s659_s17, 10 }
   0x5   : > { %s749_s18 = smov (%p27_p1, %s26_s18), 0  ;;  %p221_p3 = pnand %p554_p0, %p220_p2 }
   0x6   : > { %p267_p4 = scmp.lt.s32.totalorder (!%p221_p3), %s651_s15, 8  ;;  %s556_s19 = sshll.u32 (!%p221_p3), %s651_s15, 4 }
   0x7   : > { %224 = sbr.rel (%p221_p3) target bundleno = 284 (0x11c), region = 36  ;;  %p274_p5 = scmp.lt.s32.totalorder (!%p221_p3), %s556_s19, 143 }
   0x8   : > { %p558_p6 = scmp.ne.s32.totalorder (!%p221_p3), %s651_s15, 0 }
   0xe   : > { %s268_s20 = scalar_select %p267_p4, %s651_s15, 8 }
   0xf   : > { %s751_s19 = smov (!%p274_p5, %s556_s19), 143  ;;  %299 = sbr.rel (%p558_p6) target bundleno = 22 (0x16), region = 40 }
  0x10   : > { %s555_s21 = sshll.u32 %s268_s20, 2  ;;  %s557_s25 = sshll.u32 %s751_s19, 2  ;;  %v661_v0 = vmov (!%p558_p6), 0.0  }
  0x11   : > { %s715_s24 = scalar_lea.vmem %s741_s0, %s555_s21  ;;  %s280_s28 = scalar_lea.vmem %s742_s1, %s557_s25  ;;  %300 = vst [vmem:[#allocation2] sm:$0xff] (!%p558_p6), %v661_v0 }
  0x16 PF: > { %v629_v1 = vld [vmem:[%s280_s28] sm:$0xff]   ;;  %v662_v2 = vmov 0.0   ;;  %v630_v3 = vld [vmem:[%s280_s28 + $0x8] sm:$0xff]   ;;  %vm663_vm0 = vmmov 0   ;;  %v631_v4 = vld [vmem:[%s280_s28 + $0x10] sm:$0xff]   ;;  %p567_p7 = scmp.ne.s32.totalorder %s651_s15, 8 }
  0x17   : > { %582 = vmatprep.subr.bf16.mxu0 %v662_v2  ;;  %598 = vmatprep.mubr.msk.bf16.mxu0 %vm663_vm0, %v662_v2  ;;  %v632_v5 = vld [vmem:[%s280_s28 + $0x18] sm:$0xff]   ;;  %v633_v6 = vld [vmem:[%s280_s28 + $0x20] sm:$0xff]   ;;  %v634_v7 = vld [vmem:[%s280_s28 + $0x28] sm:$0xff]  }
  0x18   : > { %583 = vmatpush3.bf16.msra.mxu0 %v629_v1  ;;  %v635_v8 = vld [vmem:[%s280_s28 + $0x30] sm:$0xff]   ;;  %v636_v9 = vld [vmem:[%s280_s28 + $0x38] sm:$0xff]   ;;  %v302_v10 = vld [vmem:[%s715_s24] sm:$0xf] }
  0x19   : > { %584 = vmatprep.subr.bf16.mxu0 %v662_v2  ;;  %v301_v11 = vld [vmem:[#allocation2] sm:$0xff] }
  0x1a   : > { %v568_v18 = vld [vmem:[%s743_s2] ss:$0 sm:$0xff] (!%p567_p7) }
  0x1b   : > { %v569_v19 = vld [vmem:[%s744_s3] ss:$0 sm:$0xff] (!%p567_p7) }
  0x1c   : > { %585 = vmatpush3.bf16.msra.mxu0 %v630_v3 }
  0x1d   : > { %586 = vmatprep.subr.bf16.mxu0 %v662_v2 }
  0x20   : > { %587 = vmatpush3.bf16.msra.mxu0 %v631_v4 }
  0x21   : > { %588 = vmatprep.subr.bf16.mxu0 %v662_v2 }
  0x24   : > { %589 = vmatpush3.bf16.msra.mxu0 %v632_v5 }
  0x25   : > { %590 = vmatprep.subr.bf16.mxu0 %v662_v2 }
  0x28   : > { %591 = vmatpush3.bf16.msra.mxu0 %v633_v6 }
  0x29   : > { %592 = vmatprep.subr.bf16.mxu0 %v662_v2 }
  0x2c   : > { %593 = vmatpush3.bf16.msra.mxu0 %v634_v7 }
  0x2d   : > { %594 = vmatprep.subr.bf16.mxu0 %v662_v2 }
  0x30   : > { %595 = vmatpush3.bf16.msra.mxu0 %v635_v8 }
  0x31   : > { %596 = vmatprep.subr.bf16.mxu0 %v662_v2 }
  0x34   : > { %597 = vmatpush3.bf16.msra.mxu0 %v636_v9 }
  0x37   : > { %599 = vmatmul.mubr.bf16.vlgmr.msra.gmra.mrb[0].mxu0 %v302_v10 }
 0x107   : > { %412 = sbr.rel (%p567_p7) target bundleno = 284 (0x11c), region = 44 }
 0x10a   : > { %v401_v12 = vpop.f32.mrb[0].mxu0 }
 0x10b   : > { %v407_v13 = vadd.f32 %v401_v12, %v301_v11  ;;  %v600_v14 = vpop.f32.mrb[1].mxu0 }
 0x10c   : > { %v404_v15 = vpop.f32.mrb[2].mxu0 }
 0x10d   : > { %408 = vst [vmem:[#allocation2] sm:$0xff] %v407_v13  ;;  %v601_v16 = vpop.f32.mrb[3].mxu0 }
 0x114   : > { %v413_v17 = vld [vmem:[#allocation2] sm:$0xff] }
 0x115   : > { %v421_v20 = vmul.f32 %v568_v18, %v413_v17 }
 0x117   : > { %v429_v21 = vadd.f32 %v569_v19, %v421_v20 }
 0x119   : > { %v430_v22 = vmax.f32 %v429_v21, 0.0 }
 0x11b   : > { %431 = vst [vmem:[%s745_s4] sm:$0xff] %v430_v22 }
 0x11c PF: > { %s14_s17 = sadd.s32 1, %s659_s17   ;;  %s746_s15 = smov %s655_s16 }
 0x11d   : > { %p11_p8 = scmp.ge.s32.totalorder %s14_s17, 11   ;;  %s747_s16 = smov %s749_s18 }
 0x11f   :  { %13 = sbr.rel (!%p11_p8) target bundleno = 2 (0x2), region = 83 }

// kernel: encoder_m_forward.60
= control target key start
LH: loop header
LB: loop body
LE: loop exit
PB: predicated region body
PF: predicated region fallthrough
CT: control target
= control target key end

     0   :  { %s1094_s15 = smov 0   ;;  %s1096_s16 = smov 0   ;;  %s1276_s0 = inlined_call_operand.vmem [shape: bf16[8,256], index: 0, kind: input, shape index: {}]   ;;  %s1277_s1 = inlined_call_operand.vmem [shape: bf16[256,512], index: 1, kind: input, shape index: {}]   ;;  %s1278_s2 = inlined_call_operand.vmem [shape: f32[1,512], index: 2, kind: input, shape index: {}]   ;;  %s1279_s3 = inlined_call_operand.vmem [shape: f32[1,512], index: 3, kind: input, shape index: {}]   ;;  %s1280_s4 = inlined_call_operand.vmem [shape: f32[8,512], index: 4, kind: output, shape index: {}]  }
   0x1   :  { %s1098_s17 = smov 0   ;;  %s1100_s18 = smov 0  }
   0x2   :  { %s1102_s19 = smov 0  }
   0x3 LB: > { %s29_s20 = sadd.s32 1, %s1063_s18  ;;  %p77_p1 = scmp.ne.s32.totalorder %s1055_s16, %s1051_s15  ;;  %s1067_s19 = sphi %s1102_s19, %s14_s19   ;;  %s1063_s18 = sphi %s1100_s18, %s1284_s18   ;;  %s1059_s17 = sphi %s1098_s17, %s1283_s17   ;;  %s1055_s16 = sphi %s1096_s16, %s1282_s16   ;;  %s1051_s15 = sphi %s1094_s15, %s1281_s15  }
   0x4   : > { %p31_p0 = scmp.ge.s32.totalorder %s29_s20, 2  ;;  %p78_p2 = scmp.eq.s32.totalorder %s1067_s19, 0 }
   0x5   : > { %s70_s22 = sadd.s32 1, %s1055_s16  ;;  %p892_p5 = scmp.ge.s32.totalorder %s1067_s19, 2 }
   0x6   : > { %s1286_s20 = smov (%p31_p0, %s29_s20), 0  ;;  %p79_p3 = por %p78_p2, %p77_p1 }
   0x7   : > { %s66_s21 = ssub.s32 %s1063_s18, %s1286_s20  ;;  %196 = sbr.rel (%p892_p5) target bundleno = 34 (0x22), region = 20 }
   0x8   : > { %p68_p4 = scmp.eq.s32.totalorder %s66_s21, 0 }
   0xa   : > { %s1129_s23 = scalar_select %p68_p4, %s1055_s16, %s70_s22  }
   0xe   : > { %199 = sbr.rel (!%p79_p3) target bundleno = 34 (0x22), region = 24  ;;  %s201_s24 = sand.u32 (%p79_p3), 1, %s1055_s16  }
   0xf   : > { %s938_s25 = sshll.u32 (%p79_p3), %s1063_s18, 3  ;;  %s893_s26 = sshll.u32 (%p79_p3), %s201_s24, 8 }
  0x10   : > { %s1137_s29 = scalar_lea.vmem (%p79_p3), %s1277_s1, %s938_s25  ;;  %s1142_s30 = scalar_lea.vmem (%p79_p3), [#allocation3], %s893_s26 }
  0x11   : > { %v299_v0 = vld [vmem:[%s1137_s29] sm:$0xff] (%p79_p3)  ;;  %v301_v1 = vld [vmem:[%s1137_s29 + $0x10] sm:$0xff] (%p79_p3) }
  0x12   : > { %v303_v2 = vld [vmem:[%s1137_s29 + $0x20] sm:$0xff] (%p79_p3)  ;;  %300 = vst [vmem:[%s1142_s30] sm:$0xff] (%p79_p3), %v299_v0  ;;  %302 = vst [vmem:[%s1142_s30 + $0x8] sm:$0xff] (%p79_p3), %v301_v1  ;;  %v305_v3 = vld [vmem:[%s1137_s29 + $0x30] sm:$0xff] (%p79_p3) }
  0x13   : > { %304 = vst [vmem:[%s1142_s30 + $0x10] sm:$0xff] (%p79_p3), %v303_v2  ;;  %v307_v4 = vld [vmem:[%s1137_s29 + $0x40] sm:$0xff] (%p79_p3)  ;;  %v309_v5 = vld [vmem:[%s1137_s29 + $0x50] sm:$0xff] (%p79_p3)  ;;  %306 = vst [vmem:[%s1142_s30 + $0x18] sm:$0xff] (%p79_p3), %v305_v3 }
  0x14   : > { %308 = vst [vmem:[%s1142_s30 + $0x20] sm:$0xff] (%p79_p3), %v307_v4  ;;  %310 = vst [vmem:[%s1142_s30 + $0x28] sm:$0xff] (%p79_p3), %v309_v5  ;;  %v311_v6 = vld [vmem:[%s1137_s29 + $0x60] sm:$0xff] (%p79_p3)  ;;  %v313_v7 = vld [vmem:[%s1137_s29 + $0x70] sm:$0xff] (%p79_p3) }
  0x15   : > { %v315_v8 = vld [vmem:[%s1137_s29 + $0x80] sm:$0xff]  ;;  %312 = vst [vmem:[%s1142_s30 + $0x30] sm:$0xff] %v311_v6  ;;  %314 = vst [vmem:[%s1142_s30 + $0x38] sm:$0xff] %v313_v7  ;;  %v317_v9 = vld [vmem:[%s1137_s29 + $0x90] sm:$0xff] }
  0x16   : > { %316 = vst [vmem:[%s1142_s30 + $0x40] sm:$0xff] %v315_v8  ;;  %v319_v10 = vld [vmem:[%s1137_s29 + $0xa0] sm:$0xff]  ;;  %v321_v11 = vld [vmem:[%s1137_s29 + $0xb0] sm:$0xff]  ;;  %318 = vst [vmem:[%s1142_s30 + $0x48] sm:$0xff] %v317_v9 }
  0x17   : > { %320 = vst [vmem:[%s1142_s30 + $0x50] sm:$0xff] %v319_v10  ;;  %322 = vst [vmem:[%s1142_s30 + $0x58] sm:$0xff] %v321_v11  ;;  %v323_v12 = vld [vmem:[%s1137_s29 + $0xc0] sm:$0xff]  ;;  %v325_v13 = vld [vmem:[%s1137_s29 + $0xd0] sm:$0xff] }
  0x18   : > { %v327_v14 = vld [vmem:[%s1137_s29 + $0xe0] sm:$0xff]  ;;  %324 = vst [vmem:[%s1142_s30 + $0x60] sm:$0xff] %v323_v12  ;;  %326 = vst [vmem:[%s1142_s30 + $0x68] sm:$0xff] %v325_v13  ;;  %v329_v15 = vld [vmem:[%s1137_s29 + $0xf0] sm:$0xff] }
  0x19   : > { %328 = vst [vmem:[%s1142_s30 + $0x70] sm:$0xff] %v327_v14  ;;  %v331_v16 = vld [vmem:[%s1137_s29 + $0x100] sm:$0xff]  ;;  %v333_v17 = vld [vmem:[%s1137_s29 + $0x110] sm:$0xff]  ;;  %330 = vst [vmem:[%s1142_s30 + $0x78] sm:$0xff] %v329_v15 }
  0x1a   : > { %332 = vst [vmem:[%s1142_s30 + $0x80] sm:$0xff] %v331_v16  ;;  %334 = vst [vmem:[%s1142_s30 + $0x88] sm:$0xff] %v333_v17  ;;  %v335_v18 = vld [vmem:[%s1137_s29 + $0x120] sm:$0xff]  ;;  %v337_v19 = vld [vmem:[%s1137_s29 + $0x130] sm:$0xff] }
  0x1b   : > { %v339_v20 = vld [vmem:[%s1137_s29 + $0x140] sm:$0xff]  ;;  %336 = vst [vmem:[%s1142_s30 + $0x90] sm:$0xff] %v335_v18  ;;  %338 = vst [vmem:[%s1142_s30 + $0x98] sm:$0xff] %v337_v19  ;;  %v341_v21 = vld [vmem:[%s1137_s29 + $0x150] sm:$0xff] }
  0x1c   : > { %340 = vst [vmem:[%s1142_s30 + $0xa0] sm:$0xff] %v339_v20  ;;  %v343_v22 = vld [vmem:[%s1137_s29 + $0x160] sm:$0xff]  ;;  %v345_v23 = vld [vmem:[%s1137_s29 + $0x170] sm:$0xff]  ;;  %342 = vst [vmem:[%s1142_s30 + $0xa8] sm:$0xff] %v341_v21 }
  0x1d   : > { %344 = vst [vmem:[%s1142_s30 + $0xb0] sm:$0xff] %v343_v22  ;;  %346 = vst [vmem:[%s1142_s30 + $0xb8] sm:$0xff] %v345_v23  ;;  %v347_v24 = vld [vmem:[%s1137_s29 + $0x180] sm:$0xff]  ;;  %v349_v25 = vld [vmem:[%s1137_s29 + $0x190] sm:$0xff] }
  0x1e   : > { %v351_v26 = vld [vmem:[%s1137_s29 + $0x1a0] sm:$0xff]  ;;  %348 = vst [vmem:[%s1142_s30 + $0xc0] sm:$0xff] %v347_v24  ;;  %350 = vst [vmem:[%s1142_s30 + $0xc8] sm:$0xff] %v349_v25  ;;  %v353_v27 = vld [vmem:[%s1137_s29 + $0x1b0] sm:$0xff] }
  0x1f   : > { %352 = vst [vmem:[%s1142_s30 + $0xd0] sm:$0xff] %v351_v26  ;;  %v355_v28 = vld [vmem:[%s1137_s29 + $0x1c0] sm:$0xff]  ;;  %v357_v29 = vld [vmem:[%s1137_s29 + $0x1d0] sm:$0xff]  ;;  %354 = vst [vmem:[%s1142_s30 + $0xd8] sm:$0xff] %v353_v27 }
  0x20   : > { %356 = vst [vmem:[%s1142_s30 + $0xe0] sm:$0xff] %v355_v28  ;;  %358 = vst [vmem:[%s1142_s30 + $0xe8] sm:$0xff] %v357_v29  ;;  %v359_v30 = vld [vmem:[%s1137_s29 + $0x1e0] sm:$0xff]  ;;  %v361_v31 = vld [vmem:[%s1137_s29 + $0x1f0] sm:$0xff] }
  0x21   : > { %360 = vst [vmem:[%s1142_s30 + $0xf0] sm:$0xff] %v359_v30  ;;  %362 = vst [vmem:[%s1142_s30 + $0xf8] sm:$0xff] %v361_v31 }
  0x22 PF: > { %p896_p6 = scmp.ge.s32.totalorder %s1067_s19, 1  ;;  %p383_p7 = scmp.lt.s32.totalorder %s1067_s19, 3 }
  0x24   : > { %p384_p8 = pnand %p896_p6, %p383_p7 }
  0x25   : > { %s390_s5 = sand.u32 (!%p384_p8), 1, %s1051_s15   ;;  %v1211_v32 = vld [vmem:[%s1276_s0] sm:$0xff] (!%p384_p8)  ;;  %s898_s10 = sshll.u32 (!%p384_p8), %s1059_s17, 1  ;;  %v728_v3 = vlaneseq (!%p384_p8) }
  0x26   : > { %387 = sbr.rel (%p384_p8) target bundleno = 323 (0x143), region = 70  ;;  %s897_s8 = sshll.u32 (!%p384_p8), %s390_s5, 8  ;;  %v903_v33 = vcombine.high (!%p384_p8), %v1211_v32, %v1211_v32  ;;  %v902_v2 = vcombine.low (!%p384_p8), %v1211_v32, %v1211_v32 }
  0x27   : > { %s1215_s9 = scalar_lea.vmem (!%p384_p8), [#allocation3], %s897_s8  ;;  %p449_p9 = scmp.lt.s32.totalorder (!%p384_p8), %s898_s10, 3  ;;  %v729_v4 = vshrl.u32 (!%p384_p8), %v728_v3, 7 }
  0x28   : > { %v979_v34 = vld [vmem:[%s1215_s9 + $0x4] ss:$8 sps:$4 sm:$0xff] (!%p384_p8)   ;;  %708 = vmatprep.mubr.bf16.mxu0 (!%p384_p8), %v903_v33  ;;  %v981_v35 = vld [vmem:[%s1215_s9] ss:$8 sps:$4 sm:$0xff] (!%p384_p8)   ;;  %v982_v36 = vld [vmem:[%s1215_s9 + $0x14] ss:$8 sps:$4 sm:$0xff] (!%p384_p8)  }
  0x29   : > { %676 = vmatprep.subr.bf16.mxu0 (!%p384_p8), %v979_v34  ;;  %v984_v37 = vld [vmem:[%s1215_s9 + $0x10] ss:$8 sps:$4 sm:$0xff] (!%p384_p8)   ;;  %v985_v38 = vld [vmem:[%s1215_s9 + $0x24] ss:$8 sps:$4 sm:$0xff] (!%p384_p8)   ;;  %v987_v39 = vld [vmem:[%s1215_s9 + $0x20] ss:$8 sps:$4 sm:$0xff] (!%p384_p8)  }
  0x2a   : > { %677 = vmatpush1.bf16.msra.mxu0 (!%p384_p8), %v981_v35  ;;  %v988_v40 = vld [vmem:[%s1215_s9 + $0x34] ss:$8 sps:$4 sm:$0xff] (!%p384_p8)   ;;  %v990_v41 = vld [vmem:[%s1215_s9 + $0x30] ss:$8 sps:$4 sm:$0xff] (!%p384_p8)   ;;  %v991_v42 = vld [vmem:[%s1215_s9 + $0x44] ss:$8 sps:$4 sm:$0xff] (!%p384_p8)  }
  0x2b   : > { %678 = vmatprep.subr.bf16.mxu0 (!%p384_p8), %v982_v36  ;;  %v993_v43 = vld [vmem:[%s1215_s9 + $0x40] ss:$8 sps:$4 sm:$0xff] (!%p384_p8)   ;;  %v994_v44 = vld [vmem:[%s1215_s9 + $0x54] ss:$8 sps:$4 sm:$0xff] (!%p384_p8)   ;;  %v996_v45 = vld [vmem:[%s1215_s9 + $0x50] ss:$8 sps:$4 sm:$0xff] (!%p384_p8)  }
  0x2c   : > { %v997_v46 = vld [vmem:[%s1215_s9 + $0x64] ss:$8 sps:$4 sm:$0xff] (!%p384_p8)   ;;  %v999_v47 = vld [vmem:[%s1215_s9 + $0x60] ss:$8 sps:$4 sm:$0xff] (!%p384_p8)   ;;  %v1000_v48 = vld [vmem:[%s1215_s9 + $0x74] ss:$8 sps:$4 sm:$0xff] (!%p384_p8)  }
  0x2d   : > { %v1002_v49 = vld [vmem:[%s1215_s9 + $0x70] ss:$8 sps:$4 sm:$0xff]   ;;  %v1003_v50 = vld [vmem:[%s1215_s9 + $0x84] ss:$8 sps:$4 sm:$0xff]   ;;  %v1005_v51 = vld [vmem:[%s1215_s9 + $0x80] ss:$8 sps:$4 sm:$0xff]  }
  0x2e   : > { %679 = vmatpush1.bf16.msra.mxu0 %v984_v37  ;;  %v1006_v52 = vld [vmem:[%s1215_s9 + $0x94] ss:$8 sps:$4 sm:$0xff]   ;;  %v1008_v53 = vld [vmem:[%s1215_s9 + $0x90] ss:$8 sps:$4 sm:$0xff]   ;;  %v1009_v54 = vld [vmem:[%s1215_s9 + $0xa4] ss:$8 sps:$4 sm:$0xff]  }
  0x2f   : > { %680 = vmatprep.subr.bf16.mxu0 %v985_v38  ;;  %v1011_v55 = vld [vmem:[%s1215_s9 + $0xa0] ss:$8 sps:$4 sm:$0xff]   ;;  %v1012_v56 = vld [vmem:[%s1215_s9 + $0xb4] ss:$8 sps:$4 sm:$0xff]   ;;  %v1014_v57 = vld [vmem:[%s1215_s9 + $0xb0] ss:$8 sps:$4 sm:$0xff]  }
  0x30   : > { %v1015_v58 = vld [vmem:[%s1215_s9 + $0xc4] ss:$8 sps:$4 sm:$0xff]   ;;  %v1017_v59 = vld [vmem:[%s1215_s9 + $0xc0] ss:$8 sps:$4 sm:$0xff]   ;;  %v1018_v60 = vld [vmem:[%s1215_s9 + $0xd4] ss:$8 sps:$4 sm:$0xff]  }
  0x31   : > { %v1020_v61 = vld [vmem:[%s1215_s9 + $0xd0] ss:$8 sps:$4 sm:$0xff]   ;;  %v1021_v62 = vld [vmem:[%s1215_s9 + $0xe4] ss:$8 sps:$4 sm:$0xff]   ;;  %v1023_v63 = vld [vmem:[%s1215_s9 + $0xe0] ss:$8 sps:$4 sm:$0xff]  }
  0x32   : > { %681 = vmatpush1.bf16.msra.mxu0 %v987_v39  ;;  %v1024_v0 = vld [vmem:[%s1215_s9 + $0xf4] ss:$8 sps:$4 sm:$0xff]   ;;  %v1026_v1 = vld [vmem:[%s1215_s9 + $0xf0] ss:$8 sps:$4 sm:$0xff]   ;;  %s1288_s10 = smov (!%p449_p9, %s898_s10), 3  ;;  %v730_v5 = vsub.s32 0, %v729_v4 }
  0x33   : > { %682 = vmatprep.subr.bf16.mxu0 %v988_v40  ;;  %s451_s13 = scalar_lea.vmem %s1278_s2, %s1288_s10  ;;  %s456_s21 = scalar_lea.vmem %s1279_s3, %s1288_s10  ;;  %v734_v7 = vsub.s32 1, %v729_v4 }
  0x34   : > { %v726_v6 = vld [vmem:[%s451_s13] sm:$0x3]  ;;  %s901_s22 = sshll.u32 %s1288_s10, 3 }
  0x35   : > { %v740_v8 = vld [vmem:[%s456_s21] sm:$0x3]  ;;  %v731_v9 = vrot.slane %v726_v6, %v730_v5  ;;  %v735_v10 = vrot.slane %v726_v6, %v734_v7  ;;  %s466_s25 = scalar_lea.vmem %s1280_s4, %s901_s22 }
  0x36   : > { %683 = vmatpush1.bf16.msra.mxu0 %v990_v41  ;;  %v745_v11 = vrot.slane %v740_v8, %v730_v5  ;;  %v749_v13 = vrot.slane %v740_v8, %v734_v7 }
  0x37   : > { %684 = vmatprep.subr.bf16.mxu0 %v991_v42 }
  0x3a   : > { %685 = vmatpush1.bf16.msra.mxu0 %v993_v43 }
  0x3b   : > { %686 = vmatprep.subr.bf16.mxu0 %v994_v44 }
  0x3e   : > { %687 = vmatpush1.bf16.msra.mxu0 %v996_v45 }
  0x3f   : > { %688 = vmatprep.subr.bf16.mxu0 %v997_v46 }
  0x42   : > { %689 = vmatpush1.bf16.msra.mxu0 %v999_v47 }
  0x43   : > { %690 = vmatprep.subr.bf16.mxu0 %v1000_v48 }
  0x46   : > { %691 = vmatpush1.bf16.msra.mxu0 %v1002_v49 }
  0x47   : > { %692 = vmatprep.subr.bf16.mxu0 %v1003_v50 }
  0x4a   : > { %693 = vmatpush1.bf16.msra.mxu0 %v1005_v51 }
  0x4b   : > { %694 = vmatprep.subr.bf16.mxu0 %v1006_v52 }
  0x4e   : > { %695 = vmatpush1.bf16.msra.mxu0 %v1008_v53 }
  0x4f   : > { %696 = vmatprep.subr.bf16.mxu0 %v1009_v54 }
  0x52   : > { %697 = vmatpush1.bf16.msra.mxu0 %v1011_v55 }
  0x53   : > { %698 = vmatprep.subr.bf16.mxu0 %v1012_v56 }
  0x56   : > { %699 = vmatpush1.bf16.msra.mxu0 %v1014_v57 }
  0x57   : > { %700 = vmatprep.subr.bf16.mxu0 %v1015_v58 }
  0x5a   : > { %701 = vmatpush1.bf16.msra.mxu0 %v1017_v59 }
  0x5b   : > { %702 = vmatprep.subr.bf16.mxu0 %v1018_v60 }
  0x5e   : > { %703 = vmatpush1.bf16.msra.mxu0 %v1020_v61 }
  0x5f   : > { %704 = vmatprep.subr.bf16.mxu0 %v1021_v62 }
  0x62   : > { %705 = vmatpush1.bf16.msra.mxu0 %v1023_v63 }
  0x63   : > { %706 = vmatprep.subr.bf16.mxu0 %v1024_v0 }
  0x66   : > { %707 = vmatpush1.bf16.msra.mxu0 %v1026_v1 }
  0x69   : > { %709 = vmatmul.mubr.bf16.vlgmr.msra.gmra.mrb[0].mxu0 %v902_v2 }
 0x13c   : > { %v710_v12 = vpop.f32.mrb[0].mxu0 }
 0x13d   : > { %v738_v14 = vmul.f32 %v731_v9, %v710_v12  ;;  %v712_v15 = vpop.f32.mrb[1].mxu0 }
 0x13e   : > { %v739_v16 = vmul.f32 %v735_v10, %v712_v15  ;;  %v714_v17 = vpop.f32.mrb[2].mxu0 }
 0x13f   : > { %v752_v18 = vadd.f32 %v745_v11, %v738_v14  ;;  %v715_v19 = vpop.f32.mrb[3].mxu0 }
 0x140   : > { %v753_v20 = vadd.f32 %v749_v13, %v739_v16 }
 0x141   : > { %754 = vst [vmem:[%s466_s25] sm:$0xff] %v752_v18 }
 0x142   : > { %755 = vst [vmem:[%s466_s25 + $0x8] sm:$0xff] %v753_v20 }
 0x143 PF: > { %s14_s19 = sadd.s32 1, %s1067_s19   ;;  %s1281_s15 = smov %s1055_s16 }
 0x144   : > { %p11_p10 = scmp.ge.s32.totalorder %s14_s19, 4   ;;  %s1282_s16 = smov %s1129_s23 }
 0x145   : > { %s1283_s17 = smov %s1063_s18  ;;  %s1284_s18 = smov %s1286_s20 }
 0x146   :  { %13 = sbr.rel (!%p11_p10) target bundleno = 3 (0x3), region = 126 }

// kernel: encoder_m_forward.61
= control target key start
LH: loop header
LB: loop body
LE: loop exit
PB: predicated region body
PF: predicated region fallthrough
CT: control target
= control target key end

     0   :  { %s969_s18 = smov 0   ;;  %s971_s19 = smov 0   ;;  %s1064_s0 = inlined_call_operand.vmem [shape: bf16[8,128], index: 0, kind: input, shape index: {}]   ;;  %s1065_s1 = inlined_call_operand.vmem [shape: bf16[128,512], index: 1, kind: input, shape index: {}]   ;;  %s1066_s2 = inlined_call_operand.vmem [shape: f32[1,512], index: 2, kind: input, shape index: {}]   ;;  %s1067_s3 = inlined_call_operand.vmem [shape: f32[1,512], index: 3, kind: input, shape index: {}]   ;;  %s1068_s4 = inlined_call_operand.vmem [shape: f32[8,512], index: 4, kind: input, shape index: {}, may-alias: {4,5}]   ;;  %s1069_s5 = inlined_call_operand.vmem [shape: f32[8,512], index: 5, kind: output, shape index: {}, may-alias: {4,5}]  }
   0x1   :  { %s973_s20 = smov 0   ;;  %s975_s21 = smov 0  }
   0x2   :  { %s977_s22 = smov 0  }
   0x3 LB: > { %s30_s23 = sadd.s32 1, %s932_s21  ;;  %p78_p1 = scmp.ne.s32.totalorder %s924_s19, %s920_s18  ;;  %s936_s22 = sphi %s977_s22, %s15_s22   ;;  %s932_s21 = sphi %s975_s21, %s1073_s21   ;;  %s928_s20 = sphi %s973_s20, %s1072_s20   ;;  %s924_s19 = sphi %s971_s19, %s1071_s19   ;;  %s920_s18 = sphi %s969_s18, %s1070_s18  }
   0x4   : > { %p32_p0 = scmp.ge.s32.totalorder %s30_s23, 2  ;;  %p79_p2 = scmp.eq.s32.totalorder %s936_s22, 0 }
   0x5   : > { %s71_s25 = sadd.s32 1, %s924_s19  ;;  %p802_p5 = scmp.ge.s32.totalorder %s936_s22, 2 }
   0x6   : > { %s1075_s23 = smov (%p32_p0, %s30_s23), 0  ;;  %p80_p3 = por %p79_p2, %p78_p1 }
   0x7   : > { %s67_s24 = ssub.s32 %s932_s21, %s1075_s23  ;;  %222 = sbr.rel (%p802_p5) target bundleno = 26 (0x1a), region = 20 }
   0x8   : > { %p69_p4 = scmp.eq.s32.totalorder %s67_s24, 0 }
   0xa   : > { %s1004_s26 = scalar_select %p69_p4, %s924_s19, %s71_s25  }
   0xe   : > { %225 = sbr.rel (!%p80_p3) target bundleno = 26 (0x1a), region = 24  ;;  %s227_s27 = sand.u32 (%p80_p3), 1, %s924_s19  }
   0xf   : > { %s832_s28 = sshll.u32 (%p80_p3), %s932_s21, 3  ;;  %s803_s29 = sshll.u32 (%p80_p3), %s227_s27, 7 }
  0x10   : > { %s1012_s7 = scalar_lea.vmem (%p80_p3), %s1065_s1, %s832_s28  ;;  %s229_s8 = scalar_lea.vmem (%p80_p3), [#allocation3], %s803_s29 }
  0x11   : > { %v293_v0 = vld [vmem:[%s1012_s7] sm:$0xff] (%p80_p3)  ;;  %v295_v1 = vld [vmem:[%s1012_s7 + $0x10] sm:$0xff] (%p80_p3) }
  0x12   : > { %v297_v2 = vld [vmem:[%s1012_s7 + $0x20] sm:$0xff] (%p80_p3)  ;;  %294 = vst [vmem:[%s229_s8] sm:$0xff] (%p80_p3), %v293_v0  ;;  %296 = vst [vmem:[%s229_s8 + $0x8] sm:$0xff] (%p80_p3), %v295_v1  ;;  %v299_v3 = vld [vmem:[%s1012_s7 + $0x30] sm:$0xff] (%p80_p3) }
  0x13   : > { %298 = vst [vmem:[%s229_s8 + $0x10] sm:$0xff] (%p80_p3), %v297_v2  ;;  %v301_v4 = vld [vmem:[%s1012_s7 + $0x40] sm:$0xff] (%p80_p3)  ;;  %v303_v5 = vld [vmem:[%s1012_s7 + $0x50] sm:$0xff] (%p80_p3)  ;;  %300 = vst [vmem:[%s229_s8 + $0x18] sm:$0xff] (%p80_p3), %v299_v3 }
  0x14   : > { %302 = vst [vmem:[%s229_s8 + $0x20] sm:$0xff] (%p80_p3), %v301_v4  ;;  %304 = vst [vmem:[%s229_s8 + $0x28] sm:$0xff] (%p80_p3), %v303_v5  ;;  %v305_v6 = vld [vmem:[%s1012_s7 + $0x60] sm:$0xff] (%p80_p3)  ;;  %v307_v7 = vld [vmem:[%s1012_s7 + $0x70] sm:$0xff] (%p80_p3) }
  0x15   : > { %v309_v8 = vld [vmem:[%s1012_s7 + $0x80] sm:$0xff]  ;;  %306 = vst [vmem:[%s229_s8 + $0x30] sm:$0xff] %v305_v6  ;;  %308 = vst [vmem:[%s229_s8 + $0x38] sm:$0xff] %v307_v7  ;;  %v311_v9 = vld [vmem:[%s1012_s7 + $0x90] sm:$0xff] }
  0x16   : > { %310 = vst [vmem:[%s229_s8 + $0x40] sm:$0xff] %v309_v8  ;;  %v313_v10 = vld [vmem:[%s1012_s7 + $0xa0] sm:$0xff]  ;;  %v315_v11 = vld [vmem:[%s1012_s7 + $0xb0] sm:$0xff]  ;;  %312 = vst [vmem:[%s229_s8 + $0x48] sm:$0xff] %v311_v9 }
  0x17   : > { %314 = vst [vmem:[%s229_s8 + $0x50] sm:$0xff] %v313_v10  ;;  %316 = vst [vmem:[%s229_s8 + $0x58] sm:$0xff] %v315_v11  ;;  %v317_v12 = vld [vmem:[%s1012_s7 + $0xc0] sm:$0xff]  ;;  %v319_v13 = vld [vmem:[%s1012_s7 + $0xd0] sm:$0xff] }
  0x18   : > { %v321_v14 = vld [vmem:[%s1012_s7 + $0xe0] sm:$0xff]  ;;  %318 = vst [vmem:[%s229_s8 + $0x60] sm:$0xff] %v317_v12  ;;  %320 = vst [vmem:[%s229_s8 + $0x68] sm:$0xff] %v319_v13  ;;  %v323_v15 = vld [vmem:[%s1012_s7 + $0xf0] sm:$0xff] }
  0x19   : > { %322 = vst [vmem:[%s229_s8 + $0x70] sm:$0xff] %v321_v14  ;;  %324 = vst [vmem:[%s229_s8 + $0x78] sm:$0xff] %v323_v15 }
  0x1a PF: > { %p806_p6 = scmp.ge.s32.totalorder %s936_s22, 1  ;;  %p358_p7 = scmp.lt.s32.totalorder %s936_s22, 3 }
  0x1c   : > { %p359_p8 = pnand %p806_p6, %p358_p7 }
  0x1d   : > { %s365_s9 = sand.u32 (!%p359_p8), 1, %s920_s18   ;;  %v938_v16 = vmov (!%p359_p8), 0   ;;  %v468_v33 = vld [vmem:[%s1064_s0] sm:$0xf] (!%p359_p8)  ;;  %s808_s14 = sshll.u32 (!%p359_p8), %s928_s20, 1  ;;  %v617_v34 = vlaneseq (!%p359_p8) }
  0x1e   : > { %362 = sbr.rel (%p359_p8) target bundleno = 287 (0x11f), region = 74  ;;  %s807_s10 = sshll.u32 (!%p359_p8), %s365_s9, 7  ;;  %597 = vmatprep.mubr.bf16.mxu0 (!%p359_p8), %v938_v16 }
  0x1f   : > { %s367_s11 = scalar_lea.vmem (!%p359_p8), [#allocation3], %s807_s10  ;;  %p430_p9 = scmp.lt.s32.totalorder (!%p359_p8), %s808_s14, 3  ;;  %v618_v35 = vshrl.u32 (!%p359_p8), %v617_v34, 7 }
  0x20   : > { %v874_v17 = vld [vmem:[%s367_s11 + $0x4] ss:$8 sps:$4 sm:$0xff] (!%p359_p8)   ;;  %v876_v18 = vld [vmem:[%s367_s11] ss:$8 sps:$4 sm:$0xff] (!%p359_p8)   ;;  %v877_v19 = vld [vmem:[%s367_s11 + $0x14] ss:$8 sps:$4 sm:$0xff] (!%p359_p8)  }
  0x21   : > { %565 = vmatprep.subr.bf16.mxu0 (!%p359_p8), %v874_v17  ;;  %v879_v20 = vld [vmem:[%s367_s11 + $0x10] ss:$8 sps:$4 sm:$0xff] (!%p359_p8)   ;;  %v880_v21 = vld [vmem:[%s367_s11 + $0x24] ss:$8 sps:$4 sm:$0xff] (!%p359_p8)   ;;  %v882_v22 = vld [vmem:[%s367_s11 + $0x20] ss:$8 sps:$4 sm:$0xff] (!%p359_p8)  }
  0x22   : > { %566 = vmatpush1.bf16.msra.mxu0 (!%p359_p8), %v876_v18  ;;  %v883_v23 = vld [vmem:[%s367_s11 + $0x34] ss:$8 sps:$4 sm:$0xff] (!%p359_p8)   ;;  %v885_v24 = vld [vmem:[%s367_s11 + $0x30] ss:$8 sps:$4 sm:$0xff] (!%p359_p8)   ;;  %v886_v25 = vld [vmem:[%s367_s11 + $0x44] ss:$8 sps:$4 sm:$0xff] (!%p359_p8)  }
  0x23   : > { %567 = vmatprep.subr.bf16.mxu0 (!%p359_p8), %v877_v19  ;;  %v888_v26 = vld [vmem:[%s367_s11 + $0x40] ss:$8 sps:$4 sm:$0xff] (!%p359_p8)   ;;  %v889_v27 = vld [vmem:[%s367_s11 + $0x54] ss:$8 sps:$4 sm:$0xff] (!%p359_p8)   ;;  %v891_v28 = vld [vmem:[%s367_s11 + $0x50] ss:$8 sps:$4 sm:$0xff] (!%p359_p8)  }
  0x24   : > { %v892_v29 = vld [vmem:[%s367_s11 + $0x64] ss:$8 sps:$4 sm:$0xff] (!%p359_p8)   ;;  %v894_v30 = vld [vmem:[%s367_s11 + $0x60] ss:$8 sps:$4 sm:$0xff] (!%p359_p8)   ;;  %v895_v31 = vld [vmem:[%s367_s11 + $0x74] ss:$8 sps:$4 sm:$0xff] (!%p359_p8)  }
  0x25   : > { %v897_v32 = vld [vmem:[%s367_s11 + $0x70] ss:$8 sps:$4 sm:$0xff]   ;;  %s1077_s14 = smov (!%p430_p9, %s808_s14), 3  ;;  %v619_v36 = vsub.s32 0, %v618_v35  ;;  %v623_v38 = vsub.s32 1, %v618_v35 }
  0x26   : > { %568 = vmatpush1.bf16.msra.mxu0 %v879_v20  ;;  %s432_s17 = scalar_lea.vmem %s1066_s2, %s1077_s14  ;;  %s437_s25 = scalar_lea.vmem %s1067_s3, %s1077_s14 }
  0x27   : > { %569 = vmatprep.subr.bf16.mxu0 %v880_v21  ;;  %v615_v37 = vld [vmem:[%s432_s17] sm:$0x3]  ;;  %s811_s27 = sshll.u32 %s1077_s14, 3 }
  0x28   : > { %v629_v39 = vld [vmem:[%s437_s25] sm:$0x3]  ;;  %v620_v40 = vrot.slane %v615_v37, %v619_v36  ;;  %v624_v41 = vrot.slane %v615_v37, %v623_v38  ;;  %s447_s29 = scalar_lea.vmem %s1068_s4, %s811_s27  ;;  %s457_s7 = scalar_lea.vmem %s1069_s5, %s811_s27 }
  0x29   : > { %v634_v42 = vrot.slane %v629_v39, %v619_v36  ;;  %v638_v44 = vrot.slane %v629_v39, %v623_v38  ;;  %v643_v47 = vld [vmem:[%s447_s29] sm:$0xff]  ;;  %v644_v51 = vld [vmem:[%s447_s29 + $0x8] sm:$0xff] }
  0x2a   : > { %570 = vmatpush1.bf16.msra.mxu0 %v882_v22 }
  0x2b   : > { %571 = vmatprep.subr.bf16.mxu0 %v883_v23 }
  0x2e   : > { %572 = vmatpush1.bf16.msra.mxu0 %v885_v24 }
  0x2f   : > { %573 = vmatprep.subr.bf16.mxu0 %v886_v25 }
  0x32   : > { %574 = vmatpush1.bf16.msra.mxu0 %v888_v26 }
  0x33   : > { %575 = vmatprep.subr.bf16.mxu0 %v889_v27 }
  0x36   : > { %576 = vmatpush1.bf16.msra.mxu0 %v891_v28 }
  0x37   : > { %577 = vmatprep.subr.bf16.mxu0 %v892_v29 }
  0x3a   : > { %578 = vmatpush1.bf16.msra.mxu0 %v894_v30 }
  0x3b   : > { %579 = vmatprep.subr.bf16.mxu0 %v895_v31 }
  0x3e   : > { %580 = vmatpush1.bf16.msra.mxu0 %v897_v32 }
  0x41   : > { %598 = vmatmul.mubr.bf16.vlgmr.msra.gmra.mrb[0].mxu0 %v468_v33 }
 0x114   : > { %v599_v43 = vpop.f32.mrb[0].mxu0 }
 0x115   : > { %v627_v45 = vmul.f32 %v620_v40, %v599_v43  ;;  %v601_v46 = vpop.f32.mrb[1].mxu0 }
 0x116   : > { %v628_v48 = vmul.f32 %v624_v41, %v601_v46  ;;  %v603_v49 = vpop.f32.mrb[2].mxu0 }
 0x117   : > { %v641_v50 = vadd.f32 %v634_v42, %v627_v45  ;;  %v604_v52 = vpop.f32.mrb[3].mxu0 }
 0x118   : > { %v642_v53 = vadd.f32 %v638_v44, %v628_v48 }
 0x119   : > { %v645_v54 = vadd.f32 %v643_v47, %v641_v50 }
 0x11a   : > { %v646_v55 = vadd.f32 %v644_v51, %v642_v53 }
 0x11b   : > { %v647_v56 = vmax.f32 %v645_v54, 0.0 }
 0x11c   : > { %v648_v57 = vmax.f32 %v646_v55, 0.0 }
 0x11d   : > { %649 = vst [vmem:[%s457_s7] sm:$0xff] %v647_v56 }
 0x11e   : > { %650 = vst [vmem:[%s457_s7 + $0x8] sm:$0xff] %v648_v57 }
 0x11f PF: > { %s15_s22 = sadd.s32 1, %s936_s22   ;;  %s1070_s18 = smov %s924_s19 }
 0x120   : > { %p12_p10 = scmp.ge.s32.totalorder %s15_s22, 4   ;;  %s1071_s19 = smov %s1004_s26 }
 0x121   : > { %s1072_s20 = smov %s932_s21  ;;  %s1073_s21 = smov %s1075_s23 }
 0x122   :  { %14 = sbr.rel (!%p12_p10) target bundleno = 3 (0x3), region = 133 }

// kernel: encoder_m_forward.62
= control target key start
LH: loop header
LB: loop body
LE: loop exit
PB: predicated region body
PF: predicated region fallthrough
CT: control target
= control target key end

     0   :  { %s658_s1 = inlined_call_operand.vmem [shape: bf16[512,128], index: 1, kind: input, shape index: {}]   ;;  %s659_s0 = inlined_call_operand.vmem [shape: bf16[8,512], index: 0, kind: input, shape index: {}]   ;;  %s660_s2 = inlined_call_operand.vmem [shape: f32[1,128], index: 2, kind: input, shape index: {}]   ;;  %s661_s3 = inlined_call_operand.vmem [shape: f32[1,128], index: 3, kind: input, shape index: {}]   ;;  %s662_s4 = inlined_call_operand.vmem [shape: f32[8,128], index: 4, kind: output, shape index: {}]  }
   0x1   :  { %v486_v0 = vld [vmem:[%s658_s1 + $0x40] sm:$0xff]   ;;  %v490_v4 = vld [vmem:[%s658_s1 + $0x48] sm:$0xff]   ;;  %v494_v8 = vld [vmem:[%s658_s1 + $0x50] sm:$0xff]  }
   0x2   :  { %v487_v1 = vld [vmem:[%s658_s1 + $0xc0] sm:$0xff]   ;;  %442 = vmatprep.subr.bf16.mxu0 %v486_v0  ;;  %v491_v5 = vld [vmem:[%s658_s1 + $0xc8] sm:$0xff]   ;;  %v495_v9 = vld [vmem:[%s658_s1 + $0xd0] sm:$0xff]  }
   0x3   :  { %v488_v2 = vld [vmem:[%s658_s1] sm:$0xff]   ;;  %464 = vmatprep.subr.bf16.mxu1 %v487_v1  ;;  %v492_v6 = vld [vmem:[%s658_s1 + $0x8] sm:$0xff]   ;;  %v496_v10 = vld [vmem:[%s658_s1 + $0x10] sm:$0xff]  }
   0x4   :  { %v489_v3 = vld [vmem:[%s658_s1 + $0x80] sm:$0xff]   ;;  %443 = vmatpush3.bf16.msra.mxu0 %v488_v2  ;;  %v493_v7 = vld [vmem:[%s658_s1 + $0x88] sm:$0xff]   ;;  %v497_v11 = vld [vmem:[%s658_s1 + $0x90] sm:$0xff]  }
   0x5   :  { %465 = vmatpush3.bf16.msra.mxu1 %v489_v3  ;;  %444 = vmatprep.subr.bf16.mxu0 %v490_v4  ;;  %v498_v12 = vld [vmem:[%s658_s1 + $0x58] sm:$0xff]   ;;  %v502_v16 = vld [vmem:[%s658_s1 + $0x60] sm:$0xff]   ;;  %v506_v20 = vld [vmem:[%s658_s1 + $0x68] sm:$0xff]  }
   0x6   :  { %466 = vmatprep.subr.bf16.mxu1 %v491_v5  ;;  %v499_v13 = vld [vmem:[%s658_s1 + $0xd8] sm:$0xff]   ;;  %v503_v17 = vld [vmem:[%s658_s1 + $0xe0] sm:$0xff]   ;;  %v507_v21 = vld [vmem:[%s658_s1 + $0xe8] sm:$0xff]  }
   0x7   :  { %v500_v14 = vld [vmem:[%s658_s1 + $0x18] sm:$0xff]   ;;  %v504_v18 = vld [vmem:[%s658_s1 + $0x20] sm:$0xff]   ;;  %v508_v22 = vld [vmem:[%s658_s1 + $0x28] sm:$0xff]  }
   0x8   :  { %445 = vmatpush3.bf16.msra.mxu0 %v492_v6  ;;  %v501_v15 = vld [vmem:[%s658_s1 + $0x98] sm:$0xff]   ;;  %v505_v19 = vld [vmem:[%s658_s1 + $0xa0] sm:$0xff]   ;;  %v509_v23 = vld [vmem:[%s658_s1 + $0xa8] sm:$0xff]  }
   0x9   :  { %467 = vmatpush3.bf16.msra.mxu1 %v493_v7  ;;  %446 = vmatprep.subr.bf16.mxu0 %v494_v8  ;;  %v510_v24 = vld [vmem:[%s658_s1 + $0x70] sm:$0xff]   ;;  %v514_v28 = vld [vmem:[%s658_s1 + $0x78] sm:$0xff]   ;;  %v24_v32 = vld [vmem:[%s659_s0] sm:$0xff] }
   0xa   :  { %468 = vmatprep.subr.bf16.mxu1 %v495_v9  ;;  %v511_v25 = vld [vmem:[%s658_s1 + $0xf0] sm:$0xff]   ;;  %v515_v29 = vld [vmem:[%s658_s1 + $0xf8] sm:$0xff]   ;;  %v25_v33 = vld [vmem:[%s659_s0 + $0x8] sm:$0xff]  ;;  %v404_v34 = vcombine.low %v24_v32, %v24_v32  ;;  %v405_v35 = vcombine.high %v24_v32, %v24_v32 }
   0xb   :  { %v512_v26 = vld [vmem:[%s658_s1 + $0x30] sm:$0xff]   ;;  %v516_v30 = vld [vmem:[%s658_s1 + $0x38] sm:$0xff]   ;;  %v406_v36 = vcombine.low %v25_v33, %v25_v33  ;;  %v407_v37 = vcombine.high %v25_v33, %v25_v33  ;;  %v440_v46 = vld [vmem:[%s660_s2] ss:$0 sm:$0xff] }
   0xc   :  { %447 = vmatpush3.bf16.msra.mxu0 %v496_v10  ;;  %v513_v27 = vld [vmem:[%s658_s1 + $0xb0] sm:$0xff]   ;;  %v517_v31 = vld [vmem:[%s658_s1 + $0xb8] sm:$0xff]   ;;  %328 = vmatprep.mubr.bf16.mxu0 %v405_v35  ;;  %v441_v50 = vld [vmem:[%s661_s3] ss:$0 sm:$0xff] }
   0xd   :  { %469 = vmatpush3.bf16.msra.mxu1 %v497_v11  ;;  %448 = vmatprep.subr.bf16.mxu0 %v498_v12 }
   0xe   :  { %470 = vmatprep.subr.bf16.mxu1 %v499_v13  ;;  %368 = vmatprep.mubr.bf16.mxu1 %v407_v37 }
  0x10   :  { %449 = vmatpush3.bf16.msra.mxu0 %v500_v14 }
  0x11   :  { %471 = vmatpush3.bf16.msra.mxu1 %v501_v15  ;;  %450 = vmatprep.subr.bf16.mxu0 %v502_v16 }
  0x12   :  { %472 = vmatprep.subr.bf16.mxu1 %v503_v17 }
  0x14   :  { %451 = vmatpush3.bf16.msra.mxu0 %v504_v18 }
  0x15   :  { %473 = vmatpush3.bf16.msra.mxu1 %v505_v19  ;;  %452 = vmatprep.subr.bf16.mxu0 %v506_v20 }
  0x16   :  { %474 = vmatprep.subr.bf16.mxu1 %v507_v21 }
  0x18   :  { %453 = vmatpush3.bf16.msra.mxu0 %v508_v22 }
  0x19   :  { %475 = vmatpush3.bf16.msra.mxu1 %v509_v23  ;;  %454 = vmatprep.subr.bf16.mxu0 %v510_v24 }
  0x1a   :  { %476 = vmatprep.subr.bf16.mxu1 %v511_v25 }
  0x1c   :  { %455 = vmatpush3.bf16.msra.mxu0 %v512_v26 }
  0x1d   :  { %477 = vmatpush3.bf16.msra.mxu1 %v513_v27  ;;  %456 = vmatprep.subr.bf16.mxu0 %v514_v28 }
  0x1e   :  { %478 = vmatprep.subr.bf16.mxu1 %v515_v29 }
  0x20   :  { %457 = vmatpush3.bf16.msra.mxu0 %v516_v30 }
  0x21   :  { %479 = vmatpush3.bf16.msra.mxu1 %v517_v31 }
  0x23   :  { %329 = vmatmul.mubr.bf16.vlgmr.msra.gmra.mrb[0].mxu0 %v404_v34 }
  0x24   :  { %369 = vmatmul.mubr.bf16.vlgmr.msra.gmra.mrb[0].mxu1 %v406_v36 }
  0xf6   :  { %v458_v38 = vpop.f32.mrb[0].mxu0 }
  0xf7   :  { %v480_v39 = vpop.f32.mrb[0].mxu1  ;;  %v459_v40 = vpop.f32.mrb[1].mxu0 }
  0xf8   :  { %v481_v41 = vpop.f32.mrb[1].mxu1  ;;  %v460_v42 = vadd.f32 %v459_v40, %v458_v38  ;;  %v461_v44 = vpop.f32.mrb[2].mxu0 }
  0xf9   :  { %v482_v43 = vadd.f32 %v481_v41, %v480_v39  ;;  %v483_v45 = vpop.f32.mrb[2].mxu1  ;;  %v462_v47 = vpop.f32.mrb[3].mxu0 }
  0xfa   :  { %v484_v48 = vpop.f32.mrb[3].mxu1 }
  0xfb   :  { %v371_v49 = vadd.f32 %v482_v43, %v460_v42 }
  0xfd   :  { %v389_v51 = vmul.f32 %v440_v46, %v371_v49 }
  0xff   :  { %v397_v52 = vadd.f32 %v441_v50, %v389_v51 }
 0x101   :  { %v398_v53 = vmax.f32 %v397_v52, 0.0 }
 0x103   :  { %399 = vst [vmem:[%s662_s4] sm:$0xff] %v398_v53 }

// kernel: encoder_m_forward.71
= control target key start
LH: loop header
LB: loop body
LE: loop exit
PB: predicated region body
PF: predicated region fallthrough
CT: control target
= control target key end

     0   :  { %s957_s1 = inlined_call_operand.vmem [shape: bf16[512,256], index: 1, kind: input, shape index: {}]   ;;  %s958_s0 = inlined_call_operand.vmem [shape: bf16[8,512], index: 0, kind: input, shape index: {}]   ;;  %s959_s2 = inlined_call_operand.vmem [shape: f32[1,256], index: 2, kind: input, shape index: {}]   ;;  %s960_s3 = inlined_call_operand.vmem [shape: f32[1,256], index: 3, kind: input, shape index: {}]   ;;  %s961_s4 = inlined_call_operand.vmem [shape: f32[8,256], index: 4, kind: output, shape index: {}]  }
   0x1   :  { %v622_v0 = vld [vmem:[%s957_s1 + $0x4] ss:$8 sps:$4 sm:$0xff]   ;;  %v626_v2 = vld [vmem:[%s957_s1] ss:$8 sps:$4 sm:$0xff]   ;;  %v628_v4 = vld [vmem:[%s957_s1 + $0x14] ss:$8 sps:$4 sm:$0xff]  }
   0x2   :  { %v624_v1 = vld [vmem:[%s957_s1 + $0x104] ss:$8 sps:$4 sm:$0xff]   ;;  %425 = vmatprep.subr.bf16.mxu1 %v622_v0  ;;  %v627_v3 = vld [vmem:[%s957_s1 + $0x100] ss:$8 sps:$4 sm:$0xff]   ;;  %v630_v5 = vld [vmem:[%s957_s1 + $0x114] ss:$8 sps:$4 sm:$0xff]  }
   0x3   :  { %466 = vmatprep.subr.bf16.mxu0 %v624_v1  ;;  %426 = vmatpush1.bf16.msra.mxu1 %v626_v2  ;;  %v632_v6 = vld [vmem:[%s957_s1 + $0x10] ss:$8 sps:$4 sm:$0xff]   ;;  %v634_v8 = vld [vmem:[%s957_s1 + $0x24] ss:$8 sps:$4 sm:$0xff]   ;;  %v638_v10 = vld [vmem:[%s957_s1 + $0x20] ss:$8 sps:$4 sm:$0xff]  }
   0x4   :  { %467 = vmatpush1.bf16.msra.mxu0 %v627_v3  ;;  %427 = vmatprep.subr.bf16.mxu1 %v628_v4  ;;  %v633_v7 = vld [vmem:[%s957_s1 + $0x110] ss:$8 sps:$4 sm:$0xff]   ;;  %v636_v9 = vld [vmem:[%s957_s1 + $0x124] ss:$8 sps:$4 sm:$0xff]   ;;  %v639_v11 = vld [vmem:[%s957_s1 + $0x120] ss:$8 sps:$4 sm:$0xff]  }
   0x5   :  { %468 = vmatprep.subr.bf16.mxu0 %v630_v5  ;;  %v640_v12 = vld [vmem:[%s957_s1 + $0x34] ss:$8 sps:$4 sm:$0xff]   ;;  %v644_v14 = vld [vmem:[%s957_s1 + $0x30] ss:$8 sps:$4 sm:$0xff]   ;;  %v646_v16 = vld [vmem:[%s957_s1 + $0x44] ss:$8 sps:$4 sm:$0xff]  }
   0x6   :  { %v642_v13 = vld [vmem:[%s957_s1 + $0x134] ss:$8 sps:$4 sm:$0xff]   ;;  %v645_v15 = vld [vmem:[%s957_s1 + $0x130] ss:$8 sps:$4 sm:$0xff]   ;;  %v648_v17 = vld [vmem:[%s957_s1 + $0x144] ss:$8 sps:$4 sm:$0xff]  }
   0x7   :  { %428 = vmatpush1.bf16.msra.mxu1 %v632_v6  ;;  %v650_v18 = vld [vmem:[%s957_s1 + $0x40] ss:$8 sps:$4 sm:$0xff]   ;;  %v652_v20 = vld [vmem:[%s957_s1 + $0x54] ss:$8 sps:$4 sm:$0xff]   ;;  %v656_v22 = vld [vmem:[%s957_s1 + $0x50] ss:$8 sps:$4 sm:$0xff]   ;;  %v518_v6 = vlaneseq }
   0x8   :  { %469 = vmatpush1.bf16.msra.mxu0 %v633_v7  ;;  %429 = vmatprep.subr.bf16.mxu1 %v634_v8  ;;  %v651_v19 = vld [vmem:[%s957_s1 + $0x140] ss:$8 sps:$4 sm:$0xff]   ;;  %v654_v21 = vld [vmem:[%s957_s1 + $0x154] ss:$8 sps:$4 sm:$0xff]   ;;  %v657_v23 = vld [vmem:[%s957_s1 + $0x150] ss:$8 sps:$4 sm:$0xff]  }
   0x9   :  { %470 = vmatprep.subr.bf16.mxu0 %v636_v9  ;;  %v658_v24 = vld [vmem:[%s957_s1 + $0x64] ss:$8 sps:$4 sm:$0xff]   ;;  %v662_v26 = vld [vmem:[%s957_s1 + $0x60] ss:$8 sps:$4 sm:$0xff]   ;;  %v664_v28 = vld [vmem:[%s957_s1 + $0x74] ss:$8 sps:$4 sm:$0xff]  }
   0xa   :  { %v660_v25 = vld [vmem:[%s957_s1 + $0x164] ss:$8 sps:$4 sm:$0xff]   ;;  %v663_v27 = vld [vmem:[%s957_s1 + $0x160] ss:$8 sps:$4 sm:$0xff]   ;;  %v666_v29 = vld [vmem:[%s957_s1 + $0x174] ss:$8 sps:$4 sm:$0xff]  }
   0xb   :  { %430 = vmatpush1.bf16.msra.mxu1 %v638_v10  ;;  %v668_v30 = vld [vmem:[%s957_s1 + $0x70] ss:$8 sps:$4 sm:$0xff]   ;;  %v670_v32 = vld [vmem:[%s957_s1 + $0x84] ss:$8 sps:$4 sm:$0xff]   ;;  %v674_v34 = vld [vmem:[%s957_s1 + $0x80] ss:$8 sps:$4 sm:$0xff]  }
   0xc   :  { %471 = vmatpush1.bf16.msra.mxu0 %v639_v11  ;;  %431 = vmatprep.subr.bf16.mxu1 %v640_v12  ;;  %v669_v31 = vld [vmem:[%s957_s1 + $0x170] ss:$8 sps:$4 sm:$0xff]   ;;  %v672_v33 = vld [vmem:[%s957_s1 + $0x184] ss:$8 sps:$4 sm:$0xff]   ;;  %v675_v35 = vld [vmem:[%s957_s1 + $0x180] ss:$8 sps:$4 sm:$0xff]  }
   0xd   :  { %472 = vmatprep.subr.bf16.mxu0 %v642_v13  ;;  %v676_v36 = vld [vmem:[%s957_s1 + $0x94] ss:$8 sps:$4 sm:$0xff]   ;;  %v680_v38 = vld [vmem:[%s957_s1 + $0x90] ss:$8 sps:$4 sm:$0xff]   ;;  %v682_v40 = vld [vmem:[%s957_s1 + $0xa4] ss:$8 sps:$4 sm:$0xff]  }
   0xe   :  { %v678_v37 = vld [vmem:[%s957_s1 + $0x194] ss:$8 sps:$4 sm:$0xff]   ;;  %v681_v39 = vld [vmem:[%s957_s1 + $0x190] ss:$8 sps:$4 sm:$0xff]   ;;  %v684_v41 = vld [vmem:[%s957_s1 + $0x1a4] ss:$8 sps:$4 sm:$0xff]  }
   0xf   :  { %432 = vmatpush1.bf16.msra.mxu1 %v644_v14  ;;  %v686_v42 = vld [vmem:[%s957_s1 + $0xa0] ss:$8 sps:$4 sm:$0xff]   ;;  %v688_v44 = vld [vmem:[%s957_s1 + $0xb4] ss:$8 sps:$4 sm:$0xff]   ;;  %v692_v49 = vld [vmem:[%s957_s1 + $0xb0] ss:$8 sps:$4 sm:$0xff]  }
  0x10   :  { %473 = vmatpush1.bf16.msra.mxu0 %v645_v15  ;;  %433 = vmatprep.subr.bf16.mxu1 %v646_v16  ;;  %v687_v43 = vld [vmem:[%s957_s1 + $0x1a0] ss:$8 sps:$4 sm:$0xff]   ;;  %v690_v45 = vld [vmem:[%s957_s1 + $0x1b4] ss:$8 sps:$4 sm:$0xff]   ;;  %v693_v50 = vld [vmem:[%s957_s1 + $0x1b0] ss:$8 sps:$4 sm:$0xff]  }
  0x11   :  { %474 = vmatprep.subr.bf16.mxu0 %v648_v17  ;;  %v25_v46 = vld [vmem:[%s958_s0] sm:$0xff]  ;;  %v26_v48 = vld [vmem:[%s958_s0 + $0x8] sm:$0xff]  ;;  %v700_v56 = vld [vmem:[%s957_s1 + $0xd4] ss:$8 sps:$4 sm:$0xff]   ;;  %v519_v7 = vshrl.u32 %v518_v6, 7 }
  0x12   :  { %v553_v47 = vcombine.high %v25_v46, %v25_v46  ;;  %v555_v51 = vcombine.high %v26_v48, %v26_v48  ;;  %v694_v52 = vld [vmem:[%s957_s1 + $0xc4] ss:$8 sps:$4 sm:$0xff]   ;;  %v698_v54 = vld [vmem:[%s957_s1 + $0xc0] ss:$8 sps:$4 sm:$0xff]   ;;  %v702_v57 = vld [vmem:[%s957_s1 + $0x1d4] ss:$8 sps:$4 sm:$0xff]   ;;  %v552_v4 = vcombine.low %v25_v46, %v25_v46  ;;  %v554_v5 = vcombine.low %v26_v48, %v26_v48 }
  0x13   :  { %434 = vmatpush1.bf16.msra.mxu1 %v650_v18  ;;  %v696_v53 = vld [vmem:[%s957_s1 + $0x1c4] ss:$8 sps:$4 sm:$0xff]   ;;  %v699_v55 = vld [vmem:[%s957_s1 + $0x1c0] ss:$8 sps:$4 sm:$0xff]   ;;  %v704_v58 = vld [vmem:[%s957_s1 + $0xd0] ss:$8 sps:$4 sm:$0xff]  }
  0x14   :  { %475 = vmatpush1.bf16.msra.mxu0 %v651_v19  ;;  %435 = vmatprep.subr.bf16.mxu1 %v652_v20  ;;  %v705_v59 = vld [vmem:[%s957_s1 + $0x1d0] ss:$8 sps:$4 sm:$0xff]   ;;  %v706_v60 = vld [vmem:[%s957_s1 + $0xe4] ss:$8 sps:$4 sm:$0xff]   ;;  %v710_v62 = vld [vmem:[%s957_s1 + $0xe0] ss:$8 sps:$4 sm:$0xff]  }
  0x15   :  { %476 = vmatprep.subr.bf16.mxu0 %v654_v21  ;;  %457 = vmatprep.mubr.bf16.mxu1 %v553_v47  ;;  %v708_v61 = vld [vmem:[%s957_s1 + $0x1e4] ss:$8 sps:$4 sm:$0xff]   ;;  %v711_v63 = vld [vmem:[%s957_s1 + $0x1e0] ss:$8 sps:$4 sm:$0xff]   ;;  %v712_v0 = vld [vmem:[%s957_s1 + $0xf4] ss:$8 sps:$4 sm:$0xff]  }
  0x16   :  { %498 = vmatprep.mubr.bf16.mxu0 %v555_v51  ;;  %v714_v1 = vld [vmem:[%s957_s1 + $0x1f4] ss:$8 sps:$4 sm:$0xff]   ;;  %v716_v2 = vld [vmem:[%s957_s1 + $0xf0] ss:$8 sps:$4 sm:$0xff]   ;;  %v520_v8 = vsub.s32 0, %v519_v7  ;;  %v524_v10 = vsub.s32 1, %v519_v7 }
  0x17   :  { %436 = vmatpush1.bf16.msra.mxu1 %v656_v22  ;;  %v717_v3 = vld [vmem:[%s957_s1 + $0x1f0] ss:$8 sps:$4 sm:$0xff]   ;;  %v516_v9 = vld [vmem:[%s959_s2] sm:$0x3] }
  0x18   :  { %477 = vmatpush1.bf16.msra.mxu0 %v657_v23  ;;  %437 = vmatprep.subr.bf16.mxu1 %v658_v24  ;;  %v530_v11 = vld [vmem:[%s960_s3] sm:$0x3]  ;;  %v521_v12 = vrot.slane %v516_v9, %v520_v8  ;;  %v525_v15 = vrot.slane %v516_v9, %v524_v10 }
  0x19   :  { %478 = vmatprep.subr.bf16.mxu0 %v660_v25  ;;  %v535_v17 = vrot.slane %v530_v11, %v520_v8  ;;  %v539_v21 = vrot.slane %v530_v11, %v524_v10 }
  0x1b   :  { %438 = vmatpush1.bf16.msra.mxu1 %v662_v26 }
  0x1c   :  { %479 = vmatpush1.bf16.msra.mxu0 %v663_v27  ;;  %439 = vmatprep.subr.bf16.mxu1 %v664_v28 }
  0x1d   :  { %480 = vmatprep.subr.bf16.mxu0 %v666_v29 }
  0x1f   :  { %440 = vmatpush1.bf16.msra.mxu1 %v668_v30 }
  0x20   :  { %481 = vmatpush1.bf16.msra.mxu0 %v669_v31  ;;  %441 = vmatprep.subr.bf16.mxu1 %v670_v32 }
  0x21   :  { %482 = vmatprep.subr.bf16.mxu0 %v672_v33 }
  0x23   :  { %442 = vmatpush1.bf16.msra.mxu1 %v674_v34 }
  0x24   :  { %483 = vmatpush1.bf16.msra.mxu0 %v675_v35  ;;  %443 = vmatprep.subr.bf16.mxu1 %v676_v36 }
  0x25   :  { %484 = vmatprep.subr.bf16.mxu0 %v678_v37 }
  0x27   :  { %444 = vmatpush1.bf16.msra.mxu1 %v680_v38 }
  0x28   :  { %485 = vmatpush1.bf16.msra.mxu0 %v681_v39  ;;  %445 = vmatprep.subr.bf16.mxu1 %v682_v40 }
  0x29   :  { %486 = vmatprep.subr.bf16.mxu0 %v684_v41 }
  0x2b   :  { %446 = vmatpush1.bf16.msra.mxu1 %v686_v42 }
  0x2c   :  { %487 = vmatpush1.bf16.msra.mxu0 %v687_v43  ;;  %447 = vmatprep.subr.bf16.mxu1 %v688_v44 }
  0x2d   :  { %488 = vmatprep.subr.bf16.mxu0 %v690_v45 }
  0x2f   :  { %448 = vmatpush1.bf16.msra.mxu1 %v692_v49 }
  0x30   :  { %489 = vmatpush1.bf16.msra.mxu0 %v693_v50  ;;  %449 = vmatprep.subr.bf16.mxu1 %v694_v52 }
  0x31   :  { %490 = vmatprep.subr.bf16.mxu0 %v696_v53 }
  0x33   :  { %450 = vmatpush1.bf16.msra.mxu1 %v698_v54 }
  0x34   :  { %491 = vmatpush1.bf16.msra.mxu0 %v699_v55  ;;  %451 = vmatprep.subr.bf16.mxu1 %v700_v56 }
  0x35   :  { %492 = vmatprep.subr.bf16.mxu0 %v702_v57 }
  0x37   :  { %452 = vmatpush1.bf16.msra.mxu1 %v704_v58 }
  0x38   :  { %493 = vmatpush1.bf16.msra.mxu0 %v705_v59  ;;  %453 = vmatprep.subr.bf16.mxu1 %v706_v60 }
  0x39   :  { %494 = vmatprep.subr.bf16.mxu0 %v708_v61 }
  0x3b   :  { %454 = vmatpush1.bf16.msra.mxu1 %v710_v62 }
  0x3c   :  { %495 = vmatpush1.bf16.msra.mxu0 %v711_v63  ;;  %455 = vmatprep.subr.bf16.mxu1 %v712_v0 }
  0x3d   :  { %496 = vmatprep.subr.bf16.mxu0 %v714_v1 }
  0x3f   :  { %456 = vmatpush1.bf16.msra.mxu1 %v716_v2 }
  0x40   :  { %497 = vmatpush1.bf16.msra.mxu0 %v717_v3 }
  0x42   :  { %458 = vmatmul.mubr.bf16.vlgmr.msra.gmra.mrb[0].mxu1 %v552_v4 }
  0x43   :  { %499 = vmatmul.mubr.bf16.vlgmr.msra.gmra.mrb[0].mxu0 %v554_v5 }
 0x115   :  { %v459_v13 = vpop.f32.mrb[0].mxu1 }
 0x116   :  { %v500_v14 = vpop.f32.mrb[0].mxu0  ;;  %v461_v18 = vpop.f32.mrb[1].mxu1 }
 0x117   :  { %v501_v16 = vadd.f32 %v500_v14, %v459_v13  ;;  %v502_v19 = vpop.f32.mrb[1].mxu0  ;;  %v463_v22 = vpop.f32.mrb[2].mxu1 }
 0x118   :  { %v503_v20 = vadd.f32 %v502_v19, %v461_v18  ;;  %v504_v23 = vpop.f32.mrb[2].mxu0  ;;  %v464_v25 = vpop.f32.mrb[3].mxu1 }
 0x119   :  { %v528_v24 = vmul.f32 %v521_v12, %v501_v16  ;;  %v505_v26 = vpop.f32.mrb[3].mxu0 }
 0x11a   :  { %v529_v27 = vmul.f32 %v525_v15, %v503_v20 }
 0x11b   :  { %v542_v28 = vadd.f32 %v535_v17, %v528_v24 }
 0x11c   :  { %v543_v29 = vadd.f32 %v539_v21, %v529_v27 }
 0x11d   :  { %v544_v30 = vmax.f32 %v542_v28, 0.0 }
 0x11e   :  { %v545_v31 = vmax.f32 %v543_v29, 0.0 }
 0x11f   :  { %546 = vst [vmem:[%s961_s4] sm:$0xff] %v544_v30 }
 0x120   :  { %547 = vst [vmem:[%s961_s4 + $0x8] sm:$0xff] %v545_v31 }

// kernel: encoder_m_forward.72
= control target key start
LH: loop header
LB: loop body
LE: loop exit
PB: predicated region body
PF: predicated region fallthrough
CT: control target
= control target key end

     0   :  { %s920_s15 = smov 0   ;;  %s922_s16 = smov 0   ;;  %s1008_s0 = inlined_call_operand.vmem [shape: bf16[8,2304], index: 0, kind: input, shape index: {}]   ;;  %s1009_s1 = inlined_call_operand.vmem [shape: bf16[2304,256], index: 1, kind: input, shape index: {}]   ;;  %s1010_s2 = inlined_call_operand.vmem [shape: f32[1,256], index: 2, kind: input, shape index: {}]   ;;  %s1011_s3 = inlined_call_operand.vmem [shape: f32[1,256], index: 3, kind: input, shape index: {}]   ;;  %s1012_s4 = inlined_call_operand.vmem [shape: f32[8,256], index: 4, kind: output, shape index: {}]  }
   0x1   :  { %s924_s17 = smov 0  }
   0x2 LB: > { %s26_s18 = sadd.s32 1, %s888_s16  ;;  %p748_p0 = scmp.ge.s32.totalorder %s892_s17, 1  ;;  %s892_s17 = sphi %s924_s17, %s14_s17   ;;  %s888_s16 = sphi %s922_s16, %s1014_s16   ;;  %s884_s15 = sphi %s920_s15, %s1013_s15  }
   0x3   : > { %p27_p1 = scmp.ge.s32.totalorder %s26_s18, 9  ;;  %p229_p2 = scmp.lt.s32.totalorder %s892_s17, 10 }
   0x5   : > { %s1016_s18 = smov (%p27_p1, %s26_s18), 0  ;;  %p230_p3 = pnand %p748_p0, %p229_p2 }
   0x6   : > { %s749_s19 = sshll.u32 (!%p230_p3), %s884_s15, 1  ;;  %s751_s20 = sshll.u32 (!%p230_p3), %s884_s15, 5 }
   0x7   : > { %233 = sbr.rel (%p230_p3) target bundleno = 319 (0x13f), region = 36  ;;  %p284_p4 = scmp.lt.s32.totalorder (!%p230_p3), %s749_s19, 17 }
   0x8   : > { %p293_p5 = scmp.lt.s32.totalorder (!%p230_p3), %s751_s20, 287  ;;  %p754_p6 = scmp.ne.s32.totalorder (!%p230_p3), %s884_s15, 0 }
   0xe   : > { %s1018_s19 = smov (!%p284_p4, %s749_s19), 17  ;;  %s1020_s20 = smov (!%p293_p5, %s751_s20), 287 }
   0xf   : > { %s750_s21 = sshll.u32 %s1018_s19, 2  ;;  %s794_s25 = sshll.u32 %s1020_s20, 3  ;;  %v894_v0 = vmov (!%p754_p6), 0.0  }
  0x10   : > { %s945_s24 = scalar_lea.vmem %s1008_s0, %s750_s21  ;;  %s950_s28 = scalar_lea.vmem %s1009_s1, %s794_s25  ;;  %327 = vst [vmem:[#allocation2] sm:$0xff] (!%p754_p6), %v894_v0  ;;  %328 = vst [vmem:[#allocation2 + $0x8] sm:$0xff] (!%p754_p6), %v894_v0 }
  0x11   : > { %326 = sbr.rel (%p754_p6) target bundleno = 24 (0x18), region = 40 }
  0x18 PF: > { %v820_v1 = vld [vmem:[%s950_s28 + $0x4] ss:$8 sps:$4 sm:$0xff]   ;;  %v822_v2 = vld [vmem:[%s950_s28] ss:$8 sps:$4 sm:$0xff]   ;;  %v823_v3 = vld [vmem:[%s950_s28 + $0x14] ss:$8 sps:$4 sm:$0xff]  }
  0x19   : > { %531 = vmatprep.subr.bf16.mxu0 %v820_v1  ;;  %v825_v4 = vld [vmem:[%s950_s28 + $0x10] ss:$8 sps:$4 sm:$0xff]   ;;  %v826_v5 = vld [vmem:[%s950_s28 + $0x24] ss:$8 sps:$4 sm:$0xff]   ;;  %v828_v6 = vld [vmem:[%s950_s28 + $0x20] ss:$8 sps:$4 sm:$0xff]  }
  0x1a   : > { %532 = vmatpush1.bf16.msra.mxu0 %v822_v2  ;;  %v829_v7 = vld [vmem:[%s950_s28 + $0x34] ss:$8 sps:$4 sm:$0xff]   ;;  %v831_v8 = vld [vmem:[%s950_s28 + $0x30] ss:$8 sps:$4 sm:$0xff]   ;;  %v832_v9 = vld [vmem:[%s950_s28 + $0x44] ss:$8 sps:$4 sm:$0xff]  }
  0x1b   : > { %533 = vmatprep.subr.bf16.mxu0 %v823_v3  ;;  %v834_v10 = vld [vmem:[%s950_s28 + $0x40] ss:$8 sps:$4 sm:$0xff]   ;;  %v835_v11 = vld [vmem:[%s950_s28 + $0x54] ss:$8 sps:$4 sm:$0xff]   ;;  %v837_v12 = vld [vmem:[%s950_s28 + $0x50] ss:$8 sps:$4 sm:$0xff]  }
  0x1c   : > { %v838_v13 = vld [vmem:[%s950_s28 + $0x64] ss:$8 sps:$4 sm:$0xff]   ;;  %v840_v16 = vld [vmem:[%s950_s28 + $0x60] ss:$8 sps:$4 sm:$0xff]   ;;  %v841_v17 = vld [vmem:[%s950_s28 + $0x74] ss:$8 sps:$4 sm:$0xff]  }
  0x1d   : > { %v331_v14 = vld [vmem:[%s945_s24] sm:$0xff]  ;;  %v843_v18 = vld [vmem:[%s950_s28 + $0x70] ss:$8 sps:$4 sm:$0xff]   ;;  %v847_v21 = vld [vmem:[%s950_s28 + $0x94] ss:$8 sps:$4 sm:$0xff]   ;;  %p789_p7 = scmp.ne.s32.totalorder %s884_s15, 8 }
  0x1e   : > { %534 = vmatpush1.bf16.msra.mxu0 %v825_v4  ;;  %v756_v15 = vcombine.high %v331_v14, %v331_v14  ;;  %v844_v19 = vld [vmem:[%s950_s28 + $0x84] ss:$8 sps:$4 sm:$0xff]   ;;  %v846_v20 = vld [vmem:[%s950_s28 + $0x80] ss:$8 sps:$4 sm:$0xff]   ;;  %v849_v22 = vld [vmem:[%s950_s28 + $0x90] ss:$8 sps:$4 sm:$0xff]   ;;  %v755_v35 = vcombine.low %v331_v14, %v331_v14  ;;  %v584_v44 = vlaneseq (!%p789_p7) }
  0x1f   : > { %535 = vmatprep.subr.bf16.mxu0 %v826_v5  ;;  %v850_v23 = vld [vmem:[%s950_s28 + $0xa4] ss:$8 sps:$4 sm:$0xff]   ;;  %v852_v24 = vld [vmem:[%s950_s28 + $0xa0] ss:$8 sps:$4 sm:$0xff]   ;;  %v853_v25 = vld [vmem:[%s950_s28 + $0xb4] ss:$8 sps:$4 sm:$0xff]  }
  0x20   : > { %563 = vmatprep.mubr.bf16.mxu0 %v756_v15  ;;  %v855_v26 = vld [vmem:[%s950_s28 + $0xb0] ss:$8 sps:$4 sm:$0xff]   ;;  %v856_v27 = vld [vmem:[%s950_s28 + $0xc4] ss:$8 sps:$4 sm:$0xff]   ;;  %v858_v28 = vld [vmem:[%s950_s28 + $0xc0] ss:$8 sps:$4 sm:$0xff]  }
  0x21   : > { %v859_v29 = vld [vmem:[%s950_s28 + $0xd4] ss:$8 sps:$4 sm:$0xff]   ;;  %v861_v30 = vld [vmem:[%s950_s28 + $0xd0] ss:$8 sps:$4 sm:$0xff]   ;;  %v862_v31 = vld [vmem:[%s950_s28 + $0xe4] ss:$8 sps:$4 sm:$0xff]  }
  0x22   : > { %536 = vmatpush1.bf16.msra.mxu0 %v828_v6  ;;  %v864_v32 = vld [vmem:[%s950_s28 + $0xe0] ss:$8 sps:$4 sm:$0xff]   ;;  %v865_v33 = vld [vmem:[%s950_s28 + $0xf4] ss:$8 sps:$4 sm:$0xff]   ;;  %v867_v34 = vld [vmem:[%s950_s28 + $0xf0] ss:$8 sps:$4 sm:$0xff]  }
  0x23   : > { %537 = vmatprep.subr.bf16.mxu0 %v829_v7  ;;  %v329_v36 = vld [vmem:[#allocation2] sm:$0xff]  ;;  %v330_v37 = vld [vmem:[#allocation2 + $0x8] sm:$0xff]  ;;  %v585_v45 = vshrl.u32 (!%p789_p7), %v584_v44, 7 }
  0x24   : > { %v582_v46 = vld [vmem:[%s1010_s2] sm:$0x3] (!%p789_p7) }
  0x25   : > { %v596_v47 = vld [vmem:[%s1011_s3] sm:$0x3] (!%p789_p7)  ;;  %v586_v48 = vsub.s32 (!%p789_p7), 0, %v585_v45  ;;  %v590_v49 = vsub.s32 (!%p789_p7), 1, %v585_v45 }
  0x26   : > { %538 = vmatpush1.bf16.msra.mxu0 %v831_v8 }
  0x27   : > { %539 = vmatprep.subr.bf16.mxu0 %v832_v9  ;;  %v587_v52 = vrot.slane (!%p789_p7), %v582_v46, %v586_v48  ;;  %v601_v53 = vrot.slane (!%p789_p7), %v596_v47, %v586_v48  ;;  %v591_v54 = vrot.slane (!%p789_p7), %v582_v46, %v590_v49  ;;  %v605_v55 = vrot.slane (!%p789_p7), %v596_v47, %v590_v49 }
  0x2a   : > { %540 = vmatpush1.bf16.msra.mxu0 %v834_v10 }
  0x2b   : > { %541 = vmatprep.subr.bf16.mxu0 %v835_v11 }
  0x2e   : > { %542 = vmatpush1.bf16.msra.mxu0 %v837_v12 }
  0x2f   : > { %543 = vmatprep.subr.bf16.mxu0 %v838_v13 }
  0x32   : > { %544 = vmatpush1.bf16.msra.mxu0 %v840_v16 }
  0x33   : > { %545 = vmatprep.subr.bf16.mxu0 %v841_v17 }
  0x36   : > { %546 = vmatpush1.bf16.msra.mxu0 %v843_v18 }
  0x37   : > { %547 = vmatprep.subr.bf16.mxu0 %v844_v19 }
  0x3a   : > { %548 = vmatpush1.bf16.msra.mxu0 %v846_v20 }
  0x3b   : > { %549 = vmatprep.subr.bf16.mxu0 %v847_v21 }
  0x3e   : > { %550 = vmatpush1.bf16.msra.mxu0 %v849_v22 }
  0x3f   : > { %551 = vmatprep.subr.bf16.mxu0 %v850_v23 }
  0x42   : > { %552 = vmatpush1.bf16.msra.mxu0 %v852_v24 }
  0x43   : > { %553 = vmatprep.subr.bf16.mxu0 %v853_v25 }
  0x46   : > { %554 = vmatpush1.bf16.msra.mxu0 %v855_v26 }
  0x47   : > { %555 = vmatprep.subr.bf16.mxu0 %v856_v27 }
  0x4a   : > { %556 = vmatpush1.bf16.msra.mxu0 %v858_v28 }
  0x4b   : > { %557 = vmatprep.subr.bf16.mxu0 %v859_v29 }
  0x4e   : > { %558 = vmatpush1.bf16.msra.mxu0 %v861_v30 }
  0x4f   : > { %559 = vmatprep.subr.bf16.mxu0 %v862_v31 }
  0x52   : > { %560 = vmatpush1.bf16.msra.mxu0 %v864_v32 }
  0x53   : > { %561 = vmatprep.subr.bf16.mxu0 %v865_v33 }
  0x56   : > { %562 = vmatpush1.bf16.msra.mxu0 %v867_v34 }
  0x59   : > { %564 = vmatmul.mubr.bf16.vlgmr.msra.gmra.mrb[0].mxu0 %v755_v35 }
 0x12a   : > { %579 = sbr.rel (%p789_p7) target bundleno = 319 (0x13f), region = 44 }
 0x12c   : > { %v565_v38 = vpop.f32.mrb[0].mxu0 }
 0x12d   : > { %v572_v39 = vadd.f32 %v565_v38, %v329_v36  ;;  %v567_v40 = vpop.f32.mrb[1].mxu0 }
 0x12e   : > { %v573_v41 = vadd.f32 %v567_v40, %v330_v37  ;;  %v569_v42 = vpop.f32.mrb[2].mxu0 }
 0x12f   : > { %574 = vst [vmem:[#allocation2] sm:$0xff] %v572_v39  ;;  %v570_v43 = vpop.f32.mrb[3].mxu0 }
 0x130   : > { %575 = vst [vmem:[#allocation2 + $0x8] sm:$0xff] %v573_v41 }
 0x136   : > { %v580_v50 = vld [vmem:[#allocation2] sm:$0xff] }
 0x137   : > { %v581_v51 = vld [vmem:[#allocation2 + $0x8] sm:$0xff]  ;;  %v594_v56 = vmul.f32 %v587_v52, %v580_v50 }
 0x138   : > { %v595_v57 = vmul.f32 %v591_v54, %v581_v51 }
 0x139   : > { %v608_v58 = vadd.f32 %v601_v53, %v594_v56 }
 0x13a   : > { %v609_v59 = vadd.f32 %v605_v55, %v595_v57 }
 0x13b   : > { %v610_v60 = vmax.f32 %v608_v58, 0.0 }
 0x13c   : > { %v611_v61 = vmax.f32 %v609_v59, 0.0 }
 0x13d   : > { %612 = vst [vmem:[%s1012_s4] sm:$0xff] %v610_v60 }
 0x13e   : > { %613 = vst [vmem:[%s1012_s4 + $0x8] sm:$0xff] %v611_v61 }
 0x13f PF: > { %s14_s17 = sadd.s32 1, %s892_s17   ;;  %s1013_s15 = smov %s888_s16 }
 0x140   : > { %p11_p8 = scmp.ge.s32.totalorder %s14_s17, 11   ;;  %s1014_s16 = smov %s1016_s18 }
 0x142   :  { %13 = sbr.rel (!%p11_p8) target bundleno = 2 (0x2), region = 83 }

// kernel: encoder_m_forward.73
= control target key start
LH: loop header
LB: loop body
LE: loop exit
PB: predicated region body
PF: predicated region fallthrough
CT: control target
= control target key end

     0   :  { %s1549_s15 = smov 0   ;;  %s1551_s16 = smov 0   ;;  %s1836_s0 = inlined_call_operand.vmem [shape: bf16[8,512], index: 0, kind: input, shape index: {}]   ;;  %s1837_s1 = inlined_call_operand.vmem [shape: bf16[512,1024], index: 1, kind: input, shape index: {}]   ;;  %s1838_s2 = inlined_call_operand.vmem [shape: f32[1,1024], index: 2, kind: input, shape index: {}]   ;;  %s1839_s3 = inlined_call_operand.vmem [shape: f32[1,1024], index: 3, kind: input, shape index: {}]   ;;  %s1840_s4 = inlined_call_operand.vmem [shape: f32[8,1024], index: 4, kind: output, shape index: {}]  }
   0x1   :  { %s1553_s17 = smov 0   ;;  %s1555_s18 = smov 0  }
   0x2   :  { %s1557_s19 = smov 0  }
   0x3 LB: > { %s29_s20 = sadd.s32 1, %s1518_s18  ;;  %p77_p1 = scmp.ne.s32.totalorder %s1510_s16, %s1506_s15  ;;  %s1522_s19 = sphi %s1557_s19, %s14_s19   ;;  %s1518_s18 = sphi %s1555_s18, %s1844_s18   ;;  %s1514_s17 = sphi %s1553_s17, %s1843_s17   ;;  %s1510_s16 = sphi %s1551_s16, %s1842_s16   ;;  %s1506_s15 = sphi %s1549_s15, %s1841_s15  }
   0x4   : > { %p31_p0 = scmp.ge.s32.totalorder %s29_s20, 4  ;;  %p78_p2 = scmp.eq.s32.totalorder %s1522_s19, 0 }
   0x5   : > { %s70_s22 = sadd.s32 1, %s1510_s16  ;;  %p1261_p5 = scmp.ge.s32.totalorder %s1522_s19, 4 }
   0x6   : > { %s1846_s20 = smov (%p31_p0, %s29_s20), 0  ;;  %p79_p3 = por %p78_p2, %p77_p1 }
   0x7   : > { %s66_s21 = ssub.s32 %s1518_s18, %s1846_s20  ;;  %196 = sbr.rel (%p1261_p5) target bundleno = 82 (0x52), region = 20 }
   0x8   : > { %p68_p4 = scmp.eq.s32.totalorder %s66_s21, 0 }
   0xa   : > { %s1584_s23 = scalar_select %p68_p4, %s1510_s16, %s70_s22  }
   0xe   : > { %199 = sbr.rel (!%p79_p3) target bundleno = 82 (0x52), region = 24  ;;  %s201_s24 = sand.u32 (%p79_p3), 1, %s1510_s16  }
   0xf   : > { %s1341_s25 = sshll.u32 (%p79_p3), %s1518_s18, 3  ;;  %s1262_s26 = sshll.u32 (%p79_p3), %s201_s24, 9 }
  0x10   : > { %s1592_s29 = scalar_lea.vmem (%p79_p3), %s1837_s1, %s1341_s25  ;;  %s1597_s30 = scalar_lea.vmem (%p79_p3), [#allocation3], %s1262_s26 }
  0x11   : > { %v363_v0 = vld [vmem:[%s1592_s29] sm:$0xff] (%p79_p3) }
  0x12   : > { %v365_v1 = vld [vmem:[%s1592_s29 + $0x20] sm:$0xff] (%p79_p3)  ;;  %364 = vst [vmem:[%s1597_s30] sm:$0xff] (%p79_p3), %v363_v0 }
  0x13   : > { %v367_v2 = vld [vmem:[%s1592_s29 + $0x40] sm:$0xff] (%p79_p3)  ;;  %366 = vst [vmem:[%s1597_s30 + $0x8] sm:$0xff] (%p79_p3), %v365_v1 }
  0x14   : > { %368 = vst [vmem:[%s1597_s30 + $0x10] sm:$0xff] (%p79_p3), %v367_v2  ;;  %v369_v3 = vld [vmem:[%s1592_s29 + $0x60] sm:$0xff] (%p79_p3) }
  0x15   : > { %v371_v4 = vld [vmem:[%s1592_s29 + $0x80] sm:$0xff]  ;;  %370 = vst [vmem:[%s1597_s30 + $0x18] sm:$0xff] %v369_v3 }
  0x16   : > { %v373_v5 = vld [vmem:[%s1592_s29 + $0xa0] sm:$0xff]  ;;  %372 = vst [vmem:[%s1597_s30 + $0x20] sm:$0xff] %v371_v4 }
  0x17   : > { %374 = vst [vmem:[%s1597_s30 + $0x28] sm:$0xff] %v373_v5  ;;  %v375_v6 = vld [vmem:[%s1592_s29 + $0xc0] sm:$0xff] }
  0x18   : > { %v377_v7 = vld [vmem:[%s1592_s29 + $0xe0] sm:$0xff]  ;;  %376 = vst [vmem:[%s1597_s30 + $0x30] sm:$0xff] %v375_v6 }
  0x19   : > { %v379_v8 = vld [vmem:[%s1592_s29 + $0x100] sm:$0xff]  ;;  %378 = vst [vmem:[%s1597_s30 + $0x38] sm:$0xff] %v377_v7 }
  0x1a   : > { %380 = vst [vmem:[%s1597_s30 + $0x40] sm:$0xff] %v379_v8  ;;  %v381_v9 = vld [vmem:[%s1592_s29 + $0x120] sm:$0xff] }
  0x1b   : > { %v383_v10 = vld [vmem:[%s1592_s29 + $0x140] sm:$0xff]  ;;  %382 = vst [vmem:[%s1597_s30 + $0x48] sm:$0xff] %v381_v9 }
  0x1c   : > { %v385_v11 = vld [vmem:[%s1592_s29 + $0x160] sm:$0xff]  ;;  %384 = vst [vmem:[%s1597_s30 + $0x50] sm:$0xff] %v383_v10 }
  0x1d   : > { %386 = vst [vmem:[%s1597_s30 + $0x58] sm:$0xff] %v385_v11  ;;  %v387_v12 = vld [vmem:[%s1592_s29 + $0x180] sm:$0xff] }
  0x1e   : > { %v389_v13 = vld [vmem:[%s1592_s29 + $0x1a0] sm:$0xff]  ;;  %388 = vst [vmem:[%s1597_s30 + $0x60] sm:$0xff] %v387_v12 }
  0x1f   : > { %v391_v14 = vld [vmem:[%s1592_s29 + $0x1c0] sm:$0xff]  ;;  %390 = vst [vmem:[%s1597_s30 + $0x68] sm:$0xff] %v389_v13 }
  0x20   : > { %392 = vst [vmem:[%s1597_s30 + $0x70] sm:$0xff] %v391_v14  ;;  %v393_v15 = vld [vmem:[%s1592_s29 + $0x1e0] sm:$0xff] }
  0x21   : > { %v395_v16 = vld [vmem:[%s1592_s29 + $0x200] sm:$0xff]  ;;  %394 = vst [vmem:[%s1597_s30 + $0x78] sm:$0xff] %v393_v15 }
  0x22   : > { %v397_v17 = vld [vmem:[%s1592_s29 + $0x220] sm:$0xff]  ;;  %396 = vst [vmem:[%s1597_s30 + $0x80] sm:$0xff] %v395_v16 }
  0x23   : > { %398 = vst [vmem:[%s1597_s30 + $0x88] sm:$0xff] %v397_v17  ;;  %v399_v18 = vld [vmem:[%s1592_s29 + $0x240] sm:$0xff] }
  0x24   : > { %v401_v19 = vld [vmem:[%s1592_s29 + $0x260] sm:$0xff]  ;;  %400 = vst [vmem:[%s1597_s30 + $0x90] sm:$0xff] %v399_v18 }
  0x25   : > { %v403_v20 = vld [vmem:[%s1592_s29 + $0x280] sm:$0xff]  ;;  %402 = vst [vmem:[%s1597_s30 + $0x98] sm:$0xff] %v401_v19 }
  0x26   : > { %404 = vst [vmem:[%s1597_s30 + $0xa0] sm:$0xff] %v403_v20  ;;  %v405_v21 = vld [vmem:[%s1592_s29 + $0x2a0] sm:$0xff] }
  0x27   : > { %v407_v22 = vld [vmem:[%s1592_s29 + $0x2c0] sm:$0xff]  ;;  %406 = vst [vmem:[%s1597_s30 + $0xa8] sm:$0xff] %v405_v21 }
  0x28   : > { %v409_v23 = vld [vmem:[%s1592_s29 + $0x2e0] sm:$0xff]  ;;  %408 = vst [vmem:[%s1597_s30 + $0xb0] sm:$0xff] %v407_v22 }
  0x29   : > { %410 = vst [vmem:[%s1597_s30 + $0xb8] sm:$0xff] %v409_v23  ;;  %v411_v24 = vld [vmem:[%s1592_s29 + $0x300] sm:$0xff] }
  0x2a   : > { %v413_v25 = vld [vmem:[%s1592_s29 + $0x320] sm:$0xff]  ;;  %412 = vst [vmem:[%s1597_s30 + $0xc0] sm:$0xff] %v411_v24 }
  0x2b   : > { %v415_v26 = vld [vmem:[%s1592_s29 + $0x340] sm:$0xff]  ;;  %414 = vst [vmem:[%s1597_s30 + $0xc8] sm:$0xff] %v413_v25 }
  0x2c   : > { %416 = vst [vmem:[%s1597_s30 + $0xd0] sm:$0xff] %v415_v26  ;;  %v417_v27 = vld [vmem:[%s1592_s29 + $0x360] sm:$0xff] }
  0x2d   : > { %v419_v28 = vld [vmem:[%s1592_s29 + $0x380] sm:$0xff]  ;;  %418 = vst [vmem:[%s1597_s30 + $0xd8] sm:$0xff] %v417_v27 }
  0x2e   : > { %v421_v29 = vld [vmem:[%s1592_s29 + $0x3a0] sm:$0xff]  ;;  %420 = vst [vmem:[%s1597_s30 + $0xe0] sm:$0xff] %v419_v28 }
  0x2f   : > { %422 = vst [vmem:[%s1597_s30 + $0xe8] sm:$0xff] %v421_v29  ;;  %v423_v30 = vld [vmem:[%s1592_s29 + $0x3c0] sm:$0xff] }
  0x30   : > { %v425_v31 = vld [vmem:[%s1592_s29 + $0x3e0] sm:$0xff]  ;;  %424 = vst [vmem:[%s1597_s30 + $0xf0] sm:$0xff] %v423_v30 }
  0x31   : > { %v427_v32 = vld [vmem:[%s1592_s29 + $0x400] sm:$0xff]  ;;  %426 = vst [vmem:[%s1597_s30 + $0xf8] sm:$0xff] %v425_v31 }
  0x32   : > { %428 = vst [vmem:[%s1597_s30 + $0x100] sm:$0xff] %v427_v32  ;;  %v429_v33 = vld [vmem:[%s1592_s29 + $0x420] sm:$0xff] }
  0x33   : > { %v431_v34 = vld [vmem:[%s1592_s29 + $0x440] sm:$0xff]  ;;  %430 = vst [vmem:[%s1597_s30 + $0x108] sm:$0xff] %v429_v33 }
  0x34   : > { %v433_v35 = vld [vmem:[%s1592_s29 + $0x460] sm:$0xff]  ;;  %432 = vst [vmem:[%s1597_s30 + $0x110] sm:$0xff] %v431_v34 }
  0x35   : > { %434 = vst [vmem:[%s1597_s30 + $0x118] sm:$0xff] %v433_v35  ;;  %v435_v36 = vld [vmem:[%s1592_s29 + $0x480] sm:$0xff] }
  0x36   : > { %v437_v37 = vld [vmem:[%s1592_s29 + $0x4a0] sm:$0xff]  ;;  %436 = vst [vmem:[%s1597_s30 + $0x120] sm:$0xff] %v435_v36 }
  0x37   : > { %v439_v38 = vld [vmem:[%s1592_s29 + $0x4c0] sm:$0xff]  ;;  %438 = vst [vmem:[%s1597_s30 + $0x128] sm:$0xff] %v437_v37 }
  0x38   : > { %440 = vst [vmem:[%s1597_s30 + $0x130] sm:$0xff] %v439_v38  ;;  %v441_v39 = vld [vmem:[%s1592_s29 + $0x4e0] sm:$0xff] }
  0x39   : > { %v443_v40 = vld [vmem:[%s1592_s29 + $0x500] sm:$0xff]  ;;  %442 = vst [vmem:[%s1597_s30 + $0x138] sm:$0xff] %v441_v39 }
  0x3a   : > { %v445_v41 = vld [vmem:[%s1592_s29 + $0x520] sm:$0xff]  ;;  %444 = vst [vmem:[%s1597_s30 + $0x140] sm:$0xff] %v443_v40 }
  0x3b   : > { %446 = vst [vmem:[%s1597_s30 + $0x148] sm:$0xff] %v445_v41  ;;  %v447_v42 = vld [vmem:[%s1592_s29 + $0x540] sm:$0xff] }
  0x3c   : > { %v449_v43 = vld [vmem:[%s1592_s29 + $0x560] sm:$0xff]  ;;  %448 = vst [vmem:[%s1597_s30 + $0x150] sm:$0xff] %v447_v42 }
  0x3d   : > { %v451_v44 = vld [vmem:[%s1592_s29 + $0x580] sm:$0xff]  ;;  %450 = vst [vmem:[%s1597_s30 + $0x158] sm:$0xff] %v449_v43 }
  0x3e   : > { %452 = vst [vmem:[%s1597_s30 + $0x160] sm:$0xff] %v451_v44  ;;  %v453_v45 = vld [vmem:[%s1592_s29 + $0x5a0] sm:$0xff] }
  0x3f   : > { %v455_v46 = vld [vmem:[%s1592_s29 + $0x5c0] sm:$0xff]  ;;  %454 = vst [vmem:[%s1597_s30 + $0x168] sm:$0xff] %v453_v45 }
  0x40   : > { %v457_v47 = vld [vmem:[%s1592_s29 + $0x5e0] sm:$0xff]  ;;  %456 = vst [vmem:[%s1597_s30 + $0x170] sm:$0xff] %v455_v46 }
  0x41   : > { %458 = vst [vmem:[%s1597_s30 + $0x178] sm:$0xff] %v457_v47  ;;  %v459_v48 = vld [vmem:[%s1592_s29 + $0x600] sm:$0xff] }
  0x42   : > { %v461_v49 = vld [vmem:[%s1592_s29 + $0x620] sm:$0xff]  ;;  %460 = vst [vmem:[%s1597_s30 + $0x180] sm:$0xff] %v459_v48 }
  0x43   : > { %v463_v50 = vld [vmem:[%s1592_s29 + $0x640] sm:$0xff]  ;;  %462 = vst [vmem:[%s1597_s30 + $0x188] sm:$0xff] %v461_v49 }
  0x44   : > { %464 = vst [vmem:[%s1597_s30 + $0x190] sm:$0xff] %v463_v50  ;;  %v465_v51 = vld [vmem:[%s1592_s29 + $0x660] sm:$0xff] }
  0x45   : > { %v467_v52 = vld [vmem:[%s1592_s29 + $0x680] sm:$0xff]  ;;  %466 = vst [vmem:[%s1597_s30 + $0x198] sm:$0xff] %v465_v51 }
  0x46   : > { %v469_v53 = vld [vmem:[%s1592_s29 + $0x6a0] sm:$0xff]  ;;  %468 = vst [vmem:[%s1597_s30 + $0x1a0] sm:$0xff] %v467_v52 }
  0x47   : > { %470 = vst [vmem:[%s1597_s30 + $0x1a8] sm:$0xff] %v469_v53  ;;  %v471_v54 = vld [vmem:[%s1592_s29 + $0x6c0] sm:$0xff] }
  0x48   : > { %v473_v55 = vld [vmem:[%s1592_s29 + $0x6e0] sm:$0xff]  ;;  %472 = vst [vmem:[%s1597_s30 + $0x1b0] sm:$0xff] %v471_v54 }
  0x49   : > { %v475_v56 = vld [vmem:[%s1592_s29 + $0x700] sm:$0xff]  ;;  %474 = vst [vmem:[%s1597_s30 + $0x1b8] sm:$0xff] %v473_v55 }
  0x4a   : > { %476 = vst [vmem:[%s1597_s30 + $0x1c0] sm:$0xff] %v475_v56  ;;  %v477_v57 = vld [vmem:[%s1592_s29 + $0x720] sm:$0xff] }
  0x4b   : > { %v479_v58 = vld [vmem:[%s1592_s29 + $0x740] sm:$0xff]  ;;  %478 = vst [vmem:[%s1597_s30 + $0x1c8] sm:$0xff] %v477_v57 }
  0x4c   : > { %v481_v59 = vld [vmem:[%s1592_s29 + $0x760] sm:$0xff]  ;;  %480 = vst [vmem:[%s1597_s30 + $0x1d0] sm:$0xff] %v479_v58 }
  0x4d   : > { %482 = vst [vmem:[%s1597_s30 + $0x1d8] sm:$0xff] %v481_v59  ;;  %v483_v60 = vld [vmem:[%s1592_s29 + $0x780] sm:$0xff] }
  0x4e   : > { %v485_v61 = vld [vmem:[%s1592_s29 + $0x7a0] sm:$0xff]  ;;  %484 = vst [vmem:[%s1597_s30 + $0x1e0] sm:$0xff] %v483_v60 }
  0x4f   : > { %v487_v62 = vld [vmem:[%s1592_s29 + $0x7c0] sm:$0xff]  ;;  %486 = vst [vmem:[%s1597_s30 + $0x1e8] sm:$0xff] %v485_v61 }
  0x50   : > { %488 = vst [vmem:[%s1597_s30 + $0x1f0] sm:$0xff] %v487_v62  ;;  %v489_v63 = vld [vmem:[%s1592_s29 + $0x7e0] sm:$0xff] }
  0x51   : > { %490 = vst [vmem:[%s1597_s30 + $0x1f8] sm:$0xff] %v489_v63 }
  0x52 PF: > { %p1265_p6 = scmp.ge.s32.totalorder %s1522_s19, 1  ;;  %p511_p7 = scmp.lt.s32.totalorder %s1522_s19, 5 }
  0x54   : > { %p512_p8 = pnand %p1265_p6, %p511_p7 }
  0x55   : > { %s518_s5 = sand.u32 (!%p512_p8), 1, %s1506_s15   ;;  %v1730_v0 = vld [vmem:[%s1836_s0] sm:$0xff] (!%p512_p8)  ;;  %v1735_v1 = vld [vmem:[%s1836_s0 + $0x8] sm:$0xff] (!%p512_p8)  ;;  %s1267_s12 = sshll.u32 (!%p512_p8), %s1514_s17, 1 }
  0x56   : > { %515 = sbr.rel (%p512_p8) target bundleno = 374 (0x176), region = 70  ;;  %s1266_s10 = sshll.u32 (!%p512_p8), %s518_s5, 9  ;;  %v1272_v2 = vcombine.high (!%p512_p8), %v1730_v0, %v1730_v0  ;;  %v1274_v3 = vcombine.high (!%p512_p8), %v1735_v1, %v1735_v1 }
  0x57   : > { %s1741_s11 = scalar_lea.vmem (!%p512_p8), [#allocation3], %s1266_s10  ;;  %p577_p9 = scmp.lt.s32.totalorder (!%p512_p8), %s1267_s12, 7 }
  0x58   : > { %v1384_v4 = vld [vmem:[%s1741_s11 + $0x4] ss:$8 sps:$4 sm:$0xff] (!%p512_p8)   ;;  %1036 = vmatprep.mubr.bf16.mxu1 (!%p512_p8), %v1272_v2  ;;  %1077 = vmatprep.mubr.bf16.mxu0 (!%p512_p8), %v1274_v3  ;;  %v1388_v6 = vld [vmem:[%s1741_s11] ss:$8 sps:$4 sm:$0xff] (!%p512_p8)   ;;  %v1390_v8 = vld [vmem:[%s1741_s11 + $0x14] ss:$8 sps:$4 sm:$0xff] (!%p512_p8)  }
  0x59   : > { %v1386_v5 = vld [vmem:[%s1741_s11 + $0x104] ss:$8 sps:$4 sm:$0xff] (!%p512_p8)   ;;  %1004 = vmatprep.subr.bf16.mxu1 (!%p512_p8), %v1384_v4  ;;  %v1389_v7 = vld [vmem:[%s1741_s11 + $0x100] ss:$8 sps:$4 sm:$0xff] (!%p512_p8)   ;;  %v1392_v9 = vld [vmem:[%s1741_s11 + $0x114] ss:$8 sps:$4 sm:$0xff] (!%p512_p8)  }
  0x5a   : > { %1045 = vmatprep.subr.bf16.mxu0 (!%p512_p8), %v1386_v5  ;;  %1005 = vmatpush1.bf16.msra.mxu1 (!%p512_p8), %v1388_v6  ;;  %v1394_v10 = vld [vmem:[%s1741_s11 + $0x10] ss:$8 sps:$4 sm:$0xff] (!%p512_p8)   ;;  %v1396_v12 = vld [vmem:[%s1741_s11 + $0x24] ss:$8 sps:$4 sm:$0xff] (!%p512_p8)   ;;  %v1400_v14 = vld [vmem:[%s1741_s11 + $0x20] ss:$8 sps:$4 sm:$0xff] (!%p512_p8)   ;;  %v1271_v6 = vcombine.low (!%p512_p8), %v1730_v0, %v1730_v0 }
  0x5b   : > { %1046 = vmatpush1.bf16.msra.mxu0 (!%p512_p8), %v1389_v7  ;;  %1006 = vmatprep.subr.bf16.mxu1 (!%p512_p8), %v1390_v8  ;;  %v1395_v11 = vld [vmem:[%s1741_s11 + $0x110] ss:$8 sps:$4 sm:$0xff] (!%p512_p8)   ;;  %v1398_v13 = vld [vmem:[%s1741_s11 + $0x124] ss:$8 sps:$4 sm:$0xff] (!%p512_p8)   ;;  %v1401_v15 = vld [vmem:[%s1741_s11 + $0x120] ss:$8 sps:$4 sm:$0xff] (!%p512_p8)   ;;  %v1273_v7 = vcombine.low (!%p512_p8), %v1735_v1, %v1735_v1  ;;  %v1097_v8 = vlaneseq (!%p512_p8) }
  0x5c   : > { %1047 = vmatprep.subr.bf16.mxu0 (!%p512_p8), %v1392_v9  ;;  %v1402_v16 = vld [vmem:[%s1741_s11 + $0x34] ss:$8 sps:$4 sm:$0xff] (!%p512_p8)   ;;  %v1406_v18 = vld [vmem:[%s1741_s11 + $0x30] ss:$8 sps:$4 sm:$0xff] (!%p512_p8)   ;;  %v1408_v20 = vld [vmem:[%s1741_s11 + $0x44] ss:$8 sps:$4 sm:$0xff] (!%p512_p8)  }
  0x5d   : > { %v1404_v17 = vld [vmem:[%s1741_s11 + $0x134] ss:$8 sps:$4 sm:$0xff]   ;;  %v1407_v19 = vld [vmem:[%s1741_s11 + $0x130] ss:$8 sps:$4 sm:$0xff]   ;;  %v1410_v21 = vld [vmem:[%s1741_s11 + $0x144] ss:$8 sps:$4 sm:$0xff]  }
  0x5e   : > { %1007 = vmatpush1.bf16.msra.mxu1 %v1394_v10  ;;  %v1412_v22 = vld [vmem:[%s1741_s11 + $0x40] ss:$8 sps:$4 sm:$0xff]   ;;  %v1414_v24 = vld [vmem:[%s1741_s11 + $0x54] ss:$8 sps:$4 sm:$0xff]   ;;  %v1418_v26 = vld [vmem:[%s1741_s11 + $0x50] ss:$8 sps:$4 sm:$0xff]  }
  0x5f   : > { %1048 = vmatpush1.bf16.msra.mxu0 %v1395_v11  ;;  %1008 = vmatprep.subr.bf16.mxu1 %v1396_v12  ;;  %v1413_v23 = vld [vmem:[%s1741_s11 + $0x140] ss:$8 sps:$4 sm:$0xff]   ;;  %v1416_v25 = vld [vmem:[%s1741_s11 + $0x154] ss:$8 sps:$4 sm:$0xff]   ;;  %v1419_v27 = vld [vmem:[%s1741_s11 + $0x150] ss:$8 sps:$4 sm:$0xff]  }
  0x60   : > { %1049 = vmatprep.subr.bf16.mxu0 %v1398_v13  ;;  %v1420_v28 = vld [vmem:[%s1741_s11 + $0x64] ss:$8 sps:$4 sm:$0xff]   ;;  %v1424_v30 = vld [vmem:[%s1741_s11 + $0x60] ss:$8 sps:$4 sm:$0xff]   ;;  %v1426_v32 = vld [vmem:[%s1741_s11 + $0x74] ss:$8 sps:$4 sm:$0xff]  }
  0x61   : > { %v1422_v29 = vld [vmem:[%s1741_s11 + $0x164] ss:$8 sps:$4 sm:$0xff]   ;;  %v1425_v31 = vld [vmem:[%s1741_s11 + $0x160] ss:$8 sps:$4 sm:$0xff]   ;;  %v1428_v33 = vld [vmem:[%s1741_s11 + $0x174] ss:$8 sps:$4 sm:$0xff]  }
  0x62   : > { %1009 = vmatpush1.bf16.msra.mxu1 %v1400_v14  ;;  %v1430_v34 = vld [vmem:[%s1741_s11 + $0x70] ss:$8 sps:$4 sm:$0xff]   ;;  %v1432_v36 = vld [vmem:[%s1741_s11 + $0x84] ss:$8 sps:$4 sm:$0xff]   ;;  %v1436_v38 = vld [vmem:[%s1741_s11 + $0x80] ss:$8 sps:$4 sm:$0xff]  }
  0x63   : > { %1050 = vmatpush1.bf16.msra.mxu0 %v1401_v15  ;;  %1010 = vmatprep.subr.bf16.mxu1 %v1402_v16  ;;  %v1431_v35 = vld [vmem:[%s1741_s11 + $0x170] ss:$8 sps:$4 sm:$0xff]   ;;  %v1434_v37 = vld [vmem:[%s1741_s11 + $0x184] ss:$8 sps:$4 sm:$0xff]   ;;  %v1437_v39 = vld [vmem:[%s1741_s11 + $0x180] ss:$8 sps:$4 sm:$0xff]  }
  0x64   : > { %1051 = vmatprep.subr.bf16.mxu0 %v1404_v17  ;;  %v1438_v40 = vld [vmem:[%s1741_s11 + $0x94] ss:$8 sps:$4 sm:$0xff]   ;;  %v1442_v42 = vld [vmem:[%s1741_s11 + $0x90] ss:$8 sps:$4 sm:$0xff]   ;;  %v1444_v44 = vld [vmem:[%s1741_s11 + $0xa4] ss:$8 sps:$4 sm:$0xff]  }
  0x65   : > { %v1440_v41 = vld [vmem:[%s1741_s11 + $0x194] ss:$8 sps:$4 sm:$0xff]   ;;  %v1443_v43 = vld [vmem:[%s1741_s11 + $0x190] ss:$8 sps:$4 sm:$0xff]   ;;  %v1446_v45 = vld [vmem:[%s1741_s11 + $0x1a4] ss:$8 sps:$4 sm:$0xff]  }
  0x66   : > { %1011 = vmatpush1.bf16.msra.mxu1 %v1406_v18  ;;  %v1448_v46 = vld [vmem:[%s1741_s11 + $0xa0] ss:$8 sps:$4 sm:$0xff]   ;;  %v1450_v48 = vld [vmem:[%s1741_s11 + $0xb4] ss:$8 sps:$4 sm:$0xff]   ;;  %v1454_v50 = vld [vmem:[%s1741_s11 + $0xb0] ss:$8 sps:$4 sm:$0xff]  }
  0x67   : > { %1052 = vmatpush1.bf16.msra.mxu0 %v1407_v19  ;;  %1012 = vmatprep.subr.bf16.mxu1 %v1408_v20  ;;  %v1449_v47 = vld [vmem:[%s1741_s11 + $0x1a0] ss:$8 sps:$4 sm:$0xff]   ;;  %v1452_v49 = vld [vmem:[%s1741_s11 + $0x1b4] ss:$8 sps:$4 sm:$0xff]   ;;  %v1455_v51 = vld [vmem:[%s1741_s11 + $0x1b0] ss:$8 sps:$4 sm:$0xff]  }
  0x68   : > { %1053 = vmatprep.subr.bf16.mxu0 %v1410_v21  ;;  %v1456_v52 = vld [vmem:[%s1741_s11 + $0xc4] ss:$8 sps:$4 sm:$0xff]   ;;  %v1460_v54 = vld [vmem:[%s1741_s11 + $0xc0] ss:$8 sps:$4 sm:$0xff]   ;;  %v1462_v56 = vld [vmem:[%s1741_s11 + $0xd4] ss:$8 sps:$4 sm:$0xff]  }
  0x69   : > { %v1458_v53 = vld [vmem:[%s1741_s11 + $0x1c4] ss:$8 sps:$4 sm:$0xff]   ;;  %v1461_v55 = vld [vmem:[%s1741_s11 + $0x1c0] ss:$8 sps:$4 sm:$0xff]   ;;  %v1464_v57 = vld [vmem:[%s1741_s11 + $0x1d4] ss:$8 sps:$4 sm:$0xff]  }
  0x6a   : > { %1013 = vmatpush1.bf16.msra.mxu1 %v1412_v22  ;;  %v1466_v58 = vld [vmem:[%s1741_s11 + $0xd0] ss:$8 sps:$4 sm:$0xff]   ;;  %v1468_v60 = vld [vmem:[%s1741_s11 + $0xe4] ss:$8 sps:$4 sm:$0xff]   ;;  %v1472_v62 = vld [vmem:[%s1741_s11 + $0xe0] ss:$8 sps:$4 sm:$0xff]  }
  0x6b   : > { %1054 = vmatpush1.bf16.msra.mxu0 %v1413_v23  ;;  %1014 = vmatprep.subr.bf16.mxu1 %v1414_v24  ;;  %v1467_v59 = vld [vmem:[%s1741_s11 + $0x1d0] ss:$8 sps:$4 sm:$0xff]   ;;  %v1470_v61 = vld [vmem:[%s1741_s11 + $0x1e4] ss:$8 sps:$4 sm:$0xff]   ;;  %v1473_v63 = vld [vmem:[%s1741_s11 + $0x1e0] ss:$8 sps:$4 sm:$0xff]  }
  0x6c   : > { %1055 = vmatprep.subr.bf16.mxu0 %v1416_v25  ;;  %v1474_v2 = vld [vmem:[%s1741_s11 + $0xf4] ss:$8 sps:$4 sm:$0xff]   ;;  %v1478_v4 = vld [vmem:[%s1741_s11 + $0xf0] ss:$8 sps:$4 sm:$0xff]   ;;  %s1848_s12 = smov (!%p577_p9, %s1267_s12), 7  ;;  %v1098_v9 = vshrl.u32 %v1097_v8, 7 }
  0x6d   : > { %v1476_v3 = vld [vmem:[%s1741_s11 + $0x1f4] ss:$8 sps:$4 sm:$0xff]   ;;  %v1479_v5 = vld [vmem:[%s1741_s11 + $0x1f0] ss:$8 sps:$4 sm:$0xff]   ;;  %s579_s15 = scalar_lea.vmem %s1838_s2, %s1848_s12  ;;  %s584_s24 = scalar_lea.vmem %s1839_s3, %s1848_s12 }
  0x6e   : > { %1015 = vmatpush1.bf16.msra.mxu1 %v1418_v26  ;;  %v1099_v0 = vsub.s32 0, %v1098_v9  ;;  %v1095_v10 = vld [vmem:[%s579_s15] sm:$0x3]  ;;  %v1103_v1 = vsub.s32 1, %v1098_v9  ;;  %s1270_s17 = sshll.u32 %s1848_s12, 3 }
  0x6f   : > { %1056 = vmatpush1.bf16.msra.mxu0 %v1419_v27  ;;  %1016 = vmatprep.subr.bf16.mxu1 %v1420_v28  ;;  %v1109_v11 = vld [vmem:[%s584_s24] sm:$0x3]  ;;  %s594_s27 = scalar_lea.vmem %s1840_s4, %s1270_s17 }
  0x70   : > { %1057 = vmatprep.subr.bf16.mxu0 %v1422_v29  ;;  %v1100_v12 = vrot.slane %v1095_v10, %v1099_v0  ;;  %v1104_v15 = vrot.slane %v1095_v10, %v1103_v1  ;;  %v1114_v17 = vrot.slane %v1109_v11, %v1099_v0  ;;  %v1118_v21 = vrot.slane %v1109_v11, %v1103_v1 }
  0x72   : > { %1017 = vmatpush1.bf16.msra.mxu1 %v1424_v30 }
  0x73   : > { %1058 = vmatpush1.bf16.msra.mxu0 %v1425_v31  ;;  %1018 = vmatprep.subr.bf16.mxu1 %v1426_v32 }
  0x74   : > { %1059 = vmatprep.subr.bf16.mxu0 %v1428_v33 }
  0x76   : > { %1019 = vmatpush1.bf16.msra.mxu1 %v1430_v34 }
  0x77   : > { %1060 = vmatpush1.bf16.msra.mxu0 %v1431_v35  ;;  %1020 = vmatprep.subr.bf16.mxu1 %v1432_v36 }
  0x78   : > { %1061 = vmatprep.subr.bf16.mxu0 %v1434_v37 }
  0x7a   : > { %1021 = vmatpush1.bf16.msra.mxu1 %v1436_v38 }
  0x7b   : > { %1062 = vmatpush1.bf16.msra.mxu0 %v1437_v39  ;;  %1022 = vmatprep.subr.bf16.mxu1 %v1438_v40 }
  0x7c   : > { %1063 = vmatprep.subr.bf16.mxu0 %v1440_v41 }
  0x7e   : > { %1023 = vmatpush1.bf16.msra.mxu1 %v1442_v42 }
  0x7f   : > { %1064 = vmatpush1.bf16.msra.mxu0 %v1443_v43  ;;  %1024 = vmatprep.subr.bf16.mxu1 %v1444_v44 }
  0x80   : > { %1065 = vmatprep.subr.bf16.mxu0 %v1446_v45 }
  0x82   : > { %1025 = vmatpush1.bf16.msra.mxu1 %v1448_v46 }
  0x83   : > { %1066 = vmatpush1.bf16.msra.mxu0 %v1449_v47  ;;  %1026 = vmatprep.subr.bf16.mxu1 %v1450_v48 }
  0x84   : > { %1067 = vmatprep.subr.bf16.mxu0 %v1452_v49 }
  0x86   : > { %1027 = vmatpush1.bf16.msra.mxu1 %v1454_v50 }
  0x87   : > { %1068 = vmatpush1.bf16.msra.mxu0 %v1455_v51  ;;  %1028 = vmatprep.subr.bf16.mxu1 %v1456_v52 }
  0x88   : > { %1069 = vmatprep.subr.bf16.mxu0 %v1458_v53 }
  0x8a   : > { %1029 = vmatpush1.bf16.msra.mxu1 %v1460_v54 }
  0x8b   : > { %1070 = vmatpush1.bf16.msra.mxu0 %v1461_v55  ;;  %1030 = vmatprep.subr.bf16.mxu1 %v1462_v56 }
  0x8c   : > { %1071 = vmatprep.subr.bf16.mxu0 %v1464_v57 }
  0x8e   : > { %1031 = vmatpush1.bf16.msra.mxu1 %v1466_v58 }
  0x8f   : > { %1072 = vmatpush1.bf16.msra.mxu0 %v1467_v59  ;;  %1032 = vmatprep.subr.bf16.mxu1 %v1468_v60 }
  0x90   : > { %1073 = vmatprep.subr.bf16.mxu0 %v1470_v61 }
  0x92   : > { %1033 = vmatpush1.bf16.msra.mxu1 %v1472_v62 }
  0x93   : > { %1074 = vmatpush1.bf16.msra.mxu0 %v1473_v63  ;;  %1034 = vmatprep.subr.bf16.mxu1 %v1474_v2 }
  0x94   : > { %1075 = vmatprep.subr.bf16.mxu0 %v1476_v3 }
  0x96   : > { %1035 = vmatpush1.bf16.msra.mxu1 %v1478_v4 }
  0x97   : > { %1076 = vmatpush1.bf16.msra.mxu0 %v1479_v5 }
  0x99   : > { %1037 = vmatmul.mubr.bf16.vlgmr.msra.gmra.mrb[0].mxu1 %v1271_v6 }
  0x9a   : > { %1078 = vmatmul.mubr.bf16.vlgmr.msra.gmra.mrb[0].mxu0 %v1273_v7 }
 0x16c   : > { %v1038_v13 = vpop.f32.mrb[0].mxu1 }
 0x16d   : > { %v1079_v14 = vpop.f32.mrb[0].mxu0  ;;  %v1040_v18 = vpop.f32.mrb[1].mxu1 }
 0x16e   : > { %v1080_v16 = vadd.f32 %v1079_v14, %v1038_v13  ;;  %v1081_v19 = vpop.f32.mrb[1].mxu0  ;;  %v1042_v22 = vpop.f32.mrb[2].mxu1 }
 0x16f   : > { %v1082_v20 = vadd.f32 %v1081_v19, %v1040_v18  ;;  %v1083_v23 = vpop.f32.mrb[2].mxu0  ;;  %v1043_v25 = vpop.f32.mrb[3].mxu1 }
 0x170   : > { %v1107_v24 = vmul.f32 %v1100_v12, %v1080_v16  ;;  %v1084_v26 = vpop.f32.mrb[3].mxu0 }
 0x171   : > { %v1108_v27 = vmul.f32 %v1104_v15, %v1082_v20 }
 0x172   : > { %v1121_v28 = vadd.f32 %v1114_v17, %v1107_v24 }
 0x173   : > { %v1122_v29 = vadd.f32 %v1118_v21, %v1108_v27 }
 0x174   : > { %1123 = vst [vmem:[%s594_s27] sm:$0xff] %v1121_v28 }
 0x175   : > { %1124 = vst [vmem:[%s594_s27 + $0x8] sm:$0xff] %v1122_v29 }
 0x176 PF: > { %s14_s19 = sadd.s32 1, %s1522_s19   ;;  %s1841_s15 = smov %s1510_s16 }
 0x177   : > { %p11_p10 = scmp.ge.s32.totalorder %s14_s19, 6   ;;  %s1842_s16 = smov %s1584_s23 }
 0x178   : > { %s1843_s17 = smov %s1518_s18  ;;  %s1844_s18 = smov %s1846_s20 }
 0x179   :  { %13 = sbr.rel (!%p11_p10) target bundleno = 3 (0x3), region = 126 }

// kernel: encoder_m_forward.74
= control target key start
LH: loop header
LB: loop body
LE: loop exit
PB: predicated region body
PF: predicated region fallthrough
CT: control target
= control target key end

     0   :  { %s1188_s18 = smov 0   ;;  %s1190_s19 = smov 0   ;;  %s1373_s0 = inlined_call_operand.vmem [shape: bf16[8,256], index: 0, kind: input, shape index: {}]   ;;  %s1374_s1 = inlined_call_operand.vmem [shape: bf16[256,1024], index: 1, kind: input, shape index: {}]   ;;  %s1375_s2 = inlined_call_operand.vmem [shape: f32[1,1024], index: 2, kind: input, shape index: {}]   ;;  %s1376_s3 = inlined_call_operand.vmem [shape: f32[1,1024], index: 3, kind: input, shape index: {}]   ;;  %s1377_s4 = inlined_call_operand.vmem [shape: f32[8,1024], index: 4, kind: input, shape index: {}, may-alias: {4,5}]   ;;  %s1378_s5 = inlined_call_operand.vmem [shape: f32[8,1024], index: 5, kind: output, shape index: {}, may-alias: {4,5}]  }
   0x1   :  { %s1192_s20 = smov 0   ;;  %s1194_s21 = smov 0  }
   0x2   :  { %s1196_s22 = smov 0  }
   0x3 LB: > { %s30_s23 = sadd.s32 1, %s1152_s21  ;;  %p78_p1 = scmp.ne.s32.totalorder %s1144_s19, %s1140_s18  ;;  %s1156_s22 = sphi %s1196_s22, %s15_s22   ;;  %s1152_s21 = sphi %s1194_s21, %s1382_s21   ;;  %s1148_s20 = sphi %s1192_s20, %s1381_s20   ;;  %s1144_s19 = sphi %s1190_s19, %s1380_s19   ;;  %s1140_s18 = sphi %s1188_s18, %s1379_s18  }
   0x4   : > { %p32_p0 = scmp.ge.s32.totalorder %s30_s23, 4  ;;  %p79_p2 = scmp.eq.s32.totalorder %s1156_s22, 0 }
   0x5   : > { %s71_s25 = sadd.s32 1, %s1144_s19  ;;  %p979_p5 = scmp.ge.s32.totalorder %s1156_s22, 4 }
   0x6   : > { %s1384_s23 = smov (%p32_p0, %s30_s23), 0  ;;  %p80_p3 = por %p79_p2, %p78_p1 }
   0x7   : > { %s67_s24 = ssub.s32 %s1152_s21, %s1384_s23  ;;  %225 = sbr.rel (%p979_p5) target bundleno = 50 (0x32), region = 20 }
   0x8   : > { %p69_p4 = scmp.eq.s32.totalorder %s67_s24, 0 }
   0xa   : > { %s1223_s26 = scalar_select %p69_p4, %s1144_s19, %s71_s25  }
   0xe   : > { %228 = sbr.rel (!%p80_p3) target bundleno = 50 (0x32), region = 24  ;;  %s230_s27 = sand.u32 (%p80_p3), 1, %s1144_s19  }
   0xf   : > { %s1027_s28 = sshll.u32 (%p80_p3), %s1152_s21, 3  ;;  %s980_s29 = sshll.u32 (%p80_p3), %s230_s27, 8 }
  0x10   : > { %s1231_s7 = scalar_lea.vmem (%p80_p3), %s1374_s1, %s1027_s28  ;;  %s1236_s8 = scalar_lea.vmem (%p80_p3), [#allocation3], %s980_s29 }
  0x11   : > { %v328_v0 = vld [vmem:[%s1231_s7] sm:$0xff] (%p80_p3) }
  0x12   : > { %v330_v1 = vld [vmem:[%s1231_s7 + $0x20] sm:$0xff] (%p80_p3)  ;;  %329 = vst [vmem:[%s1236_s8] sm:$0xff] (%p80_p3), %v328_v0 }
  0x13   : > { %v332_v2 = vld [vmem:[%s1231_s7 + $0x40] sm:$0xff] (%p80_p3)  ;;  %331 = vst [vmem:[%s1236_s8 + $0x8] sm:$0xff] (%p80_p3), %v330_v1 }
  0x14   : > { %333 = vst [vmem:[%s1236_s8 + $0x10] sm:$0xff] (%p80_p3), %v332_v2  ;;  %v334_v3 = vld [vmem:[%s1231_s7 + $0x60] sm:$0xff] (%p80_p3) }
  0x15   : > { %v336_v4 = vld [vmem:[%s1231_s7 + $0x80] sm:$0xff]  ;;  %335 = vst [vmem:[%s1236_s8 + $0x18] sm:$0xff] %v334_v3 }
  0x16   : > { %v338_v5 = vld [vmem:[%s1231_s7 + $0xa0] sm:$0xff]  ;;  %337 = vst [vmem:[%s1236_s8 + $0x20] sm:$0xff] %v336_v4 }
  0x17   : > { %339 = vst [vmem:[%s1236_s8 + $0x28] sm:$0xff] %v338_v5  ;;  %v340_v6 = vld [vmem:[%s1231_s7 + $0xc0] sm:$0xff] }
  0x18   : > { %v342_v7 = vld [vmem:[%s1231_s7 + $0xe0] sm:$0xff]  ;;  %341 = vst [vmem:[%s1236_s8 + $0x30] sm:$0xff] %v340_v6 }
  0x19   : > { %v344_v8 = vld [vmem:[%s1231_s7 + $0x100] sm:$0xff]  ;;  %343 = vst [vmem:[%s1236_s8 + $0x38] sm:$0xff] %v342_v7 }
  0x1a   : > { %345 = vst [vmem:[%s1236_s8 + $0x40] sm:$0xff] %v344_v8  ;;  %v346_v9 = vld [vmem:[%s1231_s7 + $0x120] sm:$0xff] }
  0x1b   : > { %v348_v10 = vld [vmem:[%s1231_s7 + $0x140] sm:$0xff]  ;;  %347 = vst [vmem:[%s1236_s8 + $0x48] sm:$0xff] %v346_v9 }
  0x1c   : > { %v350_v11 = vld [vmem:[%s1231_s7 + $0x160] sm:$0xff]  ;;  %349 = vst [vmem:[%s1236_s8 + $0x50] sm:$0xff] %v348_v10 }
  0x1d   : > { %351 = vst [vmem:[%s1236_s8 + $0x58] sm:$0xff] %v350_v11  ;;  %v352_v12 = vld [vmem:[%s1231_s7 + $0x180] sm:$0xff] }
  0x1e   : > { %v354_v13 = vld [vmem:[%s1231_s7 + $0x1a0] sm:$0xff]  ;;  %353 = vst [vmem:[%s1236_s8 + $0x60] sm:$0xff] %v352_v12 }
  0x1f   : > { %v356_v14 = vld [vmem:[%s1231_s7 + $0x1c0] sm:$0xff]  ;;  %355 = vst [vmem:[%s1236_s8 + $0x68] sm:$0xff] %v354_v13 }
  0x20   : > { %357 = vst [vmem:[%s1236_s8 + $0x70] sm:$0xff] %v356_v14  ;;  %v358_v15 = vld [vmem:[%s1231_s7 + $0x1e0] sm:$0xff] }
  0x21   : > { %v360_v16 = vld [vmem:[%s1231_s7 + $0x200] sm:$0xff]  ;;  %359 = vst [vmem:[%s1236_s8 + $0x78] sm:$0xff] %v358_v15 }
  0x22   : > { %v362_v17 = vld [vmem:[%s1231_s7 + $0x220] sm:$0xff]  ;;  %361 = vst [vmem:[%s1236_s8 + $0x80] sm:$0xff] %v360_v16 }
  0x23   : > { %363 = vst [vmem:[%s1236_s8 + $0x88] sm:$0xff] %v362_v17  ;;  %v364_v18 = vld [vmem:[%s1231_s7 + $0x240] sm:$0xff] }
  0x24   : > { %v366_v19 = vld [vmem:[%s1231_s7 + $0x260] sm:$0xff]  ;;  %365 = vst [vmem:[%s1236_s8 + $0x90] sm:$0xff] %v364_v18 }
  0x25   : > { %v368_v20 = vld [vmem:[%s1231_s7 + $0x280] sm:$0xff]  ;;  %367 = vst [vmem:[%s1236_s8 + $0x98] sm:$0xff] %v366_v19 }
  0x26   : > { %369 = vst [vmem:[%s1236_s8 + $0xa0] sm:$0xff] %v368_v20  ;;  %v370_v21 = vld [vmem:[%s1231_s7 + $0x2a0] sm:$0xff] }
  0x27   : > { %v372_v22 = vld [vmem:[%s1231_s7 + $0x2c0] sm:$0xff]  ;;  %371 = vst [vmem:[%s1236_s8 + $0xa8] sm:$0xff] %v370_v21 }
  0x28   : > { %v374_v23 = vld [vmem:[%s1231_s7 + $0x2e0] sm:$0xff]  ;;  %373 = vst [vmem:[%s1236_s8 + $0xb0] sm:$0xff] %v372_v22 }
  0x29   : > { %375 = vst [vmem:[%s1236_s8 + $0xb8] sm:$0xff] %v374_v23  ;;  %v376_v24 = vld [vmem:[%s1231_s7 + $0x300] sm:$0xff] }
  0x2a   : > { %v378_v25 = vld [vmem:[%s1231_s7 + $0x320] sm:$0xff]  ;;  %377 = vst [vmem:[%s1236_s8 + $0xc0] sm:$0xff] %v376_v24 }
  0x2b   : > { %v380_v26 = vld [vmem:[%s1231_s7 + $0x340] sm:$0xff]  ;;  %379 = vst [vmem:[%s1236_s8 + $0xc8] sm:$0xff] %v378_v25 }
  0x2c   : > { %381 = vst [vmem:[%s1236_s8 + $0xd0] sm:$0xff] %v380_v26  ;;  %v382_v27 = vld [vmem:[%s1231_s7 + $0x360] sm:$0xff] }
  0x2d   : > { %v384_v28 = vld [vmem:[%s1231_s7 + $0x380] sm:$0xff]  ;;  %383 = vst [vmem:[%s1236_s8 + $0xd8] sm:$0xff] %v382_v27 }
  0x2e   : > { %v386_v29 = vld [vmem:[%s1231_s7 + $0x3a0] sm:$0xff]  ;;  %385 = vst [vmem:[%s1236_s8 + $0xe0] sm:$0xff] %v384_v28 }
  0x2f   : > { %387 = vst [vmem:[%s1236_s8 + $0xe8] sm:$0xff] %v386_v29  ;;  %v388_v30 = vld [vmem:[%s1231_s7 + $0x3c0] sm:$0xff] }
  0x30   : > { %v390_v31 = vld [vmem:[%s1231_s7 + $0x3e0] sm:$0xff]  ;;  %389 = vst [vmem:[%s1236_s8 + $0xf0] sm:$0xff] %v388_v30 }
  0x31   : > { %391 = vst [vmem:[%s1236_s8 + $0xf8] sm:$0xff] %v390_v31 }
  0x32 PF: > { %p983_p6 = scmp.ge.s32.totalorder %s1156_s22, 1  ;;  %p425_p7 = scmp.lt.s32.totalorder %s1156_s22, 5 }
  0x34   : > { %p426_p8 = pnand %p983_p6, %p425_p7 }
  0x35   : > { %s432_s9 = sand.u32 (!%p426_p8), 1, %s1140_s18   ;;  %v1305_v32 = vld [vmem:[%s1373_s0] sm:$0xff] (!%p426_p8)  ;;  %s985_s14 = sshll.u32 (!%p426_p8), %s1148_s20, 1  ;;  %v791_v3 = vlaneseq (!%p426_p8) }
  0x36   : > { %429 = sbr.rel (%p426_p8) target bundleno = 343 (0x157), region = 74  ;;  %s984_s12 = sshll.u32 (!%p426_p8), %s432_s9, 8  ;;  %v992_v33 = vcombine.high (!%p426_p8), %v1305_v32, %v1305_v32  ;;  %v991_v2 = vcombine.low (!%p426_p8), %v1305_v32, %v1305_v32 }
  0x37   : > { %s1309_s13 = scalar_lea.vmem (!%p426_p8), [#allocation3], %s984_s12  ;;  %p502_p9 = scmp.lt.s32.totalorder (!%p426_p8), %s985_s14, 7  ;;  %v792_v4 = vshrl.u32 (!%p426_p8), %v791_v3, 7 }
  0x38   : > { %v1068_v34 = vld [vmem:[%s1309_s13 + $0x4] ss:$8 sps:$4 sm:$0xff] (!%p426_p8)   ;;  %771 = vmatprep.mubr.bf16.mxu0 (!%p426_p8), %v992_v33  ;;  %v1070_v35 = vld [vmem:[%s1309_s13] ss:$8 sps:$4 sm:$0xff] (!%p426_p8)   ;;  %v1071_v36 = vld [vmem:[%s1309_s13 + $0x14] ss:$8 sps:$4 sm:$0xff] (!%p426_p8)  }
  0x39   : > { %739 = vmatprep.subr.bf16.mxu0 (!%p426_p8), %v1068_v34  ;;  %v1073_v37 = vld [vmem:[%s1309_s13 + $0x10] ss:$8 sps:$4 sm:$0xff] (!%p426_p8)   ;;  %v1074_v38 = vld [vmem:[%s1309_s13 + $0x24] ss:$8 sps:$4 sm:$0xff] (!%p426_p8)   ;;  %v1076_v39 = vld [vmem:[%s1309_s13 + $0x20] ss:$8 sps:$4 sm:$0xff] (!%p426_p8)  }
  0x3a   : > { %740 = vmatpush1.bf16.msra.mxu0 (!%p426_p8), %v1070_v35  ;;  %v1077_v40 = vld [vmem:[%s1309_s13 + $0x34] ss:$8 sps:$4 sm:$0xff] (!%p426_p8)   ;;  %v1079_v41 = vld [vmem:[%s1309_s13 + $0x30] ss:$8 sps:$4 sm:$0xff] (!%p426_p8)   ;;  %v1080_v42 = vld [vmem:[%s1309_s13 + $0x44] ss:$8 sps:$4 sm:$0xff] (!%p426_p8)  }
  0x3b   : > { %741 = vmatprep.subr.bf16.mxu0 (!%p426_p8), %v1071_v36  ;;  %v1082_v43 = vld [vmem:[%s1309_s13 + $0x40] ss:$8 sps:$4 sm:$0xff] (!%p426_p8)   ;;  %v1083_v44 = vld [vmem:[%s1309_s13 + $0x54] ss:$8 sps:$4 sm:$0xff] (!%p426_p8)   ;;  %v1085_v45 = vld [vmem:[%s1309_s13 + $0x50] ss:$8 sps:$4 sm:$0xff] (!%p426_p8)  }
  0x3c   : > { %v1086_v46 = vld [vmem:[%s1309_s13 + $0x64] ss:$8 sps:$4 sm:$0xff] (!%p426_p8)   ;;  %v1088_v47 = vld [vmem:[%s1309_s13 + $0x60] ss:$8 sps:$4 sm:$0xff] (!%p426_p8)   ;;  %v1089_v48 = vld [vmem:[%s1309_s13 + $0x74] ss:$8 sps:$4 sm:$0xff] (!%p426_p8)  }
  0x3d   : > { %v1091_v49 = vld [vmem:[%s1309_s13 + $0x70] ss:$8 sps:$4 sm:$0xff]   ;;  %v1092_v50 = vld [vmem:[%s1309_s13 + $0x84] ss:$8 sps:$4 sm:$0xff]   ;;  %v1094_v51 = vld [vmem:[%s1309_s13 + $0x80] ss:$8 sps:$4 sm:$0xff]  }
  0x3e   : > { %742 = vmatpush1.bf16.msra.mxu0 %v1073_v37  ;;  %v1095_v52 = vld [vmem:[%s1309_s13 + $0x94] ss:$8 sps:$4 sm:$0xff]   ;;  %v1097_v53 = vld [vmem:[%s1309_s13 + $0x90] ss:$8 sps:$4 sm:$0xff]   ;;  %v1098_v54 = vld [vmem:[%s1309_s13 + $0xa4] ss:$8 sps:$4 sm:$0xff]  }
  0x3f   : > { %743 = vmatprep.subr.bf16.mxu0 %v1074_v38  ;;  %v1100_v55 = vld [vmem:[%s1309_s13 + $0xa0] ss:$8 sps:$4 sm:$0xff]   ;;  %v1101_v56 = vld [vmem:[%s1309_s13 + $0xb4] ss:$8 sps:$4 sm:$0xff]   ;;  %v1103_v57 = vld [vmem:[%s1309_s13 + $0xb0] ss:$8 sps:$4 sm:$0xff]  }
  0x40   : > { %v1104_v58 = vld [vmem:[%s1309_s13 + $0xc4] ss:$8 sps:$4 sm:$0xff]   ;;  %v1106_v59 = vld [vmem:[%s1309_s13 + $0xc0] ss:$8 sps:$4 sm:$0xff]   ;;  %v1107_v60 = vld [vmem:[%s1309_s13 + $0xd4] ss:$8 sps:$4 sm:$0xff]  }
  0x41   : > { %v1109_v61 = vld [vmem:[%s1309_s13 + $0xd0] ss:$8 sps:$4 sm:$0xff]   ;;  %v1110_v62 = vld [vmem:[%s1309_s13 + $0xe4] ss:$8 sps:$4 sm:$0xff]   ;;  %v1112_v63 = vld [vmem:[%s1309_s13 + $0xe0] ss:$8 sps:$4 sm:$0xff]  }
  0x42   : > { %744 = vmatpush1.bf16.msra.mxu0 %v1076_v39  ;;  %v1113_v0 = vld [vmem:[%s1309_s13 + $0xf4] ss:$8 sps:$4 sm:$0xff]   ;;  %v1115_v1 = vld [vmem:[%s1309_s13 + $0xf0] ss:$8 sps:$4 sm:$0xff]   ;;  %s1386_s14 = smov (!%p502_p9, %s985_s14), 7  ;;  %v793_v5 = vsub.s32 0, %v792_v4 }
  0x43   : > { %745 = vmatprep.subr.bf16.mxu0 %v1077_v40  ;;  %s504_s17 = scalar_lea.vmem %s1375_s2, %s1386_s14  ;;  %s509_s25 = scalar_lea.vmem %s1376_s3, %s1386_s14  ;;  %v797_v7 = vsub.s32 1, %v792_v4 }
  0x44   : > { %v789_v6 = vld [vmem:[%s504_s17] sm:$0x3]  ;;  %s988_s27 = sshll.u32 %s1386_s14, 3 }
  0x45   : > { %v803_v8 = vld [vmem:[%s509_s25] sm:$0x3]  ;;  %v794_v9 = vrot.slane %v789_v6, %v793_v5  ;;  %v798_v10 = vrot.slane %v789_v6, %v797_v7  ;;  %s519_s29 = scalar_lea.vmem %s1377_s4, %s988_s27  ;;  %s529_s7 = scalar_lea.vmem %s1378_s5, %s988_s27 }
  0x46   : > { %746 = vmatpush1.bf16.msra.mxu0 %v1079_v41  ;;  %v808_v11 = vrot.slane %v803_v8, %v793_v5  ;;  %v812_v13 = vrot.slane %v803_v8, %v797_v7  ;;  %v817_v16 = vld [vmem:[%s519_s29] sm:$0xff]  ;;  %v818_v20 = vld [vmem:[%s519_s29 + $0x8] sm:$0xff] }
  0x47   : > { %747 = vmatprep.subr.bf16.mxu0 %v1080_v42 }
  0x4a   : > { %748 = vmatpush1.bf16.msra.mxu0 %v1082_v43 }
  0x4b   : > { %749 = vmatprep.subr.bf16.mxu0 %v1083_v44 }
  0x4e   : > { %750 = vmatpush1.bf16.msra.mxu0 %v1085_v45 }
  0x4f   : > { %751 = vmatprep.subr.bf16.mxu0 %v1086_v46 }
  0x52   : > { %752 = vmatpush1.bf16.msra.mxu0 %v1088_v47 }
  0x53   : > { %753 = vmatprep.subr.bf16.mxu0 %v1089_v48 }
  0x56   : > { %754 = vmatpush1.bf16.msra.mxu0 %v1091_v49 }
  0x57   : > { %755 = vmatprep.subr.bf16.mxu0 %v1092_v50 }
  0x5a   : > { %756 = vmatpush1.bf16.msra.mxu0 %v1094_v51 }
  0x5b   : > { %757 = vmatprep.subr.bf16.mxu0 %v1095_v52 }
  0x5e   : > { %758 = vmatpush1.bf16.msra.mxu0 %v1097_v53 }
  0x5f   : > { %759 = vmatprep.subr.bf16.mxu0 %v1098_v54 }
  0x62   : > { %760 = vmatpush1.bf16.msra.mxu0 %v1100_v55 }
  0x63   : > { %761 = vmatprep.subr.bf16.mxu0 %v1101_v56 }
  0x66   : > { %762 = vmatpush1.bf16.msra.mxu0 %v1103_v57 }
  0x67   : > { %763 = vmatprep.subr.bf16.mxu0 %v1104_v58 }
  0x6a   : > { %764 = vmatpush1.bf16.msra.mxu0 %v1106_v59 }
  0x6b   : > { %765 = vmatprep.subr.bf16.mxu0 %v1107_v60 }
  0x6e   : > { %766 = vmatpush1.bf16.msra.mxu0 %v1109_v61 }
  0x6f   : > { %767 = vmatprep.subr.bf16.mxu0 %v1110_v62 }
  0x72   : > { %768 = vmatpush1.bf16.msra.mxu0 %v1112_v63 }
  0x73   : > { %769 = vmatprep.subr.bf16.mxu0 %v1113_v0 }
  0x76   : > { %770 = vmatpush1.bf16.msra.mxu0 %v1115_v1 }
  0x79   : > { %772 = vmatmul.mubr.bf16.vlgmr.msra.gmra.mrb[0].mxu0 %v991_v2 }
 0x14c   : > { %v773_v12 = vpop.f32.mrb[0].mxu0 }
 0x14d   : > { %v801_v14 = vmul.f32 %v794_v9, %v773_v12  ;;  %v775_v15 = vpop.f32.mrb[1].mxu0 }
 0x14e   : > { %v802_v17 = vmul.f32 %v798_v10, %v775_v15  ;;  %v777_v18 = vpop.f32.mrb[2].mxu0 }
 0x14f   : > { %v815_v19 = vadd.f32 %v808_v11, %v801_v14  ;;  %v778_v21 = vpop.f32.mrb[3].mxu0 }
 0x150   : > { %v816_v22 = vadd.f32 %v812_v13, %v802_v17 }
 0x151   : > { %v819_v23 = vadd.f32 %v817_v16, %v815_v19 }
 0x152   : > { %v820_v24 = vadd.f32 %v818_v20, %v816_v22 }
 0x153   : > { %v821_v25 = vmax.f32 %v819_v23, 0.0 }
 0x154   : > { %v822_v26 = vmax.f32 %v820_v24, 0.0 }
 0x155   : > { %823 = vst [vmem:[%s529_s7] sm:$0xff] %v821_v25 }
 0x156   : > { %824 = vst [vmem:[%s529_s7 + $0x8] sm:$0xff] %v822_v26 }
 0x157 PF: > { %s15_s22 = sadd.s32 1, %s1156_s22   ;;  %s1379_s18 = smov %s1144_s19 }
 0x158   : > { %p12_p10 = scmp.ge.s32.totalorder %s15_s22, 6   ;;  %s1380_s19 = smov %s1223_s26 }
 0x159   : > { %s1381_s20 = smov %s1152_s21  ;;  %s1382_s21 = smov %s1384_s23 }
 0x15a   :  { %14 = sbr.rel (!%p12_p10) target bundleno = 3 (0x3), region = 133 }

// kernel: encoder_m_forward.75
= control target key start
LH: loop header
LB: loop body
LE: loop exit
PB: predicated region body
PF: predicated region fallthrough
CT: control target
= control target key end

     0   :  { %s1245_s15 = smov 0   ;;  %s1247_s16 = smov 0   ;;  %s1366_s0 = inlined_call_operand.vmem [shape: bf16[8,1024], index: 0, kind: input, shape index: {}]   ;;  %s1367_s1 = inlined_call_operand.vmem [shape: bf16[1024,256], index: 1, kind: input, shape index: {}]   ;;  %s1368_s2 = inlined_call_operand.vmem [shape: f32[1,256], index: 2, kind: input, shape index: {}]   ;;  %s1369_s3 = inlined_call_operand.vmem [shape: f32[1,256], index: 3, kind: input, shape index: {}]   ;;  %s1370_s4 = inlined_call_operand.vmem [shape: f32[8,256], index: 4, kind: output, shape index: {}]  }
   0x1   :  { %s1249_s17 = smov 0  }
   0x2 LB: > { %s26_s18 = sadd.s32 1, %s1213_s16  ;;  %p989_p0 = scmp.ge.s32.totalorder %s1217_s17, 1  ;;  %s1217_s17 = sphi %s1249_s17, %s14_s17   ;;  %s1213_s16 = sphi %s1247_s16, %s1372_s16   ;;  %s1209_s15 = sphi %s1245_s15, %s1371_s15  }
   0x3   : > { %p27_p1 = scmp.ge.s32.totalorder %s26_s18, 2  ;;  %p229_p2 = scmp.lt.s32.totalorder %s1217_s17, 3 }
   0x5   : > { %s1374_s18 = smov (%p27_p1, %s26_s18), 0  ;;  %p230_p3 = pnand %p989_p0, %p229_p2 }
   0x6   : > { %s990_s19 = sshll.u32 (!%p230_p3), %s1209_s15, 2  ;;  %s992_s20 = sshll.u32 (!%p230_p3), %s1209_s15, 6 }
   0x7   : > { %233 = sbr.rel (%p230_p3) target bundleno = 322 (0x142), region = 36  ;;  %p284_p4 = scmp.lt.s32.totalorder (!%p230_p3), %s990_s19, 7 }
   0x8   : > { %p293_p5 = scmp.lt.s32.totalorder (!%p230_p3), %s992_s20, 127  ;;  %p995_p6 = scmp.ne.s32.totalorder (!%p230_p3), %s1209_s15, 0 }
   0xe   : > { %s1376_s19 = smov (!%p284_p4, %s990_s19), 7  ;;  %s1378_s20 = smov (!%p293_p5, %s992_s20), 127 }
   0xf   : > { %s991_s21 = sshll.u32 %s1376_s19, 2  ;;  %s1069_s25 = sshll.u32 %s1378_s20, 3  ;;  %v1219_v0 = vmov (!%p995_p6), 0.0  }
  0x10   : > { %s1270_s24 = scalar_lea.vmem %s1366_s0, %s991_s21  ;;  %s1275_s28 = scalar_lea.vmem %s1367_s1, %s1069_s25  ;;  %327 = vst [vmem:[#allocation2] sm:$0xff] (!%p995_p6), %v1219_v0  ;;  %328 = vst [vmem:[#allocation2 + $0x8] sm:$0xff] (!%p995_p6), %v1219_v0 }
  0x11   : > { %326 = sbr.rel (%p995_p6) target bundleno = 24 (0x18), region = 40 }
  0x18 PF: > { %v1095_v1 = vld [vmem:[%s1275_s28 + $0x4] ss:$8 sps:$4 sm:$0xff]   ;;  %v1099_v3 = vld [vmem:[%s1275_s28] ss:$8 sps:$4 sm:$0xff]   ;;  %v1101_v5 = vld [vmem:[%s1275_s28 + $0x14] ss:$8 sps:$4 sm:$0xff]  }
  0x19   : > { %v1097_v2 = vld [vmem:[%s1275_s28 + $0x104] ss:$8 sps:$4 sm:$0xff]   ;;  %731 = vmatprep.subr.bf16.mxu0 %v1095_v1  ;;  %v1100_v4 = vld [vmem:[%s1275_s28 + $0x100] ss:$8 sps:$4 sm:$0xff]   ;;  %v1103_v6 = vld [vmem:[%s1275_s28 + $0x114] ss:$8 sps:$4 sm:$0xff]  }
  0x1a   : > { %772 = vmatprep.subr.bf16.mxu1 %v1097_v2  ;;  %732 = vmatpush1.bf16.msra.mxu0 %v1099_v3  ;;  %v1105_v7 = vld [vmem:[%s1275_s28 + $0x10] ss:$8 sps:$4 sm:$0xff]   ;;  %v1107_v9 = vld [vmem:[%s1275_s28 + $0x24] ss:$8 sps:$4 sm:$0xff]   ;;  %v1111_v11 = vld [vmem:[%s1275_s28 + $0x20] ss:$8 sps:$4 sm:$0xff]  }
  0x1b   : > { %773 = vmatpush1.bf16.msra.mxu1 %v1100_v4  ;;  %733 = vmatprep.subr.bf16.mxu0 %v1101_v5  ;;  %v1106_v8 = vld [vmem:[%s1275_s28 + $0x110] ss:$8 sps:$4 sm:$0xff]   ;;  %v1109_v10 = vld [vmem:[%s1275_s28 + $0x124] ss:$8 sps:$4 sm:$0xff]   ;;  %v1112_v12 = vld [vmem:[%s1275_s28 + $0x120] ss:$8 sps:$4 sm:$0xff]  }
  0x1c   : > { %774 = vmatprep.subr.bf16.mxu1 %v1103_v6  ;;  %v1113_v13 = vld [vmem:[%s1275_s28 + $0x34] ss:$8 sps:$4 sm:$0xff]   ;;  %v1117_v15 = vld [vmem:[%s1275_s28 + $0x30] ss:$8 sps:$4 sm:$0xff]   ;;  %v1119_v17 = vld [vmem:[%s1275_s28 + $0x44] ss:$8 sps:$4 sm:$0xff]  }
  0x1d   : > { %v1115_v14 = vld [vmem:[%s1275_s28 + $0x134] ss:$8 sps:$4 sm:$0xff]   ;;  %v1118_v16 = vld [vmem:[%s1275_s28 + $0x130] ss:$8 sps:$4 sm:$0xff]   ;;  %v1121_v18 = vld [vmem:[%s1275_s28 + $0x144] ss:$8 sps:$4 sm:$0xff]  }
  0x1e   : > { %734 = vmatpush1.bf16.msra.mxu0 %v1105_v7  ;;  %v1123_v19 = vld [vmem:[%s1275_s28 + $0x40] ss:$8 sps:$4 sm:$0xff]   ;;  %v1125_v21 = vld [vmem:[%s1275_s28 + $0x54] ss:$8 sps:$4 sm:$0xff]   ;;  %v1129_v23 = vld [vmem:[%s1275_s28 + $0x50] ss:$8 sps:$4 sm:$0xff]  }
  0x1f   : > { %775 = vmatpush1.bf16.msra.mxu1 %v1106_v8  ;;  %735 = vmatprep.subr.bf16.mxu0 %v1107_v9  ;;  %v1124_v20 = vld [vmem:[%s1275_s28 + $0x140] ss:$8 sps:$4 sm:$0xff]   ;;  %v1127_v22 = vld [vmem:[%s1275_s28 + $0x154] ss:$8 sps:$4 sm:$0xff]   ;;  %v1130_v24 = vld [vmem:[%s1275_s28 + $0x150] ss:$8 sps:$4 sm:$0xff]  }
  0x20   : > { %776 = vmatprep.subr.bf16.mxu1 %v1109_v10  ;;  %v1131_v25 = vld [vmem:[%s1275_s28 + $0x64] ss:$8 sps:$4 sm:$0xff]   ;;  %v1135_v27 = vld [vmem:[%s1275_s28 + $0x60] ss:$8 sps:$4 sm:$0xff]   ;;  %v1137_v29 = vld [vmem:[%s1275_s28 + $0x74] ss:$8 sps:$4 sm:$0xff]  }
  0x21   : > { %v1133_v26 = vld [vmem:[%s1275_s28 + $0x164] ss:$8 sps:$4 sm:$0xff]   ;;  %v1136_v28 = vld [vmem:[%s1275_s28 + $0x160] ss:$8 sps:$4 sm:$0xff]   ;;  %v1139_v30 = vld [vmem:[%s1275_s28 + $0x174] ss:$8 sps:$4 sm:$0xff]  }
  0x22   : > { %736 = vmatpush1.bf16.msra.mxu0 %v1111_v11  ;;  %v1141_v31 = vld [vmem:[%s1275_s28 + $0x70] ss:$8 sps:$4 sm:$0xff]   ;;  %v1143_v33 = vld [vmem:[%s1275_s28 + $0x84] ss:$8 sps:$4 sm:$0xff]   ;;  %v1147_v35 = vld [vmem:[%s1275_s28 + $0x80] ss:$8 sps:$4 sm:$0xff]  }
  0x23   : > { %777 = vmatpush1.bf16.msra.mxu1 %v1112_v12  ;;  %737 = vmatprep.subr.bf16.mxu0 %v1113_v13  ;;  %v1142_v32 = vld [vmem:[%s1275_s28 + $0x170] ss:$8 sps:$4 sm:$0xff]   ;;  %v1145_v34 = vld [vmem:[%s1275_s28 + $0x184] ss:$8 sps:$4 sm:$0xff]   ;;  %v1148_v36 = vld [vmem:[%s1275_s28 + $0x180] ss:$8 sps:$4 sm:$0xff]  }
  0x24   : > { %778 = vmatprep.subr.bf16.mxu1 %v1115_v14  ;;  %v1149_v37 = vld [vmem:[%s1275_s28 + $0x94] ss:$8 sps:$4 sm:$0xff]   ;;  %v1153_v39 = vld [vmem:[%s1275_s28 + $0x90] ss:$8 sps:$4 sm:$0xff]   ;;  %v1155_v41 = vld [vmem:[%s1275_s28 + $0xa4] ss:$8 sps:$4 sm:$0xff]  }
  0x25   : > { %v1151_v38 = vld [vmem:[%s1275_s28 + $0x194] ss:$8 sps:$4 sm:$0xff]   ;;  %v1154_v40 = vld [vmem:[%s1275_s28 + $0x190] ss:$8 sps:$4 sm:$0xff]   ;;  %v1157_v42 = vld [vmem:[%s1275_s28 + $0x1a4] ss:$8 sps:$4 sm:$0xff]  }
  0x26   : > { %738 = vmatpush1.bf16.msra.mxu0 %v1117_v15  ;;  %v1159_v43 = vld [vmem:[%s1275_s28 + $0xa0] ss:$8 sps:$4 sm:$0xff]   ;;  %v1161_v45 = vld [vmem:[%s1275_s28 + $0xb4] ss:$8 sps:$4 sm:$0xff]   ;;  %v1165_v50 = vld [vmem:[%s1275_s28 + $0xb0] ss:$8 sps:$4 sm:$0xff]  }
  0x27   : > { %779 = vmatpush1.bf16.msra.mxu1 %v1118_v16  ;;  %739 = vmatprep.subr.bf16.mxu0 %v1119_v17  ;;  %v1160_v44 = vld [vmem:[%s1275_s28 + $0x1a0] ss:$8 sps:$4 sm:$0xff]   ;;  %v1163_v46 = vld [vmem:[%s1275_s28 + $0x1b4] ss:$8 sps:$4 sm:$0xff]   ;;  %v1166_v51 = vld [vmem:[%s1275_s28 + $0x1b0] ss:$8 sps:$4 sm:$0xff]  }
  0x28   : > { %780 = vmatprep.subr.bf16.mxu1 %v1121_v18  ;;  %v331_v47 = vld [vmem:[%s1270_s24] sm:$0xff]  ;;  %v332_v49 = vld [vmem:[%s1270_s24 + $0x8] sm:$0xff]  ;;  %v1173_v57 = vld [vmem:[%s1275_s28 + $0xd4] ss:$8 sps:$4 sm:$0xff]   ;;  %p1064_p7 = scmp.ne.s32.totalorder %s1209_s15, 1 }
  0x29   : > { %v997_v48 = vcombine.high %v331_v47, %v331_v47  ;;  %v999_v52 = vcombine.high %v332_v49, %v332_v49  ;;  %v1167_v53 = vld [vmem:[%s1275_s28 + $0xc4] ss:$8 sps:$4 sm:$0xff]   ;;  %v1171_v55 = vld [vmem:[%s1275_s28 + $0xc0] ss:$8 sps:$4 sm:$0xff]   ;;  %v1175_v58 = vld [vmem:[%s1275_s28 + $0x1d4] ss:$8 sps:$4 sm:$0xff]   ;;  %v996_v5 = vcombine.low %v331_v47, %v331_v47  ;;  %v998_v6 = vcombine.low %v332_v49, %v332_v49 }
  0x2a   : > { %740 = vmatpush1.bf16.msra.mxu0 %v1123_v19  ;;  %v1169_v54 = vld [vmem:[%s1275_s28 + $0x1c4] ss:$8 sps:$4 sm:$0xff]   ;;  %v1172_v56 = vld [vmem:[%s1275_s28 + $0x1c0] ss:$8 sps:$4 sm:$0xff]   ;;  %v1177_v59 = vld [vmem:[%s1275_s28 + $0xd0] ss:$8 sps:$4 sm:$0xff]  }
  0x2b   : > { %781 = vmatpush1.bf16.msra.mxu1 %v1124_v20  ;;  %741 = vmatprep.subr.bf16.mxu0 %v1125_v21  ;;  %v1178_v60 = vld [vmem:[%s1275_s28 + $0x1d0] ss:$8 sps:$4 sm:$0xff]   ;;  %v1179_v61 = vld [vmem:[%s1275_s28 + $0xe4] ss:$8 sps:$4 sm:$0xff]   ;;  %v1183_v63 = vld [vmem:[%s1275_s28 + $0xe0] ss:$8 sps:$4 sm:$0xff]   ;;  %v825_v21 = vlaneseq (!%p1064_p7) }
  0x2c   : > { %782 = vmatprep.subr.bf16.mxu1 %v1127_v22  ;;  %763 = vmatprep.mubr.bf16.mxu0 %v997_v48  ;;  %v1181_v62 = vld [vmem:[%s1275_s28 + $0x1e4] ss:$8 sps:$4 sm:$0xff]   ;;  %v1184_v0 = vld [vmem:[%s1275_s28 + $0x1e0] ss:$8 sps:$4 sm:$0xff]   ;;  %v1185_v1 = vld [vmem:[%s1275_s28 + $0xf4] ss:$8 sps:$4 sm:$0xff]  }
  0x2d   : > { %804 = vmatprep.mubr.bf16.mxu1 %v999_v52  ;;  %v1187_v2 = vld [vmem:[%s1275_s28 + $0x1f4] ss:$8 sps:$4 sm:$0xff]   ;;  %v1189_v3 = vld [vmem:[%s1275_s28 + $0xf0] ss:$8 sps:$4 sm:$0xff]   ;;  %v329_v8 = vld [vmem:[#allocation2] sm:$0xff]  ;;  %v826_v22 = vshrl.u32 (!%p1064_p7), %v825_v21, 7 }
  0x2e   : > { %742 = vmatpush1.bf16.msra.mxu0 %v1129_v23  ;;  %v1190_v4 = vld [vmem:[%s1275_s28 + $0x1f0] ss:$8 sps:$4 sm:$0xff]   ;;  %v330_v12 = vld [vmem:[#allocation2 + $0x8] sm:$0xff]  ;;  %v823_v23 = vld [vmem:[%s1368_s2] sm:$0x3] (!%p1064_p7) }
  0x2f   : > { %783 = vmatpush1.bf16.msra.mxu1 %v1130_v24  ;;  %743 = vmatprep.subr.bf16.mxu0 %v1131_v25  ;;  %v837_v24 = vld [vmem:[%s1369_s3] sm:$0x3] (!%p1064_p7)  ;;  %v827_v25 = vsub.s32 (!%p1064_p7), 0, %v826_v22 }
  0x30   : > { %784 = vmatprep.subr.bf16.mxu1 %v1133_v26  ;;  %v831_v26 = vsub.s32 (!%p1064_p7), 1, %v826_v22 }
  0x32   : > { %744 = vmatpush1.bf16.msra.mxu0 %v1135_v27 }
  0x33   : > { %785 = vmatpush1.bf16.msra.mxu1 %v1136_v28  ;;  %745 = vmatprep.subr.bf16.mxu0 %v1137_v29  ;;  %v828_v29 = vrot.slane (!%p1064_p7), %v823_v23, %v827_v25 }
  0x34   : > { %786 = vmatprep.subr.bf16.mxu1 %v1139_v30  ;;  %v842_v30 = vrot.slane (!%p1064_p7), %v837_v24, %v827_v25 }
  0x36   : > { %746 = vmatpush1.bf16.msra.mxu0 %v1141_v31  ;;  %v832_v31 = vrot.slane (!%p1064_p7), %v823_v23, %v831_v26 }
  0x37   : > { %787 = vmatpush1.bf16.msra.mxu1 %v1142_v32  ;;  %747 = vmatprep.subr.bf16.mxu0 %v1143_v33  ;;  %v846_v32 = vrot.slane (!%p1064_p7), %v837_v24, %v831_v26 }
  0x38   : > { %788 = vmatprep.subr.bf16.mxu1 %v1145_v34 }
  0x3a   : > { %748 = vmatpush1.bf16.msra.mxu0 %v1147_v35 }
  0x3b   : > { %789 = vmatpush1.bf16.msra.mxu1 %v1148_v36  ;;  %749 = vmatprep.subr.bf16.mxu0 %v1149_v37 }
  0x3c   : > { %790 = vmatprep.subr.bf16.mxu1 %v1151_v38 }
  0x3e   : > { %750 = vmatpush1.bf16.msra.mxu0 %v1153_v39 }
  0x3f   : > { %791 = vmatpush1.bf16.msra.mxu1 %v1154_v40  ;;  %751 = vmatprep.subr.bf16.mxu0 %v1155_v41 }
  0x40   : > { %792 = vmatprep.subr.bf16.mxu1 %v1157_v42 }
  0x42   : > { %752 = vmatpush1.bf16.msra.mxu0 %v1159_v43 }
  0x43   : > { %793 = vmatpush1.bf16.msra.mxu1 %v1160_v44  ;;  %753 = vmatprep.subr.bf16.mxu0 %v1161_v45 }
  0x44   : > { %794 = vmatprep.subr.bf16.mxu1 %v1163_v46 }
  0x46   : > { %754 = vmatpush1.bf16.msra.mxu0 %v1165_v50 }
  0x47   : > { %795 = vmatpush1.bf16.msra.mxu1 %v1166_v51  ;;  %755 = vmatprep.subr.bf16.mxu0 %v1167_v53 }
  0x48   : > { %796 = vmatprep.subr.bf16.mxu1 %v1169_v54 }
  0x4a   : > { %756 = vmatpush1.bf16.msra.mxu0 %v1171_v55 }
  0x4b   : > { %797 = vmatpush1.bf16.msra.mxu1 %v1172_v56  ;;  %757 = vmatprep.subr.bf16.mxu0 %v1173_v57 }
  0x4c   : > { %798 = vmatprep.subr.bf16.mxu1 %v1175_v58 }
  0x4e   : > { %758 = vmatpush1.bf16.msra.mxu0 %v1177_v59 }
  0x4f   : > { %799 = vmatpush1.bf16.msra.mxu1 %v1178_v60  ;;  %759 = vmatprep.subr.bf16.mxu0 %v1179_v61 }
  0x50   : > { %800 = vmatprep.subr.bf16.mxu1 %v1181_v62 }
  0x52   : > { %760 = vmatpush1.bf16.msra.mxu0 %v1183_v63 }
  0x53   : > { %801 = vmatpush1.bf16.msra.mxu1 %v1184_v0  ;;  %761 = vmatprep.subr.bf16.mxu0 %v1185_v1 }
  0x54   : > { %802 = vmatprep.subr.bf16.mxu1 %v1187_v2 }
  0x56   : > { %762 = vmatpush1.bf16.msra.mxu0 %v1189_v3 }
  0x57   : > { %803 = vmatpush1.bf16.msra.mxu1 %v1190_v4 }
  0x59   : > { %764 = vmatmul.mubr.bf16.vlgmr.msra.gmra.mrb[0].mxu0 %v996_v5 }
  0x5a   : > { %805 = vmatmul.mubr.bf16.vlgmr.msra.gmra.mrb[0].mxu1 %v998_v6 }
 0x12c   : > { %v765_v7 = vpop.f32.mrb[0].mxu0 }
 0x12d   : > { %v806_v9 = vpop.f32.mrb[0].mxu1  ;;  %v767_v11 = vpop.f32.mrb[1].mxu0  ;;  %820 = sbr.rel (%p1064_p7) target bundleno = 322 (0x142), region = 44 }
 0x12e   : > { %v807_v10 = vadd.f32 %v806_v9, %v765_v7  ;;  %v808_v13 = vpop.f32.mrb[1].mxu1  ;;  %v769_v15 = vpop.f32.mrb[2].mxu0 }
 0x12f   : > { %v809_v14 = vadd.f32 %v808_v13, %v767_v11  ;;  %v810_v16 = vpop.f32.mrb[2].mxu1  ;;  %v770_v18 = vpop.f32.mrb[3].mxu0 }
 0x130   : > { %v813_v17 = vadd.f32 %v807_v10, %v329_v8  ;;  %v811_v19 = vpop.f32.mrb[3].mxu1 }
 0x131   : > { %v814_v20 = vadd.f32 %v809_v14, %v330_v12 }
 0x132   : > { %815 = vst [vmem:[#allocation2] sm:$0xff] %v813_v17 }
 0x133   : > { %816 = vst [vmem:[#allocation2 + $0x8] sm:$0xff] %v814_v20 }
 0x139   : > { %v821_v27 = vld [vmem:[#allocation2] sm:$0xff] }
 0x13a   : > { %v822_v28 = vld [vmem:[#allocation2 + $0x8] sm:$0xff]  ;;  %v835_v33 = vmul.f32 %v828_v29, %v821_v27 }
 0x13b   : > { %v836_v34 = vmul.f32 %v832_v31, %v822_v28 }
 0x13c   : > { %v849_v35 = vadd.f32 %v842_v30, %v835_v33 }
 0x13d   : > { %v850_v36 = vadd.f32 %v846_v32, %v836_v34 }
 0x13e   : > { %v851_v37 = vmax.f32 %v849_v35, 0.0 }
 0x13f   : > { %v852_v38 = vmax.f32 %v850_v36, 0.0 }
 0x140   : > { %853 = vst [vmem:[%s1370_s4] sm:$0xff] %v851_v37 }
 0x141   : > { %854 = vst [vmem:[%s1370_s4 + $0x8] sm:$0xff] %v852_v38 }
 0x142 PF: > { %s14_s17 = sadd.s32 1, %s1217_s17   ;;  %s1371_s15 = smov %s1213_s16 }
 0x143   : > { %p11_p8 = scmp.ge.s32.totalorder %s14_s17, 4   ;;  %s1372_s16 = smov %s1374_s18 }
 0x145   :  { %13 = sbr.rel (!%p11_p8) target bundleno = 2 (0x2), region = 83 }

</bundles_post_ra>
